<compile_context>
chip_gen: v7x
topology: tpu7x:2x2x1
jax: 0.10.0
libtpu: 0.0.40
codegen_flags: <defaults>
</compile_context>

<pallas_src>
import numpy as np
import jax
import jax.numpy as jnp
from jax import lax
from jax.experimental import pallas as pl
from jax.experimental.pallas import tpu as pltpu

# ----------------------------------------------------------------------------
# Configuration (small shapes; D = 384 is fixed by DG_Net's in_planes)
# ----------------------------------------------------------------------------
B = 2
C_IN = 3
H_IMG = W_IMG = 16
PATCH = 8
N_PATCH = (H_IMG // PATCH) * (W_IMG // PATCH)   # 4 patches
P_DIM = PATCH * PATCH * C_IN                    # 192 (flattened patch)
P_PAD = 256                                     # lane-dense padded patch width
T_TOK = N_PATCH + 1                             # 5 tokens (cls + patches)
D_MODEL = 384                                   # DG_Net in_planes
N_HEADS = 3
HEAD_DIM = D_MODEL // N_HEADS                   # 128 -> lane-aligned heads
MLP_DIM = 768
NUM_CLASSES = 128                               # lane-dense classifier output
LN_EPS = 1e-6
BN_EPS = 1e-5
ATTN_SCALE = 1.0 / float(np.sqrt(HEAD_DIM))
MASK_NEG = -1e30                                # additive mask value

N_SEQ_ENC = 2 * B                               # clean + noise sequences / branch
R_ENC = N_SEQ_ENC * T_TOK                       # 20 token rows in encode block
R_RERUN = B * T_TOK + B                         # 12 token rows in KL re-run block

# Packed small-parameter row offsets (row width = 3 * D_MODEL = 1152).
_R_PE_B, _R_CLS, _R_POS, _R_LN1 = 0, 1, 2, 7
_R_QKV_B, _R_PROJ_B, _R_LN2 = 9, 10, 11
_R_FC1_B, _R_FC2_B, _R_LNF, _R_TOTAL = 13, 14, 15, 17


def _build_masks():
    """Block-diagonal additive attention masks (0 inside a sequence, -1e30 across)."""
    seq_enc = np.repeat(np.arange(N_SEQ_ENC), T_TOK)              # 20 rows
    enc = np.where(seq_enc[:, None] == seq_enc[None, :], 0.0, MASK_NEG)
    seq_rer = np.concatenate([np.repeat(np.arange(B), T_TOK),      # B len-5 seqs
                              B + np.arange(B)])                    # B len-1 seqs
    rer = np.where(seq_rer[:, None] == seq_rer[None, :], 0.0, MASK_NEG)
    return enc.astype(np.float32), rer.astype(np.float32)


_ENC_MASK, _RERUN_MASK = _build_masks()


# ----------------------------------------------------------------------------
# Fused per-branch Pallas kernel (grid = (2,) over E1 / E2)
# ----------------------------------------------------------------------------
def dg_fused_kernel(patch_ref, maske_ref, maskr_ref,
                    pe_w_ref, qkv_w_ref, proj_w_ref, fc1_w_ref, fc2_w_ref,
                    sp_ref, out_ref):
    """One DG_Net encoder branch (all batch elements, clean + noise) per grid step.

    Computes, entirely in VMEM:
      feats = LN_f(Block(tokens))   for the 2B packed sequences (clean, noise)
      after / after_n = Block(KL_defen-mixed rows)[cls]   (both re-runs batched)
    Writes [x_cls(B), xn_cls(B), after(B), after_n(B)] -> (1, 4B, D).
    """
    pe_w = pe_w_ref[0]
    qkv_w = qkv_w_ref[0]
    proj_w = proj_w_ref[0]
    fc1_w = fc1_w_ref[0]
    fc2_w = fc2_w_ref[0]
    sp = sp_ref[0]                                   # (17, 1152) packed small params

    pe_b = sp[_R_PE_B:_R_PE_B + 1, :D_MODEL]
    cls_t = sp[_R_CLS:_R_CLS + 1, :D_MODEL]
    pos = sp[_R_POS:_R_POS + T_TOK, :D_MODEL]
    ln1 = sp[_R_LN1:_R_LN1 + 2, :D_MODEL]
    qkv_b = sp[_R_QKV_B:_R_QKV_B + 1, :]
    proj_b = sp[_R_PROJ_B:_R_PROJ_B + 1, :D_MODEL]
    ln2 = sp[_R_LN2:_R_LN2 + 2, :D_MODEL]
    fc1_b = sp[_R_FC1_B:_R_FC1_B + 1, :MLP_DIM]
    fc2_b = sp[_R_FC2_B:_R_FC2_B + 1, :D_MODEL]
    lnf = sp[_R_LNF:_R_LNF + 2, :D_MODEL]

    mask_enc = maske_ref[...]                        # (20, 20)
    mask_rer = maskr_ref[...]                        # (12, 12)

    def layer_norm(x, gb):                           # gb: (2, D) = [gamma; beta]
        mu = jnp.mean(x, axis=-1, keepdims=True)
        xc = x - mu
        var = jnp.mean(xc * xc, axis=-1, keepdims=True)
        return xc * lax.rsqrt(var + LN_EPS) * gb[0:1, :] + gb[1:2, :]

    def gelu(x):
        # TODO(synk): PyTorch nn.GELU defaults to exact erf; tanh approximation
        # is used because erf has no Mosaic lowering.
        c = 0.7978845608028654
        return 0.5 * x * (1.0 + jnp.tanh(c * (x + 0.044715 * x * x * x)))

    def mm(a, b):                                    # f32 MXU matmul, f32 accumulate
        return jnp.dot(a, b, preferred_element_type=jnp.float32)

    def block(rows, mask):
        """Pre-LN ViT block ("layer1") on packed token rows (R, D).

        `mask` is the block-diagonal additive mask delimiting the sequences, so
        all sequences share one pair of MXU matmuls per head (exactly equal to
        per-sequence softmax attention)."""
        h = layer_norm(rows, ln1)
        qkv = mm(h, qkv_w) + qkv_b                   # (R, 3D)
        head_outs = []
        for hh in range(N_HEADS):                    # head_dim = 128 -> lane aligned
            q = qkv[:, hh * HEAD_DIM:(hh + 1) * HEAD_DIM]
            k = qkv[:, D_MODEL + hh * HEAD_DIM:D_MODEL + (hh + 1) * HEAD_DIM]
            v = qkv[:, 2 * D_MODEL + hh * HEAD_DIM:2 * D_MODEL + (hh + 1) * HEAD_DIM]
            s = lax.dot_general(q, k, (((1,), (1,)), ((), ())),
                                preferred_element_type=jnp.float32)
            s = s * ATTN_SCALE + mask
            s = s - jnp.max(s, axis=-1, keepdims=True)
            e = jnp.exp(s)
            p = e / jnp.sum(e, axis=-1, keepdims=True)   # exact softmax
            head_outs.append(mm(p, v))               # (R, HEAD_DIM)
        attn = jnp.concatenate(head_outs, axis=-1)   # (R, D)
        rows = rows + mm(attn, proj_w) + proj_b
        h2 = layer_norm(rows, ln2)
        rows = rows + mm(gelu(mm(h2, fc1_w) + fc1_b), fc2_w) + fc2_b
        return rows

    # ---- patch embed for all 2B sequences at once (M = 16, K = 256) --------
    emb = mm(patch_ref[...], pe_w) + pe_b            # (2B*N_PATCH, D)

    # ---- assemble token rows: per sequence [cls, patch0..3] + pos ----------
    tok_pieces = []
    for s in range(N_SEQ_ENC):
        tok_pieces.append(cls_t)
        tok_pieces.append(emb[s * N_PATCH:(s + 1) * N_PATCH, :])
    tokens = jnp.concatenate(tok_pieces, axis=0)     # (R_ENC, D)
    tokens = tokens + jnp.concatenate([pos] * N_SEQ_ENC, axis=0)

    feats = layer_norm(block(tokens, mask_enc), lnf)  # E(x) / E(x_noise), (R_ENC, D)

    # ---- KL_defen re-runs through layer1 (no final LN), batched ------------
    #   new1  (len-5, per batch b): [clean cls_b, noise tokens 1..4 of b]
    #   new1n (len-1, per batch b): [noise cls_b]
    rerun_pieces = []
    for b in range(B):
        rerun_pieces.append(feats[b * T_TOK:b * T_TOK + 1, :])
        rerun_pieces.append(feats[(B + b) * T_TOK + 1:(B + b) * T_TOK + T_TOK, :])
    for b in range(B):
        rerun_pieces.append(feats[(B + b) * T_TOK:(B + b) * T_TOK + 1, :])
    rerun = block(jnp.concatenate(rerun_pieces, axis=0), mask_rer)   # (R_RERUN, D)

    # ---- pack outputs: [x_cls(B), xn_cls(B), after(B), after_n(B)] ---------
    out_pieces = []
    for b in range(B):
        out_pieces.append(feats[b * T_TOK:b * T_TOK + 1, :])              # x cls
    for b in range(B):
        out_pieces.append(feats[(B + b) * T_TOK:(B + b) * T_TOK + 1, :])  # x_noise cls
    for b in range(B):
        out_pieces.append(rerun[b * T_TOK:b * T_TOK + 1, :])              # after
    for b in range(B):
        out_pieces.append(rerun[B * T_TOK + b:B * T_TOK + b + 1, :])      # after_noise
    out_ref[...] = jnp.concatenate(out_pieces, axis=0)[None]


def run_branches(patch_rows, enc_mask, rer_mask, enc):
    """Single fused pallas_call over both encoder branches (grid=(2,), parallel)."""
    n_br = enc["pe_w"].shape[0]

    def const2d(shape):
        return pl.BlockSpec(shape, lambda i: (0, 0))

    def branch3d(shape):
        return pl.BlockSpec((1,) + tuple(shape[1:]), lambda i: (i, 0, 0))

    return pl.pallas_call(
        dg_fused_kernel,
        out_shape=jax.ShapeDtypeStruct((n_br, 4 * B, D_MODEL), jnp.float32),
        grid=(n_br,),
        in_specs=[
            const2d(patch_rows.shape),
            const2d(enc_mask.shape),
            const2d(rer_mask.shape),
            branch3d(enc["pe_w"].shape),
            branch3d(enc["qkv_w"].shape),
            branch3d(enc["proj_w"].shape),
            branch3d(enc["fc1_w"].shape),
            branch3d(enc["fc2_w"].shape),
            branch3d(enc["small"].shape),
        ],
        out_specs=pl.BlockSpec((1, 4 * B, D_MODEL), lambda i: (i, 0, 0)),
        compiler_params=pltpu.CompilerParams(
            dimension_semantics=("parallel",)),       # one branch per v7x TensorCore
    )(patch_rows, enc_mask, rer_mask,
      enc["pe_w"], enc["qkv_w"], enc["proj_w"], enc["fc1_w"], enc["fc2_w"],
      enc["small"])


# ----------------------------------------------------------------------------
# Tiny training head in plain jnp (per review: a launch costs more than the math)
# ----------------------------------------------------------------------------
def _bn_train(v):                                    # training-mode BatchNorm1d
    mu = jnp.mean(v, axis=0, keepdims=True)          # gamma=1, beta=0 (kaiming init)
    xc = v - mu
    var = jnp.mean(xc * xc, axis=0, keepdims=True)   # biased variance
    return xc * lax.rsqrt(var + BN_EPS)


def _kl_batchmean(gen, tgt):                         # KLDivLoss(log softmax, softmax)
    logp = jax.nn.log_softmax(gen, axis=1)
    logq = jax.nn.log_softmax(tgt, axis=1)
    return jnp.sum(jnp.exp(logq) * (logq - logp)) / gen.shape[0]


# ----------------------------------------------------------------------------
# Wrapper
# ----------------------------------------------------------------------------
def _patch_rows(img):                                # (B, C, H, W) -> (B*N, P_DIM)
    b, c, h, w = img.shape
    gh, gw = h // PATCH, w // PATCH
    p = img.reshape(b, c, gh, PATCH, gw, PATCH)
    p = jnp.transpose(p, (0, 2, 4, 3, 5, 1))
    return p.reshape(b * gh * gw, PATCH * PATCH * c)


def build_patch_rows(x, x_noise):                    # -> (2B*N, P_PAD), lane-dense
    rows = jnp.concatenate([_patch_rows(x), _patch_rows(x_noise)], axis=0)
    return jnp.pad(rows, ((0, 0), (0, P_PAD - P_DIM)))


@jax.jit
def dg_net_forward(x, x_noise, params):
    patch_rows = build_patch_rows(x.astype(jnp.float32), x_noise.astype(jnp.float32))
    enc_mask = jnp.asarray(_ENC_MASK)
    rer_mask = jnp.asarray(_RERUN_MASK)

    branch = run_branches(patch_rows, enc_mask, rer_mask, params["enc"])  # (2, 4B, D)

    def split(br):
        return br[0:B], br[B:2 * B], br[2 * B:3 * B], br[3 * B:4 * B]

    x1, x1n, a1, a1n = split(branch[0])
    x2, x2n, a2, a2n = split(branch[1])
    x3n = 0.5 * (x1n + x2n)

    wc = params["Wc"]

    def classify(v, i):                              # Linear(D, NC, bias=False)
        return jnp.dot(_bn_train(v), wc[i])

    score_list = [classify(x1, 0), classify(x1n, 0),   # score_fin1, score_fin1_noise
                  classify(x2, 1), classify(x2n, 1),   # score_fin2, score_fin2_noise
                  classify(x1n, 2), classify(x2n, 2),  # score_noise1, score_noise2
                  classify(x3n, 3)]                    # score_noise3

    kl1 = 0.5 * (_kl_batchmean(a1, x1) + _kl_batchmean(a1n, x1n))   # KL_defen1
    kl2 = 0.5 * (_kl_batchmean(a2, x2) + _kl_batchmean(a2n, x2n))   # KL_defen2
    kl_loss = 0.5 * (kl1 + kl2)

    feat_list = [x1, x1n, x2, x2n, x3n]
    return feat_list, score_list, kl_loss


# ----------------------------------------------------------------------------
# Parameter init (deterministic, synthetic encoders + DG_Net classifier heads)
# ----------------------------------------------------------------------------
def _uniform(key, shape, fan_in):
    bound = 1.0 / float(np.sqrt(fan_in))
    return jax.random.uniform(key, shape, jnp.float32, -bound, bound)


def _pack_rows(pieces):                              # pad widths to 3*D and stack rows
    rows = [jnp.pad(p, ((0, 0), (0, 3 * D_MODEL - p.shape[1]))) for p in pieces]
    packed = jnp.concatenate(rows, axis=0)
    assert packed.shape == (_R_TOTAL, 3 * D_MODEL)
    return packed


def init_encoder_params(key):
    ks = jax.random.split(key, 12)
    ln = jnp.concatenate([jnp.ones((1, D_MODEL), jnp.float32),
                          jnp.zeros((1, D_MODEL), jnp.float32)], axis=0)
    pe_w = jnp.pad(_uniform(ks[0], (P_DIM, D_MODEL), P_DIM),
                   ((0, P_PAD - P_DIM), (0, 0)))     # zero rows for padded patch cols
    small = _pack_rows([
        _uniform(ks[1], (1, D_MODEL), P_DIM),                            # pe_b
        0.02 * jax.random.normal(ks[2], (1, D_MODEL), jnp.float32),      # cls
        0.02 * jax.random.normal(ks[3], (T_TOK, D_MODEL), jnp.float32),  # pos
        ln,                                                              # ln1
        _uniform(ks[5], (1, 3 * D_MODEL), D_MODEL),                      # qkv_b
        _uniform(ks[7], (1, D_MODEL), D_MODEL),                          # proj_b
        ln,                                                              # ln2
        _uniform(ks[9], (1, MLP_DIM), D_MODEL),                          # fc1_b
        _uniform(ks[11], (1, D_MODEL), MLP_DIM),                         # fc2_b
        ln,                                                              # lnf
    ])
    return {
        "pe_w": pe_w,
        "qkv_w": _uniform(ks[4], (D_MODEL, 3 * D_MODEL), D_MODEL),
        "proj_w": _uniform(ks[6], (D_MODEL, D_MODEL), D_MODEL),
        "fc1_w": _uniform(ks[8], (D_MODEL, MLP_DIM), D_MODEL),
        "fc2_w": _uniform(ks[10], (MLP_DIM, D_MODEL), MLP_DIM),
        "small": small,
    }


if __name__ == "__main__":
    root = jax.random.PRNGKey(0)
    kx, kn, k1, k2, kc = jax.random.split(root, 5)
    x = jax.random.normal(kx, (B, C_IN, H_IMG, W_IMG), jnp.float32)
    x_noise = x + 0.1 * jax.random.normal(kn, (B, C_IN, H_IMG, W_IMG), jnp.float32)

    e1 = init_encoder_params(k1)
    e2 = init_encoder_params(k2)
    params = {
        # E1 / E2 stacked on a leading branch axis for the fused kernel.
        "enc": {k: jnp.stack([e1[k], e2[k]], axis=0) for k in e1},
        # classifier_final1..4: Linear(384, num_classes, bias=False), normal std=0.001
        "Wc": 0.001 * jax.random.normal(kc, (4, D_MODEL, NUM_CLASSES), jnp.float32),
    }

    feat_list, score_list, kl_loss = dg_net_forward(x, x_noise, params)
    feat_list, score_list, kl_loss = jax.block_until_ready(
        (feat_list, score_list, kl_loss))

    assert len(feat_list) == 5 and len(score_list) == 7
    assert all(f.shape == (B, D_MODEL) for f in feat_list)
    assert all(s.shape == (B, NUM_CLASSES) for s in score_list)
    assert kl_loss.shape == ()
    finite = all(bool(jnp.all(jnp.isfinite(a))) for a in feat_list + score_list)
    assert finite and bool(jnp.isfinite(kl_loss))
    print("KERNEL_OK")
</pallas_src>

<mosaic_0001>
module attributes {stable_mosaic.version = 11 : i64} {
  func.func @dg_fused_kernel(%arg0: i32, %arg1: memref<16x256xf32, #tpu.memory_space<vmem>>, %arg2: memref<20x20xf32, #tpu.memory_space<vmem>>, %arg3: memref<12x12xf32, #tpu.memory_space<vmem>>, %arg4: memref<1x256x384xf32, #tpu.memory_space<vmem>>, %arg5: memref<1x384x1152xf32, #tpu.memory_space<vmem>>, %arg6: memref<1x384x384xf32, #tpu.memory_space<vmem>>, %arg7: memref<1x384x768xf32, #tpu.memory_space<vmem>>, %arg8: memref<1x768x384xf32, #tpu.memory_space<vmem>>, %arg9: memref<1x17x1152xf32, #tpu.memory_space<vmem>>, %arg10: memref<1x8x384xf32, #tpu.memory_space<vmem>>) attributes {dimension_semantics = [#tpu.dimension_semantics<parallel>], iteration_bounds = array<i64: 2>, scalar_prefetch = 0 : i64, scratch_operands = 0 : i64, tpu.core_type = #tpu.core_type<tc>, window_params = [{pipeline_mode = #tpu.pipeline_mode<synchronous>, transform_indices = @transform_0, window_bounds = array<i64: 16, 256>}, {pipeline_mode = #tpu.pipeline_mode<synchronous>, transform_indices = @transform_1, window_bounds = array<i64: 20, 20>}, {pipeline_mode = #tpu.pipeline_mode<synchronous>, transform_indices = @transform_2, window_bounds = array<i64: 12, 12>}, {transform_indices = @transform_3, window_bounds = array<i64: 1, 256, 384>}, {transform_indices = @transform_4, window_bounds = array<i64: 1, 384, 1152>}, {transform_indices = @transform_5, window_bounds = array<i64: 1, 384, 384>}, {transform_indices = @transform_6, window_bounds = array<i64: 1, 384, 768>}, {transform_indices = @transform_7, window_bounds = array<i64: 1, 768, 384>}, {transform_indices = @transform_8, window_bounds = array<i64: 1, 17, 1152>}, {transform_indices = @transform_9, window_bounds = array<i64: 1, 8, 384>}]} {
    %c0 = arith.constant 0 : index
    %c0_0 = arith.constant 0 : index
    %c0_1 = arith.constant 0 : index
    %0 = vector.load %arg4[%c0, %c0_0, %c0_1] : memref<1x256x384xf32, #tpu.memory_space<vmem>>, vector<1x256x384xf32>
    %1 = vector.shape_cast %0 : vector<1x256x384xf32> to vector<256x384xf32>
    %c0_2 = arith.constant 0 : index
    %c0_3 = arith.constant 0 : index
    %c0_4 = arith.constant 0 : index
    %2 = vector.load %arg5[%c0_2, %c0_3, %c0_4] : memref<1x384x1152xf32, #tpu.memory_space<vmem>>, vector<1x384x1152xf32>
    %3 = vector.shape_cast %2 : vector<1x384x1152xf32> to vector<384x1152xf32>
    %c0_5 = arith.constant 0 : index
    %c0_6 = arith.constant 0 : index
    %c0_7 = arith.constant 0 : index
    %4 = vector.load %arg6[%c0_5, %c0_6, %c0_7] : memref<1x384x384xf32, #tpu.memory_space<vmem>>, vector<1x384x384xf32>
    %5 = vector.shape_cast %4 : vector<1x384x384xf32> to vector<384x384xf32>
    %c0_8 = arith.constant 0 : index
    %c0_9 = arith.constant 0 : index
    %c0_10 = arith.constant 0 : index
    %6 = vector.load %arg7[%c0_8, %c0_9, %c0_10] : memref<1x384x768xf32, #tpu.memory_space<vmem>>, vector<1x384x768xf32>
    %7 = vector.shape_cast %6 : vector<1x384x768xf32> to vector<384x768xf32>
    %c0_11 = arith.constant 0 : index
    %c0_12 = arith.constant 0 : index
    %c0_13 = arith.constant 0 : index
    %8 = vector.load %arg8[%c0_11, %c0_12, %c0_13] : memref<1x768x384xf32, #tpu.memory_space<vmem>>, vector<1x768x384xf32>
    %9 = vector.shape_cast %8 : vector<1x768x384xf32> to vector<768x384xf32>
    %c0_14 = arith.constant 0 : index
    %c0_15 = arith.constant 0 : index
    %c0_16 = arith.constant 0 : index
    %10 = vector.load %arg9[%c0_14, %c0_15, %c0_16] : memref<1x17x1152xf32, #tpu.memory_space<vmem>>, vector<1x17x1152xf32>
    %11 = vector.shape_cast %10 : vector<1x17x1152xf32> to vector<17x1152xf32>
    %12 = vector.extract_strided_slice %11 {offsets = [0, 0], sizes = [1, 384], strides = [1, 1]} : vector<17x1152xf32> to vector<1x384xf32>
    %13 = vector.extract_strided_slice %11 {offsets = [1, 0], sizes = [1, 384], strides = [1, 1]} : vector<17x1152xf32> to vector<1x384xf32>
    %14 = vector.extract_strided_slice %11 {offsets = [2, 0], sizes = [5, 384], strides = [1, 1]} : vector<17x1152xf32> to vector<5x384xf32>
    %15 = vector.extract_strided_slice %11 {offsets = [7, 0], sizes = [2, 384], strides = [1, 1]} : vector<17x1152xf32> to vector<2x384xf32>
    %16 = vector.extract_strided_slice %11 {offsets = [9, 0], sizes = [1, 1152], strides = [1, 1]} : vector<17x1152xf32> to vector<1x1152xf32>
    %17 = vector.extract_strided_slice %11 {offsets = [10, 0], sizes = [1, 384], strides = [1, 1]} : vector<17x1152xf32> to vector<1x384xf32>
    %18 = vector.extract_strided_slice %11 {offsets = [11, 0], sizes = [2, 384], strides = [1, 1]} : vector<17x1152xf32> to vector<2x384xf32>
    %19 = vector.extract_strided_slice %11 {offsets = [13, 0], sizes = [1, 768], strides = [1, 1]} : vector<17x1152xf32> to vector<1x768xf32>
    %20 = vector.extract_strided_slice %11 {offsets = [14, 0], sizes = [1, 384], strides = [1, 1]} : vector<17x1152xf32> to vector<1x384xf32>
    %21 = vector.extract_strided_slice %11 {offsets = [15, 0], sizes = [2, 384], strides = [1, 1]} : vector<17x1152xf32> to vector<2x384xf32>
    %c0_17 = arith.constant 0 : index
    %c0_18 = arith.constant 0 : index
    %22 = vector.load %arg2[%c0_17, %c0_18] : memref<20x20xf32, #tpu.memory_space<vmem>>, vector<20x20xf32>
    %c0_19 = arith.constant 0 : index
    %c0_20 = arith.constant 0 : index
    %23 = vector.load %arg3[%c0_19, %c0_20] : memref<12x12xf32, #tpu.memory_space<vmem>>, vector<12x12xf32>
    %c0_21 = arith.constant 0 : index
    %c0_22 = arith.constant 0 : index
    %24 = vector.load %arg1[%c0_21, %c0_22] : memref<16x256xf32, #tpu.memory_space<vmem>>, vector<16x256xf32>
    %cst = arith.constant dense<0.000000e+00> : vector<16x384xf32>
    %25 = tpu.matmul %24, %1, %cst {dimension_numbers = #tpu.dot_dimension_numbers<[1], [0], [0], [1], [0, 0, 1, 1], [], []>} : vector<16x256xf32>, vector<256x384xf32>, vector<16x384xf32> -> vector<16x384xf32>
    %26 = vector.broadcast %12 : vector<1x384xf32> to vector<16x384xf32>
    %27 = arith.addf %25, %26 : vector<16x384xf32>
    %28 = vector.extract_strided_slice %27 {offsets = [0, 0], sizes = [4, 384], strides = [1, 1]} : vector<16x384xf32> to vector<4x384xf32>
    %29 = vector.extract_strided_slice %27 {offsets = [4, 0], sizes = [4, 384], strides = [1, 1]} : vector<16x384xf32> to vector<4x384xf32>
    %30 = vector.extract_strided_slice %27 {offsets = [8, 0], sizes = [4, 384], strides = [1, 1]} : vector<16x384xf32> to vector<4x384xf32>
    %31 = vector.extract_strided_slice %27 {offsets = [12, 0], sizes = [4, 384], strides = [1, 1]} : vector<16x384xf32> to vector<4x384xf32>
    %32 = tpu.concatenate %13, %28, %13, %29, %13, %30, %13, %31 in 0 : vector<1x384xf32>, vector<4x384xf32>, vector<1x384xf32>, vector<4x384xf32>, vector<1x384xf32>, vector<4x384xf32>, vector<1x384xf32>, vector<4x384xf32> -> vector<20x384xf32>
    %33 = tpu.concatenate %14, %14, %14, %14 in 0 : vector<5x384xf32>, vector<5x384xf32>, vector<5x384xf32>, vector<5x384xf32> -> vector<20x384xf32>
    %34 = arith.addf %32, %33 : vector<20x384xf32>
    %cst_23 = arith.constant dense<0.000000e+00> : vector<20xf32>
    %35 = vector.multi_reduction <add>, %34, %cst_23 [1] : vector<20x384xf32> to vector<20xf32>
    %36 = vector.shape_cast %35 : vector<20xf32> to vector<20x1xf32>
    %cst_24 = arith.constant 3.840000e+02 : f32
    %37 = vector.broadcast %cst_24 : f32 to vector<20x1xf32>
    %38 = arith.divf %36, %37 : vector<20x1xf32>
    %39 = vector.broadcast %38 : vector<20x1xf32> to vector<20x384xf32>
    %40 = arith.subf %34, %39 : vector<20x384xf32>
    %41 = arith.mulf %40, %40 : vector<20x384xf32>
    %cst_25 = arith.constant dense<0.000000e+00> : vector<20xf32>
    %42 = vector.multi_reduction <add>, %41, %cst_25 [1] : vector<20x384xf32> to vector<20xf32>
    %43 = vector.shape_cast %42 : vector<20xf32> to vector<20x1xf32>
    %cst_26 = arith.constant 3.840000e+02 : f32
    %44 = vector.broadcast %cst_26 : f32 to vector<20x1xf32>
    %45 = arith.divf %43, %44 : vector<20x1xf32>
    %cst_27 = arith.constant 9.99999997E-7 : f32
    %46 = vector.broadcast %cst_27 : f32 to vector<20x1xf32>
    %47 = arith.addf %45, %46 : vector<20x1xf32>
    %48 = math.rsqrt %47 : vector<20x1xf32>
    %49 = vector.broadcast %48 : vector<20x1xf32> to vector<20x384xf32>
    %50 = arith.mulf %40, %49 : vector<20x384xf32>
    %51 = vector.extract_strided_slice %15 {offsets = [0, 0], sizes = [1, 384], strides = [1, 1]} : vector<2x384xf32> to vector<1x384xf32>
    %52 = vector.broadcast %51 : vector<1x384xf32> to vector<20x384xf32>
    %53 = arith.mulf %50, %52 : vector<20x384xf32>
    %54 = vector.extract_strided_slice %15 {offsets = [1, 0], sizes = [1, 384], strides = [1, 1]} : vector<2x384xf32> to vector<1x384xf32>
    %55 = vector.broadcast %54 : vector<1x384xf32> to vector<20x384xf32>
    %56 = arith.addf %53, %55 : vector<20x384xf32>
    %cst_28 = arith.constant dense<0.000000e+00> : vector<20x1152xf32>
    %57 = tpu.matmul %56, %3, %cst_28 {dimension_numbers = #tpu.dot_dimension_numbers<[1], [0], [0], [1], [0, 0, 1, 1], [], []>} : vector<20x384xf32>, vector<384x1152xf32>, vector<20x1152xf32> -> vector<20x1152xf32>
    %58 = vector.broadcast %16 : vector<1x1152xf32> to vector<20x1152xf32>
    %59 = arith.addf %57, %58 : vector<20x1152xf32>
    %60 = vector.extract_strided_slice %59 {offsets = [0, 0], sizes = [20, 128], strides = [1, 1]} : vector<20x1152xf32> to vector<20x128xf32>
    %61 = vector.extract_strided_slice %59 {offsets = [0, 384], sizes = [20, 128], strides = [1, 1]} : vector<20x1152xf32> to vector<20x128xf32>
    %62 = vector.extract_strided_slice %59 {offsets = [0, 768], sizes = [20, 128], strides = [1, 1]} : vector<20x1152xf32> to vector<20x128xf32>
    %cst_29 = arith.constant dense<0.000000e+00> : vector<20x20xf32>
    %63 = tpu.matmul %60, %61, %cst_29 {dimension_numbers = #tpu.dot_dimension_numbers<[1], [1], [0], [0], [0, 0, 1, 0], [], []>} : vector<20x128xf32>, vector<20x128xf32>, vector<20x20xf32> -> vector<20x20xf32>
    %cst_30 = arith.constant 0.0883883461 : f32
    %64 = vector.broadcast %cst_30 : f32 to vector<20x20xf32>
    %65 = arith.mulf %63, %64 : vector<20x20xf32>
    %66 = arith.addf %65, %22 : vector<20x20xf32>
    %cst_31 = arith.constant dense<0xFF800000> : vector<20xf32>
    %67 = vector.multi_reduction <maximumf>, %66, %cst_31 [1] : vector<20x20xf32> to vector<20xf32>
    %68 = vector.shape_cast %67 : vector<20xf32> to vector<20x1xf32>
    %69 = vector.broadcast %68 : vector<20x1xf32> to vector<20x20xf32>
    %70 = arith.subf %66, %69 : vector<20x20xf32>
    %71 = math.exp %70 : vector<20x20xf32>
    %cst_32 = arith.constant dense<0.000000e+00> : vector<20xf32>
    %72 = vector.multi_reduction <add>, %71, %cst_32 [1] : vector<20x20xf32> to vector<20xf32>
    %73 = vector.shape_cast %72 : vector<20xf32> to vector<20x1xf32>
    %74 = vector.broadcast %73 : vector<20x1xf32> to vector<20x20xf32>
    %75 = arith.divf %71, %74 : vector<20x20xf32>
    %cst_33 = arith.constant dense<0.000000e+00> : vector<20x128xf32>
    %76 = tpu.matmul %75, %62, %cst_33 {dimension_numbers = #tpu.dot_dimension_numbers<[1], [0], [0], [1], [0, 0, 1, 1], [], []>} : vector<20x20xf32>, vector<20x128xf32>, vector<20x128xf32> -> vector<20x128xf32>
    %77 = vector.extract_strided_slice %59 {offsets = [0, 128], sizes = [20, 128], strides = [1, 1]} : vector<20x1152xf32> to vector<20x128xf32>
    %78 = vector.extract_strided_slice %59 {offsets = [0, 512], sizes = [20, 128], strides = [1, 1]} : vector<20x1152xf32> to vector<20x128xf32>
    %79 = vector.extract_strided_slice %59 {offsets = [0, 896], sizes = [20, 128], strides = [1, 1]} : vector<20x1152xf32> to vector<20x128xf32>
    %cst_34 = arith.constant dense<0.000000e+00> : vector<20x20xf32>
    %80 = tpu.matmul %77, %78, %cst_34 {dimension_numbers = #tpu.dot_dimension_numbers<[1], [1], [0], [0], [0, 0, 1, 0], [], []>} : vector<20x128xf32>, vector<20x128xf32>, vector<20x20xf32> -> vector<20x20xf32>
    %cst_35 = arith.constant 0.0883883461 : f32
    %81 = vector.broadcast %cst_35 : f32 to vector<20x20xf32>
    %82 = arith.mulf %80, %81 : vector<20x20xf32>
    %83 = arith.addf %82, %22 : vector<20x20xf32>
    %cst_36 = arith.constant dense<0xFF800000> : vector<20xf32>
    %84 = vector.multi_reduction <maximumf>, %83, %cst_36 [1] : vector<20x20xf32> to vector<20xf32>
    %85 = vector.shape_cast %84 : vector<20xf32> to vector<20x1xf32>
    %86 = vector.broadcast %85 : vector<20x1xf32> to vector<20x20xf32>
    %87 = arith.subf %83, %86 : vector<20x20xf32>
    %88 = math.exp %87 : vector<20x20xf32>
    %cst_37 = arith.constant dense<0.000000e+00> : vector<20xf32>
    %89 = vector.multi_reduction <add>, %88, %cst_37 [1] : vector<20x20xf32> to vector<20xf32>
    %90 = vector.shape_cast %89 : vector<20xf32> to vector<20x1xf32>
    %91 = vector.broadcast %90 : vector<20x1xf32> to vector<20x20xf32>
    %92 = arith.divf %88, %91 : vector<20x20xf32>
    %cst_38 = arith.constant dense<0.000000e+00> : vector<20x128xf32>
    %93 = tpu.matmul %92, %79, %cst_38 {dimension_numbers = #tpu.dot_dimension_numbers<[1], [0], [0], [1], [0, 0, 1, 1], [], []>} : vector<20x20xf32>, vector<20x128xf32>, vector<20x128xf32> -> vector<20x128xf32>
    %94 = vector.extract_strided_slice %59 {offsets = [0, 256], sizes = [20, 128], strides = [1, 1]} : vector<20x1152xf32> to vector<20x128xf32>
    %95 = vector.extract_strided_slice %59 {offsets = [0, 640], sizes = [20, 128], strides = [1, 1]} : vector<20x1152xf32> to vector<20x128xf32>
    %96 = vector.extract_strided_slice %59 {offsets = [0, 1024], sizes = [20, 128], strides = [1, 1]} : vector<20x1152xf32> to vector<20x128xf32>
    %cst_39 = arith.constant dense<0.000000e+00> : vector<20x20xf32>
    %97 = tpu.matmul %94, %95, %cst_39 {dimension_numbers = #tpu.dot_dimension_numbers<[1], [1], [0], [0], [0, 0, 1, 0], [], []>} : vector<20x128xf32>, vector<20x128xf32>, vector<20x20xf32> -> vector<20x20xf32>
    %cst_40 = arith.constant 0.0883883461 : f32
    %98 = vector.broadcast %cst_40 : f32 to vector<20x20xf32>
    %99 = arith.mulf %97, %98 : vector<20x20xf32>
    %100 = arith.addf %99, %22 : vector<20x20xf32>
    %cst_41 = arith.constant dense<0xFF800000> : vector<20xf32>
    %101 = vector.multi_reduction <maximumf>, %100, %cst_41 [1] : vector<20x20xf32> to vector<20xf32>
    %102 = vector.shape_cast %101 : vector<20xf32> to vector<20x1xf32>
    %103 = vector.broadcast %102 : vector<20x1xf32> to vector<20x20xf32>
    %104 = arith.subf %100, %103 : vector<20x20xf32>
    %105 = math.exp %104 : vector<20x20xf32>
    %cst_42 = arith.constant dense<0.000000e+00> : vector<20xf32>
    %106 = vector.multi_reduction <add>, %105, %cst_42 [1] : vector<20x20xf32> to vector<20xf32>
    %107 = vector.shape_cast %106 : vector<20xf32> to vector<20x1xf32>
    %108 = vector.broadcast %107 : vector<20x1xf32> to vector<20x20xf32>
    %109 = arith.divf %105, %108 : vector<20x20xf32>
    %cst_43 = arith.constant dense<0.000000e+00> : vector<20x128xf32>
    %110 = tpu.matmul %109, %96, %cst_43 {dimension_numbers = #tpu.dot_dimension_numbers<[1], [0], [0], [1], [0, 0, 1, 1], [], []>} : vector<20x20xf32>, vector<20x128xf32>, vector<20x128xf32> -> vector<20x128xf32>
    %111 = tpu.concatenate %76, %93, %110 in 1 : vector<20x128xf32>, vector<20x128xf32>, vector<20x128xf32> -> vector<20x384xf32>
    %cst_44 = arith.constant dense<0.000000e+00> : vector<20x384xf32>
    %112 = tpu.matmul %111, %5, %cst_44 {dimension_numbers = #tpu.dot_dimension_numbers<[1], [0], [0], [1], [0, 0, 1, 1], [], []>} : vector<20x384xf32>, vector<384x384xf32>, vector<20x384xf32> -> vector<20x384xf32>
    %113 = arith.addf %34, %112 : vector<20x384xf32>
    %114 = vector.broadcast %17 : vector<1x384xf32> to vector<20x384xf32>
    %115 = arith.addf %113, %114 : vector<20x384xf32>
    %cst_45 = arith.constant dense<0.000000e+00> : vector<20xf32>
    %116 = vector.multi_reduction <add>, %115, %cst_45 [1] : vector<20x384xf32> to vector<20xf32>
    %117 = vector.shape_cast %116 : vector<20xf32> to vector<20x1xf32>
    %cst_46 = arith.constant 3.840000e+02 : f32
    %118 = vector.broadcast %cst_46 : f32 to vector<20x1xf32>
    %119 = arith.divf %117, %118 : vector<20x1xf32>
    %120 = vector.broadcast %119 : vector<20x1xf32> to vector<20x384xf32>
    %121 = arith.subf %115, %120 : vector<20x384xf32>
    %122 = arith.mulf %121, %121 : vector<20x384xf32>
    %cst_47 = arith.constant dense<0.000000e+00> : vector<20xf32>
    %123 = vector.multi_reduction <add>, %122, %cst_47 [1] : vector<20x384xf32> to vector<20xf32>
    %124 = vector.shape_cast %123 : vector<20xf32> to vector<20x1xf32>
    %cst_48 = arith.constant 3.840000e+02 : f32
    %125 = vector.broadcast %cst_48 : f32 to vector<20x1xf32>
    %126 = arith.divf %124, %125 : vector<20x1xf32>
    %cst_49 = arith.constant 9.99999997E-7 : f32
    %127 = vector.broadcast %cst_49 : f32 to vector<20x1xf32>
    %128 = arith.addf %126, %127 : vector<20x1xf32>
    %129 = math.rsqrt %128 : vector<20x1xf32>
    %130 = vector.broadcast %129 : vector<20x1xf32> to vector<20x384xf32>
    %131 = arith.mulf %121, %130 : vector<20x384xf32>
    %132 = vector.extract_strided_slice %18 {offsets = [0, 0], sizes = [1, 384], strides = [1, 1]} : vector<2x384xf32> to vector<1x384xf32>
    %133 = vector.broadcast %132 : vector<1x384xf32> to vector<20x384xf32>
    %134 = arith.mulf %131, %133 : vector<20x384xf32>
    %135 = vector.extract_strided_slice %18 {offsets = [1, 0], sizes = [1, 384], strides = [1, 1]} : vector<2x384xf32> to vector<1x384xf32>
    %136 = vector.broadcast %135 : vector<1x384xf32> to vector<20x384xf32>
    %137 = arith.addf %134, %136 : vector<20x384xf32>
    %cst_50 = arith.constant dense<0.000000e+00> : vector<20x768xf32>
    %138 = tpu.matmul %137, %7, %cst_50 {dimension_numbers = #tpu.dot_dimension_numbers<[1], [0], [0], [1], [0, 0, 1, 1], [], []>} : vector<20x384xf32>, vector<384x768xf32>, vector<20x768xf32> -> vector<20x768xf32>
    %139 = vector.broadcast %19 : vector<1x768xf32> to vector<20x768xf32>
    %140 = arith.addf %138, %139 : vector<20x768xf32>
    %cst_51 = arith.constant 5.000000e-01 : f32
    %141 = vector.broadcast %cst_51 : f32 to vector<20x768xf32>
    %142 = arith.mulf %141, %140 : vector<20x768xf32>
    %cst_52 = arith.constant 4.471500e-02 : f32
    %143 = vector.broadcast %cst_52 : f32 to vector<20x768xf32>
    %144 = arith.mulf %143, %140 : vector<20x768xf32>
    %145 = arith.mulf %144, %140 : vector<20x768xf32>
    %146 = arith.mulf %145, %140 : vector<20x768xf32>
    %147 = arith.addf %140, %146 : vector<20x768xf32>
    %cst_53 = arith.constant 0.797884583 : f32
    %148 = vector.broadcast %cst_53 : f32 to vector<20x768xf32>
    %149 = arith.mulf %148, %147 : vector<20x768xf32>
    %150 = math.tanh %149 : vector<20x768xf32>
    %cst_54 = arith.constant 1.000000e+00 : f32
    %151 = vector.broadcast %cst_54 : f32 to vector<20x768xf32>
    %152 = arith.addf %151, %150 : vector<20x768xf32>
    %153 = arith.mulf %142, %152 : vector<20x768xf32>
    %cst_55 = arith.constant dense<0.000000e+00> : vector<20x384xf32>
    %154 = tpu.matmul %153, %9, %cst_55 {dimension_numbers = #tpu.dot_dimension_numbers<[1], [0], [0], [1], [0, 0, 1, 1], [], []>} : vector<20x768xf32>, vector<768x384xf32>, vector<20x384xf32> -> vector<20x384xf32>
    %155 = arith.addf %115, %154 : vector<20x384xf32>
    %156 = vector.broadcast %20 : vector<1x384xf32> to vector<20x384xf32>
    %157 = arith.addf %155, %156 : vector<20x384xf32>
    %cst_56 = arith.constant dense<0.000000e+00> : vector<20xf32>
    %158 = vector.multi_reduction <add>, %157, %cst_56 [1] : vector<20x384xf32> to vector<20xf32>
    %159 = vector.shape_cast %158 : vector<20xf32> to vector<20x1xf32>
    %cst_57 = arith.constant 3.840000e+02 : f32
    %160 = vector.broadcast %cst_57 : f32 to vector<20x1xf32>
    %161 = arith.divf %159, %160 : vector<20x1xf32>
    %162 = vector.broadcast %161 : vector<20x1xf32> to vector<20x384xf32>
    %163 = arith.subf %157, %162 : vector<20x384xf32>
    %164 = arith.mulf %163, %163 : vector<20x384xf32>
    %cst_58 = arith.constant dense<0.000000e+00> : vector<20xf32>
    %165 = vector.multi_reduction <add>, %164, %cst_58 [1] : vector<20x384xf32> to vector<20xf32>
    %166 = vector.shape_cast %165 : vector<20xf32> to vector<20x1xf32>
    %cst_59 = arith.constant 3.840000e+02 : f32
    %167 = vector.broadcast %cst_59 : f32 to vector<20x1xf32>
    %168 = arith.divf %166, %167 : vector<20x1xf32>
    %cst_60 = arith.constant 9.99999997E-7 : f32
    %169 = vector.broadcast %cst_60 : f32 to vector<20x1xf32>
    %170 = arith.addf %168, %169 : vector<20x1xf32>
    %171 = math.rsqrt %170 : vector<20x1xf32>
    %172 = vector.broadcast %171 : vector<20x1xf32> to vector<20x384xf32>
    %173 = arith.mulf %163, %172 : vector<20x384xf32>
    %174 = vector.extract_strided_slice %21 {offsets = [0, 0], sizes = [1, 384], strides = [1, 1]} : vector<2x384xf32> to vector<1x384xf32>
    %175 = vector.broadcast %174 : vector<1x384xf32> to vector<20x384xf32>
    %176 = arith.mulf %173, %175 : vector<20x384xf32>
    %177 = vector.extract_strided_slice %21 {offsets = [1, 0], sizes = [1, 384], strides = [1, 1]} : vector<2x384xf32> to vector<1x384xf32>
    %178 = vector.broadcast %177 : vector<1x384xf32> to vector<20x384xf32>
    %179 = arith.addf %176, %178 : vector<20x384xf32>
    %180 = vector.extract_strided_slice %179 {offsets = [0, 0], sizes = [1, 384], strides = [1, 1]} : vector<20x384xf32> to vector<1x384xf32>
    %181 = vector.extract_strided_slice %179 {offsets = [11, 0], sizes = [4, 384], strides = [1, 1]} : vector<20x384xf32> to vector<4x384xf32>
    %182 = vector.extract_strided_slice %179 {offsets = [5, 0], sizes = [1, 384], strides = [1, 1]} : vector<20x384xf32> to vector<1x384xf32>
    %183 = vector.extract_strided_slice %179 {offsets = [16, 0], sizes = [4, 384], strides = [1, 1]} : vector<20x384xf32> to vector<4x384xf32>
    %184 = vector.extract_strided_slice %179 {offsets = [10, 0], sizes = [1, 384], strides = [1, 1]} : vector<20x384xf32> to vector<1x384xf32>
    %185 = vector.extract_strided_slice %179 {offsets = [15, 0], sizes = [1, 384], strides = [1, 1]} : vector<20x384xf32> to vector<1x384xf32>
    %186 = tpu.concatenate %180, %181, %182, %183, %184, %185 in 0 : vector<1x384xf32>, vector<4x384xf32>, vector<1x384xf32>, vector<4x384xf32>, vector<1x384xf32>, vector<1x384xf32> -> vector<12x384xf32>
    %cst_61 = arith.constant dense<0.000000e+00> : vector<12xf32>
    %187 = vector.multi_reduction <add>, %186, %cst_61 [1] : vector<12x384xf32> to vector<12xf32>
    %188 = vector.shape_cast %187 : vector<12xf32> to vector<12x1xf32>
    %cst_62 = arith.constant 3.840000e+02 : f32
    %189 = vector.broadcast %cst_62 : f32 to vector<12x1xf32>
    %190 = arith.divf %188, %189 : vector<12x1xf32>
    %191 = vector.broadcast %190 : vector<12x1xf32> to vector<12x384xf32>
    %192 = arith.subf %186, %191 : vector<12x384xf32>
    %193 = arith.mulf %192, %192 : vector<12x384xf32>
    %cst_63 = arith.constant dense<0.000000e+00> : vector<12xf32>
    %194 = vector.multi_reduction <add>, %193, %cst_63 [1] : vector<12x384xf32> to vector<12xf32>
    %195 = vector.shape_cast %194 : vector<12xf32> to vector<12x1xf32>
    %cst_64 = arith.constant 3.840000e+02 : f32
    %196 = vector.broadcast %cst_64 : f32 to vector<12x1xf32>
    %197 = arith.divf %195, %196 : vector<12x1xf32>
    %cst_65 = arith.constant 9.99999997E-7 : f32
    %198 = vector.broadcast %cst_65 : f32 to vector<12x1xf32>
    %199 = arith.addf %197, %198 : vector<12x1xf32>
    %200 = math.rsqrt %199 : vector<12x1xf32>
    %201 = vector.broadcast %200 : vector<12x1xf32> to vector<12x384xf32>
    %202 = arith.mulf %192, %201 : vector<12x384xf32>
    %203 = vector.extract_strided_slice %15 {offsets = [0, 0], sizes = [1, 384], strides = [1, 1]} : vector<2x384xf32> to vector<1x384xf32>
    %204 = vector.broadcast %203 : vector<1x384xf32> to vector<12x384xf32>
    %205 = arith.mulf %202, %204 : vector<12x384xf32>
    %206 = vector.extract_strided_slice %15 {offsets = [1, 0], sizes = [1, 384], strides = [1, 1]} : vector<2x384xf32> to vector<1x384xf32>
    %207 = vector.broadcast %206 : vector<1x384xf32> to vector<12x384xf32>
    %208 = arith.addf %205, %207 : vector<12x384xf32>
    %cst_66 = arith.constant dense<0.000000e+00> : vector<12x1152xf32>
    %209 = tpu.matmul %208, %3, %cst_66 {dimension_numbers = #tpu.dot_dimension_numbers<[1], [0], [0], [1], [0, 0, 1, 1], [], []>} : vector<12x384xf32>, vector<384x1152xf32>, vector<12x1152xf32> -> vector<12x1152xf32>
    %210 = vector.broadcast %16 : vector<1x1152xf32> to vector<12x1152xf32>
    %211 = arith.addf %209, %210 : vector<12x1152xf32>
    %212 = vector.extract_strided_slice %211 {offsets = [0, 0], sizes = [12, 128], strides = [1, 1]} : vector<12x1152xf32> to vector<12x128xf32>
    %213 = vector.extract_strided_slice %211 {offsets = [0, 384], sizes = [12, 128], strides = [1, 1]} : vector<12x1152xf32> to vector<12x128xf32>
    %214 = vector.extract_strided_slice %211 {offsets = [0, 768], sizes = [12, 128], strides = [1, 1]} : vector<12x1152xf32> to vector<12x128xf32>
    %cst_67 = arith.constant dense<0.000000e+00> : vector<12x12xf32>
    %215 = tpu.matmul %212, %213, %cst_67 {dimension_numbers = #tpu.dot_dimension_numbers<[1], [1], [0], [0], [0, 0, 1, 0], [], []>} : vector<12x128xf32>, vector<12x128xf32>, vector<12x12xf32> -> vector<12x12xf32>
    %cst_68 = arith.constant 0.0883883461 : f32
    %216 = vector.broadcast %cst_68 : f32 to vector<12x12xf32>
    %217 = arith.mulf %215, %216 : vector<12x12xf32>
    %218 = arith.addf %217, %23 : vector<12x12xf32>
    %cst_69 = arith.constant dense<0xFF800000> : vector<12xf32>
    %219 = vector.multi_reduction <maximumf>, %218, %cst_69 [1] : vector<12x12xf32> to vector<12xf32>
    %220 = vector.shape_cast %219 : vector<12xf32> to vector<12x1xf32>
    %221 = vector.broadcast %220 : vector<12x1xf32> to vector<12x12xf32>
    %222 = arith.subf %218, %221 : vector<12x12xf32>
    %223 = math.exp %222 : vector<12x12xf32>
    %cst_70 = arith.constant dense<0.000000e+00> : vector<12xf32>
    %224 = vector.multi_reduction <add>, %223, %cst_70 [1] : vector<12x12xf32> to vector<12xf32>
    %225 = vector.shape_cast %224 : vector<12xf32> to vector<12x1xf32>
    %226 = vector.broadcast %225 : vector<12x1xf32> to vector<12x12xf32>
    %227 = arith.divf %223, %226 : vector<12x12xf32>
    %cst_71 = arith.constant dense<0.000000e+00> : vector<12x128xf32>
    %228 = tpu.matmul %227, %214, %cst_71 {dimension_numbers = #tpu.dot_dimension_numbers<[1], [0], [0], [1], [0, 0, 1, 1], [], []>} : vector<12x12xf32>, vector<12x128xf32>, vector<12x128xf32> -> vector<12x128xf32>
    %229 = vector.extract_strided_slice %211 {offsets = [0, 128], sizes = [12, 128], strides = [1, 1]} : vector<12x1152xf32> to vector<12x128xf32>
    %230 = vector.extract_strided_slice %211 {offsets = [0, 512], sizes = [12, 128], strides = [1, 1]} : vector<12x1152xf32> to vector<12x128xf32>
    %231 = vector.extract_strided_slice %211 {offsets = [0, 896], sizes = [12, 128], strides = [1, 1]} : vector<12x1152xf32> to vector<12x128xf32>
    %cst_72 = arith.constant dense<0.000000e+00> : vector<12x12xf32>
    %232 = tpu.matmul %229, %230, %cst_72 {dimension_numbers = #tpu.dot_dimension_numbers<[1], [1], [0], [0], [0, 0, 1, 0], [], []>} : vector<12x128xf32>, vector<12x128xf32>, vector<12x12xf32> -> vector<12x12xf32>
    %cst_73 = arith.constant 0.0883883461 : f32
    %233 = vector.broadcast %cst_73 : f32 to vector<12x12xf32>
    %234 = arith.mulf %232, %233 : vector<12x12xf32>
    %235 = arith.addf %234, %23 : vector<12x12xf32>
    %cst_74 = arith.constant dense<0xFF800000> : vector<12xf32>
    %236 = vector.multi_reduction <maximumf>, %235, %cst_74 [1] : vector<12x12xf32> to vector<12xf32>
    %237 = vector.shape_cast %236 : vector<12xf32> to vector<12x1xf32>
    %238 = vector.broadcast %237 : vector<12x1xf32> to vector<12x12xf32>
    %239 = arith.subf %235, %238 : vector<12x12xf32>
    %240 = math.exp %239 : vector<12x12xf32>
    %cst_75 = arith.constant dense<0.000000e+00> : vector<12xf32>
    %241 = vector.multi_reduction <add>, %240, %cst_75 [1] : vector<12x12xf32> to vector<12xf32>
    %242 = vector.shape_cast %241 : vector<12xf32> to vector<12x1xf32>
    %243 = vector.broadcast %242 : vector<12x1xf32> to vector<12x12xf32>
    %244 = arith.divf %240, %243 : vector<12x12xf32>
    %cst_76 = arith.constant dense<0.000000e+00> : vector<12x128xf32>
    %245 = tpu.matmul %244, %231, %cst_76 {dimension_numbers = #tpu.dot_dimension_numbers<[1], [0], [0], [1], [0, 0, 1, 1], [], []>} : vector<12x12xf32>, vector<12x128xf32>, vector<12x128xf32> -> vector<12x128xf32>
    %246 = vector.extract_strided_slice %211 {offsets = [0, 256], sizes = [12, 128], strides = [1, 1]} : vector<12x1152xf32> to vector<12x128xf32>
    %247 = vector.extract_strided_slice %211 {offsets = [0, 640], sizes = [12, 128], strides = [1, 1]} : vector<12x1152xf32> to vector<12x128xf32>
    %248 = vector.extract_strided_slice %211 {offsets = [0, 1024], sizes = [12, 128], strides = [1, 1]} : vector<12x1152xf32> to vector<12x128xf32>
    %cst_77 = arith.constant dense<0.000000e+00> : vector<12x12xf32>
    %249 = tpu.matmul %246, %247, %cst_77 {dimension_numbers = #tpu.dot_dimension_numbers<[1], [1], [0], [0], [0, 0, 1, 0], [], []>} : vector<12x128xf32>, vector<12x128xf32>, vector<12x12xf32> -> vector<12x12xf32>
    %cst_78 = arith.constant 0.0883883461 : f32
    %250 = vector.broadcast %cst_78 : f32 to vector<12x12xf32>
    %251 = arith.mulf %249, %250 : vector<12x12xf32>
    %252 = arith.addf %251, %23 : vector<12x12xf32>
    %cst_79 = arith.constant dense<0xFF800000> : vector<12xf32>
    %253 = vector.multi_reduction <maximumf>, %252, %cst_79 [1] : vector<12x12xf32> to vector<12xf32>
    %254 = vector.shape_cast %253 : vector<12xf32> to vector<12x1xf32>
    %255 = vector.broadcast %254 : vector<12x1xf32> to vector<12x12xf32>
    %256 = arith.subf %252, %255 : vector<12x12xf32>
    %257 = math.exp %256 : vector<12x12xf32>
    %cst_80 = arith.constant dense<0.000000e+00> : vector<12xf32>
    %258 = vector.multi_reduction <add>, %257, %cst_80 [1] : vector<12x12xf32> to vector<12xf32>
    %259 = vector.shape_cast %258 : vector<12xf32> to vector<12x1xf32>
    %260 = vector.broadcast %259 : vector<12x1xf32> to vector<12x12xf32>
    %261 = arith.divf %257, %260 : vector<12x12xf32>
    %cst_81 = arith.constant dense<0.000000e+00> : vector<12x128xf32>
    %262 = tpu.matmul %261, %248, %cst_81 {dimension_numbers = #tpu.dot_dimension_numbers<[1], [0], [0], [1], [0, 0, 1, 1], [], []>} : vector<12x12xf32>, vector<12x128xf32>, vector<12x128xf32> -> vector<12x128xf32>
    %263 = tpu.concatenate %228, %245, %262 in 1 : vector<12x128xf32>, vector<12x128xf32>, vector<12x128xf32> -> vector<12x384xf32>
    %cst_82 = arith.constant dense<0.000000e+00> : vector<12x384xf32>
    %264 = tpu.matmul %263, %5, %cst_82 {dimension_numbers = #tpu.dot_dimension_numbers<[1], [0], [0], [1], [0, 0, 1, 1], [], []>} : vector<12x384xf32>, vector<384x384xf32>, vector<12x384xf32> -> vector<12x384xf32>
    %265 = arith.addf %186, %264 : vector<12x384xf32>
    %266 = vector.broadcast %17 : vector<1x384xf32> to vector<12x384xf32>
    %267 = arith.addf %265, %266 : vector<12x384xf32>
    %cst_83 = arith.constant dense<0.000000e+00> : vector<12xf32>
    %268 = vector.multi_reduction <add>, %267, %cst_83 [1] : vector<12x384xf32> to vector<12xf32>
    %269 = vector.shape_cast %268 : vector<12xf32> to vector<12x1xf32>
    %cst_84 = arith.constant 3.840000e+02 : f32
    %270 = vector.broadcast %cst_84 : f32 to vector<12x1xf32>
    %271 = arith.divf %269, %270 : vector<12x1xf32>
    %272 = vector.broadcast %271 : vector<12x1xf32> to vector<12x384xf32>
    %273 = arith.subf %267, %272 : vector<12x384xf32>
    %274 = arith.mulf %273, %273 : vector<12x384xf32>
    %cst_85 = arith.constant dense<0.000000e+00> : vector<12xf32>
    %275 = vector.multi_reduction <add>, %274, %cst_85 [1] : vector<12x384xf32> to vector<12xf32>
    %276 = vector.shape_cast %275 : vector<12xf32> to vector<12x1xf32>
    %cst_86 = arith.constant 3.840000e+02 : f32
    %277 = vector.broadcast %cst_86 : f32 to vector<12x1xf32>
    %278 = arith.divf %276, %277 : vector<12x1xf32>
    %cst_87 = arith.constant 9.99999997E-7 : f32
    %279 = vector.broadcast %cst_87 : f32 to vector<12x1xf32>
    %280 = arith.addf %278, %279 : vector<12x1xf32>
    %281 = math.rsqrt %280 : vector<12x1xf32>
    %282 = vector.broadcast %281 : vector<12x1xf32> to vector<12x384xf32>
    %283 = arith.mulf %273, %282 : vector<12x384xf32>
    %284 = vector.extract_strided_slice %18 {offsets = [0, 0], sizes = [1, 384], strides = [1, 1]} : vector<2x384xf32> to vector<1x384xf32>
    %285 = vector.broadcast %284 : vector<1x384xf32> to vector<12x384xf32>
    %286 = arith.mulf %283, %285 : vector<12x384xf32>
    %287 = vector.extract_strided_slice %18 {offsets = [1, 0], sizes = [1, 384], strides = [1, 1]} : vector<2x384xf32> to vector<1x384xf32>
    %288 = vector.broadcast %287 : vector<1x384xf32> to vector<12x384xf32>
    %289 = arith.addf %286, %288 : vector<12x384xf32>
    %cst_88 = arith.constant dense<0.000000e+00> : vector<12x768xf32>
    %290 = tpu.matmul %289, %7, %cst_88 {dimension_numbers = #tpu.dot_dimension_numbers<[1], [0], [0], [1], [0, 0, 1, 1], [], []>} : vector<12x384xf32>, vector<384x768xf32>, vector<12x768xf32> -> vector<12x768xf32>
    %291 = vector.broadcast %19 : vector<1x768xf32> to vector<12x768xf32>
    %292 = arith.addf %290, %291 : vector<12x768xf32>
    %cst_89 = arith.constant 5.000000e-01 : f32
    %293 = vector.broadcast %cst_89 : f32 to vector<12x768xf32>
    %294 = arith.mulf %293, %292 : vector<12x768xf32>
    %cst_90 = arith.constant 4.471500e-02 : f32
    %295 = vector.broadcast %cst_90 : f32 to vector<12x768xf32>
    %296 = arith.mulf %295, %292 : vector<12x768xf32>
    %297 = arith.mulf %296, %292 : vector<12x768xf32>
    %298 = arith.mulf %297, %292 : vector<12x768xf32>
    %299 = arith.addf %292, %298 : vector<12x768xf32>
    %cst_91 = arith.constant 0.797884583 : f32
    %300 = vector.broadcast %cst_91 : f32 to vector<12x768xf32>
    %301 = arith.mulf %300, %299 : vector<12x768xf32>
    %302 = math.tanh %301 : vector<12x768xf32>
    %cst_92 = arith.constant 1.000000e+00 : f32
    %303 = vector.broadcast %cst_92 : f32 to vector<12x768xf32>
    %304 = arith.addf %303, %302 : vector<12x768xf32>
    %305 = arith.mulf %294, %304 : vector<12x768xf32>
    %cst_93 = arith.constant dense<0.000000e+00> : vector<12x384xf32>
    %306 = tpu.matmul %305, %9, %cst_93 {dimension_numbers = #tpu.dot_dimension_numbers<[1], [0], [0], [1], [0, 0, 1, 1], [], []>} : vector<12x768xf32>, vector<768x384xf32>, vector<12x384xf32> -> vector<12x384xf32>
    %307 = arith.addf %267, %306 : vector<12x384xf32>
    %308 = vector.broadcast %20 : vector<1x384xf32> to vector<12x384xf32>
    %309 = arith.addf %307, %308 : vector<12x384xf32>
    %310 = vector.extract_strided_slice %179 {offsets = [0, 0], sizes = [1, 384], strides = [1, 1]} : vector<20x384xf32> to vector<1x384xf32>
    %311 = vector.extract_strided_slice %179 {offsets = [5, 0], sizes = [1, 384], strides = [1, 1]} : vector<20x384xf32> to vector<1x384xf32>
    %312 = vector.extract_strided_slice %179 {offsets = [10, 0], sizes = [1, 384], strides = [1, 1]} : vector<20x384xf32> to vector<1x384xf32>
    %313 = vector.extract_strided_slice %179 {offsets = [15, 0], sizes = [1, 384], strides = [1, 1]} : vector<20x384xf32> to vector<1x384xf32>
    %314 = vector.extract_strided_slice %309 {offsets = [0, 0], sizes = [1, 384], strides = [1, 1]} : vector<12x384xf32> to vector<1x384xf32>
    %315 = vector.extract_strided_slice %309 {offsets = [5, 0], sizes = [1, 384], strides = [1, 1]} : vector<12x384xf32> to vector<1x384xf32>
    %316 = vector.extract_strided_slice %309 {offsets = [10, 0], sizes = [1, 384], strides = [1, 1]} : vector<12x384xf32> to vector<1x384xf32>
    %317 = vector.extract_strided_slice %309 {offsets = [11, 0], sizes = [1, 384], strides = [1, 1]} : vector<12x384xf32> to vector<1x384xf32>
    %318 = tpu.concatenate %310, %311, %312, %313, %314, %315, %316, %317 in 0 : vector<1x384xf32>, vector<1x384xf32>, vector<1x384xf32>, vector<1x384xf32>, vector<1x384xf32>, vector<1x384xf32>, vector<1x384xf32>, vector<1x384xf32> -> vector<8x384xf32>
    %319 = vector.shape_cast %318 : vector<8x384xf32> to vector<1x8x384xf32>
    %c0_94 = arith.constant 0 : index
    %c0_95 = arith.constant 0 : index
    %c0_96 = arith.constant 0 : index
    %320 = vector.load %arg10[%c0_94, %c0_95, %c0_96] : memref<1x8x384xf32, #tpu.memory_space<vmem>>, vector<1x8x384xf32>
    tpu.vector_store %arg10[%c0_94, %c0_95, %c0_96], %319 {strides = array<i32>} : memref<1x8x384xf32, #tpu.memory_space<vmem>>, vector<1x8x384xf32>,
    return
  }
  func.func @transform_0(%arg0: i32) -> (i32, i32) {
    %c0_i32 = arith.constant 0 : i32
    %c0_i32_0 = arith.constant 0 : i32
    %c0_i32_1 = arith.constant 0 : i32
    return %c0_i32, %c0_i32_0 : i32, i32
  }
  func.func @transform_1(%arg0: i32) -> (i32, i32) {
    %c0_i32 = arith.constant 0 : i32
    %c0_i32_0 = arith.constant 0 : i32
    %c0_i32_1 = arith.constant 0 : i32
    return %c0_i32, %c0_i32_0 : i32, i32
  }
  func.func @transform_2(%arg0: i32) -> (i32, i32) {
    %c0_i32 = arith.constant 0 : i32
    %c0_i32_0 = arith.constant 0 : i32
    %c0_i32_1 = arith.constant 0 : i32
    return %c0_i32, %c0_i32_0 : i32, i32
  }
  func.func @transform_3(%arg0: i32) -> (i32, i32, i32) {
    %c0_i32 = arith.constant 0 : i32
    %c0_i32_0 = arith.constant 0 : i32
    %c0_i32_1 = arith.constant 0 : i32
    return %arg0, %c0_i32, %c0_i32_0 : i32, i32, i32
  }
  func.func @transform_4(%arg0: i32) -> (i32, i32, i32) {
    %c0_i32 = arith.constant 0 : i32
    %c0_i32_0 = arith.constant 0 : i32
    %c0_i32_1 = arith.constant 0 : i32
    return %arg0, %c0_i32, %c0_i32_0 : i32, i32, i32
  }
  func.func @transform_5(%arg0: i32) -> (i32, i32, i32) {
    %c0_i32 = arith.constant 0 : i32
    %c0_i32_0 = arith.constant 0 : i32
    %c0_i32_1 = arith.constant 0 : i32
    return %arg0, %c0_i32, %c0_i32_0 : i32, i32, i32
  }
  func.func @transform_6(%arg0: i32) -> (i32, i32, i32) {
    %c0_i32 = arith.constant 0 : i32
    %c0_i32_0 = arith.constant 0 : i32
    %c0_i32_1 = arith.constant 0 : i32
    return %arg0, %c0_i32, %c0_i32_0 : i32, i32, i32
  }
  func.func @transform_7(%arg0: i32) -> (i32, i32, i32) {
    %c0_i32 = arith.constant 0 : i32
    %c0_i32_0 = arith.constant 0 : i32
    %c0_i32_1 = arith.constant 0 : i32
    return %arg0, %c0_i32, %c0_i32_0 : i32, i32, i32
  }
  func.func @transform_8(%arg0: i32) -> (i32, i32, i32) {
    %c0_i32 = arith.constant 0 : i32
    %c0_i32_0 = arith.constant 0 : i32
    %c0_i32_1 = arith.constant 0 : i32
    return %arg0, %c0_i32, %c0_i32_0 : i32, i32, i32
  }
  func.func @transform_9(%arg0: i32) -> (i32, i32, i32) {
    %c0_i32 = arith.constant 0 : i32
    %c0_i32_0 = arith.constant 0 : i32
    %c0_i32_1 = arith.constant 0 : i32
    return %arg0, %c0_i32, %c0_i32_0 : i32, i32, i32
  }
}

</mosaic_0001>

<bundles_post_ra>
// kernel: dg_net_forward.1
= control target key start
LH: loop header
LB: loop body
LE: loop exit
PB: predicated region body
PF: predicated region fallthrough
CT: control target
= control target key end

     0   :  { %s17941_s0 = inlined_call_operand.vmem [shape: f32[16,256], index: 0, kind: input, shape index: {}]   ;;  %s17942_s1 = inlined_call_operand.hbm [shape: f32[20,20], index: 1, kind: input, shape index: {}]   ;;  %s17943_s2 = inlined_call_operand.hbm [shape: f32[12,12], index: 2, kind: input, shape index: {}]   ;;  %s17944_s3 = inlined_call_operand.vmem [shape: f32[2,256,384], index: 3, kind: input, shape index: {}]   ;;  %s17945_s4 = inlined_call_operand.hbm [shape: f32[2,384,1152], index: 4, kind: input, shape index: {}]   ;;  %s17946_s5 = inlined_call_operand.vmem [shape: f32[2,384,384], index: 5, kind: input, shape index: {}]   ;;  %s17947_s6 = inlined_call_operand.hbm [shape: f32[2,384,768], index: 6, kind: input, shape index: {}]   ;;  %s17948_s7 = inlined_call_operand.hbm [shape: f32[2,768,384], index: 7, kind: input, shape index: {}]   ;;  %s17949_s8 = inlined_call_operand.vmem [shape: f32[2,17,1152], index: 8, kind: input, shape index: {}]   ;;  %s17950_s9 = inlined_call_operand.vmem [shape: f32[2,8,384], index: 9, kind: output, shape index: {}]  }
   0x1   :  { %18589 = sst [smem:[#allocation577_spill]] %s17942_s1 }
   0x2   :  { %18590 = sst [smem:[#allocation578_spill]] %s17945_s4 }
   0x3   :  { %18591 = sst [smem:[#allocation579_spill]] %s17946_s5 }
   0x4   :  { %18592 = sst [smem:[#allocation580_spill]] %s17947_s6 }
   0x5   :  { %18593 = sst [smem:[#allocation581_spill]] %s17949_s8 }
   0x6   :  { %18594 = sst [smem:[#allocation582_spill]] %s17950_s9 }
   0x7   :  { %14 = vsyncpa [#allocation3], 0 }
   0x8   :  { %15 = vsyncpa [#allocation5], 0  ;;  %s12569_s30 = smov 0   ;;  %s12571_s10 = smov 0  }
   0x9   :  { %s12573_s11 = smov 0   ;;  %s12575_s12 = smov 0  }
   0xa LB: > { %18595 = sst [smem:[#allocation12_spill]] %s12496_s11  ;;  %s12588_s13 = sadd.s32 4294967295, %s12500_s12   ;;  %s12500_s12 = sphi %s12575_s12, %s19775_s12   ;;  %s12496_s11 = sphi %s12573_s11, %s19777_s11   ;;  %s12492_s10 = sphi %s12571_s10, %s19779_s10   ;;  %s12488_s30 = sphi %s12569_s30, %s19778_s30  }
   0xb   : > { %s12591_s14 = sadd.s32 1, %s12500_s12   ;;  %s117_s16 = sadd.s32 1, %s12496_s11 }
   0xc   : > { %18596 = sst [smem:[#allocation13_spill]] %s12591_s14  ;;  %s114_s15 = ssub.s32 %s12500_s12, %s12591_s14 }
   0xd   : > { %p115_p0 = scmp.eq.s32.totalorder %s114_s15, 0  ;;  %p124_p1 = scmp.ne.s32.totalorder %s12496_s11, %s12492_s10 }
   0xe   : > { %p125_p2 = scmp.eq.s32.totalorder %s12500_s12, 0  ;;  %p130_p3 = scmp.ne.s32.totalorder %s12492_s10, %s12488_s30 }
   0xf   : > { %s12601_s17 = scalar_select %p115_p0, %s12496_s11, %s117_s16  }
  0x10   : > { %p12603_p4 = por %p125_p2, %p124_p1  ;;  %p17951_p5 = scmp.eq.s32.totalorder %s12588_s13, 0 }
  0x11   : > { %18597 = sst [smem:[#allocation14_spill]] %s12601_s17  ;;  %p8500_p6 = scmp.ge.s32.totalorder %s12500_s12, 1 }
  0x12   : > { %p271_p7 = scmp.lt.s32.totalorder %s12500_s12, 3  ;;  %p12612_p8 = por %p17951_p5, %p130_p3 }
  0x13   : > { %s12502_s21 = smov [#allocation2]   ;;  %p12102_p12 = scmp.lt.s32.totalorder %s12500_s12, 2 }
  0x14   : > { %s18599_s19 = scalar_select %p12612_p8, 1, 0 }
  0x15   : > { %p12616_p9 = pnand %p8500_p6, %p271_p7  ;;  %s286_s22 = sshll.u32 %s12502_s21, 4  ;;  %s287_s22 = int_to_ptr.vmem [resolvable:$true] %s286_s22 }
  0x16   : > { %s323_s25 = sand.u32 1, %s12496_s11   ;;  %p12633_p13 = pnand %p12102_p12, %p12603_p4 }
  0x17   : > { %s18600_s20 = scalar_select %p12616_p9, 1, 0 }
  0x18   : > { %p12083_p10 = pneg %p12616_p9  ;;  %s18603_s1 = sld [smem:[#allocation577_spill]] }
  0x19   : > { %s18602_s26 = scalar_select %p12633_p13, 1, 0 }
  0x1a   : > { %p12624_p11 = pnand %p12083_p10, %p17951_p5 }
  0x1c   : > { %s18601_s23 = scalar_select %p12624_p11, 1, 0 }
  0x1d   : > { %p17958_p1 = pneg %p12624_p11 }
  0x1e   : > { %s12312_s29 = scalar_lea.hbm %s18603_s1, 384 }
  0x1f   : > { %p12313_p0 = scmp.ne.s32.totalorder %s18603_s1, %s12312_s29  ;;  %p12319_p4 = scmp.lt.u32.totalorder %s12312_s29, %s18603_s1 }
  0x21   : > { %p12315_p2 = pnand %p17958_p1, %p12313_p0 }
  0x23   : > { %p12316_p3 = pneg %p12315_p2 }
  0x25   : > { %p12321_p6 = pnand %p12319_p4, %p12316_p3 }
  0x27   : > { %12324 = shalt.err (!%p12321_p6)
}
  0x28   : > { %s12325_s21 = scalar_lea.vmem %s287_s22, 384  ;;  %p12333_p5 = scmp.lt.s32.totalorder %s287_s22, %s287_s22 }
  0x29   : > { %p12326_p7 = scmp.ne.s32.totalorder %s287_s22, %s12325_s21  ;;  %p12334_p8 = scmp.lt.s32.totalorder %s12325_s21, %s12325_s21 }
  0x2b   : > { %p12328_p10 = pnand %p12326_p7, %p17958_p1  ;;  %p12335_p9 = por %p12334_p8, %p12333_p5 }
  0x2d   : > { %p12329_p12 = pneg %p12328_p10 }
  0x2f   : > { %p12336_p13 = pnand %p12335_p9, %p12329_p12 }
  0x31   : > { %12339 = shalt.err (!%p12336_p13)
}
  0x32   : > { %s17961_s27 = smov 128   ;;  %s17962_s28 = smov 8  }
  0x33   : > { %12086 = dma.hbm_to_vmem [thread:$0]  (!%p12624_p11), %s18603_s1, 384, %s287_s22, [#allocation3], %s17961_s27, %s17961_s27, %s17962_s28  }
  0x34   : > { %s12057_s15 = smul.u32 3456, %s323_s25  ;;  %s18604_s4 = sld [smem:[#allocation578_spill]] }
  0x35   : > { %s12058_s16 = smul.u32 55296, %s12500_s12  ;;  %s18605_s9 = sand.u32 1, %s12500_s12  }
  0x36   : > { %s12663_s18 = smul.u32 2304, %s323_s25  ;;  %s325_s11 = scalar_lea.vmem [#allocation6], %s12057_s15 }
  0x37   : > { %s332_s14 = sshll.u32 %s325_s11, 4  ;;  %s12674_s29 = scalar_lea.sflag [#allocation3], %s18605_s9  ;;  %s12670_s14 = int_to_ptr.vmem [resolvable:$true] %s332_s14 }
  0x38   : > { %p18606_p8 = scmp.ne.s32.totalorder %s18602_s26, 0 }
  0x3a   : > { %s12668_s17 = scalar_lea.hbm %s18604_s4, %s12058_s16  ;;  %p12680_p9 = pneg %p18606_p8 }
  0x3b   : > { %s12340_s22 = scalar_lea.hbm %s12668_s17, 55296  ;;  %s12345_s11 = scalar_lea.hbm %s18604_s4, 110592 }
  0x3c   : > { %p12341_p5 = scmp.ne.s32.totalorder %s12668_s17, %s12340_s22  ;;  %p12346_p2 = scmp.lt.u32.totalorder %s12668_s17, %s18604_s4 }
  0x3d   : > { %s18607_s25 = scalar_select %p12680_p9, 1, 0 }
  0x3e   : > { %p12343_p13 = pnand %p12680_p9, %p12341_p5  ;;  %p12347_p3 = scmp.lt.u32.totalorder %s12345_s11, %s12340_s22 }
  0x3f   : > { %p12349_p6 = scmp.lt.u32.totalorder %s12340_s22, %s12668_s17 }
  0x40   : > { %p12344_p0 = pneg %p12343_p13  ;;  %p12348_p4 = por %p12347_p3, %p12346_p2 }
  0x42   : > { %p12350_p7 = por %p12349_p6, %p12348_p4 }
  0x44   : > { %p12351_p10 = pnand %p12350_p7, %p12344_p0 }
  0x46   : > { %12354 = shalt.err (!%p12351_p10)
}
  0x47   : > { %s12355_s9 = scalar_lea.vmem %s12670_s14, 55296  ;;  %s12505_s21 = smov [#allocation6]  }
  0x48   : > { %p12356_p12 = scmp.ne.s32.totalorder %s12670_s14, %s12355_s9  ;;  %s12360_s24 = sshll.u32 %s12505_s21, 4  ;;  %s12361_s24 = int_to_ptr.vmem [resolvable:$false] %s12360_s24 }
  0x49   : > { %s12362_s30 = scalar_lea.vmem %s12361_s24, 110592  ;;  %p12363_p1 = scmp.lt.s32.totalorder %s12670_s14, %s12361_s24 }
  0x4a   : > { %p12358_p5 = pnand %p12356_p12, %p12680_p9  ;;  %p12364_p11 = scmp.lt.s32.totalorder %s12362_s30, %s12355_s9 }
  0x4c   : > { %p12359_p13 = pneg %p12358_p5  ;;  %p12365_p2 = por %p12364_p11, %p12363_p1 }
  0x4e   : > { %p12366_p3 = pnand %p12365_p2, %p12359_p13 }
  0x50   : > { %12369 = shalt.err (!%p12366_p3)
}
  0x51   : > { %s12506_s22 = smov 1152   ;;  %s12507_s11 = smov 72  }
  0x52   : > { %12093 = dma.hbm_to_vmem [thread:$0]  (!%p18606_p8), %s12668_s17, 55296, %s12670_s14, %s12674_s29, %s12506_s22, %s12506_s22, %s12507_s11  }
  0x53   : > { %s12060_s15 = smul.u32 36864, %s12500_s12  ;;  %s354_s16 = scalar_lea.vmem [#allocation7], %s12663_s18 }
  0x54   : > { %s361_s21 = sshll.u32 %s354_s16, 4  ;;  %s18608_s6 = sld [smem:[#allocation580_spill]]  ;;  %s12706_s21 = int_to_ptr.vmem [resolvable:$true] %s361_s21 }
  0x5a   : > { %s12713_s30 = scalar_lea.hbm %s18608_s6, %s12060_s15  ;;  %s12375_s22 = scalar_lea.hbm %s18608_s6, 73728 }
  0x5b   : > { %s12370_s27 = scalar_lea.hbm %s12713_s30, 36864  ;;  %p12376_p4 = scmp.lt.u32.totalorder %s12713_s30, %s18608_s6 }
  0x5c   : > { %p12371_p11 = scmp.ne.s32.totalorder %s12713_s30, %s12370_s27  ;;  %p12377_p6 = scmp.lt.u32.totalorder %s12375_s22, %s12370_s27 }
  0x5d   : > { %p12379_p10 = scmp.lt.u32.totalorder %s12370_s27, %s12713_s30 }
  0x5e   : > { %p12373_p1 = pnand %p12371_p11, %p12680_p9  ;;  %p12378_p7 = por %p12377_p6, %p12376_p4 }
  0x60   : > { %p12374_p0 = pneg %p12373_p1  ;;  %p12380_p12 = por %p12379_p10, %p12378_p7 }
  0x62   : > { %p12381_p5 = pnand %p12380_p12, %p12374_p0 }
  0x64   : > { %12384 = shalt.err (!%p12381_p5)
}
  0x65   : > { %s12385_s9 = scalar_lea.vmem %s12706_s21, 36864  ;;  %s12508_s24 = smov [#allocation7]  }
  0x66   : > { %p12386_p13 = scmp.ne.s32.totalorder %s12706_s21, %s12385_s9  ;;  %s12390_s14 = sshll.u32 %s12508_s24, 4  ;;  %s12391_s14 = int_to_ptr.vmem [resolvable:$false] %s12390_s14 }
  0x67   : > { %s12392_s17 = scalar_lea.vmem %s12391_s14, 73728  ;;  %p12393_p11 = scmp.lt.s32.totalorder %s12706_s21, %s12391_s14 }
  0x68   : > { %p12388_p2 = pnand %p12386_p13, %p12680_p9  ;;  %p12394_p1 = scmp.lt.s32.totalorder %s12392_s17, %s12385_s9 }
  0x6a   : > { %p12389_p3 = pneg %p12388_p2  ;;  %p12395_p4 = por %p12394_p1, %p12393_p11 }
  0x6c   : > { %p12396_p6 = pnand %p12395_p4, %p12389_p3 }
  0x6e   : > { %12399 = shalt.err (!%p12396_p6)
}
  0x6f   : > { %s12509_s27 = smov 768   ;;  %s12510_s22 = smov 48  }
  0x70   : > { %12096 = dma.hbm_to_vmem [thread:$0]  (!%p18606_p8), %s12713_s30, 36864, %s12706_s21, %s12674_s29, %s12509_s27, %s12509_s27, %s12510_s22  }
  0x71   : > { %s12511_s11 = smov [#allocation4]   ;;  %s12742_s9 = scalar_lea.hbm %s17948_s7, %s12060_s15 }
  0x72   : > { %s299_s16 = sshll.u32 %s12511_s11, 4  ;;  %s375_s17 = scalar_lea.vmem [#allocation8], %s12663_s18  ;;  %s300_s16 = int_to_ptr.vmem [resolvable:$true] %s299_s16 }
  0x73   : > { %s382_s28 = sshll.u32 %s375_s17, 4  ;;  %s12400_s6 = scalar_lea.hbm %s17943_s2, 256  ;;  %s12768_s28 = int_to_ptr.vmem [resolvable:$true] %s382_s28 }
  0x74   : > { %p12401_p0 = scmp.ne.s32.totalorder %s17943_s2, %s12400_s6  ;;  %p18609_p7 = scmp.ne.s32.totalorder %s18601_s23, 0 }
  0x75   : > { %p12407_p13 = scmp.lt.u32.totalorder %s12400_s6, %s17943_s2 }
  0x76   : > { %p18610_p10 = pneg %p18609_p7 }
  0x78   : > { %p12403_p12 = pnand %p12401_p0, %p18610_p10 }
  0x7a   : > { %p12404_p5 = pneg %p12403_p12 }
  0x7c   : > { %p12409_p2 = pnand %p12407_p13, %p12404_p5 }
  0x7e   : > { %12412 = shalt.err (!%p12409_p2)
}
  0x7f   : > { %s12413_s18 = scalar_lea.vmem %s300_s16, 256  ;;  %p18611_p11 = pmov %p18610_p10 }
  0x80   : > { %p12414_p3 = scmp.ne.s32.totalorder %s300_s16, %s12413_s18  ;;  %p12421_p6 = scmp.lt.s32.totalorder %s300_s16, %s300_s16 }
  0x81   : > { %p12422_p8 = scmp.lt.s32.totalorder %s12413_s18, %s12413_s18 }
  0x82   : > { %p12416_p1 = pnand %p12414_p3, %p18611_p11 }
  0x83   : > { %p12423_p9 = por %p12422_p8, %p12421_p6 }
  0x84   : > { %p12417_p4 = pneg %p12416_p1 }
  0x86   : > { %p12424_p0 = pnand %p12423_p9, %p12417_p4 }
  0x88   : > { %12427 = shalt.err (!%p12424_p0)
}
  0x89   : > { %s18612_s1 = smov 8   ;;  %s18613_s4 = smov 128  }
  0x8a   : > { %12089 = dma.hbm_to_vmem [thread:$0]  (!%p18609_p7), %s17943_s2, 256, %s300_s16, [#allocation5], %s18613_s4, %s18613_s4, %s18612_s1  }
  0x8b   : > { %s12428_s8 = scalar_lea.hbm %s12742_s9, 36864  ;;  %p18614_p9 = scmp.ne.s32.totalorder %s18607_s25, 0 }
  0x8c   : > { %p12429_p8 = scmp.ne.s32.totalorder %s12742_s9, %s12428_s8  ;;  %s12433_s30 = scalar_lea.hbm %s17948_s7, 73728 }
  0x8d   : > { %p12434_p5 = scmp.lt.u32.totalorder %s12742_s9, %s17948_s7  ;;  %p12435_p13 = scmp.lt.u32.totalorder %s12433_s30, %s12428_s8 }
  0x8e   : > { %p12431_p10 = pnand %p12429_p8, %p18614_p9  ;;  %p12437_p3 = scmp.lt.u32.totalorder %s12428_s8, %s12742_s9 }
  0x8f   : > { %p12436_p2 = por %p12435_p13, %p12434_p5 }
  0x90   : > { %p12432_p12 = pneg %p12431_p10 }
  0x91   : > { %p12438_p11 = por %p12437_p3, %p12436_p2 }
  0x93   : > { %p12439_p7 = pnand %p12438_p11, %p12432_p12 }
  0x95   : > { %12442 = shalt.err (!%p12439_p7)
}
  0x96   : > { %s12443_s11 = scalar_lea.vmem %s12768_s28, 36864  ;;  %s12512_s16 = smov [#allocation8]  }
  0x97   : > { %p12444_p1 = scmp.ne.s32.totalorder %s12768_s28, %s12443_s11  ;;  %s12448_s24 = sshll.u32 %s12512_s16, 4  ;;  %s12449_s24 = int_to_ptr.vmem [resolvable:$false] %s12448_s24 }
  0x98   : > { %s12450_s14 = scalar_lea.vmem %s12449_s24, 73728  ;;  %p12451_p0 = scmp.lt.s32.totalorder %s12768_s28, %s12449_s24 }
  0x99   : > { %p12446_p4 = pnand %p12444_p1, %p18614_p9  ;;  %p12452_p8 = scmp.lt.s32.totalorder %s12450_s14, %s12443_s11 }
  0x9b   : > { %p12447_p6 = pneg %p12446_p4  ;;  %p12453_p10 = por %p12452_p8, %p12451_p0 }
  0x9d   : > { %p12454_p5 = pnand %p12453_p10, %p12447_p6 }
  0x9f   : > { %12457 = shalt.err (!%p12454_p5)
}
  0xa0   : > { %s12513_s17 = smov 384   ;;  %s12514_s12 = smov 24  }
  0xa1   : > { %p18615_p12 = scmp.ne.s32.totalorder %s18602_s26, 0  ;;  %p18616_p9 = scmp.ne.s32.totalorder %s18600_s20, 0 }
  0xa3   : > { %12099 = dma.hbm_to_vmem [thread:$0]  (!%p18615_p12), %s12742_s9, 36864, %s12768_s28, %s12674_s29, %s12513_s17, %s12513_s17, %s12514_s12  }
  0xa4   : > { %402 = sbr.rel (%p18616_p9) target bundleno = 7438 (0x1d0e), region = 56 }
  0xab   : > { %p18617_p13 = scmp.eq.s32.totalorder %s12588_s13, 0 }
  0xad   : > { %12475 = dma.done.wait (%p18617_p13), [#allocation3], 384   ;;  %p18618_p2 = pmov %p18617_p13 }
  0xaf   : > { %12477 = vsyncadd (%p18618_p2), [#allocation3], 4294966912  ;;  %p18619_p3 = pmov %p18618_p2 }
  0xb0   : > { %p18620_p11 = pmov %p18618_p2 }
  0xb1   : > { %12479 = dma.done.wait (%p18619_p3), [#allocation5], 256  }
  0xb2   : > { %12481 = vsyncadd (%p18620_p11), [#allocation5], 4294967040  ;;  %s412_s26 = sand.u32 1, %s12588_s13   ;;  %s414_s28 = sand.u32 1, %s12492_s10  }
  0xb3   : > { %s12063_s20 = smul.u32 3456, %s414_s28  ;;  %s413_s29 = scalar_lea.sflag [#allocation3], %s412_s26 }
  0xb4   : > { %p18621_p7 = scmp.ne.s32.totalorder %s18599_s19, 0 }
  0xb5   : > { %s12806_s25 = scalar_lea.vmem [#allocation6], %s12063_s20 }
  0xb6   : > { %12483 = dma.done.wait (%p18621_p7), %s413_s29, 129024  }
  0xb7   : > { %12485 = vsyncadd (%p18621_p7), %s413_s29, 4294838272  ;;  %p494_p1 = scmp.lt.s32.totalorder %s12588_s13, 1  ;;  %s18622_s16 = sld [smem:[#allocation581_spill]]  ;;  %vm2019_vm0 = vcmask 1041408   ;;  %vm2023_vm1 = vcmask 1042432   ;;  %vm2007_vm2 = vcmask 1040384  }
  0xb8   : > { %vm2011_vm3 = vcmask 1044480   ;;  %vm2015_vm4 = vcmask 1045504   ;;  %vm2027_vm5 = vcmask 1046528   ;;  %vm2069_vm6 = vcmask 1043456   ;;  %s18845_s26 = sld [smem:[#allocation579_spill]]  ;;  %s15024_s29 = smul.u32 2304, %s414_s28 }
  0xb9   : > { %s19781_s13 = smov (!%p494_p1, %s12588_s13), 1  ;;  %vm12517_vm7 = vmmov 0   ;;  %vm3120_vm8 = vcmask 162816   ;;  %vm3127_vm9 = vcmask 158720   ;;  %vm12518_vm10 = vmmov 1  }
  0xba   : > { %s12065_s9 = smul.u32 768, %s19781_s13  ;;  %s15636_s28 = scalar_lea.vmem [#allocation8], %s15024_s29  ;;  %vm17305_vm11 = vmpackc.low %vm2069_vm6, %vm12518_vm10  ;;  %vm6398_vm12 = vcmask 93184   ;;  %vm6394_vm13 = vcmask 97280  }
  0xbb   : > { %s12067_s27 = smul.u32 216, %s19781_s13 }
  0xbc   : > { %s12820_s1 = scalar_lea.vmem %s17944_s3, %s12065_s9  ;;  %s12066_s14 = smul.u32 1152, %s19781_s13 }
  0xbd   : > { %v515_v0 = vld [vmem:[%s12820_s1 + $0x8] sm:$0xff]  ;;  %v518_v1 = vld [vmem:[%s12820_s1 + $0x20] sm:$0xff]  ;;  %v517_v4 = vld [vmem:[%s12820_s1 + $0x18] sm:$0xff]  ;;  %s12936_s24 = scalar_lea.vmem %s18622_s16, %s12067_s27  ;;  %s12068_s9 = smul.u32 24, %s19781_s13 }
  0xbe   : > { %v514_v2 = vld [vmem:[%s12820_s1] sm:$0xff]  ;;  %v9391_v3 = vpack.c.bf16 %v518_v1, %v515_v0  ;;  %v521_v5 = vld [vmem:[%s12820_s1 + $0x38] sm:$0xff]  ;;  %v524_v6 = vld [vmem:[%s12820_s1 + $0x50] sm:$0xff]  ;;  %s14548_s20 = scalar_lea.vmem %s18845_s26, %s12066_s14 }
  0xbf   : > { %v9393_v7 = vpack.c.bf16 %v517_v4, %v514_v2  ;;  %v9395_v8 = vpack.c.bf16 %v524_v6, %v521_v5  ;;  %v520_v9 = vld [vmem:[%s12820_s1 + $0x30] sm:$0xff]  ;;  %v523_v10 = vld [vmem:[%s12820_s1 + $0x48] sm:$0xff]  ;;  %v530_v12 = vld [vmem:[%s12820_s1 + $0x80] sm:$0xff] }
  0xc0   : > { %v527_v11 = vld [vmem:[%s12820_s1 + $0x68] sm:$0xff]  ;;  %9392 = vmatprep.subr.bf16.mxu0 %v9391_v3  ;;  %v9397_v13 = vpack.c.bf16 %v523_v10, %v520_v9  ;;  %v526_v15 = vld [vmem:[%s12820_s1 + $0x60] sm:$0xff]  ;;  %v529_v16 = vld [vmem:[%s12820_s1 + $0x78] sm:$0xff] }
  0xc1   : > { %9394 = vmatpush1.bf16.msra.mxu0 %v9393_v7  ;;  %v9399_v14 = vpack.c.bf16 %v530_v12, %v527_v11  ;;  %v533_v17 = vld [vmem:[%s12820_s1 + $0x98] sm:$0xff]  ;;  %v536_v18 = vld [vmem:[%s12820_s1 + $0xb0] sm:$0xff]  ;;  %v9401_v19 = vpack.c.bf16 %v529_v16, %v526_v15  ;;  %v535_v22 = vld [vmem:[%s12820_s1 + $0xa8] sm:$0xff] }
  0xc2   : > { %9396 = vmatprep.subr.bf16.mxu0 %v9395_v8  ;;  %v9403_v20 = vpack.c.bf16 %v536_v18, %v533_v17  ;;  %v532_v21 = vld [vmem:[%s12820_s1 + $0x90] sm:$0xff]  ;;  %v539_v23 = vld [vmem:[%s12820_s1 + $0xc8] sm:$0xff]  ;;  %v542_v24 = vld [vmem:[%s12820_s1 + $0xe0] sm:$0xff] }
  0xc3   : > { %v564_v25 = vld [vmem:[%s12820_s1 + $0x190] sm:$0xff]  ;;  %v567_v26 = vld [vmem:[%s12820_s1 + $0x1a8] sm:$0xff]  ;;  %v9405_v30 = vpack.c.bf16 %v535_v22, %v532_v21  ;;  %v538_v31 = vld [vmem:[%s12820_s1 + $0xc0] sm:$0xff]  ;;  %v9407_v34 = vpack.c.bf16 %v542_v24, %v539_v23 }
  0xc4   : > { %v9455_v27 = vpack.c.bf16 %v567_v26, %v564_v25  ;;  %v516_v28 = vld [vmem:[%s12820_s1 + $0x10] sm:$0xff]  ;;  %v519_v29 = vld [vmem:[%s12820_s1 + $0x28] sm:$0xff]  ;;  %v570_v33 = vld [vmem:[%s12820_s1 + $0x1c0] sm:$0xff] }
  0xc5   : > { %9398 = vmatpush1.bf16.msra.mxu0 %v9397_v13  ;;  %v9457_v32 = vpack.c.bf16 %v519_v29, %v516_v28  ;;  %v541_v35 = vld [vmem:[%s12820_s1 + $0xd8] sm:$0xff]  ;;  %v548_v38 = vld [vmem:[%s12820_s1 + $0x110] sm:$0xff]  ;;  %v522_v40 = vld [vmem:[%s12820_s1 + $0x40] sm:$0xff] }
  0xc6   : > { %9400 = vmatprep.subr.bf16.mxu0 %v9399_v14  ;;  %v545_v36 = vld [vmem:[%s12820_s1 + $0xf8] sm:$0xff]  ;;  %9456 = vmatprep.subr.bf16.mxu1 %v9455_v27  ;;  %v576_v43 = vld [vmem:[%s12820_s1 + $0x1f0] sm:$0xff]  ;;  %v579_v44 = vld [vmem:[%s12820_s1 + $0x208] sm:$0xff]  ;;  %v9409_v45 = vpack.c.bf16 %v541_v35, %v538_v31 }
  0xc7   : > { %v573_v37 = vld [vmem:[%s12820_s1 + $0x1d8] sm:$0xff]  ;;  %9458 = vmatpush3.bf16.msra.mxu1 %v9457_v32  ;;  %v544_v46 = vld [vmem:[%s12820_s1 + $0xf0] sm:$0xff]  ;;  %v9463_v47 = vpack.c.bf16 %v579_v44, %v576_v43  ;;  %v9411_v49 = vpack.c.bf16 %v548_v38, %v545_v36  ;;  %v547_v50 = vld [vmem:[%s12820_s1 + $0x108] sm:$0xff] }
  0xc8   : > { %v9459_v39 = vpack.c.bf16 %v573_v37, %v570_v33  ;;  %v525_v41 = vld [vmem:[%s12820_s1 + $0x58] sm:$0xff]  ;;  %v528_v48 = vld [vmem:[%s12820_s1 + $0x70] sm:$0xff]  ;;  %v551_v51 = vld [vmem:[%s12820_s1 + $0x128] sm:$0xff]  ;;  %v9413_v60 = vpack.c.bf16 %v547_v50, %v544_v46 }
  0xc9   : > { %9402 = vmatpush1.bf16.msra.mxu0 %v9401_v19  ;;  %v9461_v42 = vpack.c.bf16 %v525_v41, %v522_v40  ;;  %v531_v52 = vld [vmem:[%s12820_s1 + $0x88] sm:$0xff]  ;;  %v554_v53 = vld [vmem:[%s12820_s1 + $0x140] sm:$0xff]  ;;  %v585_v56 = vld [vmem:[%s12820_s1 + $0x238] sm:$0xff] }
  0xca   : > { %9404 = vmatprep.subr.bf16.mxu0 %v9403_v20  ;;  %9460 = vmatprep.subr.bf16.mxu1 %v9459_v39  ;;  %v9465_v54 = vpack.c.bf16 %v531_v52, %v528_v48  ;;  %v582_v55 = vld [vmem:[%s12820_s1 + $0x220] sm:$0xff]  ;;  %v537_v59 = vld [vmem:[%s12820_s1 + $0xb8] sm:$0xff]  ;;  %v588_v61 = vld [vmem:[%s12820_s1 + $0x250] sm:$0xff]  ;;  %v9415_v62 = vpack.c.bf16 %v554_v53, %v551_v51 }
  0xcb   : > { %9462 = vmatpush3.bf16.msra.mxu1 %v9461_v42  ;;  %v9467_v57 = vpack.c.bf16 %v585_v56, %v582_v55  ;;  %v534_v58 = vld [vmem:[%s12820_s1 + $0xa0] sm:$0xff]  ;;  %v553_v0 = vld [vmem:[%s12820_s1 + $0x138] sm:$0xff]  ;;  %v591_v1 = vld [vmem:[%s12820_s1 + $0x268] sm:$0xff] }
  0xcc   : > { %9464 = vmatprep.subr.bf16.mxu1 %v9463_v47  ;;  %v550_v63 = vld [vmem:[%s12820_s1 + $0x120] sm:$0xff]  ;;  %v557_v2 = vld [vmem:[%s12820_s1 + $0x158] sm:$0xff]  ;;  %v560_v3 = vld [vmem:[%s12820_s1 + $0x170] sm:$0xff]  ;;  %v9469_v4 = vpack.c.bf16 %v537_v59, %v534_v58  ;;  %v9471_v5 = vpack.c.bf16 %v591_v1, %v588_v61 }
  0xcd   : > { %9406 = vmatpush1.bf16.msra.mxu0 %v9405_v30  ;;  %v540_v6 = vld [vmem:[%s12820_s1 + $0xd0] sm:$0xff]  ;;  %v543_v7 = vld [vmem:[%s12820_s1 + $0xe8] sm:$0xff]  ;;  %v9417_v8 = vpack.c.bf16 %v553_v0, %v550_v63  ;;  %v594_v9 = vld [vmem:[%s12820_s1 + $0x280] sm:$0xff]  ;;  %v9419_v11 = vpack.c.bf16 %v560_v3, %v557_v2 }
  0xce   : > { %9408 = vmatprep.subr.bf16.mxu0 %v9407_v34  ;;  %v597_v10 = vld [vmem:[%s12820_s1 + $0x298] sm:$0xff]  ;;  %v556_v12 = vld [vmem:[%s12820_s1 + $0x150] sm:$0xff]  ;;  %v559_v13 = vld [vmem:[%s12820_s1 + $0x168] sm:$0xff]  ;;  %v9473_v16 = vpack.c.bf16 %v543_v7, %v540_v6 }
  0xcf   : > { %9466 = vmatpush3.bf16.msra.mxu1 %v9465_v54  ;;  %v563_v14 = vld [vmem:[%s12820_s1 + $0x188] sm:$0xff]  ;;  %v566_v15 = vld [vmem:[%s12820_s1 + $0x1a0] sm:$0xff]  ;;  %v9475_v17 = vpack.c.bf16 %v597_v10, %v594_v9  ;;  %v549_v19 = vld [vmem:[%s12820_s1 + $0x118] sm:$0xff]  ;;  %v9421_v20 = vpack.c.bf16 %v559_v13, %v556_v12 }
  0xd0   : > { %9468 = vmatprep.subr.bf16.mxu1 %v9467_v57  ;;  %v546_v18 = vld [vmem:[%s12820_s1 + $0x100] sm:$0xff]  ;;  %v600_v21 = vld [vmem:[%s12820_s1 + $0x2b0] sm:$0xff]  ;;  %v603_v22 = vld [vmem:[%s12820_s1 + $0x2c8] sm:$0xff]  ;;  %v9423_v23 = vpack.c.bf16 %v566_v15, %v563_v14 }
  0xd1   : > { %9410 = vmatpush1.bf16.msra.mxu0 %v9409_v45  ;;  %v562_v24 = vld [vmem:[%s12820_s1 + $0x180] sm:$0xff]  ;;  %v565_v25 = vld [vmem:[%s12820_s1 + $0x198] sm:$0xff]  ;;  %v572_v27 = vld [vmem:[%s12820_s1 + $0x1d0] sm:$0xff]  ;;  %v9477_v28 = vpack.c.bf16 %v549_v19, %v546_v18  ;;  %v9479_v30 = vpack.c.bf16 %v603_v22, %v600_v21 }
  0xd2   : > { %9412 = vmatprep.subr.bf16.mxu0 %v9411_v49  ;;  %v569_v26 = vld [vmem:[%s12820_s1 + $0x1b8] sm:$0xff]  ;;  %v1783_v29 = vld [vmem:[%s17941_s0 + $0x8] sm:$0xff]  ;;  %v552_v31 = vld [vmem:[%s12820_s1 + $0x130] sm:$0xff]  ;;  %v9425_v33 = vpack.c.bf16 %v565_v25, %v562_v24 }
  0xd3   : > { %9470 = vmatpush3.bf16.msra.mxu1 %v9469_v4  ;;  %v555_v32 = vld [vmem:[%s12820_s1 + $0x148] sm:$0xff]  ;;  %1939 = vmatprep.mubr.f32.mxu1 %v1783_v29  ;;  %v606_v34 = vld [vmem:[%s12820_s1 + $0x2e0] sm:$0xff]  ;;  %v609_v35 = vld [vmem:[%s12820_s1 + $0x2f8] sm:$0xff]  ;;  %v9427_v36 = vpack.c.bf16 %v572_v27, %v569_v26 }
  0xd4   : > { %9472 = vmatprep.subr.bf16.mxu1 %v9471_v5  ;;  %1862 = vmatprep.mubr.f32.mxu0 %v1783_v29  ;;  %v568_v37 = vld [vmem:[%s12820_s1 + $0x1b0] sm:$0xff]  ;;  %v571_v38 = vld [vmem:[%s12820_s1 + $0x1c8] sm:$0xff]  ;;  %v578_v40 = vld [vmem:[%s12820_s1 + $0x200] sm:$0xff]  ;;  %v9481_v41 = vpack.c.bf16 %v555_v32, %v552_v31  ;;  %v9483_v42 = vpack.c.bf16 %v609_v35, %v606_v34 }
  0xd5   : > { %9414 = vmatpush1.bf16.msra.mxu0 %v9413_v60  ;;  %v575_v39 = vld [vmem:[%s12820_s1 + $0x1e8] sm:$0xff]  ;;  %v558_v43 = vld [vmem:[%s12820_s1 + $0x160] sm:$0xff]  ;;  %v561_v44 = vld [vmem:[%s12820_s1 + $0x178] sm:$0xff]  ;;  %v9429_v45 = vpack.c.bf16 %v571_v38, %v568_v37 }
  0xd6   : > { %9416 = vmatprep.subr.bf16.mxu0 %v9415_v62  ;;  %v9431_v46 = vpack.c.bf16 %v578_v40, %v575_v39  ;;  %v574_v47 = vld [vmem:[%s12820_s1 + $0x1e0] sm:$0xff]  ;;  %v577_v48 = vld [vmem:[%s12820_s1 + $0x1f8] sm:$0xff]  ;;  %v584_v50 = vld [vmem:[%s12820_s1 + $0x230] sm:$0xff]  ;;  %v9485_v51 = vpack.c.bf16 %v561_v44, %v558_v43 }
  0xd7   : > { %9474 = vmatpush3.bf16.msra.mxu1 %v9473_v16  ;;  %v581_v49 = vld [vmem:[%s12820_s1 + $0x218] sm:$0xff]  ;;  %v9433_v52 = vpack.c.bf16 %v577_v48, %v574_v47  ;;  %v580_v54 = vld [vmem:[%s12820_s1 + $0x210] sm:$0xff]  ;;  %v583_v55 = vld [vmem:[%s12820_s1 + $0x228] sm:$0xff] }
  0xd8   : > { %9476 = vmatprep.subr.bf16.mxu1 %v9475_v17  ;;  %v9435_v53 = vpack.c.bf16 %v584_v50, %v581_v49  ;;  %v587_v56 = vld [vmem:[%s12820_s1 + $0x248] sm:$0xff]  ;;  %v590_v57 = vld [vmem:[%s12820_s1 + $0x260] sm:$0xff]  ;;  %v1785_v59 = vld [vmem:[%s17941_s0 + $0x18] sm:$0xff]  ;;  %v9437_v60 = vpack.c.bf16 %v583_v55, %v580_v54 }
  0xd9   : > { %9418 = vmatpush1.bf16.msra.mxu0 %v9417_v8  ;;  %v1782_v58 = vld [vmem:[%s17941_s0] sm:$0xff]  ;;  %v9439_v61 = vpack.c.bf16 %v590_v57, %v587_v56  ;;  %v589_v63 = vld [vmem:[%s12820_s1 + $0x258] sm:$0xff]  ;;  %v596_v1 = vld [vmem:[%s12820_s1 + $0x290] sm:$0xff] }
  0xda   : > { %9420 = vmatprep.subr.bf16.mxu0 %v9419_v11  ;;  %v586_v62 = vld [vmem:[%s12820_s1 + $0x240] sm:$0xff]  ;;  %v593_v0 = vld [vmem:[%s12820_s1 + $0x278] sm:$0xff]  ;;  %v1784_v2 = vld [vmem:[%s17941_s0 + $0x10] sm:$0xff] }
  0xdb   : > { %9478 = vmatpush3.bf16.msra.mxu1 %v9477_v28  ;;  %v9441_v3 = vpack.c.bf16 %v589_v63, %v586_v62  ;;  %v9443_v4 = vpack.c.bf16 %v596_v1, %v593_v0  ;;  %v592_v5 = vld [vmem:[%s12820_s1 + $0x270] sm:$0xff]  ;;  %v595_v6 = vld [vmem:[%s12820_s1 + $0x288] sm:$0xff]  ;;  %v602_v8 = vld [vmem:[%s12820_s1 + $0x2c0] sm:$0xff] }
  0xdc   : > { %9480 = vmatprep.subr.bf16.mxu1 %v9479_v30  ;;  %v599_v7 = vld [vmem:[%s12820_s1 + $0x2a8] sm:$0xff]  ;;  %v9445_v9 = vpack.c.bf16 %v595_v6, %v592_v5  ;;  %v598_v11 = vld [vmem:[%s12820_s1 + $0x2a0] sm:$0xff]  ;;  %v601_v12 = vld [vmem:[%s12820_s1 + $0x2b8] sm:$0xff] }
  0xdd   : > { %9422 = vmatpush1.bf16.msra.mxu0 %v9421_v20  ;;  %v9447_v10 = vpack.c.bf16 %v602_v8, %v599_v7  ;;  %v605_v13 = vld [vmem:[%s12820_s1 + $0x2d8] sm:$0xff]  ;;  %v608_v14 = vld [vmem:[%s12820_s1 + $0x2f0] sm:$0xff]  ;;  %v9449_v15 = vpack.c.bf16 %v601_v12, %v598_v11  ;;  %v607_v18 = vld [vmem:[%s12820_s1 + $0x2e8] sm:$0xff]  ;;  %v1786_v20 = vlaneseq }
  0xde   : > { %9424 = vmatprep.subr.bf16.mxu0 %v9423_v23  ;;  %v9451_v16 = vpack.c.bf16 %v608_v14, %v605_v13  ;;  %v604_v17 = vld [vmem:[%s12820_s1 + $0x2d0] sm:$0xff]  ;;  %v12953_v40 = vld [vmem:[%s12936_s24] sm:$0xff]  ;;  %s19767_s1 = sld [smem:[#allocation582_spill]] }
  0xdf   : > { %9482 = vmatpush3.bf16.msra.mxu1 %v9481_v41  ;;  %v9453_v19 = vpack.c.bf16 %v607_v18, %v604_v17  ;;  %v12931_v21 = vshrl.u32 %v1786_v20, 7  ;;  %v12942_v23 = vld [vmem:[%s12936_s24 + $0x10] sm:$0xff]  ;;  %v12956_v41 = vld [vmem:[%s12936_s24 + $0x8] sm:$0xff]  ;;  %v1968_v47 = vrot.slane %v12953_v40, 4  ;;  %v1980_v50 = vrot.slane %v12953_v40, 7 }
  0xe0   : > { %9484 = vmatprep.subr.bf16.mxu1 %v9483_v42  ;;  %v1982_v30 = vrot.slane %v12942_v23, 7  ;;  %v1955_v38 = vrot.slane %v12942_v23, 1  ;;  %v1970_v42 = vrot.slane %v12942_v23, 4  ;;  %v1997_v48 = vrot.slane %v12942_v23, 2 }
  0xe1   : > { %9426 = vmatpush1.bf16.msra.mxu0 %v9425_v33  ;;  %v12939_v22 = vsub.s32 0, %v12931_v21  ;;  %v2033_v49 = vrot.slane %v12942_v23, 5  ;;  %v2031_v55 = vrot.slane %v12953_v40, 5  ;;  %v2032_v56 = vrot.slane %v12956_v41, 5 }
  0xe2   : > { %9428 = vmatprep.subr.bf16.mxu0 %v9427_v36  ;;  %v1981_v57 = vrot.slane %v12956_v41, 7  ;;  %v1969_v7 = vrot.slane %v12956_v41, 4 }
  0xe3   : > { %9486 = vmatpush3.bf16.msra.mxu1 %v9485_v51  ;;  %v1797_v25 = vrot.slane %v12942_v23, %v12939_v22  ;;  %v1789_v44 = vrot.slane %v12953_v40, %v12939_v22  ;;  %v1954_v51 = vrot.slane %v12956_v41, 1  ;;  %v2045_v62 = vsel %vm2011_vm3, %v1997_v48, %v2033_v49 }
  0xe4   : > { %v2046_v63 = vsel %vm2019_vm0, %v2031_v55, %v12953_v40  ;;  %v2048_v0 = vsel %vm2019_vm0, %v2033_v49, %v12942_v23  ;;  %v2047_v5 = vsel %vm2019_vm0, %v2032_v56, %v12956_v41  ;;  %s513_s19 = scalar_lea.vmem %s19767_s1, %s12068_s9 }
  0xe5   : > { %9430 = vmatpush1.bf16.msra.mxu0 %v9429_v45  ;;  %v1793_v45 = vrot.slane %v12956_v41, %v12939_v22 }
  0xe6   : > { %9432 = vmatprep.subr.bf16.mxu0 %v9431_v46  ;;  %1940 = vmatmul.mubr.f32.vlgmr.msra.gmra.mrb[0].mxu1 %v1782_v58  ;;  %v1953_v46 = vrot.slane %v12953_v40, 1 }
  0xe7   : > { %1944 = vmatprep.mubr.f32.mxu1 %v1785_v59 }
  0xe9   : > { %9434 = vmatpush1.bf16.msra.mxu0 %v9433_v52  ;;  %v1995_v52 = vrot.slane %v12953_v40, 2 }
  0xea   : > { %9436 = vmatprep.subr.bf16.mxu0 %v9435_v53  ;;  %1945 = vmatmul.mubr.f32.gmra.mrb[2].mxu1 %v1784_v2  ;;  %v1996_v53 = vrot.slane %v12956_v41, 2 }
  0xeb   : > { %v2043_v8 = vsel %vm2011_vm3, %v1995_v52, %v2031_v55 }
  0xed   : > { %9438 = vmatpush1.bf16.msra.mxu0 %v9437_v60  ;;  %v2039_v60 = vrot.slane %v12942_v23, 3 }
  0xee   : > { %9440 = vmatprep.subr.bf16.mxu0 %v9439_v61 }
  0xef   : > { %v2051_v13 = vsel %vm2027_vm5, %v2048_v0, %v2039_v60  ;;  %v622_v0 = vld [vmem:[%s12806_s25 + $0x60] sm:$0xff] }
  0xf1   : > { %9442 = vmatpush1.bf16.msra.mxu0 %v9441_v3 }
  0xf2   : > { %9444 = vmatprep.subr.bf16.mxu0 %v9443_v4 }
  0xf5   : > { %9446 = vmatpush1.bf16.msra.mxu0 %v9445_v9  ;;  %v2044_v9 = vsel %vm2011_vm3, %v1996_v53, %v2032_v56 }
  0xf6   : > { %9448 = vmatprep.subr.bf16.mxu0 %v9447_v10 }
  0xf9   : > { %9450 = vmatpush1.bf16.msra.mxu0 %v9449_v15 }
  0xfa   : > { %9452 = vmatprep.subr.bf16.mxu0 %v9451_v16 }
  0xfd   : > { %9454 = vmatpush1.bf16.msra.mxu0 %v9453_v19 }
 0x100   : > { %1863 = vmatmul.mubr.f32.vlgmr.msra.gmra.mrb[0].mxu0 %v1782_v58  ;;  %v2037_v58 = vrot.slane %v12953_v40, 3 }
 0x101   : > { %1868 = vmatprep.mubr.f32.mxu0 %v1785_v59  ;;  %v2038_v59 = vrot.slane %v12956_v41, 3 }
 0x102   : > { %v2049_v12 = vsel %vm2027_vm5, %v2046_v63, %v2037_v58 }
 0x103   : > { %v2050_v17 = vsel %vm2027_vm5, %v2047_v5, %v2038_v59  ;;  %v612_v5 = vld [vmem:[%s12806_s25 + $0x10] sm:$0xff] }
 0x104   : > { %1869 = vmatmul.mubr.f32.gmra.mrb[2].mxu0 %v1784_v2 }
 0x1b9   : > { %v8572_v24 = vpop.f32.mrb[0].mxu1 }
 0x1ba   : > { %v8573_v26 = vpop.f32.mrb[1].mxu1 }
 0x1bb   : > { %v8574_v27 = vadd.f32 %v8573_v26, %v8572_v24 }
 0x1bd   : > { %v1942_v28 = vadd.f32 %v8574_v27, %v1797_v25  ;;  %v8575_v29 = vpop.f32.mrb[2].mxu1 }
 0x1be   : > { %v8576_v31 = vpop.f32.mrb[3].mxu1 }
 0x1bf   : > { %v1976_v32 = vrot.slane %v1942_v28, 6  ;;  %v8577_v33 = vadd.f32 %v8576_v31, %v8575_v29  ;;  %v1964_v39 = vrot.slane %v1942_v28, 7 }
 0x1c1   : > { %v1947_v34 = vadd.f32 %v8577_v33, %v1797_v25  ;;  %v2022_v35 = vsel %vm2019_vm0, %v1976_v32, %v1982_v30  ;;  %v2010_v43 = vsel %vm2007_vm2, %v1955_v38, %v1964_v39 }
 0x1c2   : > { %v2014_v54 = vsel %vm2011_vm3, %v2010_v43, %v1970_v42 }
 0x1c3   : > { %v1991_v36 = vrot.slane %v1947_v34, 5  ;;  %v2003_v3 = vrot.slane %v1947_v34, 4  ;;  %v2018_v4 = vsel %vm2015_vm4, %v2014_v54, %v1976_v32 }
 0x1c4   : > { %v12992_v16 = vadd.f32 %v2045_v62, %v2018_v4  ;;  %v613_v62 = vld [vmem:[%s12806_s25 + $0x18] sm:$0xff] }
 0x1c5   : > { %v12949_v37 = vsel %vm2023_vm1, %v2022_v35, %v1991_v36  ;;  %v12996_v24 = vadd.f32 %v2039_v60, %v2003_v3  ;;  %v611_v60 = vld [vmem:[%s12806_s25 + $0x8] sm:$0xff]  ;;  %v13045_v3 = vpack.c.bf16 %v622_v0, %v613_v62  ;;  %v682_v62 = vld [vmem:[%s12806_s25 + $0x240] sm:$0xff] }
 0x1c6   : > { %v691_v0 = vld [vmem:[%s12806_s25 + $0x288] sm:$0xff] }
 0x1c7   : > { %18623 = vst [vmem:[#allocation15_spill] sm:$0xff] %v13045_v3  ;;  %9584 = vmatprep.subr.bf16.mxu0 %v13045_v3 }
 0x1d3   : > { %v1864_v61 = vpop.f32.mrb[0].mxu0 }
 0x1d4   : > { %v1865_v1 = vadd.f32 %v1864_v61, %v1789_v44  ;;  %v1866_v2 = vpop.f32.mrb[1].mxu0  ;;  %v620_v61 = vld [vmem:[%s12806_s25 + $0x50] sm:$0xff] }
 0x1d5   : > { %v1867_v6 = vadd.f32 %v1866_v2, %v1793_v45  ;;  %v13040_v63 = vpack.c.bf16 %v620_v61, %v611_v60  ;;  %v619_v2 = vld [vmem:[%s12806_s25 + $0x48] sm:$0xff] }
 0x1d6   : > { %v1962_v10 = vrot.slane %v1865_v1, 7  ;;  %v1974_v11 = vrot.slane %v1865_v1, 6  ;;  %v610_v1 = vld [vmem:[%s12806_s25] sm:$0xff] }
 0x1d7   : > { %v1963_v14 = vrot.slane %v1867_v6, 7  ;;  %v1870_v15 = vpop.f32.mrb[2].mxu0  ;;  %v1975_v19 = vrot.slane %v1867_v6, 6  ;;  %v13047_v4 = vpack.c.bf16 %v619_v2, %v610_v1  ;;  %v621_v6 = vld [vmem:[%s12806_s25 + $0x58] sm:$0xff]  ;;  %9488 = vmatprep.subr.bf16.mxu1 %v13040_v63  ;;  %v684_v1 = vld [vmem:[%s12806_s25 + $0x250] sm:$0xff] }
 0x1d8   : > { %v2008_v18 = vsel %vm2007_vm2, %v1953_v46, %v1962_v10  ;;  %v1871_v20 = vadd.f32 %v1870_v15, %v1789_v44  ;;  %v1872_v23 = vpop.f32.mrb[3].mxu0  ;;  %v2020_v26 = vsel %vm2019_vm0, %v1974_v11, %v1980_v50  ;;  %v631_v10 = vld [vmem:[%s12806_s25 + $0xa8] sm:$0xff]  ;;  %v637_v15 = vld [vmem:[%s12806_s25 + $0xd8] sm:$0xff] }
 0x1d9   : > { %v2012_v25 = vsel %vm2011_vm3, %v2008_v18, %v1968_v47  ;;  %v2009_v27 = vsel %vm2007_vm2, %v1954_v51, %v1963_v14  ;;  %v1873_v28 = vadd.f32 %v1872_v23, %v1793_v45  ;;  %v2021_v38 = vsel %vm2019_vm0, %v1975_v19, %v1981_v57  ;;  %9490 = vmatpush1.bf16.msra.mxu1 %v13047_v4  ;;  %v628_v14 = vld [vmem:[%s12806_s25 + $0x90] sm:$0xff] }
 0x1da   : > { %v2016_v29 = vsel %vm2015_vm4, %v2012_v25, %v1974_v11  ;;  %v2013_v30 = vsel %vm2011_vm3, %v2009_v27, %v1969_v7  ;;  %v1989_v31 = vrot.slane %v1871_v20, 5  ;;  %v2001_v32 = vrot.slane %v1871_v20, 4  ;;  %v629_v7 = vld [vmem:[%s12806_s25 + $0x98] sm:$0xff]  ;;  %v640_v11 = vld [vmem:[%s12806_s25 + $0xf0] sm:$0xff]  ;;  %v647_v20 = vld [vmem:[%s12806_s25 + $0x128] sm:$0xff] }
 0x1db   : > { %v2017_v33 = vsel %vm2015_vm4, %v2013_v30, %v1975_v19  ;;  %v1990_v34 = vrot.slane %v1873_v28, 5  ;;  %v2002_v35 = vrot.slane %v1873_v28, 4  ;;  %v13004_v36 = vadd.f32 %v2043_v8, %v2016_v29  ;;  %v639_v19 = vld [vmem:[%s12806_s25 + $0xe8] sm:$0xff]  ;;  %v656_v23 = vld [vmem:[%s12806_s25 + $0x170] sm:$0xff]  ;;  %v649_v27 = vld [vmem:[%s12806_s25 + $0x138] sm:$0xff] }
 0x1dc   : > { %v2024_v39 = vsel %vm2023_vm1, %v2020_v26, %v1989_v31  ;;  %v13008_v42 = vadd.f32 %v2037_v58, %v2001_v32  ;;  %v13010_v43 = vadd.f32 %v2044_v9, %v2017_v33  ;;  %v2030_v47 = vsel %vm2027_vm5, %v12949_v37, %v1997_v48  ;;  %v638_v9 = vld [vmem:[%s12806_s25 + $0xe0] sm:$0xff]  ;;  %v655_v31 = vld [vmem:[%s12806_s25 + $0x168] sm:$0xff]  ;;  %v648_v32 = vld [vmem:[%s12806_s25 + $0x130] sm:$0xff] }
 0x1dd   : > { %v2025_v44 = vsel %vm2023_vm1, %v2021_v38, %v1990_v34  ;;  %v13013_v45 = vadd.f32 %v2038_v59, %v2002_v35  ;;  %v2028_v46 = vsel %vm2027_vm5, %v2024_v39, %v1995_v52  ;;  %v2073_v37 = vsel %vm2069_vm6, %v12996_v24, 0.0  ;;  %v658_v28 = vld [vmem:[%s12806_s25 + $0x180] sm:$0xff]  ;;  %v657_v33 = vld [vmem:[%s12806_s25 + $0x178] sm:$0xff]  ;;  %v667_v39 = vld [vmem:[%s12806_s25 + $0x1c8] sm:$0xff] }
 0x1de   : > { %v2061_v49 = vadd.f32 %v13010_v43, %v13004_v36  ;;  %v2070_v50 = vsel %vm2069_vm6, %v13008_v42, 0.0  ;;  %v2029_v51 = vsel %vm2027_vm5, %v2025_v44, %v1996_v53  ;;  %v13023_v54 = vadd.f32 %v2049_v12, %v2028_v46  ;;  %v646_v29 = vld [vmem:[%s12806_s25 + $0x120] sm:$0xff]  ;;  %v665_v35 = vld [vmem:[%s12806_s25 + $0x1b8] sm:$0xff] }
 0x1df   : > { %v2071_v55 = vsel %vm2069_vm6, %v13013_v45, 0.0  ;;  %v13029_v48 = vadd.f32 %v2050_v17, %v2029_v51  ;;  %v13032_v57 = vadd.f32 %v2051_v13, %v2030_v47  ;;  %v13053_v8 = vpack.c.bf16 %v621_v6, %v612_v5  ;;  %v630_v17 = vld [vmem:[%s12806_s25 + $0xa0] sm:$0xff]  ;;  %v676_v47 = vld [vmem:[%s12806_s25 + $0x210] sm:$0xff]  ;;  %v693_v5 = vld [vmem:[%s12806_s25 + $0x298] sm:$0xff] }
 0x1e0   : > { %v2062_v52 = vadd.f32 %v2061_v49, %v12992_v16  ;;  %v2072_v56 = vadd.f32 %v2071_v55, %v2070_v50  ;;  %v13060_v12 = vpack.c.bf16 %v638_v9, %v629_v7  ;;  %v13062_v13 = vpack.c.bf16 %v640_v11, %v631_v10  ;;  %v674_v38 = vld [vmem:[%s12806_s25 + $0x200] sm:$0xff]  ;;  %v664_v49 = vld [vmem:[%s12806_s25 + $0x1b0] sm:$0xff]  ;;  %v673_v50 = vld [vmem:[%s12806_s25 + $0x1f8] sm:$0xff] }
 0x1e1   : > { %v2065_v53 = vadd.f32 %v13029_v48, %v13023_v54  ;;  %18624 = vst [vmem:[#allocation16_spill] sm:$0xff] %v13053_v8  ;;  %9586 = vmatpush1.bf16.msra.mxu0 %v13053_v8  ;;  %v13068_v18 = vpack.c.bf16 %v637_v15, %v628_v14  ;;  %v13075_v25 = vpack.c.bf16 %v639_v19, %v630_v17  ;;  %v666_v55 = vld [vmem:[%s12806_s25 + $0x1c0] sm:$0xff]  ;;  %v701_v6 = vld [vmem:[%s12806_s25 + $0x2d8] sm:$0xff]  ;;  %v703_v9 = vld [vmem:[%s12806_s25 + $0x2e8] sm:$0xff] }
 0x1e2   : > { %2063 = vadd.xlane.f32.xlu0 %v2062_v52  ;;  %v2074_v58 = vadd.f32 %v2073_v37, %v2072_v56  ;;  %18625 = vst [vmem:[#allocation17_spill] sm:$0xff] %v13062_v13  ;;  %9492 = vmatprep.subr.bf16.mxu1 %v13060_v12  ;;  %v13077_v26 = vpack.c.bf16 %v656_v23, %v647_v20  ;;  %v675_v37 = vld [vmem:[%s12806_s25 + $0x208] sm:$0xff]  ;;  %v692_v56 = vld [vmem:[%s12806_s25 + $0x290] sm:$0xff]  ;;  %v710_v7 = vld [vmem:[%s12806_s25 + $0x320] sm:$0xff] }
 0x1e3   : > { %v2066_v59 = vadd.f32 %v2065_v53, %v13032_v57  ;;  %9588 = vmatprep.subr.bf16.mxu0 %v13062_v13  ;;  %18626 = vst [vmem:[#allocation18_spill] sm:$0xff] %v13075_v25  ;;  %v13082_v30 = vpack.c.bf16 %v658_v28, %v649_v27  ;;  %9494 = vmatpush1.bf16.msra.mxu1 %v13068_v18  ;;  %v683_v52 = vld [vmem:[%s12806_s25 + $0x248] sm:$0xff]  ;;  %v685_v53 = vld [vmem:[%s12806_s25 + $0x258] sm:$0xff]  ;;  %v712_v10 = vld [vmem:[%s12806_s25 + $0x330] sm:$0xff] }
 0x1e4   : > { %2075 = vadd.xlane.f32.xlu1 %v2074_v58  ;;  %v13088_v34 = vpack.c.bf16 %v655_v31, %v646_v29  ;;  %9496 = vmatprep.subr.bf16.mxu1 %v13077_v26  ;;  %v13095_v44 = vpack.c.bf16 %v657_v33, %v648_v32  ;;  %v13097_v46 = vpack.c.bf16 %v674_v38, %v665_v35  ;;  %v694_v58 = vld [vmem:[%s12806_s25 + $0x2a0] sm:$0xff]  ;;  %v700_v17 = vld [vmem:[%s12806_s25 + $0x2d0] sm:$0xff]  ;;  %v709_v19 = vld [vmem:[%s12806_s25 + $0x318] sm:$0xff] }
 0x1e5   : > { %18627 = vst [vmem:[#allocation19_spill] sm:$0xff] %v13082_v30  ;;  %9590 = vmatpush1.bf16.msra.mxu0 %v13075_v25  ;;  %v13103_v51 = vpack.c.bf16 %v676_v47, %v667_v39  ;;  %v13116_v60 = vpack.c.bf16 %v675_v37, %v666_v55  ;;  %v13118_v61 = vpack.c.bf16 %v692_v56, %v683_v52  ;;  %v702_v20 = vld [vmem:[%s12806_s25 + $0x2e0] sm:$0xff]  ;;  %v711_v27 = vld [vmem:[%s12806_s25 + $0x328] sm:$0xff]  ;;  %v728_v29 = vld [vmem:[%s12806_s25 + $0x3b0] sm:$0xff] }
 0x1e6   : > { %2067 = vadd.xlane.f32.xlu0 %v2066_v59  ;;  %18628 = vst [vmem:[#allocation20_spill] sm:$0xff] %v13095_v44  ;;  %9592 = vmatprep.subr.bf16.mxu0 %v13082_v30  ;;  %v13112_v59 = vpack.c.bf16 %v673_v50, %v664_v49  ;;  %v13124_v2 = vpack.c.bf16 %v694_v58, %v685_v53  ;;  %v719_v28 = vld [vmem:[%s12806_s25 + $0x368] sm:$0xff]  ;;  %v721_v31 = vld [vmem:[%s12806_s25 + $0x378] sm:$0xff]  ;;  %v730_v32 = vld [vmem:[%s12806_s25 + $0x3c0] sm:$0xff] }
 0x1e7   : > { %18629 = vst [vmem:[#allocation21_spill] sm:$0xff] %v13103_v51  ;;  %9498 = vmatpush1.bf16.msra.mxu1 %v13088_v34  ;;  %18630 = vst [vmem:[#allocation22_spill] sm:$0xff] %v13116_v60  ;;  %v13132_v11 = vpack.c.bf16 %v691_v0, %v682_v62  ;;  %v13136_v14 = vpack.c.bf16 %v693_v5, %v684_v1  ;;  %v13138_v15 = vpack.c.bf16 %v710_v7, %v701_v6  ;;  %v718_v39 = vld [vmem:[%s12806_s25 + $0x360] sm:$0xff]  ;;  %v727_v47 = vld [vmem:[%s12806_s25 + $0x3a8] sm:$0xff] }
 0x1e8   : > { %9500 = vmatprep.subr.bf16.mxu1 %v13097_v46  ;;  %18631 = vst [vmem:[#allocation23_spill] sm:$0xff] %v13124_v2  ;;  %v13144_v23 = vpack.c.bf16 %v712_v10, %v703_v9  ;;  %v13152_v33 = vpack.c.bf16 %v709_v19, %v700_v17  ;;  %v13156_v35 = vpack.c.bf16 %v711_v27, %v702_v20  ;;  %v720_v49 = vld [vmem:[%s12806_s25 + $0x370] sm:$0xff]  ;;  %v729_v55 = vld [vmem:[%s12806_s25 + $0x3b8] sm:$0xff]  ;;  %v746_v52 = vld [vmem:[%s12806_s25 + $0x440] sm:$0xff] }
 0x1e9   : > { %9594 = vmatpush1.bf16.msra.mxu0 %v13095_v44  ;;  %18632 = vst [vmem:[#allocation24_spill] sm:$0xff] %v13136_v14  ;;  %v13158_v38 = vpack.c.bf16 %v728_v29, %v719_v28  ;;  %v13164_v50 = vpack.c.bf16 %v730_v32, %v721_v31  ;;  %v737_v37 = vld [vmem:[%s12806_s25 + $0x3f8] sm:$0xff]  ;;  %v739_v56 = vld [vmem:[%s12806_s25 + $0x408] sm:$0xff]  ;;  %v748_v53 = vld [vmem:[%s12806_s25 + $0x450] sm:$0xff]  ;;  %v13172_v58 = vpack.c.bf16 %v727_v47, %v718_v39 }
 0x1ea   : > { %9596 = vmatprep.subr.bf16.mxu0 %v13103_v51  ;;  %18633 = vst [vmem:[#allocation25_spill] sm:$0xff] %v13144_v23  ;;  %18634 = vst [vmem:[#allocation26_spill] sm:$0xff] %v13156_v35  ;;  %v13176_v62 = vpack.c.bf16 %v729_v55, %v720_v49  ;;  %v13178_v0 = vpack.c.bf16 %v746_v52, %v737_v37  ;;  %v736_v1 = vld [vmem:[%s12806_s25 + $0x3f0] sm:$0xff]  ;;  %v745_v5 = vld [vmem:[%s12806_s25 + $0x438] sm:$0xff]  ;;  %v13184_v7 = vpack.c.bf16 %v748_v53, %v739_v56 }
 0x1eb   : > { %9502 = vmatpush1.bf16.msra.mxu1 %v13112_v59  ;;  %18635 = vst [vmem:[#allocation27_spill] sm:$0xff] %v13164_v50  ;;  %v738_v6 = vld [vmem:[%s12806_s25 + $0x400] sm:$0xff]  ;;  %v747_v9 = vld [vmem:[%s12806_s25 + $0x448] sm:$0xff]  ;;  %v764_v17 = vld [vmem:[%s12806_s25 + $0x4d0] sm:$0xff]  ;;  %v13192_v27 = vpack.c.bf16 %v745_v5, %v736_v1 }
 0x1ec   : > { %9504 = vmatprep.subr.bf16.mxu1 %v13118_v61  ;;  %18636 = vst [vmem:[#allocation28_spill] sm:$0xff] %v13176_v62  ;;  %18637 = vst [vmem:[#allocation29_spill] sm:$0xff] %v13178_v0  ;;  %v755_v10 = vld [vmem:[%s12806_s25 + $0x488] sm:$0xff]  ;;  %v757_v19 = vld [vmem:[%s12806_s25 + $0x498] sm:$0xff]  ;;  %v13196_v28 = vpack.c.bf16 %v747_v9, %v738_v6 }
 0x1ed   : > { %9598 = vmatpush1.bf16.msra.mxu0 %v13116_v60  ;;  %18638 = vst [vmem:[#allocation30_spill] sm:$0xff] %v13184_v7  ;;  %v766_v20 = vld [vmem:[%s12806_s25 + $0x4e0] sm:$0xff]  ;;  %18639 = vst [vmem:[#allocation31_spill] sm:$0xff] %v13192_v27  ;;  %v13198_v29 = vpack.c.bf16 %v764_v17, %v755_v10  ;;  %v763_v32 = vld [vmem:[%s12806_s25 + $0x4c8] sm:$0xff] }
 0x1ee   : > { %9600 = vmatprep.subr.bf16.mxu0 %v13124_v2  ;;  %18640 = vst [vmem:[#allocation32_spill] sm:$0xff] %v13196_v28  ;;  %v754_v31 = vld [vmem:[%s12806_s25 + $0x480] sm:$0xff]  ;;  %v756_v39 = vld [vmem:[%s12806_s25 + $0x490] sm:$0xff]  ;;  %v13204_v47 = vpack.c.bf16 %v766_v20, %v757_v19  ;;  %v765_v49 = vld [vmem:[%s12806_s25 + $0x4d8] sm:$0xff] }
 0x1ef   : > { %9506 = vmatpush1.bf16.msra.mxu1 %v13132_v11  ;;  %18641 = vst [vmem:[#allocation33_spill] sm:$0xff] %v13198_v29  ;;  %v773_v55 = vld [vmem:[%s12806_s25 + $0x518] sm:$0xff]  ;;  %v782_v37 = vld [vmem:[%s12806_s25 + $0x560] sm:$0xff]  ;;  %v775_v52 = vld [vmem:[%s12806_s25 + $0x528] sm:$0xff]  ;;  %v13212_v53 = vpack.c.bf16 %v763_v32, %v754_v31  ;;  %v13216_v1 = vpack.c.bf16 %v765_v49, %v756_v39 }
 0x1f0   : > { %9508 = vmatprep.subr.bf16.mxu1 %v13138_v15  ;;  %18642 = vst [vmem:[#allocation34_spill] sm:$0xff] %v13204_v47  ;;  %v784_v56 = vld [vmem:[%s12806_s25 + $0x570] sm:$0xff]  ;;  %v13218_v5 = vpack.c.bf16 %v782_v37, %v773_v55  ;;  %v781_v9 = vld [vmem:[%s12806_s25 + $0x558] sm:$0xff]  ;;  %v774_v10 = vld [vmem:[%s12806_s25 + $0x520] sm:$0xff] }
 0x1f1   : > { %9602 = vmatpush1.bf16.msra.mxu0 %v13136_v14  ;;  %18643 = vst [vmem:[#allocation35_spill] sm:$0xff] %v13212_v53  ;;  %18644 = vst [vmem:[#allocation36_spill] sm:$0xff] %v13216_v1  ;;  %v772_v6 = vld [vmem:[%s12806_s25 + $0x510] sm:$0xff]  ;;  %v13224_v17 = vpack.c.bf16 %v784_v56, %v775_v52  ;;  %v783_v19 = vld [vmem:[%s12806_s25 + $0x568] sm:$0xff] }
 0x1f2   : > { %9604 = vmatprep.subr.bf16.mxu0 %v13144_v23  ;;  %18645 = vst [vmem:[#allocation37_spill] sm:$0xff] %v13218_v5  ;;  %v791_v20 = vld [vmem:[%s12806_s25 + $0x5a8] sm:$0xff]  ;;  %v800_v31 = vld [vmem:[%s12806_s25 + $0x5f0] sm:$0xff]  ;;  %v793_v32 = vld [vmem:[%s12806_s25 + $0x5b8] sm:$0xff]  ;;  %v13232_v39 = vpack.c.bf16 %v781_v9, %v772_v6  ;;  %v13236_v49 = vpack.c.bf16 %v783_v19, %v774_v10 }
 0x1f3   : > { %9510 = vmatpush1.bf16.msra.mxu1 %v13152_v33  ;;  %18646 = vst [vmem:[#allocation38_spill] sm:$0xff] %v13224_v17  ;;  %v13238_v55 = vpack.c.bf16 %v800_v31, %v791_v20  ;;  %v790_v37 = vld [vmem:[%s12806_s25 + $0x5a0] sm:$0xff]  ;;  %v799_v52 = vld [vmem:[%s12806_s25 + $0x5e8] sm:$0xff]  ;;  %v928_v25 = vld [vmem:[%s12806_s25 + $0x9f0] sm:$0xff] }
 0x1f4   : > { %9512 = vmatprep.subr.bf16.mxu1 %v13158_v38  ;;  %18647 = vst [vmem:[#allocation39_spill] sm:$0xff] %v13232_v39  ;;  %18648 = vst [vmem:[#allocation40_spill] sm:$0xff] %v13236_v49  ;;  %v13248_v6 = vpack.c.bf16 %v799_v52, %v790_v37  ;;  %v919_v30 = vld [vmem:[%s12806_s25 + $0x9a8] sm:$0xff]  ;;  %v916_v13 = vld [vmem:[%s12806_s25 + $0x990] sm:$0xff] }
 0x1f5   : > { %9606 = vmatpush1.bf16.msra.mxu0 %v13156_v35  ;;  %18649 = vst [vmem:[#allocation41_spill] sm:$0xff] %v13238_v55  ;;  %v918_v8 = vld [vmem:[%s12806_s25 + $0x9a0] sm:$0xff] }
 0x1f6   : > { %9608 = vmatprep.subr.bf16.mxu0 %v13164_v50  ;;  %18651 = vst [vmem:[#allocation43_spill] sm:$0xff] %v13248_v6 }
 0x1f7   : > { %9514 = vmatpush1.bf16.msra.mxu1 %v13172_v58 }
 0x1f8   : > { %9516 = vmatprep.subr.bf16.mxu1 %v13178_v0 }
 0x1f9   : > { %9610 = vmatpush1.bf16.msra.mxu0 %v13176_v62 }
 0x1fa   : > { %9612 = vmatprep.subr.bf16.mxu0 %v13184_v7  ;;  %v801_v7 = vld [vmem:[%s12806_s25 + $0x5f8] sm:$0xff] }
 0x1fb   : > { %9518 = vmatpush1.bf16.msra.mxu1 %v13192_v27 }
 0x1fc   : > { %9520 = vmatprep.subr.bf16.mxu1 %v13198_v29 }
 0x1fd   : > { %9614 = vmatpush1.bf16.msra.mxu0 %v13196_v28  ;;  %v802_v28 = vld [vmem:[%s12806_s25 + $0x600] sm:$0xff] }
 0x1fe   : > { %9616 = vmatprep.subr.bf16.mxu0 %v13204_v47  ;;  %v13243_v56 = vpack.c.bf16 %v802_v28, %v793_v32  ;;  %v792_v47 = vld [vmem:[%s12806_s25 + $0x5b0] sm:$0xff] }
 0x1ff   : > { %9522 = vmatpush1.bf16.msra.mxu1 %v13212_v53  ;;  %v13252_v9 = vpack.c.bf16 %v801_v7, %v792_v47  ;;  %v945_v53 = vld [vmem:[%s12806_s25 + $0xa78] sm:$0xff] }
 0x200   : > { %9524 = vmatprep.subr.bf16.mxu1 %v13218_v5  ;;  %18650 = vst [vmem:[#allocation42_spill] sm:$0xff] %v13243_v56  ;;  %v927_v5 = vld [vmem:[%s12806_s25 + $0x9e8] sm:$0xff] }
 0x201   : > { %9618 = vmatpush1.bf16.msra.mxu0 %v13216_v1  ;;  %18652 = vst [vmem:[#allocation44_spill] sm:$0xff] %v13252_v9 }
 0x202   : > { %9620 = vmatprep.subr.bf16.mxu0 %v13224_v17 }
 0x203   : > { %9526 = vmatpush1.bf16.msra.mxu1 %v13232_v39 }
 0x204   : > { %9528 = vmatprep.subr.bf16.mxu1 %v13238_v55 }
 0x205   : > { %9622 = vmatpush1.bf16.msra.mxu0 %v13236_v49 }
 0x206   : > { %9624 = vmatprep.subr.bf16.mxu0 %v13243_v56 }
 0x207   : > { %9530 = vmatpush1.bf16.msra.mxu1 %v13248_v6  ;;  %v891_v6 = vld [vmem:[%s12806_s25 + $0x8c8] sm:$0xff] }
 0x209   : > { %9626 = vmatpush1.bf16.msra.mxu0 %v13252_v9 }
 0x26f   : > { %v2064_v28 = vpop.xlane.xlu0 %2063 }
 0x270   : > { %v2078_v10 = vmul.f32 0.0026041667, %v2064_v28 }
 0x271   : > { %v2076_v19 = vpop.xlane.xlu1 %2075 }
 0x272   : > { %v13258_v20 = vsub.f32 %v13004_v36, %v2078_v10  ;;  %v13261_v31 = vsub.f32 %v13010_v43, %v2078_v10  ;;  %v2080_v32 = vmul.f32 0.0026041667, %v2076_v19  ;;  %v13264_v37 = vsub.f32 %v12992_v16, %v2078_v10 }
 0x273   : > { %v2068_v7 = vpop.xlane.xlu0 %2067 }
 0x274   : > { %v13267_v47 = vsub.f32 %v13008_v42, %v2080_v32  ;;  %v13270_v52 = vsub.f32 %v13013_v45, %v2080_v32  ;;  %v13273_v28 = vsub.f32 %v12996_v24, %v2080_v32  ;;  %v2079_v9 = vmul.f32 0.0026041667, %v2068_v7 }
 0x275   : > { %v2090_v56 = vmul.f32 %v13258_v20, %v13258_v20  ;;  %v2091_v19 = vmul.f32 %v13261_v31, %v13261_v31  ;;  %v2092_v7 = vmul.f32 %v13264_v37, %v13264_v37 }
 0x276   : > { %v13280_v10 = vsub.f32 %v13023_v54, %v2079_v9  ;;  %v13283_v49 = vsub.f32 %v13029_v48, %v2079_v9  ;;  %v13286_v17 = vsub.f32 %v13032_v57, %v2079_v9  ;;  %v2096_v32 = vmul.f32 %v13267_v47, %v13267_v47 }
 0x277   : > { %v2099_v1 = vadd.f32 %v2091_v19, %v2090_v56  ;;  %v2097_v62 = vmul.f32 %v13270_v52, %v13270_v52  ;;  %v2098_v50 = vmul.f32 %v13273_v28, %v13273_v28 }
 0x278   : > { %v2107_v35 = vsel %vm2069_vm6, %v2096_v32, 0.0  ;;  %v2093_v9 = vmul.f32 %v13280_v10, %v13280_v10  ;;  %v2094_v23 = vmul.f32 %v13283_v49, %v13283_v49  ;;  %v2095_v2 = vmul.f32 %v13286_v17, %v13286_v17 }
 0x279   : > { %v2100_v14 = vadd.f32 %v2099_v1, %v2092_v7  ;;  %v2108_v56 = vsel %vm2069_vm6, %v2097_v62, 0.0  ;;  %v2110_v32 = vsel %vm2069_vm6, %v2098_v50, 0.0  ;;  %v809_v1 = vld [vmem:[%s12806_s25 + $0x638] sm:$0xff]  ;;  %v818_v7 = vld [vmem:[%s12806_s25 + $0x680] sm:$0xff]  ;;  %v811_v62 = vld [vmem:[%s12806_s25 + $0x648] sm:$0xff] }
 0x27a   : > { %v2109_v19 = vadd.f32 %v2108_v56, %v2107_v35  ;;  %v2103_v60 = vadd.f32 %v2094_v23, %v2093_v9  ;;  %v13308_v35 = vpack.c.bf16 %v818_v7, %v809_v1  ;;  %v820_v56 = vld [vmem:[%s12806_s25 + $0x690] sm:$0xff]  ;;  %v838_v7 = vld [vmem:[%s12806_s25 + $0x720] sm:$0xff] }
 0x27b   : > { %2101 = vadd.xlane.f32.xlu1 %v2100_v14  ;;  %v808_v23 = vld [vmem:[%s12806_s25 + $0x630] sm:$0xff]  ;;  %v817_v14 = vld [vmem:[%s12806_s25 + $0x678] sm:$0xff]  ;;  %v13313_v9 = vpack.c.bf16 %v820_v56, %v811_v62  ;;  %v826_v62 = vld [vmem:[%s12806_s25 + $0x6c0] sm:$0xff] }
 0x27c   : > { %v2111_v51 = vadd.f32 %v2110_v32, %v2109_v19  ;;  %v2104_v44 = vadd.f32 %v2103_v60, %v2095_v2  ;;  %18653 = vst [vmem:[#allocation45_spill] sm:$0xff] %v13308_v35  ;;  %v13315_v50 = vpack.c.bf16 %v817_v14, %v808_v23  ;;  %9532 = vmatprep.subr.bf16.mxu1 %v13308_v35  ;;  %v827_v2 = vld [vmem:[%s12806_s25 + $0x6c8] sm:$0xff]  ;;  %v836_v19 = vld [vmem:[%s12806_s25 + $0x710] sm:$0xff]  ;;  %v829_v32 = vld [vmem:[%s12806_s25 + $0x6d8] sm:$0xff] }
 0x27d   : > { %18654 = vst [vmem:[#allocation46_spill] sm:$0xff] %v13313_v9  ;;  %9628 = vmatprep.subr.bf16.mxu0 %v13313_v9  ;;  %v13328_v1 = vpack.c.bf16 %v836_v19, %v827_v2  ;;  %v835_v56 = vld [vmem:[%s12806_s25 + $0x708] sm:$0xff]  ;;  %v13333_v23 = vpack.c.bf16 %v838_v7, %v829_v32  ;;  %v845_v2 = vld [vmem:[%s12806_s25 + $0x758] sm:$0xff]  ;;  %v854_v19 = vld [vmem:[%s12806_s25 + $0x7a0] sm:$0xff] }
 0x27e   : > { %2105 = vadd.xlane.f32.xlu0 %v2104_v44  ;;  %18655 = vst [vmem:[#allocation47_spill] sm:$0xff] %v13315_v50  ;;  %v810_v44 = vld [vmem:[%s12806_s25 + $0x640] sm:$0xff]  ;;  %9534 = vmatpush1.bf16.msra.mxu1 %v13315_v50  ;;  %v13335_v14 = vpack.c.bf16 %v835_v56, %v826_v62  ;;  %v847_v32 = vld [vmem:[%s12806_s25 + $0x768] sm:$0xff]  ;;  %v13348_v7 = vpack.c.bf16 %v854_v19, %v845_v2  ;;  %v856_v62 = vld [vmem:[%s12806_s25 + $0x7b0] sm:$0xff] }
 0x27f   : > { %2112 = vadd.xlane.f32.xlu1 %v2111_v51  ;;  %v819_v51 = vld [vmem:[%s12806_s25 + $0x688] sm:$0xff]  ;;  %18657 = vst [vmem:[#allocation49_spill] sm:$0xff] %v13328_v1  ;;  %18658 = vst [vmem:[#allocation50_spill] sm:$0xff] %v13333_v23  ;;  %9536 = vmatprep.subr.bf16.mxu1 %v13328_v1  ;;  %v844_v56 = vld [vmem:[%s12806_s25 + $0x750] sm:$0xff] }
 0x280   : > { %v13320_v60 = vpack.c.bf16 %v819_v51, %v810_v44  ;;  %18659 = vst [vmem:[#allocation51_spill] sm:$0xff] %v13335_v14  ;;  %v828_v44 = vld [vmem:[%s12806_s25 + $0x6d0] sm:$0xff]  ;;  %v837_v51 = vld [vmem:[%s12806_s25 + $0x718] sm:$0xff]  ;;  %18661 = vst [vmem:[#allocation53_spill] sm:$0xff] %v13348_v7 }
 0x281   : > { %v853_v9 = vld [vmem:[%s12806_s25 + $0x798] sm:$0xff]  ;;  %v863_v1 = vld [vmem:[%s12806_s25 + $0x7e8] sm:$0xff]  ;;  %v872_v19 = vld [vmem:[%s12806_s25 + $0x830] sm:$0xff] }
 0x282   : > { %18656 = vst [vmem:[#allocation48_spill] sm:$0xff] %v13320_v60  ;;  %9630 = vmatpush1.bf16.msra.mxu0 %v13320_v60  ;;  %v13340_v60 = vpack.c.bf16 %v837_v51, %v828_v44  ;;  %9538 = vmatpush1.bf16.msra.mxu1 %v13335_v14  ;;  %v13353_v44 = vpack.c.bf16 %v856_v62, %v847_v32  ;;  %v855_v14 = vld [vmem:[%s12806_s25 + $0x7a8] sm:$0xff]  ;;  %v874_v50 = vld [vmem:[%s12806_s25 + $0x840] sm:$0xff] }
 0x283   : > { %9632 = vmatprep.subr.bf16.mxu0 %v13333_v23  ;;  %v13355_v51 = vpack.c.bf16 %v853_v9, %v844_v56  ;;  %v846_v23 = vld [vmem:[%s12806_s25 + $0x760] sm:$0xff]  ;;  %9540 = vmatprep.subr.bf16.mxu1 %v13348_v7  ;;  %v13368_v9 = vpack.c.bf16 %v872_v19, %v863_v1  ;;  %v871_v56 = vld [vmem:[%s12806_s25 + $0x828] sm:$0xff]  ;;  %v881_v7 = vld [vmem:[%s12806_s25 + $0x878] sm:$0xff] }
 0x284   : > { %18660 = vst [vmem:[#allocation52_spill] sm:$0xff] %v13340_v60  ;;  %18662 = vst [vmem:[#allocation54_spill] sm:$0xff] %v13353_v44  ;;  %v13361_v2 = vpack.c.bf16 %v855_v14, %v846_v23  ;;  %v862_v62 = vld [vmem:[%s12806_s25 + $0x7e0] sm:$0xff]  ;;  %v864_v23 = vld [vmem:[%s12806_s25 + $0x7f0] sm:$0xff] }
 0x285   : > { %18663 = vst [vmem:[#allocation55_spill] sm:$0xff] %v13355_v51  ;;  %18665 = vst [vmem:[#allocation57_spill] sm:$0xff] %v13368_v9  ;;  %v13376_v14 = vpack.c.bf16 %v871_v56, %v862_v62  ;;  %v890_v35 = vld [vmem:[%s12806_s25 + $0x8c0] sm:$0xff]  ;;  %v892_v19 = vld [vmem:[%s12806_s25 + $0x8d0] sm:$0xff] }
 0x286   : > { %9634 = vmatpush1.bf16.msra.mxu0 %v13340_v60  ;;  %18664 = vst [vmem:[#allocation56_spill] sm:$0xff] %v13361_v2  ;;  %v865_v60 = vld [vmem:[%s12806_s25 + $0x7f8] sm:$0xff]  ;;  %9542 = vmatpush1.bf16.msra.mxu1 %v13355_v51  ;;  %v880_v51 = vld [vmem:[%s12806_s25 + $0x870] sm:$0xff]  ;;  %v882_v56 = vld [vmem:[%s12806_s25 + $0x880] sm:$0xff] }
 0x287   : > { %9636 = vmatprep.subr.bf16.mxu0 %v13353_v44  ;;  %v13370_v32 = vpack.c.bf16 %v874_v50, %v865_v60  ;;  %18667 = vst [vmem:[#allocation59_spill] sm:$0xff] %v13376_v14  ;;  %v873_v44 = vld [vmem:[%s12806_s25 + $0x838] sm:$0xff]  ;;  %9544 = vmatprep.subr.bf16.mxu1 %v13368_v9  ;;  %v13385_v50 = vpack.c.bf16 %v890_v35, %v881_v7  ;;  %v883_v60 = vld [vmem:[%s12806_s25 + $0x888] sm:$0xff] }
 0x288   : > { %v13383_v1 = vpack.c.bf16 %v873_v44, %v864_v23  ;;  %v889_v62 = vld [vmem:[%s12806_s25 + $0x8b8] sm:$0xff]  ;;  %v13400_v35 = vpack.c.bf16 %v891_v6, %v882_v56  ;;  %v899_v7 = vld [vmem:[%s12806_s25 + $0x908] sm:$0xff]  ;;  %v908_v44 = vld [vmem:[%s12806_s25 + $0x950] sm:$0xff] }
 0x289   : > { %18666 = vst [vmem:[#allocation58_spill] sm:$0xff] %v13370_v32  ;;  %18669 = vst [vmem:[#allocation61_spill] sm:$0xff] %v13385_v50  ;;  %v13396_v9 = vpack.c.bf16 %v889_v62, %v880_v51  ;;  %v901_v23 = vld [vmem:[%s12806_s25 + $0x918] sm:$0xff] }
 0x28a   : > { %9638 = vmatpush1.bf16.msra.mxu0 %v13361_v2  ;;  %18668 = vst [vmem:[#allocation60_spill] sm:$0xff] %v13383_v1  ;;  %v13390_v2 = vpack.c.bf16 %v892_v19, %v883_v60  ;;  %9546 = vmatpush1.bf16.msra.mxu1 %v13376_v14  ;;  %18672 = vst [vmem:[#allocation64_spill] sm:$0xff] %v13400_v35  ;;  %v13408_v60 = vpack.c.bf16 %v908_v44, %v899_v7  ;;  %v910_v19 = vld [vmem:[%s12806_s25 + $0x960] sm:$0xff] }
 0x28b   : > { %9640 = vmatprep.subr.bf16.mxu0 %v13370_v32  ;;  %18671 = vst [vmem:[#allocation63_spill] sm:$0xff] %v13396_v9  ;;  %9548 = vmatprep.subr.bf16.mxu1 %v13385_v50  ;;  %v13411_v51 = vpack.c.bf16 %v910_v19, %v901_v23  ;;  %v13416_v23 = vsub.s32 7, %v12931_v21  ;;  %v1766_v19 = vld [vmem:[%s12936_s24 + $0x50] sm:$0xff]  ;;  %v926_v50 = vld [vmem:[%s12806_s25 + $0x9e0] sm:$0xff] }
 0x28c   : > { %18670 = vst [vmem:[#allocation62_spill] sm:$0xff] %v13390_v2  ;;  %18673 = vst [vmem:[#allocation65_spill] sm:$0xff] %v13408_v60 }
 0x28d   : > { %18674 = vst [vmem:[#allocation66_spill] sm:$0xff] %v13411_v51  ;;  %18675 = vst [vmem:[#allocation67_spill] sm:$0xff] %v13416_v23 }
 0x28e   : > { %9642 = vmatpush1.bf16.msra.mxu0 %v13383_v1  ;;  %9550 = vmatpush1.bf16.msra.mxu1 %v13396_v9 }
 0x28f   : > { %9644 = vmatprep.subr.bf16.mxu0 %v13390_v2  ;;  %9552 = vmatprep.subr.bf16.mxu1 %v13408_v60 }
 0x292   : > { %9646 = vmatpush1.bf16.msra.mxu0 %v13400_v35 }
 0x293   : > { %9648 = vmatprep.subr.bf16.mxu0 %v13411_v51  ;;  %v909_v51 = vld [vmem:[%s12806_s25 + $0x958] sm:$0xff] }
 0x308   : > { %v2102_v6 = vpop.xlane.xlu1 %2101 }
 0x309   : > { %v2114_v62 = vmul.f32 0.0026041667, %v2102_v6  ;;  %v1765_v6 = vld [vmem:[%s12936_s24 + $0x48] sm:$0xff] }
 0x30b   : > { %v2117_v56 = vadd.f32 1e-06, %v2114_v62  ;;  %v2106_v2 = vpop.xlane.xlu0 %2105  ;;  %v13433_v62 = vrot.slane %v1766_v19, %v12939_v22  ;;  %v917_v19 = vld [vmem:[%s12806_s25 + $0x998] sm:$0xff] }
 0x30c   : > { %v2113_v1 = vpop.xlane.xlu1 %2112  ;;  %v2115_v32 = vmul.f32 0.0026041667, %v2106_v2  ;;  %v13422_v2 = vrot.slane %v12956_v41, %v13416_v23  ;;  %v13438_v41 = vrot.slane %v1765_v6, %v12939_v22 }
 0x30d   : > { %12151 = vrsqrt.f32 %v2117_v56  ;;  %v2116_v35 = vmul.f32 0.0026041667, %v2113_v1  ;;  %v13426_v1 = vrot.slane %v12953_v40, %v13416_v23  ;;  %18678 = vst [vmem:[#allocation70_spill] sm:$0xff] %v13433_v62  ;;  %v900_v40 = vld [vmem:[%s12806_s25 + $0x910] sm:$0xff] }
 0x30e   : > { %v2118_v7 = vadd.f32 1e-06, %v2115_v32  ;;  %18676 = vst [vmem:[#allocation68_spill] sm:$0xff] %v13422_v2  ;;  %18679 = vst [vmem:[#allocation71_spill] sm:$0xff] %v13438_v41  ;;  %v13466_v39 = vpack.c.bf16 %v909_v51, %v900_v40  ;;  %v944_v40 = vld [vmem:[%s12806_s25 + $0xa70] sm:$0xff] }
 0x30f   : > { %v2119_v44 = vadd.f32 1e-06, %v2116_v35  ;;  %18677 = vst [vmem:[#allocation69_spill] sm:$0xff] %v13426_v1 }
 0x310   : > { %12153 = vrsqrt.f32 %v2118_v7  ;;  %v898_v7 = vld [vmem:[%s12806_s25 + $0x900] sm:$0xff]  ;;  %18681 = vst [vmem:[#allocation73_spill] sm:$0xff] %v13466_v39 }
 0x311   : > { %12155 = vrsqrt.f32 %v2119_v44  ;;  %v907_v44 = vld [vmem:[%s12806_s25 + $0x948] sm:$0xff] }
 0x317   : > { %v13428_v32 = vpop.eup %12151 }
 0x318   : > { %v2124_v35 = vmul.f32 %v13428_v32, %v13261_v31  ;;  %v2123_v56 = vmul.f32 %v13428_v32, %v13258_v20  ;;  %v13452_v20 = vpack.c.bf16 %v907_v44, %v898_v7  ;;  %v13472_v44 = vpack.c.bf16 %v926_v50, %v917_v19  ;;  %v935_v50 = vld [vmem:[%s12806_s25 + $0xa28] sm:$0xff]  ;;  %v937_v19 = vld [vmem:[%s12806_s25 + $0xa38] sm:$0xff] }
 0x31a   : > { %v13444_v60 = vpop.eup %12153  ;;  %v2145_v31 = vmul.f32 %v13422_v2, %v2124_v35  ;;  %v2144_v9 = vmul.f32 %v13426_v1, %v2123_v56  ;;  %18680 = vst [vmem:[#allocation72_spill] sm:$0xff] %v13452_v20  ;;  %18682 = vst [vmem:[#allocation74_spill] sm:$0xff] %v13472_v44 }
 0x31b   : > { %v13450_v14 = vpop.eup %12155  ;;  %v2127_v6 = vmul.f32 %v13444_v60, %v13283_v49  ;;  %v2126_v55 = vmul.f32 %v13444_v60, %v13280_v10 }
 0x31c   : > { %v13461_v35 = vadd.f32 %v13433_v62, %v2145_v31  ;;  %v13464_v56 = vadd.f32 %v13438_v41, %v2144_v9  ;;  %v2130_v7 = vmul.f32 %v13450_v14, %v13270_v52  ;;  %v925_v31 = vld [vmem:[%s12806_s25 + $0x9d8] sm:$0xff]  ;;  %v2129_v9 = vmul.f32 %v13450_v14, %v13267_v47 }
 0x31d   : > { %v2148_v49 = vmul.f32 %v13422_v2, %v2127_v6  ;;  %v2147_v10 = vmul.f32 %v13426_v1, %v2126_v55  ;;  %v13482_v52 = vpack.c.bf16 %v928_v25, %v919_v30  ;;  %v946_v25 = vld [vmem:[%s12806_s25 + $0xa80] sm:$0xff]  ;;  %v13499_v30 = vpack.c.bf16 %v925_v31, %v916_v13  ;;  %v955_v31 = vld [vmem:[%s12806_s25 + $0xac8] sm:$0xff] }
 0x31e   : > { %2274 = vmatprep.mubr.f32.mxu1 %v13461_v35  ;;  %2440 = vmatprep.mubr.f32.mxu0 %v13461_v35  ;;  %v2151_v51 = vmul.f32 %v13422_v2, %v2130_v7  ;;  %v13501_v6 = vpack.c.bf16 %v927_v5, %v918_v8  ;;  %v2150_v7 = vmul.f32 %v13426_v1, %v2129_v9  ;;  %v936_v2 = vld [vmem:[%s12806_s25 + $0xa30] sm:$0xff]  ;;  %v962_v5 = vld [vmem:[%s12806_s25 + $0xb00] sm:$0xff] }
 0x31f   : > { %18683 = vst [vmem:[#allocation75_spill] sm:$0xff] %v13482_v52  ;;  %2275 = vmatmul.mubr.f32.vlgmr.msra.gmra.mrb[4].mxu1 %v13464_v56  ;;  %2441 = vmatmul.mubr.f32.vlgmr.msra.gmra.mrb[4].mxu0 %v13464_v56  ;;  %v13488_v55 = vadd.f32 %v13433_v62, %v2148_v49  ;;  %v13491_v47 = vadd.f32 %v13438_v41, %v2147_v10  ;;  %18684 = vst [vmem:[#allocation76_spill] sm:$0xff] %v13499_v30  ;;  %v934_v49 = vld [vmem:[%s12806_s25 + $0xa20] sm:$0xff]  ;;  %v943_v10 = vld [vmem:[%s12806_s25 + $0xa68] sm:$0xff] }
 0x320   : > { %9554 = vmatpush1.bf16.msra.mxu1 %v13452_v20  ;;  %9650 = vmatpush1.bf16.msra.mxu0 %v13466_v39  ;;  %18685 = vst [vmem:[#allocation77_spill] sm:$0xff] %v13501_v6  ;;  %v953_v20 = vld [vmem:[%s12806_s25 + $0xab8] sm:$0xff]  ;;  %v13513_v13 = vpack.c.bf16 %v944_v40, %v935_v50  ;;  %v13515_v8 = vpack.c.bf16 %v946_v25, %v937_v19  ;;  %v964_v39 = vld [vmem:[%s12806_s25 + $0xb10] sm:$0xff] }
 0x321   : > { %2280 = vmatprep.mubr.f32.mxu1 %v13488_v55  ;;  %9556 = vmatprep.subr.bf16.mxu1 %v13472_v44  ;;  %v13523_v9 = vadd.f32 %v13433_v62, %v2151_v51  ;;  %v13527_v50 = vpack.c.bf16 %v943_v10, %v934_v49  ;;  %v13529_v40 = vpack.c.bf16 %v945_v53, %v936_v2  ;;  %v952_v19 = vld [vmem:[%s12806_s25 + $0xab0] sm:$0xff]  ;;  %v961_v25 = vld [vmem:[%s12806_s25 + $0xaf8] sm:$0xff]  ;;  %v954_v49 = vld [vmem:[%s12806_s25 + $0xac0] sm:$0xff] }
 0x322   : > { %2446 = vmatprep.mubr.f32.mxu0 %v13488_v55  ;;  %9652 = vmatprep.subr.bf16.mxu0 %v13482_v52  ;;  %18686 = vst [vmem:[#allocation78_spill] sm:$0xff] %v13513_v13  ;;  %18687 = vst [vmem:[#allocation79_spill] sm:$0xff] %v13515_v8  ;;  %v13536_v51 = vadd.f32 %v13438_v41, %v2150_v7  ;;  %v13538_v52 = vpack.c.bf16 %v962_v5, %v953_v20  ;;  %v963_v10 = vld [vmem:[%s12806_s25 + $0xb08] sm:$0xff]  ;;  %v980_v53 = vld [vmem:[%s12806_s25 + $0xb90] sm:$0xff] }
 0x323   : > { %2281 = vmatmul.mubr.f32.gmra.mrb[6].mxu1 %v13491_v47  ;;  %2447 = vmatmul.mubr.f32.gmra.mrb[6].mxu0 %v13491_v47  ;;  %18688 = vst [vmem:[#allocation80_spill] sm:$0xff] %v13527_v50  ;;  %18689 = vst [vmem:[#allocation81_spill] sm:$0xff] %v13529_v40  ;;  %v973_v2 = vld [vmem:[%s12806_s25 + $0xb58] sm:$0xff]  ;;  %v982_v7 = vld [vmem:[%s12806_s25 + $0xba0] sm:$0xff]  ;;  %v13556_v20 = vpack.c.bf16 %v963_v10, %v954_v49  ;;  %v18028_v49 = vmov 0.0  }
 0x324   : > { %9558 = vmatpush1.bf16.msra.mxu1 %v13499_v30  ;;  %9654 = vmatpush1.bf16.msra.mxu0 %v13501_v6  ;;  %18690 = vst [vmem:[#allocation82_spill] sm:$0xff] %v13538_v52  ;;  %v13540_v30 = vpack.c.bf16 %v964_v39, %v955_v31  ;;  %v971_v6 = vld [vmem:[%s12806_s25 + $0xb48] sm:$0xff]  ;;  %v13554_v39 = vpack.c.bf16 %v961_v25, %v952_v19  ;;  %v970_v5 = vld [vmem:[%s12806_s25 + $0xb40] sm:$0xff]  ;;  %v972_v44 = vld [vmem:[%s12806_s25 + $0xb50] sm:$0xff] }
 0x325   : > { %2286 = vmatprep.mubr.f32.mxu1 %v13523_v9  ;;  %2452 = vmatprep.mubr.f32.mxu0 %v13523_v9  ;;  %18693 = vst [vmem:[#allocation85_spill] sm:$0xff] %v13556_v20  ;;  %v979_v31 = vld [vmem:[%s12806_s25 + $0xb88] sm:$0xff]  ;;  %v989_v41 = vld [vmem:[%s12806_s25 + $0xbd8] sm:$0xff]  ;;  %v1000_v25 = vld [vmem:[%s12806_s25 + $0xc30] sm:$0xff] }
 0x326   : > { %18691 = vst [vmem:[#allocation83_spill] sm:$0xff] %v13540_v30  ;;  %9560 = vmatprep.subr.bf16.mxu1 %v13513_v13  ;;  %9656 = vmatprep.subr.bf16.mxu0 %v13515_v8  ;;  %18692 = vst [vmem:[#allocation84_spill] sm:$0xff] %v13554_v39  ;;  %v13562_v8 = vpack.c.bf16 %v980_v53, %v971_v6  ;;  %v13564_v13 = vpack.c.bf16 %v982_v7, %v973_v2  ;;  %v991_v19 = vld [vmem:[%s12806_s25 + $0xbe8] sm:$0xff]  ;;  %v988_v53 = vld [vmem:[%s12806_s25 + $0xbd0] sm:$0xff] }
 0x327   : > { %2287 = vmatmul.mubr.f32.gmra.mrb[8].mxu1 %v13536_v51  ;;  %2453 = vmatmul.mubr.f32.gmra.mrb[8].mxu0 %v13536_v51  ;;  %v13576_v6 = vpack.c.bf16 %v979_v31, %v970_v5  ;;  %v997_v2 = vld [vmem:[%s12806_s25 + $0xc18] sm:$0xff]  ;;  %v1007_v5 = vld [vmem:[%s12806_s25 + $0xc68] sm:$0xff]  ;;  %v1018_v31 = vld [vmem:[%s12806_s25 + $0xcc0] sm:$0xff] }
 0x328   : > { %9562 = vmatpush1.bf16.msra.mxu1 %v13527_v50  ;;  %9658 = vmatpush1.bf16.msra.mxu0 %v13529_v40  ;;  %18694 = vst [vmem:[#allocation86_spill] sm:$0xff] %v13562_v8  ;;  %18695 = vst [vmem:[#allocation87_spill] sm:$0xff] %v13564_v13  ;;  %v981_v50 = vld [vmem:[%s12806_s25 + $0xb98] sm:$0xff]  ;;  %v998_v40 = vld [vmem:[%s12806_s25 + $0xc20] sm:$0xff] }
 0x329   : > { %9564 = vmatprep.subr.bf16.mxu1 %v13538_v52  ;;  %9660 = vmatprep.subr.bf16.mxu0 %v13540_v30  ;;  %18696 = vst [vmem:[#allocation88_spill] sm:$0xff] %v13576_v6  ;;  %v13578_v10 = vpack.c.bf16 %v981_v50, %v972_v44  ;;  %v13584_v7 = vpack.c.bf16 %v998_v40, %v989_v41  ;;  %v990_v30 = vld [vmem:[%s12806_s25 + $0xbe0] sm:$0xff]  ;;  %v1016_v44 = vld [vmem:[%s12806_s25 + $0xcb0] sm:$0xff]  ;;  %v1009_v50 = vld [vmem:[%s12806_s25 + $0xc78] sm:$0xff] }
 0x32a   : > { %2357 = vmatprep.mubr.f32.mxu1 %v18028_v49  ;;  %2523 = vmatprep.mubr.f32.mxu0 %v18028_v49  ;;  %v13586_v49 = vpack.c.bf16 %v1000_v25, %v991_v19  ;;  %v13596_v41 = vpack.c.bf16 %v997_v2, %v988_v53  ;;  %v1006_v19 = vld [vmem:[%s12806_s25 + $0xc60] sm:$0xff]  ;;  %v1015_v25 = vld [vmem:[%s12806_s25 + $0xca8] sm:$0xff]  ;;  %v1025_v53 = vld [vmem:[%s12806_s25 + $0xcf8] sm:$0xff] }
 0x32b   : > { %18697 = vst [vmem:[#allocation89_spill] sm:$0xff] %v13578_v10  ;;  %18698 = vst [vmem:[#allocation90_spill] sm:$0xff] %v13584_v7  ;;  %v1034_v2 = vld [vmem:[%s12806_s25 + $0xd40] sm:$0xff] }
 0x32c   : > { %9566 = vmatpush1.bf16.msra.mxu1 %v13554_v39  ;;  %9662 = vmatpush1.bf16.msra.mxu0 %v13556_v20  ;;  %18699 = vst [vmem:[#allocation91_spill] sm:$0xff] %v13586_v49  ;;  %v999_v39 = vld [vmem:[%s12806_s25 + $0xc28] sm:$0xff]  ;;  %18700 = vst [vmem:[#allocation92_spill] sm:$0xff] %v13596_v41  ;;  %v1767_v20 = vld [vmem:[%s12936_s24 + $0x58] sm:$0xff] }
 0x32d   : > { %9568 = vmatprep.subr.bf16.mxu1 %v13562_v8  ;;  %9664 = vmatprep.subr.bf16.mxu0 %v13564_v13  ;;  %v13598_v40 = vpack.c.bf16 %v999_v39, %v990_v30  ;;  %v13604_v13 = vpack.c.bf16 %v1016_v44, %v1007_v5  ;;  %v1008_v8 = vld [vmem:[%s12806_s25 + $0xc70] sm:$0xff]  ;;  %v1027_v30 = vld [vmem:[%s12806_s25 + $0xd08] sm:$0xff]  ;;  %v13617_v5 = vpack.c.bf16 %v1015_v25, %v1006_v19  ;;  %v626_v62 = vld [vmem:[%s12806_s25 + $0x80] sm:$0xff] }
 0x32e   : > { %v1036_v39 = vld [vmem:[%s12806_s25 + $0xd50] sm:$0xff]  ;;  %v1035_v19 = vld [vmem:[%s12806_s25 + $0xd48] sm:$0xff] }
 0x32f   : > { %18701 = vst [vmem:[#allocation93_spill] sm:$0xff] %v13598_v40  ;;  %18702 = vst [vmem:[#allocation94_spill] sm:$0xff] %v13604_v13  ;;  %v624_v25 = vld [vmem:[%s12806_s25 + $0x70] sm:$0xff] }
 0x330   : > { %9570 = vmatpush1.bf16.msra.mxu1 %v13576_v6  ;;  %9666 = vmatpush1.bf16.msra.mxu0 %v13578_v10  ;;  %v13606_v6 = vpack.c.bf16 %v1018_v31, %v1009_v50  ;;  %v1017_v10 = vld [vmem:[%s12806_s25 + $0xcb8] sm:$0xff]  ;;  %18704 = vst [vmem:[#allocation96_spill] sm:$0xff] %v13617_v5  ;;  %v1024_v50 = vld [vmem:[%s12806_s25 + $0xcf0] sm:$0xff] }
 0x331   : > { %9572 = vmatprep.subr.bf16.mxu1 %v13584_v7  ;;  %9668 = vmatprep.subr.bf16.mxu0 %v13586_v49  ;;  %v13619_v44 = vpack.c.bf16 %v1017_v10, %v1008_v8  ;;  %v1033_v31 = vld [vmem:[%s12806_s25 + $0xd38] sm:$0xff]  ;;  %v1026_v49 = vld [vmem:[%s12806_s25 + $0xd00] sm:$0xff]  ;;  %v12297_v7 = vld [vmem:[%s12936_s24 + $0x10] sm:$0xff]  ;;  %v2125_v8 = vmul.f32 %v13428_v32, %v13264_v37 }
 0x332   : > { %18703 = vst [vmem:[#allocation95_spill] sm:$0xff] %v13606_v6  ;;  %v13626_v52 = vrot.slane %v12297_v7, %v13416_v23  ;;  %v615_v10 = vld [vmem:[%s12806_s25 + $0x28] sm:$0xff]  ;;  %v617_v7 = vld [vmem:[%s12806_s25 + $0x38] sm:$0xff]  ;;  %v13648_v37 = vpack.c.bf16 %v1035_v19, %v1026_v49  ;;  %v2128_v49 = vmul.f32 %v13444_v60, %v13286_v17 }
 0x333   : > { %18705 = vst [vmem:[#allocation97_spill] sm:$0xff] %v13619_v44  ;;  %v13650_v32 = vpack.c.bf16 %v624_v25, %v615_v10  ;;  %v635_v19 = vld [vmem:[%s12806_s25 + $0xc8] sm:$0xff]  ;;  %v644_v10 = vld [vmem:[%s12806_s25 + $0x110] sm:$0xff] }
 0x334   : > { %9574 = vmatpush1.bf16.msra.mxu1 %v13596_v41  ;;  %9670 = vmatpush1.bf16.msra.mxu0 %v13598_v40  ;;  %18706 = vst [vmem:[#allocation98_spill] sm:$0xff] %v13626_v52  ;;  %v13630_v41 = vpack.c.bf16 %v1034_v2, %v1025_v53  ;;  %v13632_v40 = vpack.c.bf16 %v1036_v39, %v1027_v30  ;;  %18711 = vst [vmem:[#allocation103_spill] sm:$0xff] %v13648_v37  ;;  %v614_v2 = vld [vmem:[%s12806_s25 + $0x20] sm:$0xff]  ;;  %v623_v30 = vld [vmem:[%s12806_s25 + $0x68] sm:$0xff] }
 0x335   : > { %9576 = vmatprep.subr.bf16.mxu1 %v13604_v13  ;;  %9672 = vmatprep.subr.bf16.mxu0 %v13606_v6  ;;  %v13642_v13 = vrot.slane %v1767_v20, %v12939_v22  ;;  %v13646_v53 = vpack.c.bf16 %v1033_v31, %v1024_v50  ;;  %18712 = vst [vmem:[#allocation104_spill] sm:$0xff] %v13650_v32  ;;  %v616_v39 = vld [vmem:[%s12806_s25 + $0x30] sm:$0xff]  ;;  %v633_v50 = vld [vmem:[%s12806_s25 + $0xb8] sm:$0xff]  ;;  %v642_v31 = vld [vmem:[%s12806_s25 + $0x100] sm:$0xff] }
 0x336   : > { %18707 = vst [vmem:[#allocation99_spill] sm:$0xff] %v13630_v41  ;;  %18708 = vst [vmem:[#allocation100_spill] sm:$0xff] %v13632_v40  ;;  %v2146_v22 = vmul.f32 %v13626_v52, %v2125_v8  ;;  %v13656_v20 = vpack.c.bf16 %v626_v62, %v617_v7  ;;  %v13669_v62 = vpack.c.bf16 %v623_v30, %v614_v2  ;;  %v632_v25 = vld [vmem:[%s12806_s25 + $0xb0] sm:$0xff]  ;;  %v641_v7 = vld [vmem:[%s12806_s25 + $0xf8] sm:$0xff] }
 0x337   : > { %18709 = vst [vmem:[#allocation101_spill] sm:$0xff] %v13642_v13  ;;  %18710 = vst [vmem:[#allocation102_spill] sm:$0xff] %v13646_v53  ;;  %v2149_v60 = vmul.f32 %v13626_v52, %v2128_v49  ;;  %v2131_v2 = vmul.f32 %v13450_v14, %v13273_v28  ;;  %v13687_v30 = vpack.c.bf16 %v644_v10, %v635_v19  ;;  %v662_v49 = vld [vmem:[%s12806_s25 + $0x1a0] sm:$0xff] }
 0x338   : > { %9578 = vmatpush1.bf16.msra.mxu1 %v13617_v5  ;;  %9674 = vmatpush1.bf16.msra.mxu0 %v13619_v44  ;;  %18713 = vst [vmem:[#allocation105_spill] sm:$0xff] %v13656_v20  ;;  %v625_v44 = vld [vmem:[%s12806_s25 + $0x78] sm:$0xff]  ;;  %18714 = vst [vmem:[#allocation106_spill] sm:$0xff] %v13669_v62  ;;  %v13675_v17 = vadd.f32 %v13642_v13, %v2146_v22  ;;  %v651_v22 = vld [vmem:[%s12806_s25 + $0x148] sm:$0xff]  ;;  %v13697_v28 = vpack.c.bf16 %v641_v7, %v632_v25 }
 0x339   : > { %9580 = vmatprep.subr.bf16.mxu1 %v13630_v41  ;;  %9676 = vmatprep.subr.bf16.mxu0 %v13632_v40  ;;  %v13671_v8 = vpack.c.bf16 %v625_v44, %v616_v39  ;;  %v13685_v44 = vpack.c.bf16 %v642_v31, %v633_v50  ;;  %18717 = vst [vmem:[#allocation109_spill] sm:$0xff] %v13687_v30  ;;  %v660_v39 = vld [vmem:[%s12806_s25 + $0x190] sm:$0xff]  ;;  %v18720_v50 = vmov 0.0   ;;  %v650_v10 = vld [vmem:[%s12806_s25 + $0x140] sm:$0xff]  ;;  %v661_v7 = vld [vmem:[%s12806_s25 + $0x198] sm:$0xff] }
 0x33a   : > { %18718 = vst [vmem:[#allocation110_spill] sm:$0xff] %v13697_v28  ;;  %v13704_v31 = vadd.f32 %v13642_v13, %v2149_v60  ;;  %v2152_v19 = vmul.f32 %v13626_v52, %v2131_v2  ;;  %v652_v25 = vld [vmem:[%s12806_s25 + $0x150] sm:$0xff]  ;;  %v678_v60 = vld [vmem:[%s12806_s25 + $0x220] sm:$0xff]  ;;  %v671_v2 = vld [vmem:[%s12806_s25 + $0x1e8] sm:$0xff] }
 0x33b   : > { %18715 = vst [vmem:[#allocation107_spill] sm:$0xff] %v13671_v8  ;;  %18716 = vst [vmem:[#allocation108_spill] sm:$0xff] %v13685_v44 }
 0x33c   : > { %9582 = vmatpush1.bf16.msra.mxu1 %v13646_v53  ;;  %9678 = vmatpush1.bf16.msra.mxu0 %v13648_v37  ;;  %v634_v53 = vld [vmem:[%s12806_s25 + $0xc0] sm:$0xff]  ;;  %v643_v37 = vld [vmem:[%s12806_s25 + $0x108] sm:$0xff] }
 0x33d   : > { %9680 = vmatprep.subr.bf16.mxu1 %v13650_v32  ;;  %9776 = vmatprep.subr.bf16.mxu0 %v13656_v20  ;;  %v653_v20 = vld [vmem:[%s12806_s25 + $0x158] sm:$0xff]  ;;  %v13699_v14 = vpack.c.bf16 %v643_v37, %v634_v53  ;;  %v13711_v53 = vpack.c.bf16 %v660_v39, %v651_v22  ;;  %v13730_v22 = vadd.f32 %v13642_v13, %v2152_v19  ;;  %v670_v32 = vld [vmem:[%s12806_s25 + $0x1e0] sm:$0xff]  ;;  %v696_v19 = vld [vmem:[%s12806_s25 + $0x2b0] sm:$0xff] }
 0x33e   : > { %v13713_v37 = vpack.c.bf16 %v662_v49, %v653_v20  ;;  %v13732_v39 = vpack.c.bf16 %v661_v7, %v652_v25  ;;  %v668_v49 = vld [vmem:[%s12806_s25 + $0x1d0] sm:$0xff]  ;;  %v689_v25 = vld [vmem:[%s12806_s25 + $0x278] sm:$0xff]  ;;  %v698_v7 = vld [vmem:[%s12806_s25 + $0x2c0] sm:$0xff] }
 0x33f   : > { %2358 = vmatmul.mubr.f32.vlgmr.msra.gmra.mrb[4].mxu1 %v13675_v17  ;;  %2524 = vmatmul.mubr.f32.vlgmr.msra.gmra.mrb[4].mxu0 %v13675_v17  ;;  %18719 = vst [vmem:[#allocation111_spill] sm:$0xff] %v13699_v14  ;;  %18721 = vst [vmem:[#allocation112_spill] sm:$0xff] %v13711_v53 }
 0x340   : > { %9682 = vmatpush1.bf16.msra.mxu1 %v13669_v62  ;;  %9778 = vmatpush1.bf16.msra.mxu0 %v13671_v8  ;;  %v659_v62 = vld [vmem:[%s12806_s25 + $0x188] sm:$0xff]  ;;  %18722 = vst [vmem:[#allocation113_spill] sm:$0xff] %v13713_v37  ;;  %v669_v8 = vld [vmem:[%s12806_s25 + $0x1d8] sm:$0xff]  ;;  %18724 = vst [vmem:[#allocation115_spill] sm:$0xff] %v13732_v39 }
 0x341   : > { %2363 = vmatprep.mubr.f32.mxu1 %v18720_v50  ;;  %2529 = vmatprep.mubr.f32.mxu0 %v18720_v50  ;;  %v13725_v20 = vpack.c.bf16 %v659_v62, %v650_v10  ;;  %v13739_v62 = vpack.c.bf16 %v678_v60, %v669_v8 }
 0x342   : > { %9684 = vmatprep.subr.bf16.mxu1 %v13685_v44  ;;  %9780 = vmatprep.subr.bf16.mxu0 %v13687_v30  ;;  %v680_v44 = vld [vmem:[%s12806_s25 + $0x230] sm:$0xff]  ;;  %v677_v30 = vld [vmem:[%s12806_s25 + $0x218] sm:$0xff] }
 0x343   : > { %2364 = vmatmul.mubr.f32.gmra.mrb[6].mxu1 %v13704_v31  ;;  %2530 = vmatmul.mubr.f32.gmra.mrb[6].mxu0 %v13704_v31  ;;  %18723 = vst [vmem:[#allocation114_spill] sm:$0xff] %v13725_v20  ;;  %18725 = vst [vmem:[#allocation116_spill] sm:$0xff] %v13739_v62  ;;  %v13741_v10 = vpack.c.bf16 %v680_v44, %v671_v2  ;;  %v13752_v8 = vpack.c.bf16 %v677_v30, %v668_v49  ;;  %v686_v2 = vld [vmem:[%s12806_s25 + $0x260] sm:$0xff]  ;;  %v697_v49 = vld [vmem:[%s12806_s25 + $0x2b8] sm:$0xff] }
 0x344   : > { %9686 = vmatpush1.bf16.msra.mxu1 %v13697_v28  ;;  %9782 = vmatpush1.bf16.msra.mxu0 %v13699_v14  ;;  %v679_v14 = vld [vmem:[%s12806_s25 + $0x228] sm:$0xff]  ;;  %v13765_v30 = vpack.c.bf16 %v698_v7, %v689_v25 }
 0x345   : > { %2369 = vmatprep.mubr.f32.mxu1 %v18720_v50  ;;  %2535 = vmatprep.mubr.f32.mxu0 %v18720_v50  ;;  %18726 = vst [vmem:[#allocation117_spill] sm:$0xff] %v13741_v10  ;;  %v687_v28 = vld [vmem:[%s12806_s25 + $0x268] sm:$0xff]  ;;  %18727 = vst [vmem:[#allocation118_spill] sm:$0xff] %v13752_v8  ;;  %v13756_v44 = vpack.c.bf16 %v679_v14, %v670_v32  ;;  %v714_v32 = vld [vmem:[%s12806_s25 + $0x340] sm:$0xff] }
 0x346   : > { %9688 = vmatprep.subr.bf16.mxu1 %v13711_v53  ;;  %9784 = vmatprep.subr.bf16.mxu0 %v13713_v37  ;;  %v13758_v60 = vpack.c.bf16 %v696_v19, %v687_v28  ;;  %v695_v37 = vld [vmem:[%s12806_s25 + $0x2a8] sm:$0xff]  ;;  %v688_v53 = vld [vmem:[%s12806_s25 + $0x270] sm:$0xff]  ;;  %18730 = vst [vmem:[#allocation121_spill] sm:$0xff] %v13765_v30 }
 0x347   : > { %2370 = vmatmul.mubr.f32.gmra.mrb[8].mxu1 %v13730_v22  ;;  %2536 = vmatmul.mubr.f32.gmra.mrb[8].mxu0 %v13730_v22  ;;  %18728 = vst [vmem:[#allocation119_spill] sm:$0xff] %v13756_v44  ;;  %v707_v28 = vld [vmem:[%s12806_s25 + $0x308] sm:$0xff]  ;;  %v716_v14 = vld [vmem:[%s12806_s25 + $0x350] sm:$0xff]  ;;  %v13773_v19 = vpack.c.bf16 %v695_v37, %v686_v2  ;;  %v13777_v25 = vpack.c.bf16 %v697_v49, %v688_v53  ;;  %v725_v53 = vld [vmem:[%s12806_s25 + $0x398] sm:$0xff] }
 0x348   : > { %9690 = vmatpush1.bf16.msra.mxu1 %v13725_v20  ;;  %2606 = vmatprep.mubr.f32.mxu1 %v13461_v35  ;;  %18729 = vst [vmem:[#allocation120_spill] sm:$0xff] %v13758_v60  ;;  %v706_v20 = vld [vmem:[%s12806_s25 + $0x300] sm:$0xff]  ;;  %v13785_v13 = vpack.c.bf16 %v716_v14, %v707_v28  ;;  %v715_v37 = vld [vmem:[%s12806_s25 + $0x348] sm:$0xff] }
 0x349   : > { %9786 = vmatpush1.bf16.msra.mxu0 %v13732_v39  ;;  %2772 = vmatprep.mubr.f32.mxu0 %v13461_v35  ;;  %v705_v39 = vld [vmem:[%s12806_s25 + $0x2f8] sm:$0xff]  ;;  %18731 = vst [vmem:[#allocation122_spill] sm:$0xff] %v13773_v19  ;;  %18732 = vst [vmem:[#allocation123_spill] sm:$0xff] %v13777_v25  ;;  %v723_v2 = vld [vmem:[%s12806_s25 + $0x388] sm:$0xff] }
 0x34a   : > { %9692 = vmatprep.subr.bf16.mxu1 %v13739_v62  ;;  %9788 = vmatprep.subr.bf16.mxu0 %v13741_v10  ;;  %v13779_v7 = vpack.c.bf16 %v714_v32, %v705_v39  ;;  %v704_v10 = vld [vmem:[%s12806_s25 + $0x2f0] sm:$0xff]  ;;  %v713_v62 = vld [vmem:[%s12806_s25 + $0x338] sm:$0xff]  ;;  %18734 = vst [vmem:[#allocation125_spill] sm:$0xff] %v13785_v13  ;;  %v734_v39 = vld [vmem:[%s12806_s25 + $0x3e0] sm:$0xff]  ;;  %v13797_v32 = vpack.c.bf16 %v715_v37, %v706_v20 }
 0x34b   : > { %v13793_v49 = vpack.c.bf16 %v713_v62, %v704_v10  ;;  %v722_v14 = vld [vmem:[%s12806_s25 + $0x380] sm:$0xff]  ;;  %v733_v62 = vld [vmem:[%s12806_s25 + $0x3d8] sm:$0xff]  ;;  %v743_v20 = vld [vmem:[%s12806_s25 + $0x428] sm:$0xff] }
 0x34c   : > { %9694 = vmatpush1.bf16.msra.mxu1 %v13752_v8  ;;  %18733 = vst [vmem:[#allocation124_spill] sm:$0xff] %v13779_v7  ;;  %18736 = vst [vmem:[#allocation127_spill] sm:$0xff] %v13797_v32  ;;  %v13805_v8 = vpack.c.bf16 %v734_v39, %v725_v53  ;;  %v741_v10 = vld [vmem:[%s12806_s25 + $0x418] sm:$0xff]  ;;  %v740_v39 = vld [vmem:[%s12806_s25 + $0x410] sm:$0xff] }
 0x34d   : > { %9790 = vmatpush1.bf16.msra.mxu0 %v13756_v44  ;;  %9696 = vmatprep.subr.bf16.mxu1 %v13758_v60  ;;  %v732_v44 = vld [vmem:[%s12806_s25 + $0x3d0] sm:$0xff]  ;;  %18735 = vst [vmem:[#allocation126_spill] sm:$0xff] %v13793_v49 }
 0x34e   : > { %9792 = vmatprep.subr.bf16.mxu0 %v13765_v30  ;;  %v13799_v28 = vpack.c.bf16 %v732_v44, %v723_v2  ;;  %v731_v30 = vld [vmem:[%s12806_s25 + $0x3c8] sm:$0xff]  ;;  %v724_v60 = vld [vmem:[%s12806_s25 + $0x390] sm:$0xff]  ;;  %18738 = vst [vmem:[#allocation129_spill] sm:$0xff] %v13805_v8 }
 0x34f   : > { %v752_v44 = vld [vmem:[%s12806_s25 + $0x470] sm:$0xff]  ;;  %v13813_v37 = vpack.c.bf16 %v731_v30, %v722_v14  ;;  %v13817_v2 = vpack.c.bf16 %v733_v62, %v724_v60  ;;  %v751_v30 = vld [vmem:[%s12806_s25 + $0x468] sm:$0xff]  ;;  %v761_v60 = vld [vmem:[%s12806_s25 + $0x4b8] sm:$0xff] }
 0x350   : > { %9698 = vmatpush1.bf16.msra.mxu1 %v13773_v19  ;;  %18737 = vst [vmem:[#allocation128_spill] sm:$0xff] %v13799_v28  ;;  %v13825_v19 = vpack.c.bf16 %v752_v44, %v743_v20  ;;  %v759_v14 = vld [vmem:[%s12806_s25 + $0x4a8] sm:$0xff]  ;;  %v758_v44 = vld [vmem:[%s12806_s25 + $0x4a0] sm:$0xff] }
 0x351   : > { %9794 = vmatpush1.bf16.msra.mxu0 %v13777_v25  ;;  %9700 = vmatprep.subr.bf16.mxu1 %v13779_v7  ;;  %v750_v25 = vld [vmem:[%s12806_s25 + $0x460] sm:$0xff]  ;;  %18739 = vst [vmem:[#allocation130_spill] sm:$0xff] %v13813_v37  ;;  %18740 = vst [vmem:[#allocation131_spill] sm:$0xff] %v13817_v2 }
 0x352   : > { %9796 = vmatprep.subr.bf16.mxu0 %v13785_v13  ;;  %v13819_v53 = vpack.c.bf16 %v750_v25, %v741_v10  ;;  %v749_v13 = vld [vmem:[%s12806_s25 + $0x458] sm:$0xff]  ;;  %v742_v7 = vld [vmem:[%s12806_s25 + $0x420] sm:$0xff]  ;;  %18742 = vst [vmem:[#allocation133_spill] sm:$0xff] %v13825_v19 }
 0x353   : > { %v770_v25 = vld [vmem:[%s12806_s25 + $0x500] sm:$0xff]  ;;  %v13833_v62 = vpack.c.bf16 %v749_v13, %v740_v39  ;;  %v13837_v10 = vpack.c.bf16 %v751_v30, %v742_v7  ;;  %v769_v13 = vld [vmem:[%s12806_s25 + $0x4f8] sm:$0xff]  ;;  %v779_v7 = vld [vmem:[%s12806_s25 + $0x548] sm:$0xff] }
 0x354   : > { %9702 = vmatpush1.bf16.msra.mxu1 %v13793_v49  ;;  %18741 = vst [vmem:[#allocation132_spill] sm:$0xff] %v13819_v53  ;;  %v13845_v49 = vpack.c.bf16 %v770_v25, %v761_v60  ;;  %v777_v39 = vld [vmem:[%s12806_s25 + $0x538] sm:$0xff]  ;;  %v776_v25 = vld [vmem:[%s12806_s25 + $0x530] sm:$0xff] }
 0x355   : > { %9798 = vmatpush1.bf16.msra.mxu0 %v13797_v32  ;;  %9704 = vmatprep.subr.bf16.mxu1 %v13799_v28  ;;  %v768_v32 = vld [vmem:[%s12806_s25 + $0x4f0] sm:$0xff]  ;;  %18743 = vst [vmem:[#allocation134_spill] sm:$0xff] %v13833_v62  ;;  %18744 = vst [vmem:[#allocation135_spill] sm:$0xff] %v13837_v10 }
 0x356   : > { %9800 = vmatprep.subr.bf16.mxu0 %v13805_v8  ;;  %v13839_v20 = vpack.c.bf16 %v768_v32, %v759_v14  ;;  %v767_v8 = vld [vmem:[%s12806_s25 + $0x4e8] sm:$0xff]  ;;  %v760_v28 = vld [vmem:[%s12806_s25 + $0x4b0] sm:$0xff]  ;;  %18746 = vst [vmem:[#allocation137_spill] sm:$0xff] %v13845_v49 }
 0x357   : > { %v788_v32 = vld [vmem:[%s12806_s25 + $0x590] sm:$0xff]  ;;  %v13853_v30 = vpack.c.bf16 %v767_v8, %v758_v44  ;;  %v13857_v14 = vpack.c.bf16 %v769_v13, %v760_v28  ;;  %v787_v8 = vld [vmem:[%s12806_s25 + $0x588] sm:$0xff]  ;;  %v797_v28 = vld [vmem:[%s12806_s25 + $0x5d8] sm:$0xff] }
 0x358   : > { %9706 = vmatpush1.bf16.msra.mxu1 %v13813_v37  ;;  %18745 = vst [vmem:[#allocation136_spill] sm:$0xff] %v13839_v20  ;;  %v13865_v37 = vpack.c.bf16 %v788_v32, %v779_v7  ;;  %v795_v44 = vld [vmem:[%s12806_s25 + $0x5c8] sm:$0xff]  ;;  %v794_v32 = vld [vmem:[%s12806_s25 + $0x5c0] sm:$0xff] }
 0x359   : > { %9802 = vmatpush1.bf16.msra.mxu0 %v13817_v2  ;;  %9708 = vmatprep.subr.bf16.mxu1 %v13819_v53  ;;  %v786_v2 = vld [vmem:[%s12806_s25 + $0x580] sm:$0xff]  ;;  %18747 = vst [vmem:[#allocation138_spill] sm:$0xff] %v13853_v30  ;;  %18748 = vst [vmem:[#allocation139_spill] sm:$0xff] %v13857_v14 }
 0x35a   : > { %9804 = vmatprep.subr.bf16.mxu0 %v13825_v19  ;;  %v13859_v60 = vpack.c.bf16 %v786_v2, %v777_v39  ;;  %v785_v19 = vld [vmem:[%s12806_s25 + $0x578] sm:$0xff]  ;;  %v778_v53 = vld [vmem:[%s12806_s25 + $0x540] sm:$0xff]  ;;  %18750 = vst [vmem:[#allocation141_spill] sm:$0xff] %v13865_v37 }
 0x35b   : > { %v806_v2 = vld [vmem:[%s12806_s25 + $0x620] sm:$0xff]  ;;  %v13873_v13 = vpack.c.bf16 %v785_v19, %v776_v25  ;;  %v13877_v39 = vpack.c.bf16 %v787_v8, %v778_v53  ;;  %v805_v19 = vld [vmem:[%s12806_s25 + $0x618] sm:$0xff]  ;;  %v815_v53 = vld [vmem:[%s12806_s25 + $0x668] sm:$0xff] }
 0x35c   : > { %9710 = vmatpush1.bf16.msra.mxu1 %v13833_v62  ;;  %18749 = vst [vmem:[#allocation140_spill] sm:$0xff] %v13859_v60  ;;  %v13885_v62 = vpack.c.bf16 %v806_v2, %v797_v28  ;;  %v813_v25 = vld [vmem:[%s12806_s25 + $0x658] sm:$0xff]  ;;  %v812_v2 = vld [vmem:[%s12806_s25 + $0x650] sm:$0xff] }
 0x35d   : > { %9806 = vmatpush1.bf16.msra.mxu0 %v13837_v10  ;;  %9712 = vmatprep.subr.bf16.mxu1 %v13839_v20  ;;  %v804_v10 = vld [vmem:[%s12806_s25 + $0x610] sm:$0xff]  ;;  %18751 = vst [vmem:[#allocation142_spill] sm:$0xff] %v13873_v13  ;;  %18752 = vst [vmem:[#allocation143_spill] sm:$0xff] %v13877_v39 }
 0x35e   : > { %9808 = vmatprep.subr.bf16.mxu0 %v13845_v49  ;;  %v13879_v7 = vpack.c.bf16 %v804_v10, %v795_v44  ;;  %v803_v49 = vld [vmem:[%s12806_s25 + $0x608] sm:$0xff]  ;;  %v796_v20 = vld [vmem:[%s12806_s25 + $0x5d0] sm:$0xff]  ;;  %18754 = vst [vmem:[#allocation145_spill] sm:$0xff] %v13885_v62 }
 0x35f   : > { %v824_v10 = vld [vmem:[%s12806_s25 + $0x6b0] sm:$0xff]  ;;  %v13893_v8 = vpack.c.bf16 %v803_v49, %v794_v32  ;;  %v13897_v44 = vpack.c.bf16 %v805_v19, %v796_v20  ;;  %v823_v49 = vld [vmem:[%s12806_s25 + $0x6a8] sm:$0xff]  ;;  %v833_v20 = vld [vmem:[%s12806_s25 + $0x6f8] sm:$0xff] }
 0x360   : > { %9714 = vmatpush1.bf16.msra.mxu1 %v13853_v30  ;;  %18753 = vst [vmem:[#allocation144_spill] sm:$0xff] %v13879_v7  ;;  %v13905_v30 = vpack.c.bf16 %v824_v10, %v815_v53  ;;  %v831_v32 = vld [vmem:[%s12806_s25 + $0x6e8] sm:$0xff]  ;;  %v830_v10 = vld [vmem:[%s12806_s25 + $0x6e0] sm:$0xff] }
 0x361   : > { %9810 = vmatpush1.bf16.msra.mxu0 %v13857_v14  ;;  %9716 = vmatprep.subr.bf16.mxu1 %v13859_v60  ;;  %v822_v14 = vld [vmem:[%s12806_s25 + $0x6a0] sm:$0xff]  ;;  %18755 = vst [vmem:[#allocation146_spill] sm:$0xff] %v13893_v8  ;;  %18756 = vst [vmem:[#allocation147_spill] sm:$0xff] %v13897_v44 }
 0x362   : > { %9812 = vmatprep.subr.bf16.mxu0 %v13865_v37  ;;  %v13899_v28 = vpack.c.bf16 %v822_v14, %v813_v25  ;;  %v821_v37 = vld [vmem:[%s12806_s25 + $0x698] sm:$0xff]  ;;  %v814_v60 = vld [vmem:[%s12806_s25 + $0x660] sm:$0xff]  ;;  %18758 = vst [vmem:[#allocation149_spill] sm:$0xff] %v13905_v30 }
 0x363   : > { %v842_v14 = vld [vmem:[%s12806_s25 + $0x740] sm:$0xff]  ;;  %v13913_v19 = vpack.c.bf16 %v821_v37, %v812_v2  ;;  %v13917_v25 = vpack.c.bf16 %v823_v49, %v814_v60  ;;  %v841_v37 = vld [vmem:[%s12806_s25 + $0x738] sm:$0xff]  ;;  %v851_v60 = vld [vmem:[%s12806_s25 + $0x788] sm:$0xff] }
 0x364   : > { %9718 = vmatpush1.bf16.msra.mxu1 %v13873_v13  ;;  %18757 = vst [vmem:[#allocation148_spill] sm:$0xff] %v13899_v28  ;;  %v13925_v13 = vpack.c.bf16 %v842_v14, %v833_v20  ;;  %v849_v2 = vld [vmem:[%s12806_s25 + $0x778] sm:$0xff]  ;;  %v848_v14 = vld [vmem:[%s12806_s25 + $0x770] sm:$0xff] }
 0x365   : > { %9814 = vmatpush1.bf16.msra.mxu0 %v13877_v39  ;;  %9720 = vmatprep.subr.bf16.mxu1 %v13879_v7  ;;  %v840_v39 = vld [vmem:[%s12806_s25 + $0x730] sm:$0xff]  ;;  %18759 = vst [vmem:[#allocation150_spill] sm:$0xff] %v13913_v19  ;;  %18760 = vst [vmem:[#allocation151_spill] sm:$0xff] %v13917_v25 }
 0x366   : > { %9816 = vmatprep.subr.bf16.mxu0 %v13885_v62  ;;  %v13919_v53 = vpack.c.bf16 %v840_v39, %v831_v32  ;;  %v839_v62 = vld [vmem:[%s12806_s25 + $0x728] sm:$0xff]  ;;  %v832_v7 = vld [vmem:[%s12806_s25 + $0x6f0] sm:$0xff]  ;;  %18762 = vst [vmem:[#allocation153_spill] sm:$0xff] %v13925_v13 }
 0x367   : > { %v860_v39 = vld [vmem:[%s12806_s25 + $0x7d0] sm:$0xff]  ;;  %v13933_v49 = vpack.c.bf16 %v839_v62, %v830_v10  ;;  %v13937_v32 = vpack.c.bf16 %v841_v37, %v832_v7  ;;  %v859_v62 = vld [vmem:[%s12806_s25 + $0x7c8] sm:$0xff]  ;;  %v869_v7 = vld [vmem:[%s12806_s25 + $0x818] sm:$0xff] }
 0x368   : > { %9722 = vmatpush1.bf16.msra.mxu1 %v13893_v8  ;;  %18761 = vst [vmem:[#allocation152_spill] sm:$0xff] %v13919_v53  ;;  %v13945_v8 = vpack.c.bf16 %v860_v39, %v851_v60  ;;  %v867_v10 = vld [vmem:[%s12806_s25 + $0x808] sm:$0xff]  ;;  %v866_v39 = vld [vmem:[%s12806_s25 + $0x800] sm:$0xff] }
 0x369   : > { %9818 = vmatpush1.bf16.msra.mxu0 %v13897_v44  ;;  %9724 = vmatprep.subr.bf16.mxu1 %v13899_v28  ;;  %v858_v44 = vld [vmem:[%s12806_s25 + $0x7c0] sm:$0xff]  ;;  %18763 = vst [vmem:[#allocation154_spill] sm:$0xff] %v13933_v49  ;;  %18764 = vst [vmem:[#allocation155_spill] sm:$0xff] %v13937_v32 }
 0x36a   : > { %9820 = vmatprep.subr.bf16.mxu0 %v13905_v30  ;;  %v13939_v20 = vpack.c.bf16 %v858_v44, %v849_v2  ;;  %v857_v30 = vld [vmem:[%s12806_s25 + $0x7b8] sm:$0xff]  ;;  %v850_v28 = vld [vmem:[%s12806_s25 + $0x780] sm:$0xff]  ;;  %18766 = vst [vmem:[#allocation157_spill] sm:$0xff] %v13945_v8 }
 0x36b   : > { %v878_v44 = vld [vmem:[%s12806_s25 + $0x860] sm:$0xff]  ;;  %v13953_v37 = vpack.c.bf16 %v857_v30, %v848_v14  ;;  %v13957_v2 = vpack.c.bf16 %v859_v62, %v850_v28  ;;  %v877_v30 = vld [vmem:[%s12806_s25 + $0x858] sm:$0xff]  ;;  %v887_v28 = vld [vmem:[%s12806_s25 + $0x8a8] sm:$0xff] }
 0x36c   : > { %9726 = vmatpush1.bf16.msra.mxu1 %v13913_v19  ;;  %18765 = vst [vmem:[#allocation156_spill] sm:$0xff] %v13939_v20  ;;  %v13965_v19 = vpack.c.bf16 %v878_v44, %v869_v7  ;;  %v885_v14 = vld [vmem:[%s12806_s25 + $0x898] sm:$0xff]  ;;  %v884_v44 = vld [vmem:[%s12806_s25 + $0x890] sm:$0xff] }
 0x36d   : > { %9822 = vmatpush1.bf16.msra.mxu0 %v13917_v25  ;;  %9728 = vmatprep.subr.bf16.mxu1 %v13919_v53  ;;  %v876_v25 = vld [vmem:[%s12806_s25 + $0x850] sm:$0xff]  ;;  %18767 = vst [vmem:[#allocation158_spill] sm:$0xff] %v13953_v37  ;;  %18768 = vst [vmem:[#allocation159_spill] sm:$0xff] %v13957_v2 }
 0x36e   : > { %9824 = vmatprep.subr.bf16.mxu0 %v13925_v13  ;;  %v13959_v60 = vpack.c.bf16 %v876_v25, %v867_v10  ;;  %v875_v13 = vld [vmem:[%s12806_s25 + $0x848] sm:$0xff]  ;;  %v868_v53 = vld [vmem:[%s12806_s25 + $0x810] sm:$0xff]  ;;  %18770 = vst [vmem:[#allocation161_spill] sm:$0xff] %v13965_v19 }
 0x36f   : > { %v896_v25 = vld [vmem:[%s12806_s25 + $0x8f0] sm:$0xff]  ;;  %v13973_v62 = vpack.c.bf16 %v875_v13, %v866_v39  ;;  %v13977_v10 = vpack.c.bf16 %v877_v30, %v868_v53  ;;  %v895_v13 = vld [vmem:[%s12806_s25 + $0x8e8] sm:$0xff]  ;;  %v905_v53 = vld [vmem:[%s12806_s25 + $0x938] sm:$0xff] }
 0x370   : > { %9730 = vmatpush1.bf16.msra.mxu1 %v13933_v49  ;;  %18769 = vst [vmem:[#allocation160_spill] sm:$0xff] %v13959_v60  ;;  %v13985_v49 = vpack.c.bf16 %v896_v25, %v887_v28  ;;  %v903_v39 = vld [vmem:[%s12806_s25 + $0x928] sm:$0xff]  ;;  %v914_v30 = vld [vmem:[%s12806_s25 + $0x980] sm:$0xff] }
 0x371   : > { %9826 = vmatpush1.bf16.msra.mxu0 %v13937_v32  ;;  %9732 = vmatprep.subr.bf16.mxu1 %v13939_v20  ;;  %v894_v32 = vld [vmem:[%s12806_s25 + $0x8e0] sm:$0xff]  ;;  %18771 = vst [vmem:[#allocation162_spill] sm:$0xff] %v13973_v62  ;;  %18772 = vst [vmem:[#allocation163_spill] sm:$0xff] %v13977_v10  ;;  %v14002_v25 = vpack.c.bf16 %v914_v30, %v905_v53  ;;  %v920_v30 = vld [vmem:[%s12806_s25 + $0x9b0] sm:$0xff] }
 0x372   : > { %9828 = vmatprep.subr.bf16.mxu0 %v13945_v8  ;;  %v13979_v7 = vpack.c.bf16 %v894_v32, %v885_v14  ;;  %v893_v8 = vld [vmem:[%s12806_s25 + $0x8d8] sm:$0xff]  ;;  %v886_v20 = vld [vmem:[%s12806_s25 + $0x8a0] sm:$0xff]  ;;  %18774 = vst [vmem:[#allocation165_spill] sm:$0xff] %v13985_v49 }
 0x373   : > { %v13993_v32 = vpack.c.bf16 %v893_v8, %v884_v44  ;;  %v13997_v14 = vpack.c.bf16 %v895_v13, %v886_v20  ;;  %18778 = vst [vmem:[#allocation169_spill] sm:$0xff] %v14002_v25  ;;  %v913_v8 = vld [vmem:[%s12806_s25 + $0x978] sm:$0xff]  ;;  %v923_v20 = vld [vmem:[%s12806_s25 + $0x9c8] sm:$0xff] }
 0x374   : > { %9734 = vmatpush1.bf16.msra.mxu1 %v13953_v37  ;;  %18773 = vst [vmem:[#allocation164_spill] sm:$0xff] %v13979_v7  ;;  %v921_v44 = vld [vmem:[%s12806_s25 + $0x9b8] sm:$0xff] }
 0x375   : > { %9830 = vmatpush1.bf16.msra.mxu0 %v13957_v2  ;;  %9736 = vmatprep.subr.bf16.mxu1 %v13959_v60  ;;  %v912_v2 = vld [vmem:[%s12806_s25 + $0x970] sm:$0xff]  ;;  %18775 = vst [vmem:[#allocation166_spill] sm:$0xff] %v13993_v32  ;;  %18776 = vst [vmem:[#allocation167_spill] sm:$0xff] %v13997_v14  ;;  %v911_v60 = vld [vmem:[%s12806_s25 + $0x968] sm:$0xff] }
 0x376   : > { %9832 = vmatprep.subr.bf16.mxu0 %v13965_v19  ;;  %v13999_v28 = vpack.c.bf16 %v912_v2, %v903_v39  ;;  %v902_v19 = vld [vmem:[%s12806_s25 + $0x920] sm:$0xff]  ;;  %v932_v2 = vld [vmem:[%s12806_s25 + $0xa10] sm:$0xff] }
 0x377   : > { %v14015_v13 = vpack.c.bf16 %v911_v60, %v902_v19  ;;  %v948_v19 = vld [vmem:[%s12806_s25 + $0xa90] sm:$0xff]  ;;  %v941_v60 = vld [vmem:[%s12806_s25 + $0xa58] sm:$0xff] }
 0x378   : > { %9738 = vmatpush1.bf16.msra.mxu1 %v13973_v62  ;;  %18777 = vst [vmem:[#allocation168_spill] sm:$0xff] %v13999_v28  ;;  %v904_v62 = vld [vmem:[%s12806_s25 + $0x930] sm:$0xff] }
 0x379   : > { %9834 = vmatpush1.bf16.msra.mxu0 %v13977_v10  ;;  %9740 = vmatprep.subr.bf16.mxu1 %v13979_v7  ;;  %v930_v10 = vld [vmem:[%s12806_s25 + $0xa00] sm:$0xff]  ;;  %18779 = vst [vmem:[#allocation170_spill] sm:$0xff] %v14015_v13  ;;  %v14018_v39 = vpack.c.bf16 %v913_v8, %v904_v62  ;;  %v14026_v7 = vpack.c.bf16 %v932_v2, %v923_v20  ;;  %v947_v2 = vld [vmem:[%s12806_s25 + $0xa88] sm:$0xff] }
 0x37a   : > { %9836 = vmatprep.subr.bf16.mxu0 %v13985_v49  ;;  %v14020_v53 = vpack.c.bf16 %v930_v10, %v921_v44  ;;  %v929_v49 = vld [vmem:[%s12806_s25 + $0x9f8] sm:$0xff]  ;;  %v950_v62 = vld [vmem:[%s12806_s25 + $0xaa0] sm:$0xff] }
 0x37b   : > { %18780 = vst [vmem:[#allocation171_spill] sm:$0xff] %v14018_v39  ;;  %18782 = vst [vmem:[#allocation173_spill] sm:$0xff] %v14026_v7  ;;  %v14037_v10 = vpack.c.bf16 %v929_v49, %v920_v30  ;;  %v938_v20 = vld [vmem:[%s12806_s25 + $0xa40] sm:$0xff]  ;;  %v14050_v49 = vpack.c.bf16 %v950_v62, %v941_v60  ;;  %v949_v30 = vld [vmem:[%s12806_s25 + $0xa98] sm:$0xff] }
 0x37c   : > { %9742 = vmatpush1.bf16.msra.mxu1 %v13993_v32  ;;  %18781 = vst [vmem:[#allocation172_spill] sm:$0xff] %v14020_v53  ;;  %v922_v32 = vld [vmem:[%s12806_s25 + $0x9c0] sm:$0xff]  ;;  %v956_v62 = vld [vmem:[%s12806_s25 + $0xad0] sm:$0xff] }
 0x37d   : > { %9838 = vmatpush1.bf16.msra.mxu0 %v13997_v14  ;;  %9744 = vmatprep.subr.bf16.mxu1 %v13999_v28  ;;  %v931_v14 = vld [vmem:[%s12806_s25 + $0xa08] sm:$0xff]  ;;  %18783 = vst [vmem:[#allocation174_spill] sm:$0xff] %v14037_v10  ;;  %18786 = vst [vmem:[#allocation177_spill] sm:$0xff] %v14050_v49 }
 0x37e   : > { %9840 = vmatprep.subr.bf16.mxu0 %v14002_v25  ;;  %v939_v28 = vld [vmem:[%s12806_s25 + $0xa48] sm:$0xff]  ;;  %v14041_v8 = vpack.c.bf16 %v931_v14, %v922_v32  ;;  %v940_v25 = vld [vmem:[%s12806_s25 + $0xa50] sm:$0xff] }
 0x37f   : > { %2607 = vmatmul.mubr.f32.vlgmr.msra.gmra.mrb[10].mxu1 %v13464_v56  ;;  %v14043_v44 = vpack.c.bf16 %v948_v19, %v939_v28  ;;  %v959_v32 = vld [vmem:[%s12806_s25 + $0xae8] sm:$0xff]  ;;  %v968_v14 = vld [vmem:[%s12806_s25 + $0xb30] sm:$0xff]  ;;  %v14061_v28 = vpack.c.bf16 %v947_v2, %v938_v20  ;;  %v14065_v19 = vpack.c.bf16 %v949_v30, %v940_v25  ;;  %v977_v25 = vld [vmem:[%s12806_s25 + $0xb78] sm:$0xff] }
 0x380   : > { %2773 = vmatmul.mubr.f32.vlgmr.msra.gmra.mrb[10].mxu0 %v13464_v56  ;;  %2612 = vmatprep.mubr.f32.mxu1 %v13488_v55  ;;  %18784 = vst [vmem:[#allocation175_spill] sm:$0xff] %v14041_v8  ;;  %v967_v20 = vld [vmem:[%s12806_s25 + $0xb28] sm:$0xff] }
 0x381   : > { %9746 = vmatpush1.bf16.msra.mxu1 %v14015_v13  ;;  %2778 = vmatprep.mubr.f32.mxu0 %v13488_v55  ;;  %18785 = vst [vmem:[#allocation176_spill] sm:$0xff] %v14043_v44  ;;  %v966_v13 = vld [vmem:[%s12806_s25 + $0xb20] sm:$0xff]  ;;  %18787 = vst [vmem:[#allocation178_spill] sm:$0xff] %v14061_v28  ;;  %v975_v2 = vld [vmem:[%s12806_s25 + $0xb68] sm:$0xff] }
 0x382   : > { %9842 = vmatpush1.bf16.msra.mxu0 %v14018_v39  ;;  %9748 = vmatprep.subr.bf16.mxu1 %v14020_v53  ;;  %v957_v39 = vld [vmem:[%s12806_s25 + $0xad8] sm:$0xff]  ;;  %18788 = vst [vmem:[#allocation179_spill] sm:$0xff] %v14065_v19  ;;  %v958_v53 = vld [vmem:[%s12806_s25 + $0xae0] sm:$0xff] }
 0x383   : > { %2613 = vmatmul.mubr.f32.gmra.mrb[12].mxu1 %v13491_v47  ;;  %9844 = vmatprep.subr.bf16.mxu0 %v14026_v7  ;;  %v14067_v60 = vpack.c.bf16 %v966_v13, %v957_v39  ;;  %v965_v7 = vld [vmem:[%s12806_s25 + $0xb18] sm:$0xff]  ;;  %v986_v13 = vld [vmem:[%s12806_s25 + $0xbc0] sm:$0xff]  ;;  %v14089_v30 = vpack.c.bf16 %v967_v20, %v958_v53  ;;  %v995_v53 = vld [vmem:[%s12806_s25 + $0xc08] sm:$0xff] }
 0x384   : > { %2779 = vmatmul.mubr.f32.gmra.mrb[12].mxu0 %v13491_v47  ;;  %2618 = vmatprep.mubr.f32.mxu1 %v13523_v9  ;;  %v14084_v39 = vpack.c.bf16 %v965_v7, %v956_v62  ;;  %v14097_v7 = vpack.c.bf16 %v986_v13, %v977_v25  ;;  %v985_v62 = vld [vmem:[%s12806_s25 + $0xbb8] sm:$0xff]  ;;  %v992_v13 = vld [vmem:[%s12806_s25 + $0xbf0] sm:$0xff] }
 0x385   : > { %9750 = vmatpush1.bf16.msra.mxu1 %v14037_v10  ;;  %2784 = vmatprep.mubr.f32.mxu0 %v13523_v9  ;;  %18789 = vst [vmem:[#allocation180_spill] sm:$0xff] %v14067_v60  ;;  %v14074_v10 = vpack.c.bf16 %v968_v14, %v959_v32  ;;  %18792 = vst [vmem:[#allocation183_spill] sm:$0xff] %v14089_v30  ;;  %v974_v14 = vld [vmem:[%s12806_s25 + $0xb60] sm:$0xff] }
 0x386   : > { %9846 = vmatpush1.bf16.msra.mxu0 %v14041_v8  ;;  %9752 = vmatprep.subr.bf16.mxu1 %v14043_v44  ;;  %v984_v8 = vld [vmem:[%s12806_s25 + $0xbb0] sm:$0xff]  ;;  %18791 = vst [vmem:[#allocation182_spill] sm:$0xff] %v14084_v39  ;;  %18794 = vst [vmem:[#allocation185_spill] sm:$0xff] %v14097_v7 }
 0x387   : > { %2619 = vmatmul.mubr.f32.gmra.mrb[14].mxu1 %v13536_v51  ;;  %9848 = vmatprep.subr.bf16.mxu0 %v14050_v49  ;;  %18790 = vst [vmem:[#allocation181_spill] sm:$0xff] %v14074_v10  ;;  %v14091_v32 = vpack.c.bf16 %v984_v8, %v975_v2  ;;  %v983_v49 = vld [vmem:[%s12806_s25 + $0xba8] sm:$0xff]  ;;  %v976_v44 = vld [vmem:[%s12806_s25 + $0xb70] sm:$0xff] }
 0x388   : > { %2785 = vmatmul.mubr.f32.gmra.mrb[14].mxu0 %v13536_v51  ;;  %2689 = vmatprep.mubr.f32.mxu1 %v18720_v50  ;;  %v1004_v8 = vld [vmem:[%s12806_s25 + $0xc50] sm:$0xff]  ;;  %v14105_v20 = vpack.c.bf16 %v983_v49, %v974_v14  ;;  %v14109_v2 = vpack.c.bf16 %v985_v62, %v976_v44  ;;  %v1003_v49 = vld [vmem:[%s12806_s25 + $0xc48] sm:$0xff]  ;;  %v1013_v44 = vld [vmem:[%s12806_s25 + $0xc98] sm:$0xff] }
 0x389   : > { %9754 = vmatpush1.bf16.msra.mxu1 %v14061_v28  ;;  %2855 = vmatprep.mubr.f32.mxu0 %v18720_v50  ;;  %18793 = vst [vmem:[#allocation184_spill] sm:$0xff] %v14091_v32  ;;  %v993_v28 = vld [vmem:[%s12806_s25 + $0xbf8] sm:$0xff]  ;;  %v14117_v37 = vpack.c.bf16 %v1004_v8, %v995_v53  ;;  %v1011_v14 = vld [vmem:[%s12806_s25 + $0xc88] sm:$0xff]  ;;  %v1010_v8 = vld [vmem:[%s12806_s25 + $0xc80] sm:$0xff] }
 0x38a   : > { %9850 = vmatpush1.bf16.msra.mxu0 %v14065_v19  ;;  %9756 = vmatprep.subr.bf16.mxu1 %v14067_v60  ;;  %v1002_v19 = vld [vmem:[%s12806_s25 + $0xc40] sm:$0xff]  ;;  %18795 = vst [vmem:[#allocation186_spill] sm:$0xff] %v14105_v20  ;;  %18796 = vst [vmem:[#allocation187_spill] sm:$0xff] %v14109_v2 }
 0x38b   : > { %9852 = vmatprep.subr.bf16.mxu0 %v14074_v10  ;;  %v14111_v25 = vpack.c.bf16 %v1002_v19, %v993_v28  ;;  %v1001_v10 = vld [vmem:[%s12806_s25 + $0xc38] sm:$0xff]  ;;  %v994_v60 = vld [vmem:[%s12806_s25 + $0xc00] sm:$0xff]  ;;  %18798 = vst [vmem:[#allocation189_spill] sm:$0xff] %v14117_v37 }
 0x38c   : > { %v1022_v28 = vld [vmem:[%s12806_s25 + $0xce0] sm:$0xff]  ;;  %v14125_v19 = vpack.c.bf16 %v1001_v10, %v992_v13  ;;  %v14129_v62 = vpack.c.bf16 %v1003_v49, %v994_v60  ;;  %v1021_v10 = vld [vmem:[%s12806_s25 + $0xcd8] sm:$0xff]  ;;  %v1031_v60 = vld [vmem:[%s12806_s25 + $0xd28] sm:$0xff] }
 0x38d   : > { %9758 = vmatpush1.bf16.msra.mxu1 %v14084_v39  ;;  %18797 = vst [vmem:[#allocation188_spill] sm:$0xff] %v14111_v25  ;;  %v14137_v39 = vpack.c.bf16 %v1022_v28, %v1013_v44  ;;  %v1029_v13 = vld [vmem:[%s12806_s25 + $0xd18] sm:$0xff]  ;;  %v1040_v49 = vld [vmem:[%s12806_s25 + $0xd70] sm:$0xff] }
 0x38e   : > { %9854 = vmatpush1.bf16.msra.mxu0 %v14089_v30  ;;  %9760 = vmatprep.subr.bf16.mxu1 %v14091_v32  ;;  %v1020_v30 = vld [vmem:[%s12806_s25 + $0xcd0] sm:$0xff]  ;;  %18799 = vst [vmem:[#allocation190_spill] sm:$0xff] %v14125_v19  ;;  %18800 = vst [vmem:[#allocation191_spill] sm:$0xff] %v14129_v62 }
 0x38f   : > { %9856 = vmatprep.subr.bf16.mxu0 %v14097_v7  ;;  %v14131_v53 = vpack.c.bf16 %v1020_v30, %v1011_v14  ;;  %v1019_v7 = vld [vmem:[%s12806_s25 + $0xcc8] sm:$0xff]  ;;  %v1012_v32 = vld [vmem:[%s12806_s25 + $0xc90] sm:$0xff]  ;;  %18802 = vst [vmem:[#allocation193_spill] sm:$0xff] %v14137_v39 }
 0x390   : > { %v14145_v30 = vpack.c.bf16 %v1019_v7, %v1010_v8  ;;  %v14149_v14 = vpack.c.bf16 %v1021_v10, %v1012_v32  ;;  %v1028_v28 = vld [vmem:[%s12806_s25 + $0xd10] sm:$0xff]  ;;  %v14157_v7 = vpack.c.bf16 %v1040_v49, %v1031_v60  ;;  %v1039_v8 = vld [vmem:[%s12806_s25 + $0xd68] sm:$0xff]  ;;  %v906_v49 = vld [vmem:[%s12806_s25 + $0x940] sm:$0xff] }
 0x391   : > { %9762 = vmatpush1.bf16.msra.mxu1 %v14105_v20  ;;  %18801 = vst [vmem:[#allocation192_spill] sm:$0xff] %v14131_v53  ;;  %v627_v60 = vld [vmem:[%s12806_s25 + $0x88] sm:$0xff] }
 0x392   : > { %9858 = vmatpush1.bf16.msra.mxu0 %v14109_v2  ;;  %9764 = vmatprep.subr.bf16.mxu1 %v14111_v25  ;;  %v1038_v2 = vld [vmem:[%s12806_s25 + $0xd60] sm:$0xff]  ;;  %18803 = vst [vmem:[#allocation194_spill] sm:$0xff] %v14145_v30  ;;  %18804 = vst [vmem:[#allocation195_spill] sm:$0xff] %v14149_v14 }
 0x393   : > { %9860 = vmatprep.subr.bf16.mxu0 %v14117_v37  ;;  %v14151_v44 = vpack.c.bf16 %v1038_v2, %v1029_v13  ;;  %v1037_v37 = vld [vmem:[%s12806_s25 + $0xd58] sm:$0xff]  ;;  %v1030_v25 = vld [vmem:[%s12806_s25 + $0xd20] sm:$0xff]  ;;  %18806 = vst [vmem:[#allocation197_spill] sm:$0xff] %v14157_v7 }
 0x394   : > { %v14163_v32 = vpack.c.bf16 %v1037_v37, %v1028_v28  ;;  %v14167_v2 = vpack.c.bf16 %v1039_v8, %v1030_v25  ;;  %v618_v13 = vld [vmem:[%s12806_s25 + $0x40] sm:$0xff]  ;;  %v780_v37 = vld [vmem:[%s12806_s25 + $0x550] sm:$0xff]  ;;  %v789_v28 = vld [vmem:[%s12806_s25 + $0x598] sm:$0xff]  ;;  %v18142_v8 = vmov 0.0|0.0  }
 0x395   : > { %9766 = vmatpush1.bf16.msra.mxu1 %v14125_v19  ;;  %18805 = vst [vmem:[#allocation196_spill] sm:$0xff] %v14151_v44 }
 0x396   : > { %9862 = vmatpush1.bf16.msra.mxu0 %v14129_v62  ;;  %9768 = vmatprep.subr.bf16.mxu1 %v14131_v53  ;;  %v762_v62 = vld [vmem:[%s12806_s25 + $0x4c0] sm:$0xff]  ;;  %v771_v53 = vld [vmem:[%s12806_s25 + $0x508] sm:$0xff]  ;;  %18807 = vst [vmem:[#allocation198_spill] sm:$0xff] %v14163_v32  ;;  %18808 = vst [vmem:[#allocation199_spill] sm:$0xff] %v14167_v2 }
 0x397   : > { %9864 = vmatprep.subr.bf16.mxu0 %v14137_v39  ;;  %v14169_v10 = vpack.c.bf16 %v771_v53, %v762_v62  ;;  %v636_v62 = vld [vmem:[%s12806_s25 + $0xd0] sm:$0xff]  ;;  %v645_v53 = vld [vmem:[%s12806_s25 + $0x118] sm:$0xff] }
 0x399   : > { %9770 = vmatpush1.bf16.msra.mxu1 %v14145_v30  ;;  %18809 = vst [vmem:[#allocation200_spill] sm:$0xff] %v14169_v10  ;;  %v915_v30 = vld [vmem:[%s12806_s25 + $0x988] sm:$0xff] }
 0x39a   : > { %9866 = vmatpush1.bf16.msra.mxu0 %v14149_v14  ;;  %9772 = vmatprep.subr.bf16.mxu1 %v14151_v44  ;;  %v14179_v44 = vpack.c.bf16 %v627_v60, %v618_v13  ;;  %v14183_v25 = vpack.c.bf16 %v915_v30, %v906_v49  ;;  %v924_v14 = vld [vmem:[%s12806_s25 + $0x9d0] sm:$0xff]  ;;  %v798_v13 = vld [vmem:[%s12806_s25 + $0x5e0] sm:$0xff]  ;;  %v807_v60 = vld [vmem:[%s12806_s25 + $0x628] sm:$0xff]  ;;  %v14197_v30 = vpack.c.bf16 %v645_v53, %v636_v62  ;;  %v18816_v53 = vmov 0.0|0.0  }
 0x39b   : > { %9868 = vmatprep.subr.bf16.mxu0 %v14157_v7  ;;  %v14188_v7 = vpack.c.bf16 %v789_v28, %v780_v37  ;;  %v654_v37 = vld [vmem:[%s12806_s25 + $0x160] sm:$0xff]  ;;  %v663_v28 = vld [vmem:[%s12806_s25 + $0x1a8] sm:$0xff] }
 0x39c   : > { %18810 = vst [vmem:[#allocation201_spill] sm:$0xff] %v14179_v44  ;;  %18811 = vst [vmem:[#allocation202_spill] sm:$0xff] %v14183_v25  ;;  %v951_v62 = vld [vmem:[%s12806_s25 + $0xaa8] sm:$0xff] }
 0x39d   : > { %9774 = vmatpush1.bf16.msra.mxu1 %v14163_v32  ;;  %18812 = vst [vmem:[#allocation203_spill] sm:$0xff] %v14188_v7  ;;  %v933_v32 = vld [vmem:[%s12806_s25 + $0xa18] sm:$0xff]  ;;  %18813 = vst [vmem:[#allocation204_spill] sm:$0xff] %v14197_v30 }
 0x39e   : > { %9870 = vmatpush1.bf16.msra.mxu0 %v14167_v2  ;;  %9872 = vmatprep.subr.bf16.mxu1 %v14169_v10  ;;  %v14201_v49 = vpack.c.bf16 %v933_v32, %v924_v14  ;;  %v816_v14 = vld [vmem:[%s12806_s25 + $0x670] sm:$0xff]  ;;  %v825_v32 = vld [vmem:[%s12806_s25 + $0x6b8] sm:$0xff] }
 0x39f   : > { %9903 = vmatprep.subr.bf16.mxu0 %v18142_v8  ;;  %v14207_v8 = vpack.c.bf16 %v807_v60, %v798_v13  ;;  %v672_v60 = vld [vmem:[%s12806_s25 + $0x1f0] sm:$0xff]  ;;  %v14228_v2 = vpack.c.bf16 %v825_v32, %v816_v14  ;;  %v690_v32 = vld [vmem:[%s12806_s25 + $0x280] sm:$0xff] }
 0x3a0   : > { %2690 = vmatmul.mubr.f32.vlgmr.msra.gmra.mrb[10].mxu1 %v13675_v17  ;;  %18814 = vst [vmem:[#allocation205_spill] sm:$0xff] %v14201_v49  ;;  %v960_v10 = vld [vmem:[%s12806_s25 + $0xaf0] sm:$0xff] }
 0x3a1   : > { %2856 = vmatmul.mubr.f32.vlgmr.msra.gmra.mrb[10].mxu0 %v13675_v17  ;;  %9874 = vmatpush3.bf16.msra.mxu1 %v14179_v44  ;;  %18815 = vst [vmem:[#allocation206_spill] sm:$0xff] %v14207_v8  ;;  %v942_v44 = vld [vmem:[%s12806_s25 + $0xa60] sm:$0xff]  ;;  %18819 = vst [vmem:[#allocation209_spill] sm:$0xff] %v14228_v2 }
 0x3a2   : > { %9905 = vmatpush3.bf16.msra.mxu0 %v14183_v25  ;;  %2695 = vmatprep.mubr.f32.mxu1 %v18720_v50  ;;  %v14217_v25 = vpack.c.bf16 %v663_v28, %v654_v37  ;;  %v14221_v13 = vpack.c.bf16 %v951_v62, %v942_v44  ;;  %v969_v37 = vld [vmem:[%s12806_s25 + $0xb38] sm:$0xff]  ;;  %v834_v28 = vld [vmem:[%s12806_s25 + $0x700] sm:$0xff] }
 0x3a3   : > { %2861 = vmatprep.mubr.f32.mxu0 %v18720_v50  ;;  %9876 = vmatprep.subr.bf16.mxu1 %v14188_v7  ;;  %v681_v7 = vld [vmem:[%s12806_s25 + $0x238] sm:$0xff]  ;;  %v14241_v62 = vpack.c.bf16 %v969_v37, %v960_v10 }
 0x3a4   : > { %2696 = vmatmul.mubr.f32.gmra.mrb[12].mxu1 %v13704_v31  ;;  %9906 = vmatprep.subr.bf16.mxu0 %v18816_v53  ;;  %18817 = vst [vmem:[#allocation207_spill] sm:$0xff] %v14217_v25  ;;  %18818 = vst [vmem:[#allocation208_spill] sm:$0xff] %v14221_v13  ;;  %v14237_v44 = vpack.c.bf16 %v681_v7, %v672_v60  ;;  %v987_v7 = vld [vmem:[%s12806_s25 + $0xbc8] sm:$0xff]  ;;  %v861_v60 = vld [vmem:[%s12806_s25 + $0x7d8] sm:$0xff] }
 0x3a5   : > { %2862 = vmatmul.mubr.f32.gmra.mrb[12].mxu0 %v13704_v31  ;;  %9878 = vmatpush3.bf16.msra.mxu1 %v14197_v30  ;;  %v843_v30 = vld [vmem:[%s12806_s25 + $0x748] sm:$0xff]  ;;  %18821 = vst [vmem:[#allocation211_spill] sm:$0xff] %v14241_v62 }
 0x3a6   : > { %9908 = vmatpush3.bf16.msra.mxu0 %v14201_v49  ;;  %2701 = vmatprep.mubr.f32.mxu1 %v18720_v50  ;;  %18820 = vst [vmem:[#allocation210_spill] sm:$0xff] %v14237_v44  ;;  %v14243_v14 = vpack.c.bf16 %v843_v30, %v834_v28  ;;  %v978_v49 = vld [vmem:[%s12806_s25 + $0xb80] sm:$0xff]  ;;  %v708_v28 = vld [vmem:[%s12806_s25 + $0x310] sm:$0xff] }
 0x3a7   : > { %2867 = vmatprep.mubr.f32.mxu0 %v18720_v50  ;;  %9880 = vmatprep.subr.bf16.mxu1 %v14207_v8  ;;  %v699_v8 = vld [vmem:[%s12806_s25 + $0x2c8] sm:$0xff]  ;;  %v14260_v30 = vpack.c.bf16 %v987_v7, %v978_v49 }
 0x3a8   : > { %2702 = vmatmul.mubr.f32.gmra.mrb[14].mxu1 %v13730_v22  ;;  %9909 = vmatprep.subr.bf16.mxu0 %v18816_v53  ;;  %18822 = vst [vmem:[#allocation212_spill] sm:$0xff] %v14243_v14  ;;  %v14256_v10 = vpack.c.bf16 %v699_v8, %v690_v32  ;;  %v1005_v8 = vld [vmem:[%s12806_s25 + $0xc58] sm:$0xff]  ;;  %v870_v32 = vld [vmem:[%s12806_s25 + $0x820] sm:$0xff] }
 0x3a9   : > { %2868 = vmatmul.mubr.f32.gmra.mrb[14].mxu0 %v13730_v22  ;;  %9882 = vmatpush3.bf16.msra.mxu1 %v14217_v25  ;;  %18824 = vst [vmem:[#allocation214_spill] sm:$0xff] %v14260_v30  ;;  %v996_v25 = vld [vmem:[%s12806_s25 + $0xc10] sm:$0xff] }
 0x3aa   : > { %2938 = vmatprep.mubr.f32.mxu1 %v13461_v35  ;;  %9911 = vmatpush3.bf16.msra.mxu0 %v14221_v13  ;;  %v852_v35 = vld [vmem:[%s12806_s25 + $0x790] sm:$0xff]  ;;  %18823 = vst [vmem:[#allocation213_spill] sm:$0xff] %v14256_v10  ;;  %v14276_v49 = vpack.c.bf16 %v1005_v8, %v996_v25  ;;  %v1041_v13 = vld [vmem:[%s12806_s25 + $0xd78] sm:$0xff] }
 0x3ab   : > { %9884 = vmatprep.subr.bf16.mxu1 %v14228_v2  ;;  %9912 = vmatprep.subr.bf16.mxu0 %v18816_v53  ;;  %v14262_v37 = vpack.c.bf16 %v861_v60, %v852_v35  ;;  %v717_v2 = vld [vmem:[%s12806_s25 + $0x358] sm:$0xff]  ;;  %v726_v35 = vld [vmem:[%s12806_s25 + $0x3a0] sm:$0xff]  ;;  %v735_v60 = vld [vmem:[%s12806_s25 + $0x3e8] sm:$0xff] }
 0x3ac   : > { %9139 = vmatprep.mubr.msk.f32.mxu0 %vm12517_vm7, %v18720_v50  ;;  %18827 = vst [vmem:[#allocation217_spill] sm:$0xff] %v14276_v49  ;;  %v744_v8 = vld [vmem:[%s12806_s25 + $0x430] sm:$0xff] }
 0x3ad   : > { %9886 = vmatpush3.bf16.msra.mxu1 %v14237_v44  ;;  %18825 = vst [vmem:[#allocation215_spill] sm:$0xff] %v14262_v37  ;;  %v879_v44 = vld [vmem:[%s12806_s25 + $0x868] sm:$0xff] }
 0x3ae   : > { %9914 = vmatpush3.bf16.msra.mxu0 %v14241_v62  ;;  %9888 = vmatprep.subr.bf16.mxu1 %v14243_v14  ;;  %v14272_v14 = vpack.c.bf16 %v717_v2, %v708_v28  ;;  %v14278_v7 = vpack.c.bf16 %v879_v44, %v870_v32  ;;  %v1014_v62 = vld [vmem:[%s12806_s25 + $0xca0] sm:$0xff]  ;;  %v888_v2 = vld [vmem:[%s12806_s25 + $0x8b0] sm:$0xff]  ;;  %v897_v28 = vld [vmem:[%s12806_s25 + $0x8f8] sm:$0xff] }
 0x3af   : > { %9915 = vmatprep.subr.bf16.mxu0 %v18816_v53  ;;  %v14294_v44 = vpack.c.bf16 %v897_v28, %v888_v2  ;;  %v753_v32 = vld [vmem:[%s12806_s25 + $0x478] sm:$0xff] }
 0x3b0   : > { %18826 = vst [vmem:[#allocation216_spill] sm:$0xff] %v14272_v14  ;;  %18828 = vst [vmem:[#allocation218_spill] sm:$0xff] %v14278_v7  ;;  %v14302_v39 = vpack.c.bf16 %v753_v32, %v744_v8 }
 0x3b1   : > { %9890 = vmatpush3.bf16.msra.mxu1 %v14256_v10  ;;  %v1023_v10 = vld [vmem:[%s12806_s25 + $0xce8] sm:$0xff]  ;;  %18831 = vst [vmem:[#allocation221_spill] sm:$0xff] %v14294_v44 }
 0x3b2   : > { %9917 = vmatpush3.bf16.msra.mxu0 %v14260_v30  ;;  %9892 = vmatprep.subr.bf16.mxu1 %v14262_v37  ;;  %v14288_v30 = vpack.c.bf16 %v735_v60, %v726_v35  ;;  %v14292_v25 = vpack.c.bf16 %v1023_v10, %v1014_v62  ;;  %v1032_v37 = vld [vmem:[%s12806_s25 + $0xd30] sm:$0xff]  ;;  %18832 = vst [vmem:[#allocation222_spill] sm:$0xff] %v14302_v39  ;;  %s15027_s25 = scalar_lea.vmem [#allocation7], %s15024_s29 }
 0x3b3   : > { %9918 = vmatprep.subr.bf16.mxu0 %v18816_v53  ;;  %v14306_v35 = vpack.c.bf16 %v1041_v13, %v1032_v37 }
 0x3b4   : > { %18829 = vst [vmem:[#allocation219_spill] sm:$0xff] %v14288_v30  ;;  %18830 = vst [vmem:[#allocation220_spill] sm:$0xff] %v14292_v25 }
 0x3b5   : > { %9894 = vmatpush3.bf16.msra.mxu1 %v14272_v14  ;;  %18833 = vst [vmem:[#allocation223_spill] sm:$0xff] %v14306_v35 }
 0x3b6   : > { %9920 = vmatpush3.bf16.msra.mxu0 %v14276_v49  ;;  %9896 = vmatprep.subr.bf16.mxu1 %v14278_v7 }
 0x3b7   : > { %9921 = vmatprep.subr.bf16.mxu0 %v18816_v53 }
 0x3b9   : > { %9898 = vmatpush3.bf16.msra.mxu1 %v14288_v30 }
 0x3ba   : > { %9923 = vmatpush3.bf16.msra.mxu0 %v14292_v25  ;;  %9900 = vmatprep.subr.bf16.mxu1 %v14294_v44 }
 0x3bb   : > { %9924 = vmatprep.subr.bf16.mxu0 %v18816_v53 }
 0x3bd   : > { %9902 = vmatpush3.bf16.msra.mxu1 %v14302_v39 }
 0x3be   : > { %9926 = vmatpush3.bf16.msra.mxu0 %v14306_v35  ;;  %9930 = vmatprep.subr.bf16.mxu1 %v18816_v53 }
 0x3bf   : > { %9927 = vmatprep.subr.bf16.mxu0 %v18816_v53 }
 0x3c0   : > { %2939 = vmatmul.mubr.f32.vlgmr.msra.gmra.mrb[16].mxu1 %v13464_v56  ;;  %v14330_v56 = vsub.s32 1, %v12931_v21 }
 0x3c1   : > { %9140 = vmatmul.mubr.f32.vlgmr.msra.gmra.mrb[16].mxu0 %v13675_v17  ;;  %2943 = vmatprep.mubr.f32.mxu1 %v13488_v55  ;;  %v1768_v55 = vld [vmem:[%s12936_s24 + $0x60] sm:$0xff] }
 0x3c2   : > { %9142 = vmatprep.mubr.msk.f32.mxu0 %vm12517_vm7, %v18720_v50 }
 0x3c4   : > { %2944 = vmatmul.mubr.f32.gmra.mrb[18].mxu1 %v13491_v47 }
 0x3c5   : > { %9143 = vmatmul.mubr.f32.gmra.mrb[18].mxu0 %v13704_v31  ;;  %2948 = vmatprep.mubr.f32.mxu1 %v13523_v9 }
 0x3c6   : > { %9145 = vmatprep.mubr.msk.f32.mxu0 %vm12517_vm7, %v18720_v50 }
 0x3c8   : > { %2949 = vmatmul.mubr.f32.gmra.mrb[20].mxu1 %v13536_v51  ;;  %v14338_v51 = vrot.slane %v1768_v55, %v14330_v56  ;;  %v12298_v55 = vld [vmem:[%s12936_s24 + $0x48] sm:$0xff] }
 0x3c9   : > { %9146 = vmatmul.mubr.f32.gmra.mrb[20].mxu0 %v13730_v22  ;;  %9169 = vmatprep.mubr.msk.f32.mxu1 %vm12517_vm7, %v18720_v50  ;;  %v14353_v35 = vrot.slane %v12298_v55, %v14330_v56 }
 0x3ca   : > { %9154 = vmatprep.mubr.msk.f32.mxu0 %vm12517_vm7, %v18720_v50  ;;  %18834 = vst [vmem:[#allocation224_spill] sm:$0xff] %v14338_v51 }
 0x3cb   : > { %18835 = vst [vmem:[#allocation225_spill] sm:$0xff] %v14353_v35 }
 0x412   : > { %v2359_v47 = vpop.f32.mrb[4].mxu1  ;;  %v14333_v17 = vpop.f32.mrb[4].mxu0 }
 0x413   : > { %v14335_v9 = vpop.f32.mrb[5].mxu1  ;;  %v2527_v31 = vpop.f32.mrb[5].mxu0 }
 0x414   : > { %v11894_v37 = vadd.f32 %v2527_v31, %v14338_v51 }
 0x416   : > { %v2365_v22 = vpop.f32.mrb[6].mxu1  ;;  %v14340_v13 = vpop.f32.mrb[6].mxu0 }
 0x417   : > { %v14342_v62 = vpop.f32.mrb[7].mxu1  ;;  %v2533_v10 = vpop.f32.mrb[7].mxu0 }
 0x418   : > { %v11896_v60 = vadd.f32 %v2533_v10, %v14338_v51  ;;  %v11887_v10 = vadd.f32 %v2359_v47, %v14353_v35  ;;  %v1771_v47 = vld [vmem:[%s12936_s24 + $0x78] sm:$0xff] }
 0x41a   : > { %v9928_v2 = vpack.c.bf16 %v11896_v60, %v11894_v37  ;;  %v2371_v28 = vpop.f32.mrb[8].mxu1  ;;  %v14346_v8 = vpop.f32.mrb[8].mxu0  ;;  %v11889_v37 = vadd.f32 %v2365_v22, %v14353_v35 }
 0x41b   : > { %v14348_v32 = vpop.f32.mrb[9].mxu1  ;;  %v2539_v39 = vpop.f32.mrb[9].mxu0  ;;  %v11891_v60 = vadd.f32 %v2371_v28, %v14353_v35 }
 0x41c   : > { %9929 = vmatpush3.bf16.xpose.msra.mxu0 %v9928_v2  ;;  %v11898_v31 = vadd.f32 %v2539_v39, %v14338_v51  ;;  %v1769_v39 = vld [vmem:[%s12936_s24 + $0x68] sm:$0xff]  ;;  %v1770_v2 = vld [vmem:[%s12936_s24 + $0x70] sm:$0xff] }
 0x41d   : > { %9152 = vmatprep.subr.mxu0 %v18720_v50  ;;  %v14377_v44 = vrot.slane %v1770_v2, %v14330_v56 }
 0x41f   : > { %18838 = vst [vmem:[#allocation228_spill] sm:$0xff] %v14377_v44 }
 0x424   : > { %9153 = vmatpush3.xpose.msra.mxu0 %v11898_v31  ;;  %v1772_v31 = vld [vmem:[%s12936_s24 + $0x80] sm:$0xff] }
 0x425   : > { %9936 = vmatprep.subr.bf16.mxu0 %v18816_v53 }
 0x427   : > { %9155 = vmatmul.mubr.f32.vlgmr.msra.gmra.mrb[22].mxu0 %v11887_v10  ;;  %v14371_v10 = vrot.slane %v1769_v39, %v14330_v56 }
 0x428   : > { %9157 = vmatprep.mubr.msk.f32.mxu0 %vm12517_vm7, %v18720_v50 }
 0x429   : > { %18836 = vst [vmem:[#allocation226_spill] sm:$0xff] %v14371_v10 }
 0x42b   : > { %9158 = vmatmul.mubr.f32.gmra.mrb[24].mxu0 %v11889_v37  ;;  %v14374_v37 = vrot.slane %v1771_v47, %v14330_v56 }
 0x42c   : > { %9160 = vmatprep.mubr.msk.f32.mxu0 %vm12517_vm7, %v18720_v50 }
 0x42d   : > { %18837 = vst [vmem:[#allocation227_spill] sm:$0xff] %v14374_v37 }
 0x42f   : > { %9161 = vmatmul.mubr.f32.gmra.mrb[26].mxu0 %v11891_v60  ;;  %v14380_v60 = vrot.slane %v1772_v31, %v14330_v56 }
 0x430   : > { %9199 = vmatprep.mubr.msk.f32.mxu0 %vm12517_vm7, %v18720_v50 }
 0x431   : > { %18839 = vst [vmem:[#allocation229_spill] sm:$0xff] %v14380_v60 }
 0x473   : > { %v2691_v55 = vpop.f32.mrb[10].mxu1 }
 0x474   : > { %v2857_v51 = vpop.f32.mrb[10].mxu0  ;;  %v2693_v22 = vpop.f32.mrb[11].mxu1  ;;  %v14383_v30 = vadd.f32 %v2691_v55, %v14371_v10 }
 0x475   : > { %v2859_v28 = vpop.f32.mrb[11].mxu0  ;;  %v11905_v14 = vadd.f32 %v2857_v51, %v14374_v37  ;;  %v14390_v47 = vadd.f32 %v2693_v22, %v14377_v44 }
 0x476   : > { %v11906_v19 = vadd.f32 %v2859_v28, %v14380_v60 }
 0x477   : > { %v2697_v35 = vpop.f32.mrb[12].mxu1 }
 0x478   : > { %v14386_v25 = vadd.f32 %v2697_v35, %v14371_v10  ;;  %v2863_v39 = vpop.f32.mrb[12].mxu0  ;;  %v2699_v7 = vpop.f32.mrb[13].mxu1 }
 0x479   : > { %v11907_v2 = vadd.f32 %v2863_v39, %v14374_v37  ;;  %v14394_v49 = vadd.f32 %v2699_v7, %v14377_v44  ;;  %v2865_v31 = vpop.f32.mrb[13].mxu0 }
 0x47a   : > { %v11908_v35 = vadd.f32 %v2865_v31, %v14380_v60 }
 0x47b   : > { %v9931_v20 = vpack.c.bf16 %v11907_v2, %v11905_v14  ;;  %v14402_v22 = vpop.f32.mrb[14].mxu1 }
 0x47c   : > { %v9937_v52 = vpack.c.bf16 %v11908_v35, %v11906_v19  ;;  %v2869_v39 = vpop.f32.mrb[14].mxu0  ;;  %v14404_v40 = vpop.f32.mrb[15].mxu1  ;;  %v1773_v19 = vld [vmem:[%s12936_s24 + $0x88] sm:$0xff] }
 0x47d   : > { %v2871_v7 = vpop.f32.mrb[15].mxu0  ;;  %9932 = vmatpush3.bf16.msra.mxu1 %v9931_v20  ;;  %v11909_v28 = vadd.f32 %v2869_v39, %v14374_v37 }
 0x47e   : > { %9938 = vmatpush3.bf16.msra.mxu0 %v9937_v52  ;;  %9167 = vmatprep.subr.mxu1 %v18720_v50  ;;  %v11910_v14 = vadd.f32 %v2871_v7, %v14380_v60  ;;  %v14416_v52 = vrot.slane %v1773_v19, %v14330_v56 }
 0x47f   : > { %9197 = vmatprep.subr.mxu0 %v18720_v50 }
 0x480   : > { %18840 = vst [vmem:[#allocation230_spill] sm:$0xff] %v14416_v52 }
 0x481   : > { %9168 = vmatpush3.msk.msra.mxu1 %vm2069_vm6, %v11909_v28 }
 0x482   : > { %9198 = vmatpush3.msk.msra.mxu0 %vm2069_vm6, %v11910_v14  ;;  %9933 = vmatprep.subr.bf16.mxu1 %v18816_v53 }
 0x483   : > { %9942 = vmatprep.subr.bf16.mxu0 %v18816_v53 }
 0x493   : > { %v8610_v2 = vpop.f32.mrb[16].mxu1 }
 0x494   : > { %v3020_v20 = vpop.f32.mrb[16].mxu0  ;;  %v8611_v31 = vpop.f32.mrb[17].mxu1 }
 0x495   : > { %v8612_v35 = vadd.f32 %v8611_v31, %v8610_v2  ;;  %v9141_v39 = vpop.f32.mrb[17].mxu0 }
 0x497   : > { %v2941_v51 = vadd.f32 %v8612_v35, %v14416_v52  ;;  %v8613_v7 = vpop.f32.mrb[18].mxu1 }
 0x498   : > { %v3025_v55 = vpop.f32.mrb[18].mxu0  ;;  %v8614_v28 = vpop.f32.mrb[19].mxu1 }
 0x499   : > { %v14419_v60 = vadd.f32 %v3020_v20, %v2941_v51  ;;  %v8615_v14 = vadd.f32 %v8614_v28, %v8613_v7  ;;  %v9144_v37 = vpop.f32.mrb[19].mxu0  ;;  %v14429_v20 = vld [vmem:[#allocation2] sm:$0xff] }
 0x49b   : > { %v2946_v41 = vadd.f32 %v8615_v14, %v14416_v52  ;;  %v8616_v5 = vpop.f32.mrb[20].mxu1 }
 0x49c   : > { %v3030_v6 = vpop.f32.mrb[20].mxu0  ;;  %v8617_v1 = vpop.f32.mrb[21].mxu1 }
 0x49d   : > { %v14422_v19 = vadd.f32 %v3025_v55, %v2946_v41  ;;  %v8618_v23 = vadd.f32 %v8617_v1, %v8616_v5  ;;  %v9147_v3 = vpop.f32.mrb[21].mxu0  ;;  %v14432_v41 = vld [vmem:[#allocation2 + $0x8] sm:$0xff]  ;;  %v14436_v55 = vld [vmem:[#allocation2 + $0x10] sm:$0xf] }
 0x49f   : > { %v2951_v31 = vadd.f32 %v8618_v23, %v14416_v52 }
 0x4a1   : > { %v14427_v35 = vadd.f32 %v3030_v6, %v2951_v31 }
 0x4fa   : > { %v3100_v51 = vpop.f32.mrb[22].mxu0 }
 0x4fb   : > { %v3114_v37 = vmul.f32 0.088388346, %v3100_v51  ;;  %v9156_v39 = vpop.f32.mrb[23].mxu0 }
 0x4fd   : > { %v3117_v7 = vadd.f32 %v3114_v37, %v14429_v20 }
 0x4fe   : > { %v3105_v28 = vpop.f32.mrb[24].mxu0 }
 0x4ff   : > { %v3115_v1 = vmul.f32 0.088388346, %v3105_v28  ;;  %v9159_v3 = vpop.f32.mrb[25].mxu0  ;;  %v3121_v5 = vsel %vm3120_vm8, %v3117_v7, -inf }
 0x500   : > { %3122 = vmax.xlane.f32.xlu0 %v3121_v5 }
 0x501   : > { %v3118_v23 = vadd.f32 %v3115_v1, %v14432_v41 }
 0x502   : > { %v3110_v6 = vpop.f32.mrb[26].mxu0 }
 0x503   : > { %v3116_v14 = vmul.f32 0.088388346, %v3110_v6  ;;  %v9162_v31 = vpop.f32.mrb[27].mxu0  ;;  %v3124_v51 = vsel %vm3120_vm8, %v3118_v23, -inf }
 0x504   : > { %3125 = vmax.xlane.f32.xlu1 %v3124_v51 }
 0x505   : > { %v3119_v37 = vadd.f32 %v3116_v14, %v14436_v55 }
 0x507   : > { %v3128_v39 = vsel %vm3127_vm9, %v3119_v37, -inf }
 0x508   : > { %3129 = vmax.xlane.f32.xlu0 %v3128_v39 }
 0x58d   : > { %v3123_v28 = vpop.xlane.xlu0 %3122 }
 0x58e   : > { %v3131_v3 = vsub.f32 %v3117_v7, %v3123_v28 }
 0x590   : > { %v3134_v2 = vmul.f32 1.442695, %v3131_v3  ;;  %v18841_v3 = vpack.c.bf16 %v14386_v25, %v14383_v30  ;;  %v11903_v25 = vadd.f32 %v14402_v22, %v14371_v10  ;;  %v1583_v10 = vld [vmem:[%s15636_s28 + $0x368] sm:$0xff] }
 0x591   : > { %v3126_v5 = vpop.xlane.xlu1 %3125 }
 0x592   : > { %12157 = vpow2.f32 %v3134_v2  ;;  %v3132_v1 = vsub.f32 %v3118_v23, %v3126_v5 }
 0x594   : > { %v3136_v52 = vmul.f32 1.442695, %v3132_v1 }
 0x595   : > { %v3130_v29 = vpop.xlane.xlu0 %3129 }
 0x596   : > { %12159 = vpow2.f32 %v3136_v52  ;;  %v3133_v6 = vsub.f32 %v3119_v37, %v3130_v29 }
 0x598   : > { %v3138_v31 = vmul.f32 1.442695, %v3133_v6 }
 0x59a   : > { %12161 = vpow2.f32 %v3138_v31  ;;  %v18843_v31 = vpack.c.bf16 %v14394_v49, %v14390_v47  ;;  %v11904_v47 = vadd.f32 %v14404_v40, %v14377_v44 }
 0x59c   : > { %v12158_v27 = vpop.eup %12157 }
 0x59d   : > { %v3140_v51 = vsel %vm3120_vm8, %v12158_v27, 0.0 }
 0x59e   : > { %3141 = vadd.xlane.f32.xlu1 %v3140_v51 }
 0x5a0   : > { %v12160_v14 = vpop.eup %12159 }
 0x5a1   : > { %v3143_v0 = vsel %vm3120_vm8, %v12160_v14, 0.0 }
 0x5a2   : > { %3144 = vadd.xlane.f32.xlu0 %v3143_v0 }
 0x5a4   : > { %v12162_v39 = vpop.eup %12161 }
 0x5a5   : > { %v3146_v7 = vsel %vm3127_vm9, %v12162_v39, 0.0 }
 0x5a6   : > { %3147 = vadd.xlane.f32.xlu1 %v3146_v7 }
 0x62b   : > { %v3142_v2 = vpop.xlane.xlu1 %3141 }
 0x62c   : > { %12163 = vrcp.f32 %v3142_v2 }
 0x62f   : > { %v3145_v23 = vpop.xlane.xlu0 %3144 }
 0x630   : > { %12165 = vrcp.f32 %v3145_v23 }
 0x633   : > { %v3148_v29 = vpop.xlane.xlu1 %3147 }
 0x634   : > { %12167 = vrcp.f32 %v3148_v29 }
 0x636   : > { %v12164_v52 = vpop.eup %12163 }
 0x637   : > { %v3150_v37 = vmul.f32 %v12164_v52, %v12158_v27  ;;  %v14455_v27 = vld [vmem:[%s12936_s24 + $0x50] sm:$0xff] }
 0x638   : > { %v14459_v1 = vrot.slane %v14455_v27, %v14330_v56 }
 0x639   : > { %9170 = vmatmul.mubr.msk.f32.vlgmr.msra.gmra.mrb[22].mxu1 %vm3120_vm8, %v3150_v37 }
 0x63a   : > { %v12166_v28 = vpop.eup %12165  ;;  %9935 = vmatpush3.bf16.xpose.msra.mxu1 %v18841_v3  ;;  %9172 = vmatprep.mubr.msk.f32.mxu1 %vm12517_vm7, %v18720_v50  ;;  %18842 = vst [vmem:[#allocation231_spill] sm:$0xff] %v14459_v1  ;;  %v11888_v6 = vadd.f32 %v14335_v9, %v14459_v1  ;;  %v11890_v22 = vadd.f32 %v14342_v62, %v14459_v1  ;;  %v14480_v9 = vld [vmem:[%s12936_s24 + $0x58] sm:$0xff] }
 0x63b   : > { %v3152_v0 = vmul.f32 %v12166_v28, %v12160_v14  ;;  %9182 = vmatprep.subr.mxu1 %v18720_v50  ;;  %v14484_v51 = vrot.slane %v14480_v9, %v14330_v56  ;;  %v11892_v49 = vadd.f32 %v14348_v32, %v14459_v1 }
 0x63d   : > { %9173 = vmatmul.mubr.msk.f32.gmra.mrb[24].mxu1 %vm3120_vm8, %v3152_v0  ;;  %18844 = vst [vmem:[#allocation232_spill] sm:$0xff] %v14484_v51  ;;  %v11893_v62 = vadd.f32 %v14333_v17, %v14484_v51  ;;  %v11895_v56 = vadd.f32 %v14340_v13, %v14484_v51  ;;  %v11897_v40 = vadd.f32 %v14346_v8, %v14484_v51  ;;  %v1411_v51 = vld [vmem:[%s15027_s25 + $0x708] sm:$0xff] }
 0x63e   : > { %v12168_v5 = vpop.eup %12167  ;;  %9175 = vmatprep.mubr.msk.f32.mxu1 %vm12517_vm7, %v18720_v50 }
 0x63f   : > { %v3154_v30 = vmul.f32 %v12168_v5, %v12162_v39 }
 0x641   : > { %9176 = vmatmul.mubr.msk.f32.gmra.mrb[26].mxu1 %vm3120_vm8, %v3154_v30 }
 0x642   : > { %9183 = vmatpush3.xpose.msra.mxu1 %v11903_v25  ;;  %9184 = vmatprep.mubr.msk.f32.mxu1 %vm12517_vm7, %v18720_v50 }
 0x643   : > { %9939 = vmatprep.subr.bf16.mxu1 %v18816_v53 }
 0x645   : > { %9185 = vmatmul.mubr.f32.vlgmr.msra.gmra.mrb[28].mxu1 %v11888_v6 }
 0x646   : > { %9941 = vmatpush3.bf16.xpose.msra.mxu1 %v18843_v31  ;;  %9187 = vmatprep.mubr.msk.f32.mxu1 %vm12517_vm7, %v18720_v50 }
 0x647   : > { %9212 = vmatprep.subr.mxu1 %v18720_v50 }
 0x649   : > { %9188 = vmatmul.mubr.f32.gmra.mrb[30].mxu1 %v11890_v22 }
 0x64a   : > { %9190 = vmatprep.mubr.msk.f32.mxu1 %vm12517_vm7, %v18720_v50 }
 0x64d   : > { %9191 = vmatmul.mubr.f32.gmra.mrb[32].mxu1 %v11892_v49 }
 0x64e   : > { %9213 = vmatpush3.xpose.msra.mxu1 %v11904_v47  ;;  %9214 = vmatprep.mubr.msk.f32.mxu1 %vm12517_vm7, %v18720_v50 }
 0x651   : > { %9215 = vmatmul.mubr.f32.vlgmr.msra.gmra.mrb[34].mxu1 %v11893_v62 }
 0x652   : > { %9217 = vmatprep.mubr.msk.f32.mxu1 %vm12517_vm7, %v18720_v50 }
 0x655   : > { %9218 = vmatmul.mubr.f32.gmra.mrb[36].mxu1 %v11895_v56 }
 0x656   : > { %9220 = vmatprep.mubr.msk.f32.mxu1 %vm12517_vm7, %v18720_v50 }
 0x659   : > { %9221 = vmatmul.mubr.f32.gmra.mrb[38].mxu1 %v11897_v40 }
 0x70c   : > { %v14502_v32 = vpop.f32.mrb[22].mxu1 }
 0x70d   : > { %v9171_v14 = vpop.f32.mrb[23].mxu1 }
 0x710   : > { %v14504_v39 = vpop.f32.mrb[24].mxu1 }
 0x711   : > { %v9174_v17 = vpop.f32.mrb[25].mxu1 }
 0x714   : > { %v14506_v7 = vpop.f32.mrb[26].mxu1 }
 0x715   : > { %v9177_v2 = vpop.f32.mrb[27].mxu1 }
 0x718   : > { %v3313_v23 = vpop.f32.mrb[28].mxu1 }
 0x719   : > { %v3327_v29 = vmul.f32 0.088388346, %v3313_v23  ;;  %v9186_v13 = vpop.f32.mrb[29].mxu1 }
 0x71b   : > { %v3330_v52 = vadd.f32 %v3327_v29, %v14429_v20 }
 0x71c   : > { %v3318_v37 = vpop.f32.mrb[30].mxu1 }
 0x71d   : > { %v3328_v28 = vmul.f32 0.088388346, %v3318_v37  ;;  %v9189_v3 = vpop.f32.mrb[31].mxu1  ;;  %v3333_v8 = vsel %vm3120_vm8, %v3330_v52, -inf }
 0x71e   : > { %3334 = vmax.xlane.f32.xlu0 %v3333_v8 }
 0x71f   : > { %v3331_v0 = vadd.f32 %v3328_v28, %v14432_v41 }
 0x720   : > { %v3323_v5 = vpop.f32.mrb[32].mxu1 }
 0x721   : > { %v3329_v30 = vmul.f32 0.088388346, %v3323_v5  ;;  %v9192_v25 = vpop.f32.mrb[33].mxu1  ;;  %v3336_v6 = vsel %vm3120_vm8, %v3331_v0, -inf }
 0x722   : > { %3337 = vmax.xlane.f32.xlu1 %v3336_v6 }
 0x723   : > { %v3332_v31 = vadd.f32 %v3329_v30, %v14436_v55 }
 0x724   : > { %v3524_v22 = vpop.f32.mrb[34].mxu1 }
 0x725   : > { %v3538_v49 = vmul.f32 0.088388346, %v3524_v22  ;;  %v9216_v47 = vpop.f32.mrb[35].mxu1  ;;  %v3339_v62 = vsel %vm3127_vm9, %v3332_v31, -inf }
 0x726   : > { %3340 = vmax.xlane.f32.xlu0 %v3339_v62 }
 0x727   : > { %v3541_v56 = vadd.f32 %v3538_v49, %v14429_v20 }
 0x728   : > { %v3529_v40 = vpop.f32.mrb[36].mxu1 }
 0x729   : > { %v3539_v14 = vmul.f32 0.088388346, %v3529_v40  ;;  %v9219_v17 = vpop.f32.mrb[37].mxu1  ;;  %v3544_v2 = vsel %vm3120_vm8, %v3541_v56, -inf }
 0x72a   : > { %3545 = vmax.xlane.f32.xlu1 %v3544_v2 }
 0x72b   : > { %v3542_v23 = vadd.f32 %v3539_v14, %v14432_v41 }
 0x72c   : > { %v3534_v29 = vpop.f32.mrb[38].mxu1 }
 0x72d   : > { %v3540_v13 = vmul.f32 0.088388346, %v3534_v29  ;;  %v9222_v37 = vpop.f32.mrb[39].mxu1  ;;  %v3547_v28 = vsel %vm3120_vm8, %v3542_v23, -inf }
 0x72e   : > { %3548 = vmax.xlane.f32.xlu0 %v3547_v28 }
 0x72f   : > { %v3543_v3 = vadd.f32 %v3540_v13, %v14436_v55 }
 0x731   : > { %v3550_v8 = vsel %vm3127_vm9, %v3543_v3, -inf }
 0x732   : > { %3551 = vmax.xlane.f32.xlu1 %v3550_v8 }
 0x7ab   : > { %v3335_v20 = vpop.xlane.xlu0 %3334 }
 0x7ac   : > { %v3342_v5 = vsub.f32 %v3330_v52, %v3335_v20 }
 0x7ae   : > { %v3345_v30 = vmul.f32 1.442695, %v3342_v5 }
 0x7af   : > { %v3338_v25 = vpop.xlane.xlu1 %3337 }
 0x7b0   : > { %12169 = vpow2.f32 %v3345_v30  ;;  %v3343_v6 = vsub.f32 %v3331_v0, %v3338_v25 }
 0x7b2   : > { %v3347_v22 = vmul.f32 1.442695, %v3343_v6  ;;  %v1043_v6 = vld [vmem:[%s14548_s20 + $0x8] sm:$0xff] }
 0x7b3   : > { %v3341_v49 = vpop.xlane.xlu0 %3340 }
 0x7b4   : > { %12171 = vpow2.f32 %v3347_v22  ;;  %v3344_v41 = vsub.f32 %v3332_v31, %v3341_v49  ;;  %v1046_v22 = vld [vmem:[%s14548_s20 + $0x20] sm:$0xff] }
 0x7b5   : > { %v1042_v49 = vld [vmem:[%s14548_s20] sm:$0xff] }
 0x7b6   : > { %v3349_v47 = vmul.f32 1.442695, %v3344_v41  ;;  %v14553_v41 = vpack.c.bf16 %v1046_v22, %v1043_v6  ;;  %v1060_v22 = vld [vmem:[%s14548_s20 + $0x90] sm:$0xff] }
 0x7b7   : > { %v3546_v62 = vpop.xlane.xlu1 %3545 }
 0x7b8   : > { %12173 = vpow2.f32 %v3349_v47  ;;  %v3553_v40 = vsub.f32 %v3541_v56, %v3546_v62  ;;  %18846 = vst [vmem:[#allocation233_spill] sm:$0xff] %v14553_v41  ;;  %v1045_v47 = vld [vmem:[%s14548_s20 + $0x18] sm:$0xff]  ;;  %9946 = vmatprep.subr.bf16.mxu1 %v14553_v41 }
 0x7b9   : > { %v1049_v62 = vld [vmem:[%s14548_s20 + $0x38] sm:$0xff] }
 0x7ba   : > { %v14520_v14 = vpop.eup %12169  ;;  %v3556_v55 = vmul.f32 1.442695, %v3553_v40  ;;  %v1052_v40 = vld [vmem:[%s14548_s20 + $0x50] sm:$0xff] }
 0x7bb   : > { %v3549_v17 = vpop.xlane.xlu0 %3548  ;;  %v3351_v2 = vsel %vm3120_vm8, %v14520_v14, 0.0 }
 0x7bc   : > { %12175 = vpow2.f32 %v3556_v55  ;;  %v3554_v52 = vsub.f32 %v3542_v23, %v3549_v17  ;;  %3352 = vadd.xlane.f32.xlu0 %v3351_v2  ;;  %v14558_v55 = vpack.c.bf16 %v1045_v47, %v1042_v49  ;;  %v14560_v17 = vpack.c.bf16 %v1052_v40, %v1049_v62  ;;  %v1048_v2 = vld [vmem:[%s14548_s20 + $0x30] sm:$0xff]  ;;  %v1063_v49 = vld [vmem:[%s14548_s20 + $0xa8] sm:$0xff]  ;;  %v1070_v62 = vld [vmem:[%s14548_s20 + $0xe0] sm:$0xff] }
 0x7bd   : > { %v1067_v47 = vld [vmem:[%s14548_s20 + $0xc8] sm:$0xff]  ;;  %v14588_v40 = vpack.c.bf16 %v1063_v49, %v1060_v22 }
 0x7be   : > { %v14524_v29 = vpop.eup %12171  ;;  %v3558_v0 = vmul.f32 1.442695, %v3554_v52  ;;  %18847 = vst [vmem:[#allocation234_spill] sm:$0xff] %v14558_v55  ;;  %18848 = vst [vmem:[#allocation235_spill] sm:$0xff] %v14560_v17  ;;  %v1051_v52 = vld [vmem:[%s14548_s20 + $0x48] sm:$0xff]  ;;  %9948 = vmatpush1.bf16.msra.mxu1 %v14558_v55  ;;  %v1144_v55 = vld [vmem:[%s14548_s20 + $0x330] sm:$0xff] }
 0x7bf   : > { %v3552_v13 = vpop.xlane.xlu1 %3551  ;;  %v3354_v31 = vsel %vm3120_vm8, %v14524_v29, 0.0  ;;  %9950 = vmatprep.subr.bf16.mxu1 %v14560_v17  ;;  %18853 = vst [vmem:[#allocation240_spill] sm:$0xff] %v14588_v40  ;;  %v1075_v22 = vld [vmem:[%s14548_s20 + $0x108] sm:$0xff] }
 0x7c0   : > { %12177 = vpow2.f32 %v3558_v0  ;;  %v3555_v37 = vsub.f32 %v3543_v3, %v3552_v13  ;;  %3355 = vadd.xlane.f32.xlu1 %v3354_v31  ;;  %v1055_v0 = vld [vmem:[%s14548_s20 + $0x68] sm:$0xff]  ;;  %v1058_v13 = vld [vmem:[%s14548_s20 + $0x80] sm:$0xff]  ;;  %v14568_v31 = vpack.c.bf16 %v1051_v52, %v1048_v2  ;;  %v14591_v2 = vpack.c.bf16 %v1070_v62, %v1067_v47 }
 0x7c1   : > { %v1066_v52 = vld [vmem:[%s14548_s20 + $0xc0] sm:$0xff]  ;;  %v1079_v49 = vld [vmem:[%s14548_s20 + $0x128] sm:$0xff] }
 0x7c2   : > { %v14528_v56 = vpop.eup %12173  ;;  %v3560_v28 = vmul.f32 1.442695, %v3555_v37  ;;  %18849 = vst [vmem:[#allocation236_spill] sm:$0xff] %v14568_v31  ;;  %v14571_v37 = vpack.c.bf16 %v1058_v13, %v1055_v0  ;;  %9952 = vmatpush1.bf16.msra.mxu1 %v14568_v31  ;;  %18854 = vst [vmem:[#allocation241_spill] sm:$0xff] %v14591_v2  ;;  %v1069_v0 = vld [vmem:[%s14548_s20 + $0xd8] sm:$0xff]  ;;  %v1082_v47 = vld [vmem:[%s14548_s20 + $0x140] sm:$0xff] }
 0x7c3   : > { %v3357_v8 = vsel %vm3127_vm9, %v14528_v56, 0.0  ;;  %v1073_v13 = vld [vmem:[%s14548_s20 + $0xf8] sm:$0xff] }
 0x7c4   : > { %12179 = vpow2.f32 %v3560_v28  ;;  %3358 = vadd.xlane.f32.xlu0 %v3357_v8  ;;  %18850 = vst [vmem:[#allocation237_spill] sm:$0xff] %v14571_v37  ;;  %v1054_v28 = vld [vmem:[%s14548_s20 + $0x60] sm:$0xff]  ;;  %v1057_v8 = vld [vmem:[%s14548_s20 + $0x78] sm:$0xff]  ;;  %9954 = vmatprep.subr.bf16.mxu1 %v14571_v37  ;;  %v1148_v37 = vld [vmem:[%s14548_s20 + $0x350] sm:$0xff] }
 0x7c6   : > { %v14532_v23 = vpop.eup %12175 }
 0x7c7   : > { %v3562_v20 = vsel %vm3120_vm8, %v14532_v23, 0.0 }
 0x7c8   : > { %3563 = vadd.xlane.f32.xlu1 %v3562_v20  ;;  %v1061_v20 = vld [vmem:[%s14548_s20 + $0x98] sm:$0xff] }
 0x7ca   : > { %v14536_v5 = vpop.eup %12177 }
 0x7cb   : > { %v3565_v3 = vsel %vm3120_vm8, %v14536_v5, 0.0 }
 0x7cc   : > { %3566 = vadd.xlane.f32.xlu0 %v3565_v3  ;;  %v1064_v3 = vld [vmem:[%s14548_s20 + $0xb0] sm:$0xff] }
 0x7cd   : > { %v14581_v6 = vpack.c.bf16 %v1064_v3, %v1061_v20  ;;  %v1072_v3 = vld [vmem:[%s14548_s20 + $0xf0] sm:$0xff] }
 0x7ce   : > { %v14540_v30 = vpop.eup %12179  ;;  %v14608_v62 = vpack.c.bf16 %v1075_v22, %v1072_v3  ;;  %v1084_v22 = vld [vmem:[%s14548_s20 + $0x150] sm:$0xff] }
 0x7cf   : > { %v3568_v25 = vsel %vm3127_vm9, %v14540_v30, 0.0  ;;  %18852 = vst [vmem:[#allocation239_spill] sm:$0xff] %v14581_v6 }
 0x7d0   : > { %3569 = vadd.xlane.f32.xlu1 %v3568_v25  ;;  %v14578_v25 = vpack.c.bf16 %v1057_v8, %v1054_v28  ;;  %v1076_v28 = vld [vmem:[%s14548_s20 + $0x110] sm:$0xff]  ;;  %v14598_v8 = vpack.c.bf16 %v1069_v0, %v1066_v52  ;;  %18857 = vst [vmem:[#allocation244_spill] sm:$0xff] %v14608_v62  ;;  %v14611_v52 = vpack.c.bf16 %v1082_v47, %v1079_v49  ;;  %v1078_v0 = vld [vmem:[%s14548_s20 + $0x120] sm:$0xff]  ;;  %v1087_v49 = vld [vmem:[%s14548_s20 + $0x168] sm:$0xff] }
 0x7d1   : > { %v14601_v20 = vpack.c.bf16 %v1076_v28, %v1073_v13  ;;  %v1081_v13 = vld [vmem:[%s14548_s20 + $0x138] sm:$0xff]  ;;  %v1091_v47 = vld [vmem:[%s14548_s20 + $0x188] sm:$0xff] }
 0x7d2   : > { %18851 = vst [vmem:[#allocation238_spill] sm:$0xff] %v14578_v25  ;;  %9956 = vmatpush1.bf16.msra.mxu1 %v14578_v25  ;;  %18855 = vst [vmem:[#allocation242_spill] sm:$0xff] %v14598_v8  ;;  %v1085_v28 = vld [vmem:[%s14548_s20 + $0x158] sm:$0xff]  ;;  %v1132_v25 = vld [vmem:[%s14548_s20 + $0x2d0] sm:$0xff] }
 0x7d3   : > { %9958 = vmatprep.subr.bf16.mxu1 %v14581_v6  ;;  %18856 = vst [vmem:[#allocation243_spill] sm:$0xff] %v14601_v20  ;;  %18858 = vst [vmem:[#allocation245_spill] sm:$0xff] %v14611_v52 }
 0x7d6   : > { %9960 = vmatpush1.bf16.msra.mxu1 %v14588_v40  ;;  %v14618_v40 = vpack.c.bf16 %v1081_v13, %v1078_v0  ;;  %v1090_v13 = vld [vmem:[%s14548_s20 + $0x180] sm:$0xff] }
 0x7d7   : > { %9962 = vmatprep.subr.bf16.mxu1 %v14591_v2  ;;  %v1088_v2 = vld [vmem:[%s14548_s20 + $0x170] sm:$0xff] }
 0x7d8   : > { %18859 = vst [vmem:[#allocation246_spill] sm:$0xff] %v14618_v40  ;;  %v14621_v3 = vpack.c.bf16 %v1088_v2, %v1085_v28  ;;  %v1093_v2 = vld [vmem:[%s14548_s20 + $0x198] sm:$0xff] }
 0x7d9   : > { %v1097_v28 = vld [vmem:[%s14548_s20 + $0x1b8] sm:$0xff] }
 0x7da   : > { %9964 = vmatpush1.bf16.msra.mxu1 %v14598_v8  ;;  %18860 = vst [vmem:[#allocation247_spill] sm:$0xff] %v14621_v3  ;;  %v14628_v8 = vpack.c.bf16 %v1087_v49, %v1084_v22  ;;  %v1096_v49 = vld [vmem:[%s14548_s20 + $0x1b0] sm:$0xff] }
 0x7db   : > { %9966 = vmatprep.subr.bf16.mxu1 %v14601_v20  ;;  %v1094_v20 = vld [vmem:[%s14548_s20 + $0x1a0] sm:$0xff] }
 0x7dc   : > { %18861 = vst [vmem:[#allocation248_spill] sm:$0xff] %v14628_v8  ;;  %v14631_v0 = vpack.c.bf16 %v1094_v20, %v1091_v47  ;;  %v1099_v20 = vld [vmem:[%s14548_s20 + $0x1c8] sm:$0xff] }
 0x7dd   : > { %v1103_v47 = vld [vmem:[%s14548_s20 + $0x1e8] sm:$0xff] }
 0x7de   : > { %9968 = vmatpush1.bf16.msra.mxu1 %v14608_v62  ;;  %18862 = vst [vmem:[#allocation249_spill] sm:$0xff] %v14631_v0  ;;  %v14638_v62 = vpack.c.bf16 %v1093_v2, %v1090_v13  ;;  %v1102_v2 = vld [vmem:[%s14548_s20 + $0x1e0] sm:$0xff] }
 0x7df   : > { %9970 = vmatprep.subr.bf16.mxu1 %v14611_v52  ;;  %v1100_v52 = vld [vmem:[%s14548_s20 + $0x1d0] sm:$0xff] }
 0x7e0   : > { %18863 = vst [vmem:[#allocation250_spill] sm:$0xff] %v14638_v62  ;;  %v14641_v22 = vpack.c.bf16 %v1100_v52, %v1097_v28  ;;  %v1105_v52 = vld [vmem:[%s14548_s20 + $0x1f8] sm:$0xff] }
 0x7e1   : > { %v1109_v28 = vld [vmem:[%s14548_s20 + $0x218] sm:$0xff] }
 0x7e2   : > { %9972 = vmatpush1.bf16.msra.mxu1 %v14618_v40  ;;  %18864 = vst [vmem:[#allocation251_spill] sm:$0xff] %v14641_v22  ;;  %v14648_v40 = vpack.c.bf16 %v1099_v20, %v1096_v49  ;;  %v1108_v20 = vld [vmem:[%s14548_s20 + $0x210] sm:$0xff] }
 0x7e3   : > { %9974 = vmatprep.subr.bf16.mxu1 %v14621_v3  ;;  %v1106_v3 = vld [vmem:[%s14548_s20 + $0x200] sm:$0xff] }
 0x7e4   : > { %18865 = vst [vmem:[#allocation252_spill] sm:$0xff] %v14648_v40  ;;  %v14651_v13 = vpack.c.bf16 %v1106_v3, %v1103_v47  ;;  %v1111_v3 = vld [vmem:[%s14548_s20 + $0x228] sm:$0xff] }
 0x7e5   : > { %v1115_v47 = vld [vmem:[%s14548_s20 + $0x248] sm:$0xff] }
 0x7e6   : > { %9976 = vmatpush1.bf16.msra.mxu1 %v14628_v8  ;;  %18866 = vst [vmem:[#allocation253_spill] sm:$0xff] %v14651_v13  ;;  %v14658_v8 = vpack.c.bf16 %v1105_v52, %v1102_v2  ;;  %v1114_v52 = vld [vmem:[%s14548_s20 + $0x240] sm:$0xff] }
 0x7e7   : > { %9978 = vmatprep.subr.bf16.mxu1 %v14631_v0  ;;  %v1112_v0 = vld [vmem:[%s14548_s20 + $0x230] sm:$0xff] }
 0x7e8   : > { %18867 = vst [vmem:[#allocation254_spill] sm:$0xff] %v14658_v8  ;;  %v14661_v49 = vpack.c.bf16 %v1112_v0, %v1109_v28  ;;  %v1117_v0 = vld [vmem:[%s14548_s20 + $0x258] sm:$0xff] }
 0x7e9   : > { %v1121_v28 = vld [vmem:[%s14548_s20 + $0x278] sm:$0xff] }
 0x7ea   : > { %9980 = vmatpush1.bf16.msra.mxu1 %v14638_v62  ;;  %18868 = vst [vmem:[#allocation255_spill] sm:$0xff] %v14661_v49  ;;  %v14668_v62 = vpack.c.bf16 %v1111_v3, %v1108_v20  ;;  %v1120_v3 = vld [vmem:[%s14548_s20 + $0x270] sm:$0xff] }
 0x7eb   : > { %9982 = vmatprep.subr.bf16.mxu1 %v14641_v22  ;;  %v1118_v22 = vld [vmem:[%s14548_s20 + $0x260] sm:$0xff] }
 0x7ec   : > { %18869 = vst [vmem:[#allocation256_spill] sm:$0xff] %v14668_v62  ;;  %v14671_v2 = vpack.c.bf16 %v1118_v22, %v1115_v47  ;;  %v1123_v22 = vld [vmem:[%s14548_s20 + $0x288] sm:$0xff] }
 0x7ed   : > { %v1127_v47 = vld [vmem:[%s14548_s20 + $0x2a8] sm:$0xff] }
 0x7ee   : > { %9984 = vmatpush1.bf16.msra.mxu1 %v14648_v40  ;;  %18870 = vst [vmem:[#allocation257_spill] sm:$0xff] %v14671_v2  ;;  %v14678_v40 = vpack.c.bf16 %v1117_v0, %v1114_v52  ;;  %v1126_v52 = vld [vmem:[%s14548_s20 + $0x2a0] sm:$0xff]  ;;  %v1129_v0 = vld [vmem:[%s14548_s20 + $0x2b8] sm:$0xff] }
 0x7ef   : > { %9986 = vmatprep.subr.bf16.mxu1 %v14651_v13  ;;  %v1124_v13 = vld [vmem:[%s14548_s20 + $0x290] sm:$0xff] }
 0x7f0   : > { %18871 = vst [vmem:[#allocation258_spill] sm:$0xff] %v14678_v40  ;;  %v14681_v20 = vpack.c.bf16 %v1124_v13, %v1121_v28  ;;  %v14698_v13 = vpack.c.bf16 %v1129_v0, %v1126_v52 }
 0x7f2   : > { %9988 = vmatpush1.bf16.msra.mxu1 %v14658_v8  ;;  %18872 = vst [vmem:[#allocation259_spill] sm:$0xff] %v14681_v20  ;;  %v14688_v8 = vpack.c.bf16 %v1123_v22, %v1120_v3  ;;  %18875 = vst [vmem:[#allocation262_spill] sm:$0xff] %v14698_v13  ;;  %v1135_v3 = vld [vmem:[%s14548_s20 + $0x2e8] sm:$0xff] }
 0x7f3   : > { %9990 = vmatprep.subr.bf16.mxu1 %v14661_v49  ;;  %v1130_v49 = vld [vmem:[%s14548_s20 + $0x2c0] sm:$0xff] }
 0x7f4   : > { %18873 = vst [vmem:[#allocation260_spill] sm:$0xff] %v14688_v8  ;;  %v14691_v6 = vpack.c.bf16 %v1130_v49, %v1127_v47  ;;  %v14706_v49 = vpack.c.bf16 %v1135_v3, %v1132_v25  ;;  %v18878_v3 = vpack.c.bf16 %v14422_v19, %v14419_v60 }
 0x7f6   : > { %9992 = vmatpush1.bf16.msra.mxu1 %v14668_v62  ;;  %18874 = vst [vmem:[#allocation261_spill] sm:$0xff] %v14691_v6  ;;  %v1133_v62 = vld [vmem:[%s14548_s20 + $0x2d8] sm:$0xff]  ;;  %18877 = vst [vmem:[#allocation264_spill] sm:$0xff] %v14706_v49 }
 0x7f7   : > { %9994 = vmatprep.subr.bf16.mxu1 %v14671_v2  ;;  %v1136_v2 = vld [vmem:[%s14548_s20 + $0x2f0] sm:$0xff] }
 0x7f8   : > { %v14701_v28 = vpack.c.bf16 %v1136_v2, %v1133_v62 }
 0x7fa   : > { %9996 = vmatpush1.bf16.msra.mxu1 %v14678_v40  ;;  %18876 = vst [vmem:[#allocation263_spill] sm:$0xff] %v14701_v28  ;;  %v1145_v40 = vld [vmem:[%s14548_s20 + $0x338] sm:$0xff] }
 0x7fb   : > { %9998 = vmatprep.subr.bf16.mxu1 %v14681_v20  ;;  %v1141_v20 = vld [vmem:[%s14548_s20 + $0x318] sm:$0xff] }
 0x7fe   : > { %10000 = vmatpush1.bf16.msra.mxu1 %v14688_v8  ;;  %v1095_v8 = vld [vmem:[%s14548_s20 + $0x1a8] sm:$0xff] }
 0x7ff   : > { %10002 = vmatprep.subr.bf16.mxu1 %v14691_v6  ;;  %v1092_v6 = vld [vmem:[%s14548_s20 + $0x190] sm:$0xff] }
 0x802   : > { %10004 = vmatpush1.bf16.msra.mxu1 %v14698_v13 }
 0x803   : > { %10006 = vmatprep.subr.bf16.mxu1 %v14701_v28 }
 0x806   : > { %10008 = vmatpush1.bf16.msra.mxu1 %v14706_v49 }
 0x849   : > { %v3353_v22 = vpop.xlane.xlu0 %3352 }
 0x84a   : > { %12181 = vrcp.f32 %v3353_v22 }
 0x84d   : > { %v3356_v47 = vpop.xlane.xlu1 %3355 }
 0x84e   : > { %12183 = vrcp.f32 %v3356_v47  ;;  %v14721_v47 = vpack.c.bf16 %v1095_v8, %v1092_v6  ;;  %v1047_v6 = vld [vmem:[%s14548_s20 + $0x28] sm:$0xff]  ;;  %v1098_v8 = vld [vmem:[%s14548_s20 + $0x1c0] sm:$0xff] }
 0x850   : > { %18879 = vst [vmem:[#allocation265_spill] sm:$0xff] %v14721_v47 }
 0x851   : > { %v3359_v52 = vpop.xlane.xlu0 %3358 }
 0x852   : > { %12185 = vrcp.f32 %v3359_v52 }
 0x854   : > { %v12182_v62 = vpop.eup %12181 }
 0x855   : > { %v3361_v2 = vmul.f32 %v12182_v62, %v14520_v14  ;;  %v3564_v0 = vpop.xlane.xlu1 %3563  ;;  %v1101_v62 = vld [vmem:[%s14548_s20 + $0x1d8] sm:$0xff] }
 0x856   : > { %12187 = vrcp.f32 %v3564_v0  ;;  %v14740_v0 = vpack.c.bf16 %v1101_v62, %v1098_v8  ;;  %v1110_v8 = vld [vmem:[%s14548_s20 + $0x220] sm:$0xff]  ;;  %v1113_v62 = vld [vmem:[%s14548_s20 + $0x238] sm:$0xff] }
 0x857   : > { %9200 = vmatmul.mubr.msk.f32.vlgmr.msra.gmra.mrb[28].mxu0 %vm3120_vm8, %v3361_v2 }
 0x858   : > { %v12184_v25 = vpop.eup %12183  ;;  %9944 = vmatpush3.bf16.msra.mxu0 %v18878_v3  ;;  %9202 = vmatprep.mubr.msk.f32.mxu0 %vm12517_vm7, %v18720_v50  ;;  %18881 = vst [vmem:[#allocation267_spill] sm:$0xff] %v14740_v0  ;;  %v1053_v3 = vld [vmem:[%s14548_s20 + $0x58] sm:$0xff] }
 0x859   : > { %v3567_v22 = vpop.xlane.xlu0 %3566  ;;  %9227 = vmatprep.subr.mxu0 %v18720_v50  ;;  %v3363_v14 = vmul.f32 %v12184_v25, %v14524_v29  ;;  %v1044_v29 = vld [vmem:[%s14548_s20 + $0x10] sm:$0xff]  ;;  %v1050_v25 = vld [vmem:[%s14548_s20 + $0x40] sm:$0xff] }
 0x85a   : > { %12189 = vrcp.f32 %v3567_v22  ;;  %v14737_v2 = vpack.c.bf16 %v1047_v6, %v1044_v29  ;;  %v1104_v22 = vld [vmem:[%s14548_s20 + $0x1f0] sm:$0xff]  ;;  %v1059_v6 = vld [vmem:[%s14548_s20 + $0x88] sm:$0xff] }
 0x85b   : > { %9203 = vmatmul.mubr.msk.f32.gmra.mrb[30].mxu0 %vm3120_vm8, %v3363_v14  ;;  %v1107_v14 = vld [vmem:[%s14548_s20 + $0x208] sm:$0xff]  ;;  %v1056_v29 = vld [vmem:[%s14548_s20 + $0x70] sm:$0xff] }
 0x85c   : > { %v12186_v52 = vpop.eup %12185  ;;  %9228 = vmatpush3.msk.msra.mxu0 %vm2069_vm6, %v14427_v35  ;;  %9205 = vmatprep.mubr.msk.f32.mxu0 %vm12517_vm7, %v18720_v50  ;;  %18880 = vst [vmem:[#allocation266_spill] sm:$0xff] %v14737_v2 }
 0x85d   : > { %v3570_v60 = vpop.xlane.xlu1 %3569  ;;  %v3365_v19 = vmul.f32 %v12186_v52, %v14528_v56  ;;  %10042 = vmatprep.subr.bf16.mxu0 %v14721_v47  ;;  %v1405_v47 = vld [vmem:[%s15027_s25 + $0x6d8] sm:$0xff] }
 0x85e   : > { %12191 = vrcp.f32 %v3570_v60  ;;  %v14750_v60 = vpack.c.bf16 %v1053_v3, %v1050_v25  ;;  %v14768_v25 = vpack.c.bf16 %v1113_v62, %v1110_v8  ;;  %v1062_v3 = vld [vmem:[%s14548_s20 + $0xa0] sm:$0xff]  ;;  %v1125_v62 = vld [vmem:[%s14548_s20 + $0x298] sm:$0xff] }
 0x85f   : > { %9206 = vmatmul.mubr.msk.f32.gmra.mrb[32].mxu0 %vm3120_vm8, %v3365_v19  ;;  %v14754_v19 = vpack.c.bf16 %v1107_v14, %v1104_v22  ;;  %v1065_v22 = vld [vmem:[%s14548_s20 + $0xb8] sm:$0xff]  ;;  %v1116_v14 = vld [vmem:[%s14548_s20 + $0x250] sm:$0xff]  ;;  %v1122_v8 = vld [vmem:[%s14548_s20 + $0x280] sm:$0xff] }
 0x860   : > { %v12188_v35 = vpop.eup %12187  ;;  %9229 = vmatprep.mubr.msk.f32.mxu0 %vm12517_vm7, %v18720_v50  ;;  %18882 = vst [vmem:[#allocation268_spill] sm:$0xff] %v14750_v60  ;;  %18885 = vst [vmem:[#allocation271_spill] sm:$0xff] %v14768_v25 }
 0x861   : > { %v3572_v56 = vmul.f32 %v12188_v35, %v14532_v23  ;;  %18883 = vst [vmem:[#allocation269_spill] sm:$0xff] %v14754_v19 }
 0x863   : > { %9230 = vmatmul.mubr.msk.f32.vlgmr.msra.gmra.mrb[34].mxu0 %vm3120_vm8, %v3572_v56 }
 0x864   : > { %v12190_v52 = vpop.eup %12189  ;;  %9232 = vmatprep.mubr.msk.f32.mxu0 %vm12517_vm7, %v18720_v50  ;;  %10044 = vmatpush3.bf16.msra.mxu0 %v14737_v2  ;;  %v1403_v2 = vld [vmem:[%s15027_s25 + $0x6c8] sm:$0xff] }
 0x865   : > { %v3574_v23 = vmul.f32 %v12190_v52, %v14536_v5  ;;  %10046 = vmatprep.subr.bf16.mxu0 %v14740_v0  ;;  %v14764_v5 = vpack.c.bf16 %v1059_v6, %v1056_v29  ;;  %v1119_v52 = vld [vmem:[%s14548_s20 + $0x268] sm:$0xff]  ;;  %v1068_v29 = vld [vmem:[%s14548_s20 + $0xd0] sm:$0xff] }
 0x866   : > { %v1071_v6 = vld [vmem:[%s14548_s20 + $0xe8] sm:$0xff] }
 0x867   : > { %9233 = vmatmul.mubr.msk.f32.gmra.mrb[36].mxu0 %vm3120_vm8, %v3574_v23  ;;  %18884 = vst [vmem:[#allocation270_spill] sm:$0xff] %v14764_v5  ;;  %v14776_v23 = vpack.c.bf16 %v1065_v22, %v1062_v3  ;;  %v1074_v3 = vld [vmem:[%s14548_s20 + $0x100] sm:$0xff]  ;;  %v1077_v22 = vld [vmem:[%s14548_s20 + $0x118] sm:$0xff]  ;;  %v1390_v0 = vld [vmem:[%s15027_s25 + $0x660] sm:$0xff] }
 0x868   : > { %v12192_v35 = vpop.eup %12191  ;;  %9235 = vmatprep.mubr.msk.f32.mxu0 %vm12517_vm7, %v18720_v50  ;;  %10048 = vmatpush3.bf16.msra.mxu0 %v14750_v60  ;;  %v14796_v49 = vpack.c.bf16 %v1077_v22, %v1074_v3  ;;  %v1086_v22 = vld [vmem:[%s14548_s20 + $0x160] sm:$0xff] }
 0x869   : > { %v3576_v56 = vmul.f32 %v12192_v35, %v14540_v30  ;;  %10050 = vmatprep.subr.bf16.mxu0 %v14754_v19  ;;  %18886 = vst [vmem:[#allocation272_spill] sm:$0xff] %v14776_v23  ;;  %v14779_v30 = vpack.c.bf16 %v1119_v52, %v1116_v14  ;;  %v14786_v35 = vpack.c.bf16 %v1071_v6, %v1068_v29  ;;  %v1128_v14 = vld [vmem:[%s14548_s20 + $0x2b0] sm:$0xff]  ;;  %v1131_v52 = vld [vmem:[%s14548_s20 + $0x2c8] sm:$0xff] }
 0x86a   : > { %18890 = vst [vmem:[#allocation276_spill] sm:$0xff] %v14796_v49  ;;  %v14799_v28 = vpack.c.bf16 %v1131_v52, %v1128_v14  ;;  %v1080_v29 = vld [vmem:[%s14548_s20 + $0x130] sm:$0xff]  ;;  %v1083_v6 = vld [vmem:[%s14548_s20 + $0x148] sm:$0xff]  ;;  %v1089_v14 = vld [vmem:[%s14548_s20 + $0x178] sm:$0xff] }
 0x86b   : > { %9236 = vmatmul.mubr.msk.f32.gmra.mrb[38].mxu0 %vm3120_vm8, %v3576_v56  ;;  %18887 = vst [vmem:[#allocation273_spill] sm:$0xff] %v14779_v30  ;;  %18888 = vst [vmem:[#allocation274_spill] sm:$0xff] %v14786_v35  ;;  %v14789_v56 = vpack.c.bf16 %v1125_v62, %v1122_v8  ;;  %v1134_v8 = vld [vmem:[%s14548_s20 + $0x2e0] sm:$0xff]  ;;  %v1137_v62 = vld [vmem:[%s14548_s20 + $0x2f8] sm:$0xff]  ;;  %v14806_v13 = vpack.c.bf16 %v1083_v6, %v1080_v29  ;;  %v14814_v52 = vpack.c.bf16 %v1089_v14, %v1086_v22 }
 0x86c   : > { %10052 = vmatpush3.bf16.msra.mxu0 %v14764_v5  ;;  %18891 = vst [vmem:[#allocation277_spill] sm:$0xff] %v14799_v28  ;;  %v14809_v3 = vpack.c.bf16 %v1137_v62, %v1134_v8  ;;  %v1139_v29 = vld [vmem:[%s14548_s20 + $0x308] sm:$0xff]  ;;  %v1142_v6 = vld [vmem:[%s14548_s20 + $0x320] sm:$0xff]  ;;  %v1140_v22 = vld [vmem:[%s14548_s20 + $0x310] sm:$0xff] }
 0x86d   : > { %10054 = vmatprep.subr.bf16.mxu0 %v14768_v25  ;;  %18889 = vst [vmem:[#allocation275_spill] sm:$0xff] %v14789_v56  ;;  %18892 = vst [vmem:[#allocation278_spill] sm:$0xff] %v14806_v13  ;;  %v14821_v8 = vpack.c.bf16 %v1142_v6, %v1139_v29  ;;  %v1138_v62 = vld [vmem:[%s14548_s20 + $0x300] sm:$0xff]  ;;  %v1143_v14 = vld [vmem:[%s14548_s20 + $0x328] sm:$0xff] }
 0x86e   : > { %18893 = vst [vmem:[#allocation279_spill] sm:$0xff] %v14809_v3  ;;  %18894 = vst [vmem:[#allocation280_spill] sm:$0xff] %v14814_v52  ;;  %v14830_v31 = vpack.c.bf16 %v1141_v20, %v1138_v62  ;;  %v14832_v17 = vpack.c.bf16 %v1143_v14, %v1140_v22  ;;  %v1147_v29 = vld [vmem:[%s14548_s20 + $0x348] sm:$0xff]  ;;  %v1146_v6 = vld [vmem:[%s14548_s20 + $0x340] sm:$0xff] }
 0x86f   : > { %18895 = vst [vmem:[#allocation281_spill] sm:$0xff] %v14821_v8  ;;  %10010 = vmatprep.subr.bf16.mxu1 %v14821_v8  ;;  %v1149_v8 = vld [vmem:[%s14548_s20 + $0x358] sm:$0xff]  ;;  %v1150_v20 = vld [vmem:[%s14548_s20 + $0x360] sm:$0xff]  ;;  %v1152_v62 = vld [vmem:[%s14548_s20 + $0x370] sm:$0xff] }
 0x870   : > { %10056 = vmatpush3.bf16.msra.mxu0 %v14776_v23  ;;  %18896 = vst [vmem:[#allocation282_spill] sm:$0xff] %v14830_v31  ;;  %18897 = vst [vmem:[#allocation283_spill] sm:$0xff] %v14832_v17  ;;  %v1155_v22 = vld [vmem:[%s14548_s20 + $0x388] sm:$0xff]  ;;  %v1393_v23 = vld [vmem:[%s15027_s25 + $0x678] sm:$0xff] }
 0x871   : > { %10058 = vmatprep.subr.bf16.mxu0 %v14779_v30 }
 0x874   : > { %10060 = vmatpush3.bf16.msra.mxu0 %v14786_v35  ;;  %v1386_v35 = vld [vmem:[%s15027_s25 + $0x640] sm:$0xff] }
 0x875   : > { %10062 = vmatprep.subr.bf16.mxu0 %v14789_v56  ;;  %v1318_v56 = vld [vmem:[%s15027_s25 + $0x420] sm:$0xff] }
 0x878   : > { %10064 = vmatpush3.bf16.msra.mxu0 %v14796_v49  ;;  %v1154_v49 = vld [vmem:[%s14548_s20 + $0x380] sm:$0xff] }
 0x879   : > { %10066 = vmatprep.subr.bf16.mxu0 %v14799_v28  ;;  %v1151_v28 = vld [vmem:[%s14548_s20 + $0x368] sm:$0xff] }
 0x87c   : > { %10068 = vmatpush3.bf16.msra.mxu0 %v14806_v13 }
 0x87d   : > { %10070 = vmatprep.subr.bf16.mxu0 %v14809_v3  ;;  %v14835_v3 = vpack.c.bf16 %v1148_v37, %v1145_v40  ;;  %v14846_v37 = vpack.c.bf16 %v1147_v29, %v1144_v55  ;;  %v14848_v40 = vpack.c.bf16 %v1149_v8, %v1146_v6  ;;  %v1157_v55 = vld [vmem:[%s14548_s20 + $0x398] sm:$0xff]  ;;  %v1160_v8 = vld [vmem:[%s14548_s20 + $0x3b0] sm:$0xff] }
 0x87e   : > { %v1156_v29 = vld [vmem:[%s14548_s20 + $0x390] sm:$0xff] }
 0x87f   : > { %18898 = vst [vmem:[#allocation284_spill] sm:$0xff] %v14835_v3  ;;  %18899 = vst [vmem:[#allocation285_spill] sm:$0xff] %v14846_v37 }
 0x880   : > { %10072 = vmatpush3.bf16.msra.mxu0 %v14814_v52  ;;  %18900 = vst [vmem:[#allocation286_spill] sm:$0xff] %v14848_v40 }
 0x881   : > { %10073 = vmatprep.subr.bf16.mxu0 %v18816_v53 }
 0x92a   : > { %v3444_v52 = vpop.f32.mrb[28].mxu0 }
 0x92b   : > { %v9201_v13 = vpop.f32.mrb[29].mxu0  ;;  %3733 = vmatprep.mubr.f32.mxu1 %v3444_v52  ;;  %3899 = vmatprep.mubr.f32.mxu0 %v3444_v52  ;;  %v14853_v52 = vpack.c.bf16 %v1154_v49, %v1151_v28  ;;  %v14866_v49 = vpack.c.bf16 %v1155_v22, %v1152_v62  ;;  %v1162_v22 = vld [vmem:[%s14548_s20 + $0x3c0] sm:$0xff] }
 0x92c   : > { %3734 = vmatmul.mubr.f32.vlgmr.msra.gmra.mrb[40].mxu1 %v14502_v32  ;;  %3900 = vmatmul.mubr.f32.vlgmr.msra.gmra.mrb[40].mxu0 %v14502_v32  ;;  %v1153_v32 = vld [vmem:[%s14548_s20 + $0x378] sm:$0xff] }
 0x92d   : > { %10012 = vmatpush1.bf16.msra.mxu1 %v14830_v31  ;;  %10075 = vmatpush3.bf16.msra.mxu0 %v14832_v17  ;;  %18901 = vst [vmem:[#allocation287_spill] sm:$0xff] %v14853_v52  ;;  %v14864_v28 = vpack.c.bf16 %v1153_v32, %v1150_v20  ;;  %18903 = vst [vmem:[#allocation289_spill] sm:$0xff] %v14866_v49  ;;  %v1163_v20 = vld [vmem:[%s14548_s20 + $0x3c8] sm:$0xff]  ;;  %v1166_v32 = vld [vmem:[%s14548_s20 + $0x3e0] sm:$0xff] }
 0x92e   : > { %v3449_v13 = vpop.f32.mrb[30].mxu0  ;;  %10014 = vmatprep.subr.bf16.mxu1 %v14835_v3  ;;  %10076 = vmatprep.subr.bf16.mxu0 %v18816_v53  ;;  %v1161_v3 = vld [vmem:[%s14548_s20 + $0x3b8] sm:$0xff]  ;;  %v1170_v31 = vld [vmem:[%s14548_s20 + $0x400] sm:$0xff] }
 0x92f   : > { %v9204_v14 = vpop.f32.mrb[31].mxu0  ;;  %3739 = vmatprep.mubr.f32.mxu1 %v3449_v13  ;;  %3904 = vmatprep.mubr.f32.mxu0 %v3449_v13  ;;  %18902 = vst [vmem:[#allocation288_spill] sm:$0xff] %v14864_v28  ;;  %v14871_v13 = vpack.c.bf16 %v1160_v8, %v1157_v55  ;;  %v14889_v8 = vpack.c.bf16 %v1166_v32, %v1163_v20 }
 0x930   : > { %3740 = vmatmul.mubr.f32.gmra.mrb[42].mxu1 %v14504_v39  ;;  %3905 = vmatmul.mubr.f32.gmra.mrb[42].mxu0 %v14504_v39  ;;  %v1159_v39 = vld [vmem:[%s14548_s20 + $0x3a8] sm:$0xff]  ;;  %v1158_v14 = vld [vmem:[%s14548_s20 + $0x3a0] sm:$0xff] }
 0x931   : > { %10016 = vmatpush1.bf16.msra.mxu1 %v14846_v37  ;;  %10078 = vmatpush3.bf16.msra.mxu0 %v14848_v40  ;;  %18904 = vst [vmem:[#allocation290_spill] sm:$0xff] %v14871_v13  ;;  %v14882_v62 = vpack.c.bf16 %v1159_v39, %v1156_v29  ;;  %18907 = vst [vmem:[#allocation293_spill] sm:$0xff] %v14889_v8  ;;  %v1169_v29 = vld [vmem:[%s14548_s20 + $0x3f8] sm:$0xff]  ;;  %v1172_v39 = vld [vmem:[%s14548_s20 + $0x410] sm:$0xff] }
 0x932   : > { %v3454_v6 = vpop.f32.mrb[32].mxu0  ;;  %10018 = vmatprep.subr.bf16.mxu1 %v14853_v52  ;;  %10079 = vmatprep.subr.bf16.mxu0 %v18816_v53  ;;  %v1164_v52 = vld [vmem:[%s14548_s20 + $0x3d0] sm:$0xff]  ;;  %v14908_v32 = vpack.c.bf16 %v1172_v39, %v1169_v29  ;;  %v1174_v29 = vld [vmem:[%s14548_s20 + $0x420] sm:$0xff] }
 0x933   : > { %v9207_v37 = vpop.f32.mrb[33].mxu0  ;;  %3745 = vmatprep.mubr.f32.mxu1 %v3454_v6  ;;  %3909 = vmatprep.mubr.f32.mxu0 %v3454_v6  ;;  %18905 = vst [vmem:[#allocation291_spill] sm:$0xff] %v14882_v62  ;;  %v1165_v6 = vld [vmem:[%s14548_s20 + $0x3d8] sm:$0xff]  ;;  %v1182_v40 = vld [vmem:[%s14548_s20 + $0x460] sm:$0xff] }
 0x934   : > { %3746 = vmatmul.mubr.f32.gmra.mrb[44].mxu1 %v14506_v7  ;;  %3910 = vmatmul.mubr.f32.gmra.mrb[44].mxu0 %v14506_v7  ;;  %v14884_v37 = vpack.c.bf16 %v1161_v3, %v1158_v14  ;;  %v1167_v7 = vld [vmem:[%s14548_s20 + $0x3e8] sm:$0xff]  ;;  %v14901_v3 = vpack.c.bf16 %v1165_v6, %v1162_v22  ;;  %18910 = vst [vmem:[#allocation296_spill] sm:$0xff] %v14908_v32 }
 0x935   : > { %10020 = vmatpush1.bf16.msra.mxu1 %v14864_v28  ;;  %10081 = vmatpush3.bf16.msra.mxu0 %v14866_v49  ;;  %v14903_v14 = vpack.c.bf16 %v1167_v7, %v1164_v52  ;;  %v1175_v22 = vld [vmem:[%s14548_s20 + $0x428] sm:$0xff]  ;;  %v1178_v52 = vld [vmem:[%s14548_s20 + $0x440] sm:$0xff] }
 0x936   : > { %18906 = vst [vmem:[#allocation292_spill] sm:$0xff] %v14884_v37  ;;  %v3655_v55 = vpop.f32.mrb[34].mxu0  ;;  %10022 = vmatprep.subr.bf16.mxu1 %v14871_v13  ;;  %10082 = vmatprep.subr.bf16.mxu0 %v18816_v53  ;;  %18908 = vst [vmem:[#allocation294_spill] sm:$0xff] %v14901_v3  ;;  %v1171_v13 = vld [vmem:[%s14548_s20 + $0x408] sm:$0xff] }
 0x937   : > { %v9231_v28 = vpop.f32.mrb[35].mxu0  ;;  %3816 = vmatprep.mubr.f32.mxu1 %v18720_v50  ;;  %9270 = vmatprep.mubr.msk.f32.mxu0 %vm12517_vm7, %v18720_v50  ;;  %18909 = vst [vmem:[#allocation295_spill] sm:$0xff] %v14903_v14  ;;  %v1179_v49 = vld [vmem:[%s14548_s20 + $0x448] sm:$0xff] }
 0x938   : > { %v1168_v28 = vld [vmem:[%s14548_s20 + $0x3f0] sm:$0xff] }
 0x939   : > { %10024 = vmatpush1.bf16.msra.mxu1 %v14882_v62  ;;  %10084 = vmatpush3.bf16.msra.mxu0 %v14884_v37  ;;  %v1173_v62 = vld [vmem:[%s14548_s20 + $0x418] sm:$0xff]  ;;  %v14917_v6 = vpack.c.bf16 %v1171_v13, %v1168_v28  ;;  %v1184_v28 = vld [vmem:[%s14548_s20 + $0x470] sm:$0xff] }
 0x93a   : > { %v3660_v20 = vpop.f32.mrb[36].mxu0  ;;  %10026 = vmatprep.subr.bf16.mxu1 %v14889_v8  ;;  %10085 = vmatprep.subr.bf16.mxu0 %v18816_v53  ;;  %v14919_v7 = vpack.c.bf16 %v1173_v62, %v1170_v31  ;;  %v1177_v8 = vld [vmem:[%s14548_s20 + $0x438] sm:$0xff] }
 0x93b   : > { %v9234_v37 = vpop.f32.mrb[37].mxu0  ;;  %18911 = vst [vmem:[#allocation297_spill] sm:$0xff] %v14917_v6  ;;  %v1181_v13 = vld [vmem:[%s14548_s20 + $0x458] sm:$0xff]  ;;  %v14933_v31 = vpack.c.bf16 %v1177_v8, %v1174_v29 }
 0x93c   : > { %18912 = vst [vmem:[#allocation298_spill] sm:$0xff] %v14919_v7  ;;  %v14924_v37 = vpack.c.bf16 %v1178_v52, %v1175_v22  ;;  %v14940_v22 = vpack.c.bf16 %v1184_v28, %v1181_v13  ;;  %v1183_v52 = vld [vmem:[%s14548_s20 + $0x468] sm:$0xff] }
 0x93d   : > { %10028 = vmatpush1.bf16.msra.mxu1 %v14901_v3  ;;  %10087 = vmatpush3.bf16.msra.mxu0 %v14903_v14  ;;  %v1176_v3 = vld [vmem:[%s14548_s20 + $0x430] sm:$0xff]  ;;  %18914 = vst [vmem:[#allocation300_spill] sm:$0xff] %v14933_v31 }
 0x93e   : > { %v3665_v39 = vpop.f32.mrb[38].mxu0  ;;  %10030 = vmatprep.subr.bf16.mxu1 %v14908_v32  ;;  %10088 = vmatprep.subr.bf16.mxu0 %v18816_v53  ;;  %18913 = vst [vmem:[#allocation299_spill] sm:$0xff] %v14924_v37  ;;  %v14935_v62 = vpack.c.bf16 %v1179_v49, %v1176_v3  ;;  %v1180_v32 = vld [vmem:[%s14548_s20 + $0x450] sm:$0xff]  ;;  %18916 = vst [vmem:[#allocation302_spill] sm:$0xff] %v14940_v22 }
 0x93f   : > { %v9237_v14 = vpop.f32.mrb[39].mxu0 }
 0x940   : > { %18915 = vst [vmem:[#allocation301_spill] sm:$0xff] %v14935_v62  ;;  %v1185_v14 = vld [vmem:[%s14548_s20 + $0x478] sm:$0xff] }
 0x941   : > { %10032 = vmatpush1.bf16.msra.mxu1 %v14917_v6  ;;  %10090 = vmatpush3.bf16.msra.mxu0 %v14919_v7  ;;  %v14947_v6 = vpack.c.bf16 %v1183_v52, %v1180_v32  ;;  %v14949_v8 = vpack.c.bf16 %v1185_v14, %v1182_v40  ;;  %v4006_v52 = vsub.s32 2, %v12931_v21  ;;  %v14963_v14 = vld [vmem:[%s12936_s24 + $0x48] sm:$0xff]  ;;  %v1321_v7 = vld [vmem:[%s15027_s25 + $0x438] sm:$0xff] }
 0x942   : > { %10034 = vmatprep.subr.bf16.mxu1 %v14924_v37  ;;  %10091 = vmatprep.subr.bf16.mxu0 %v18816_v53 }
 0x943   : > { %18917 = vst [vmem:[#allocation303_spill] sm:$0xff] %v14947_v6  ;;  %18918 = vst [vmem:[#allocation304_spill] sm:$0xff] %v14949_v8 }
 0x945   : > { %10036 = vmatpush1.bf16.msra.mxu1 %v14933_v31  ;;  %10093 = vmatpush3.bf16.msra.mxu0 %v14935_v62 }
 0x946   : > { %10038 = vmatprep.subr.bf16.mxu1 %v14940_v22  ;;  %10094 = vmatprep.subr.bf16.mxu0 %v18816_v53 }
 0x949   : > { %10040 = vmatpush1.bf16.msra.mxu1 %v14947_v6  ;;  %10096 = vmatpush3.bf16.msra.mxu0 %v14949_v8 }
 0x94c   : > { %3817 = vmatmul.mubr.f32.vlgmr.msra.gmra.mrb[40].mxu1 %v3655_v55  ;;  %9271 = vmatmul.mubr.f32.vlgmr.msra.gmra.mrb[46].mxu0 %v3655_v55 }
 0x94d   : > { %3822 = vmatprep.mubr.f32.mxu1 %v18720_v50  ;;  %9273 = vmatprep.mubr.msk.f32.mxu0 %vm12517_vm7, %v18720_v50 }
 0x950   : > { %3823 = vmatmul.mubr.f32.gmra.mrb[42].mxu1 %v3660_v20  ;;  %9274 = vmatmul.mubr.f32.gmra.mrb[48].mxu0 %v3660_v20  ;;  %v14966_v20 = vrot.slane %v14963_v14, %v4006_v52 }
 0x951   : > { %3828 = vmatprep.mubr.f32.mxu1 %v18720_v50  ;;  %9276 = vmatprep.mubr.msk.f32.mxu0 %vm12517_vm7, %v18720_v50 }
 0x952   : > { %18919 = vst [vmem:[#allocation305_spill] sm:$0xff] %v14966_v20 }
 0x954   : > { %3829 = vmatmul.mubr.f32.gmra.mrb[44].mxu1 %v3665_v39  ;;  %9277 = vmatmul.mubr.f32.gmra.mrb[50].mxu0 %v3665_v39  ;;  %v14969_v39 = vrot.slane %v14455_v27, %v4006_v52 }
 0x956   : > { %18920 = vst [vmem:[#allocation306_spill] sm:$0xff] %v14969_v39 }
 0x9ff   : > { %v8706_v53 = vpop.f32.mrb[40].mxu0 }
 0xa00   : > { %v8707_v40 = vpop.f32.mrb[41].mxu0 }
 0xa01   : > { %v8708_v49 = vadd.f32 %v8707_v40, %v8706_v53 }
 0xa03   : > { %v8709_v3 = vpop.f32.mrb[42].mxu0 }
 0xa04   : > { %v8710_v55 = vpop.f32.mrb[43].mxu0 }
 0xa05   : > { %v8711_v32 = vadd.f32 %v8710_v55, %v8709_v3  ;;  %v14973_v3 = vrot.slane %v14480_v9, %v4006_v52 }
 0xa07   : > { %v8712_v29 = vpop.f32.mrb[44].mxu0  ;;  %18921 = vst [vmem:[#allocation307_spill] sm:$0xff] %v14973_v3 }
 0xa08   : > { %v8713_v13 = vpop.f32.mrb[45].mxu0 }
 0xa09   : > { %v8714_v28 = vadd.f32 %v8713_v13, %v8712_v29 }
 0xa1f   : > { %v3818_v6 = vpop.f32.mrb[40].mxu1  ;;  %v3981_v22 = vpop.f32.mrb[46].mxu0 }
 0xa20   : > { %v3995_v53 = vadd.f32 %v3818_v6, %v13004_v36  ;;  %v3982_v40 = vadd.f32 %v8708_v49, %v3981_v22  ;;  %v3820_v55 = vpop.f32.mrb[41].mxu1  ;;  %v9272_v29 = vpop.f32.mrb[47].mxu0 }
 0xa21   : > { %v3996_v13 = vadd.f32 %v3820_v55, %v13010_v43 }
 0xa22   : > { %v14977_v31 = vadd.f32 %v14966_v20, %v3995_v53  ;;  %v3997_v37 = vadd.f32 %v3982_v40, %v12992_v16 }
 0xa23   : > { %v14981_v8 = vadd.f32 %v14969_v39, %v3996_v13  ;;  %v3824_v27 = vpop.f32.mrb[42].mxu1  ;;  %v3986_v62 = vpop.f32.mrb[48].mxu0 }
 0xa24   : > { %v14984_v36 = vadd.f32 %v14973_v3, %v3997_v37  ;;  %v3998_v9 = vadd.f32 %v3824_v27, %v13023_v54  ;;  %v3987_v6 = vadd.f32 %v8711_v32, %v3986_v62  ;;  %v3826_v22 = vpop.f32.mrb[43].mxu1  ;;  %v9275_v49 = vpop.f32.mrb[49].mxu0 }
 0xa25   : > { %v3999_v43 = vadd.f32 %v3826_v22, %v13029_v48  ;;  %v4025_v52 = vadd.f32 %v14981_v8, %v14977_v31 }
 0xa26   : > { %v14991_v16 = vadd.f32 %v14966_v20, %v3998_v9  ;;  %v4000_v53 = vadd.f32 %v3987_v6, %v13032_v57 }
 0xa27   : > { %v14995_v40 = vadd.f32 %v14969_v39, %v3999_v43  ;;  %v3830_v37 = vpop.f32.mrb[44].mxu1  ;;  %v3991_v55 = vpop.f32.mrb[50].mxu0  ;;  %v4026_v54 = vadd.f32 %v4025_v52, %v14984_v36 }
 0xa28   : > { %v14999_v62 = vadd.f32 %v14973_v3, %v4000_v53  ;;  %v4001_v48 = vadd.f32 %v3830_v37, %v13008_v42  ;;  %v3992_v32 = vadd.f32 %v8714_v28, %v3991_v55  ;;  %v3832_v29 = vpop.f32.mrb[45].mxu1  ;;  %v9278_v13 = vpop.f32.mrb[51].mxu0  ;;  %v1187_v53 = vld [vmem:[%s15027_s25 + $0x8] sm:$0xff]  ;;  %v1193_v37 = vld [vmem:[%s15027_s25 + $0x38] sm:$0xff] }
 0xa29   : > { %v4002_v27 = vadd.f32 %v3832_v29, %v13013_v45  ;;  %4027 = vadd.xlane.f32.xlu0 %v4026_v54  ;;  %v4029_v57 = vadd.f32 %v14995_v40, %v14991_v16  ;;  %v1189_v55 = vld [vmem:[%s15027_s25 + $0x18] sm:$0xff]  ;;  %v15032_v54 = vpack.c.bf16 %v1193_v37, %v1187_v53  ;;  %v1192_v29 = vld [vmem:[%s15027_s25 + $0x30] sm:$0xff]  ;;  %v1198_v37 = vld [vmem:[%s15027_s25 + $0x60] sm:$0xff] }
 0xa2a   : > { %v15006_v9 = vadd.f32 %v14966_v20, %v4001_v48  ;;  %v4003_v6 = vadd.f32 %v3992_v32, %v12996_v24  ;;  %v1195_v48 = vld [vmem:[%s15027_s25 + $0x48] sm:$0xff]  ;;  %v1186_v32 = vld [vmem:[%s15027_s25] sm:$0xff] }
 0xa2b   : > { %v15010_v22 = vadd.f32 %v14969_v39, %v4002_v27  ;;  %v4030_v42 = vadd.f32 %v4029_v57, %v14999_v62  ;;  %18922 = vst [vmem:[#allocation308_spill] sm:$0xff] %v15032_v54  ;;  %v15037_v13 = vpack.c.bf16 %v1195_v48, %v1189_v55  ;;  %v15039_v27 = vpack.c.bf16 %v1192_v29, %v1186_v32  ;;  %v1188_v57 = vld [vmem:[%s15027_s25 + $0x10] sm:$0xff]  ;;  %v1206_v29 = vld [vmem:[%s15027_s25 + $0xa0] sm:$0xff] }
 0xa2c   : > { %v15014_v28 = vadd.f32 %v14973_v3, %v4003_v6  ;;  %v4033_v45 = vsel %vm2069_vm6, %v15006_v9, 0.0  ;;  %v1194_v6 = vld [vmem:[%s15027_s25 + $0x40] sm:$0xff]  ;;  %10098 = vmatprep.subr.bf16.mxu0 %v15032_v54  ;;  %v1204_v55 = vld [vmem:[%s15027_s25 + $0x90] sm:$0xff] }
 0xa2d   : > { %4031 = vadd.xlane.f32.xlu1 %v4030_v42  ;;  %v4034_v49 = vsel %vm2069_vm6, %v15010_v22, 0.0  ;;  %18923 = vst [vmem:[#allocation309_spill] sm:$0xff] %v15037_v13  ;;  %18924 = vst [vmem:[#allocation310_spill] sm:$0xff] %v15039_v27  ;;  %v1199_v42 = vld [vmem:[%s15027_s25 + $0x68] sm:$0xff]  ;;  %10194 = vmatprep.subr.bf16.mxu1 %v15037_v13  ;;  %v1200_v48 = vld [vmem:[%s15027_s25 + $0x70] sm:$0xff]  ;;  %v15060_v32 = vpack.c.bf16 %v1204_v55, %v1198_v37 }
 0xa2e   : > { %v4035_v43 = vadd.f32 %v4034_v49, %v4033_v45  ;;  %v4036_v52 = vsel %vm2069_vm6, %v15014_v28, 0.0  ;;  %v15045_v45 = vpack.c.bf16 %v1194_v6, %v1188_v57  ;;  %v1205_v49 = vld [vmem:[%s15027_s25 + $0x98] sm:$0xff]  ;;  %10100 = vmatpush1.bf16.msra.mxu0 %v15039_v27  ;;  %v1211_v57 = vld [vmem:[%s15027_s25 + $0xc8] sm:$0xff]  ;;  %v1210_v37 = vld [vmem:[%s15027_s25 + $0xc0] sm:$0xff] }
 0xa2f   : > { %18928 = vst [vmem:[#allocation314_spill] sm:$0xff] %v15060_v32  ;;  %v1217_v6 = vld [vmem:[%s15027_s25 + $0xf8] sm:$0xff]  ;;  %v1216_v3 = vld [vmem:[%s15027_s25 + $0xf0] sm:$0xff]  ;;  %v1218_v20 = vld [vmem:[%s15027_s25 + $0x100] sm:$0xff] }
 0xa30   : > { %v4037_v24 = vadd.f32 %v4036_v52, %v4035_v43  ;;  %18925 = vst [vmem:[#allocation311_spill] sm:$0xff] %v15045_v45  ;;  %v1201_v43 = vld [vmem:[%s15027_s25 + $0x78] sm:$0xff]  ;;  %v1207_v52 = vld [vmem:[%s15027_s25 + $0xa8] sm:$0xff]  ;;  %10196 = vmatpush1.bf16.msra.mxu1 %v15045_v45  ;;  %v1212_v39 = vld [vmem:[%s15027_s25 + $0xd0] sm:$0xff] }
 0xa31   : > { %v15054_v53 = vpack.c.bf16 %v1207_v52, %v1201_v43  ;;  %v1213_v43 = vld [vmem:[%s15027_s25 + $0xd8] sm:$0xff]  ;;  %v1219_v52 = vld [vmem:[%s15027_s25 + $0x108] sm:$0xff]  ;;  %v1230_v45 = vld [vmem:[%s15027_s25 + $0x160] sm:$0xff] }
 0xa32   : > { %4038 = vadd.xlane.f32.xlu0 %v4037_v24  ;;  %v15052_v24 = vpack.c.bf16 %v1205_v49, %v1199_v42  ;;  %v15067_v42 = vpack.c.bf16 %v1206_v29, %v1200_v48  ;;  %v15069_v49 = vpack.c.bf16 %v1217_v6, %v1211_v57  ;;  %v15074_v55 = vpack.c.bf16 %v1219_v52, %v1213_v43  ;;  %v1223_v29 = vld [vmem:[%s15027_s25 + $0x128] sm:$0xff]  ;;  %v1229_v57 = vld [vmem:[%s15027_s25 + $0x158] sm:$0xff]  ;;  %v1236_v27 = vld [vmem:[%s15027_s25 + $0x190] sm:$0xff] }
 0xa33   : > { %18927 = vst [vmem:[#allocation313_spill] sm:$0xff] %v15054_v53  ;;  %10198 = vmatprep.subr.bf16.mxu1 %v15054_v53  ;;  %v15080_v48 = vpack.c.bf16 %v1216_v3, %v1210_v37  ;;  %v1225_v6 = vld [vmem:[%s15027_s25 + $0x138] sm:$0xff]  ;;  %v15087_v43 = vpack.c.bf16 %v1218_v20, %v1212_v39  ;;  %v15089_v52 = vpack.c.bf16 %v1229_v57, %v1223_v29  ;;  %v1231_v53 = vld [vmem:[%s15027_s25 + $0x168] sm:$0xff]  ;;  %v1224_v37 = vld [vmem:[%s15027_s25 + $0x130] sm:$0xff] }
 0xa34   : > { %18926 = vst [vmem:[#allocation312_spill] sm:$0xff] %v15052_v24  ;;  %10102 = vmatprep.subr.bf16.mxu0 %v15052_v24  ;;  %18929 = vst [vmem:[#allocation315_spill] sm:$0xff] %v15067_v42  ;;  %10200 = vmatpush1.bf16.msra.mxu1 %v15067_v42  ;;  %v1222_v24 = vld [vmem:[%s15027_s25 + $0x120] sm:$0xff]  ;;  %v15095_v3 = vpack.c.bf16 %v1231_v53, %v1225_v6  ;;  %v1235_v42 = vld [vmem:[%s15027_s25 + $0x188] sm:$0xff]  ;;  %v15108_v53 = vpack.c.bf16 %v1230_v45, %v1224_v37 }
 0xa35   : > { %18930 = vst [vmem:[#allocation316_spill] sm:$0xff] %v15069_v49  ;;  %18931 = vst [vmem:[#allocation317_spill] sm:$0xff] %v15074_v55  ;;  %10104 = vmatpush1.bf16.msra.mxu0 %v15060_v32  ;;  %v1228_v32 = vld [vmem:[%s15027_s25 + $0x150] sm:$0xff]  ;;  %10202 = vmatprep.subr.bf16.mxu1 %v15074_v55  ;;  %v1237_v20 = vld [vmem:[%s15027_s25 + $0x198] sm:$0xff] }
 0xa36   : > { %18932 = vst [vmem:[#allocation318_spill] sm:$0xff] %v15080_v48  ;;  %10106 = vmatprep.subr.bf16.mxu0 %v15069_v49  ;;  %18933 = vst [vmem:[#allocation319_spill] sm:$0xff] %v15087_v43  ;;  %v1241_v49 = vld [vmem:[%s15027_s25 + $0x1b8] sm:$0xff]  ;;  %v1243_v39 = vld [vmem:[%s15027_s25 + $0x1c8] sm:$0xff]  ;;  %v15104_v29 = vpack.c.bf16 %v1228_v32, %v1222_v24 }
 0xa37   : > { %18934 = vst [vmem:[#allocation320_spill] sm:$0xff] %v15089_v52  ;;  %18935 = vst [vmem:[#allocation321_spill] sm:$0xff] %v15095_v3  ;;  %v15110_v57 = vpack.c.bf16 %v1241_v49, %v1235_v42  ;;  %v1234_v6 = vld [vmem:[%s15027_s25 + $0x180] sm:$0xff]  ;;  %v1240_v55 = vld [vmem:[%s15027_s25 + $0x1b0] sm:$0xff]  ;;  %v15116_v13 = vpack.c.bf16 %v1243_v39, %v1237_v20 }
 0xa38   : > { %18936 = vst [vmem:[#allocation322_spill] sm:$0xff] %v15104_v29  ;;  %10204 = vmatpush1.bf16.msra.mxu1 %v15087_v43  ;;  %18937 = vst [vmem:[#allocation323_spill] sm:$0xff] %v15108_v53  ;;  %v1242_v24 = vld [vmem:[%s15027_s25 + $0x1c0] sm:$0xff]  ;;  %v1247_v32 = vld [vmem:[%s15027_s25 + $0x1e8] sm:$0xff]  ;;  %v15124_v49 = vpack.c.bf16 %v1240_v55, %v1234_v6 }
 0xa39   : > { %10108 = vmatpush1.bf16.msra.mxu0 %v15080_v48  ;;  %18938 = vst [vmem:[#allocation324_spill] sm:$0xff] %v15110_v57  ;;  %10206 = vmatprep.subr.bf16.mxu1 %v15095_v3  ;;  %18939 = vst [vmem:[#allocation325_spill] sm:$0xff] %v15116_v13  ;;  %v1253_v43 = vld [vmem:[%s15027_s25 + $0x218] sm:$0xff]  ;;  %v1255_v42 = vld [vmem:[%s15027_s25 + $0x228] sm:$0xff]  ;;  %v15128_v37 = vpack.c.bf16 %v1242_v24, %v1236_v27 }
 0xa3a   : > { %10110 = vmatprep.subr.bf16.mxu0 %v15089_v52  ;;  %v1249_v45 = vld [vmem:[%s15027_s25 + $0x1f8] sm:$0xff]  ;;  %18940 = vst [vmem:[#allocation326_spill] sm:$0xff] %v15124_v49  ;;  %v15130_v20 = vpack.c.bf16 %v1253_v43, %v1247_v32  ;;  %v1246_v39 = vld [vmem:[%s15027_s25 + $0x1e0] sm:$0xff]  ;;  %v1252_v3 = vld [vmem:[%s15027_s25 + $0x210] sm:$0xff] }
 0xa3b   : > { %18941 = vst [vmem:[#allocation327_spill] sm:$0xff] %v15128_v37  ;;  %v1248_v52 = vld [vmem:[%s15027_s25 + $0x1f0] sm:$0xff]  ;;  %v15136_v48 = vpack.c.bf16 %v1255_v42, %v1249_v45  ;;  %v1254_v55 = vld [vmem:[%s15027_s25 + $0x220] sm:$0xff]  ;;  %v1259_v6 = vld [vmem:[%s15027_s25 + $0x248] sm:$0xff]  ;;  %v15144_v24 = vpack.c.bf16 %v1252_v3, %v1246_v39 }
 0xa3c   : > { %10208 = vmatpush1.bf16.msra.mxu1 %v15108_v53  ;;  %18942 = vst [vmem:[#allocation328_spill] sm:$0xff] %v15130_v20  ;;  %v1265_v53 = vld [vmem:[%s15027_s25 + $0x278] sm:$0xff]  ;;  %v1267_v43 = vld [vmem:[%s15027_s25 + $0x288] sm:$0xff]  ;;  %v15148_v32 = vpack.c.bf16 %v1254_v55, %v1248_v52  ;;  %v1258_v42 = vld [vmem:[%s15027_s25 + $0x240] sm:$0xff] }
 0xa3d   : > { %10112 = vmatpush1.bf16.msra.mxu0 %v15104_v29  ;;  %10210 = vmatprep.subr.bf16.mxu1 %v15116_v13  ;;  %18943 = vst [vmem:[#allocation329_spill] sm:$0xff] %v15136_v48  ;;  %v1261_v27 = vld [vmem:[%s15027_s25 + $0x258] sm:$0xff]  ;;  %18944 = vst [vmem:[#allocation330_spill] sm:$0xff] %v15144_v24  ;;  %v15150_v45 = vpack.c.bf16 %v1265_v53, %v1259_v6  ;;  %v1264_v13 = vld [vmem:[%s15027_s25 + $0x270] sm:$0xff] }
 0xa3e   : > { %10114 = vmatprep.subr.bf16.mxu0 %v15110_v57  ;;  %18945 = vst [vmem:[#allocation331_spill] sm:$0xff] %v15148_v32  ;;  %v1260_v57 = vld [vmem:[%s15027_s25 + $0x250] sm:$0xff]  ;;  %v15156_v29 = vpack.c.bf16 %v1267_v43, %v1261_v27  ;;  %v1266_v3 = vld [vmem:[%s15027_s25 + $0x280] sm:$0xff]  ;;  %v1271_v39 = vld [vmem:[%s15027_s25 + $0x2a8] sm:$0xff]  ;;  %v15164_v55 = vpack.c.bf16 %v1264_v13, %v1258_v42 }
 0xa3f   : > { %18946 = vst [vmem:[#allocation332_spill] sm:$0xff] %v15150_v45  ;;  %v1273_v52 = vld [vmem:[%s15027_s25 + $0x2b8] sm:$0xff]  ;;  %v1279_v53 = vld [vmem:[%s15027_s25 + $0x2e8] sm:$0xff]  ;;  %v15168_v6 = vpack.c.bf16 %v1266_v3, %v1260_v57  ;;  %v1270_v43 = vld [vmem:[%s15027_s25 + $0x2a0] sm:$0xff] }
 0xa40   : > { %10212 = vmatpush1.bf16.msra.mxu1 %v15128_v37  ;;  %18947 = vst [vmem:[#allocation333_spill] sm:$0xff] %v15156_v29  ;;  %v1277_v37 = vld [vmem:[%s15027_s25 + $0x2d8] sm:$0xff]  ;;  %18948 = vst [vmem:[#allocation334_spill] sm:$0xff] %v15164_v55  ;;  %v1278_v13 = vld [vmem:[%s15027_s25 + $0x2e0] sm:$0xff] }
 0xa41   : > { %10116 = vmatpush1.bf16.msra.mxu0 %v15124_v49  ;;  %10214 = vmatprep.subr.bf16.mxu1 %v15136_v48  ;;  %18949 = vst [vmem:[#allocation335_spill] sm:$0xff] %v15168_v6  ;;  %v15170_v27 = vpack.c.bf16 %v1277_v37, %v1271_v39  ;;  %v1276_v48 = vld [vmem:[%s15027_s25 + $0x2d0] sm:$0xff]  ;;  %v15176_v49 = vpack.c.bf16 %v1279_v53, %v1273_v52  ;;  %v1283_v42 = vld [vmem:[%s15027_s25 + $0x308] sm:$0xff]  ;;  %v1285_v57 = vld [vmem:[%s15027_s25 + $0x318] sm:$0xff] }
 0xa42   : > { %10118 = vmatprep.subr.bf16.mxu0 %v15130_v20  ;;  %v1272_v20 = vld [vmem:[%s15027_s25 + $0x2b0] sm:$0xff]  ;;  %v1291_v37 = vld [vmem:[%s15027_s25 + $0x348] sm:$0xff]  ;;  %v15184_v3 = vpack.c.bf16 %v1276_v48, %v1270_v43  ;;  %v1282_v53 = vld [vmem:[%s15027_s25 + $0x300] sm:$0xff] }
 0xa43   : > { %18950 = vst [vmem:[#allocation336_spill] sm:$0xff] %v15170_v27  ;;  %18951 = vst [vmem:[#allocation337_spill] sm:$0xff] %v15176_v49  ;;  %v15188_v39 = vpack.c.bf16 %v1278_v13, %v1272_v20  ;;  %v1290_v48 = vld [vmem:[%s15027_s25 + $0x340] sm:$0xff]  ;;  %v1295_v43 = vld [vmem:[%s15027_s25 + $0x368] sm:$0xff] }
 0xa44   : > { %10216 = vmatpush1.bf16.msra.mxu1 %v15148_v32  ;;  %v1289_v32 = vld [vmem:[%s15027_s25 + $0x338] sm:$0xff]  ;;  %18952 = vst [vmem:[#allocation338_spill] sm:$0xff] %v15184_v3  ;;  %v1314_v54 = vld [vmem:[%s15027_s25 + $0x400] sm:$0xff] }
 0xa45   : > { %10120 = vmatpush1.bf16.msra.mxu0 %v15144_v24  ;;  %10218 = vmatprep.subr.bf16.mxu1 %v15156_v29  ;;  %18953 = vst [vmem:[#allocation339_spill] sm:$0xff] %v15188_v39  ;;  %v15190_v52 = vpack.c.bf16 %v1289_v32, %v1283_v42  ;;  %v1288_v29 = vld [vmem:[%s15027_s25 + $0x330] sm:$0xff]  ;;  %v15196_v24 = vpack.c.bf16 %v1291_v37, %v1285_v57  ;;  %v1297_v20 = vld [vmem:[%s15027_s25 + $0x378] sm:$0xff]  ;;  %v1303_v32 = vld [vmem:[%s15027_s25 + $0x3a8] sm:$0xff] }
 0xa46   : > { %10122 = vmatprep.subr.bf16.mxu0 %v15150_v45  ;;  %v1284_v45 = vld [vmem:[%s15027_s25 + $0x310] sm:$0xff]  ;;  %v15204_v13 = vpack.c.bf16 %v1288_v29, %v1282_v53  ;;  %v1294_v37 = vld [vmem:[%s15027_s25 + $0x360] sm:$0xff]  ;;  %v1307_v53 = vld [vmem:[%s15027_s25 + $0x3c8] sm:$0xff] }
 0xa47   : > { %18954 = vst [vmem:[#allocation340_spill] sm:$0xff] %v15190_v52  ;;  %18955 = vst [vmem:[#allocation341_spill] sm:$0xff] %v15196_v24  ;;  %v15208_v42 = vpack.c.bf16 %v1290_v48, %v1284_v45  ;;  %v1302_v29 = vld [vmem:[%s15027_s25 + $0x3a0] sm:$0xff] }
 0xa48   : > { %10220 = vmatpush1.bf16.msra.mxu1 %v15168_v6  ;;  %v1301_v6 = vld [vmem:[%s15027_s25 + $0x398] sm:$0xff]  ;;  %18956 = vst [vmem:[#allocation342_spill] sm:$0xff] %v15204_v13 }
 0xa49   : > { %10124 = vmatpush1.bf16.msra.mxu0 %v15164_v55  ;;  %10222 = vmatprep.subr.bf16.mxu1 %v15176_v49  ;;  %18957 = vst [vmem:[#allocation343_spill] sm:$0xff] %v15208_v42  ;;  %v15210_v57 = vpack.c.bf16 %v1301_v6, %v1295_v43  ;;  %v1300_v49 = vld [vmem:[%s15027_s25 + $0x390] sm:$0xff]  ;;  %v15216_v55 = vpack.c.bf16 %v1303_v32, %v1297_v20  ;;  %v1306_v43 = vld [vmem:[%s15027_s25 + $0x3c0] sm:$0xff] }
 0xa4a   : > { %10126 = vmatprep.subr.bf16.mxu0 %v15170_v27  ;;  %v1296_v27 = vld [vmem:[%s15027_s25 + $0x370] sm:$0xff]  ;;  %v15224_v45 = vpack.c.bf16 %v1300_v49, %v1294_v37 }
 0xa4b   : > { %18958 = vst [vmem:[#allocation344_spill] sm:$0xff] %v15210_v57  ;;  %18959 = vst [vmem:[#allocation345_spill] sm:$0xff] %v15216_v55  ;;  %v15228_v6 = vpack.c.bf16 %v1302_v29, %v1296_v27  ;;  %v1312_v20 = vld [vmem:[%s15027_s25 + $0x3f0] sm:$0xff] }
 0xa4c   : > { %10224 = vmatpush1.bf16.msra.mxu1 %v15188_v39  ;;  %v1313_v39 = vld [vmem:[%s15027_s25 + $0x3f8] sm:$0xff]  ;;  %18960 = vst [vmem:[#allocation346_spill] sm:$0xff] %v15224_v45  ;;  %v15240_v49 = vpack.c.bf16 %v1312_v20, %v1306_v43 }
 0xa4d   : > { %10128 = vmatpush1.bf16.msra.mxu0 %v15184_v3  ;;  %10226 = vmatprep.subr.bf16.mxu1 %v15196_v24  ;;  %v1309_v3 = vld [vmem:[%s15027_s25 + $0x3d8] sm:$0xff]  ;;  %18961 = vst [vmem:[#allocation347_spill] sm:$0xff] %v15228_v6  ;;  %v15230_v48 = vpack.c.bf16 %v1313_v39, %v1307_v53  ;;  %v1308_v24 = vld [vmem:[%s15027_s25 + $0x3d0] sm:$0xff] }
 0xa4e   : > { %10130 = vmatprep.subr.bf16.mxu0 %v15190_v52  ;;  %v1315_v52 = vld [vmem:[%s15027_s25 + $0x408] sm:$0xff]  ;;  %18964 = vst [vmem:[#allocation350_spill] sm:$0xff] %v15240_v49  ;;  %v15244_v27 = vpack.c.bf16 %v1314_v54, %v1308_v24 }
 0xa4f   : > { %18962 = vst [vmem:[#allocation348_spill] sm:$0xff] %v15230_v48  ;;  %v15235_v32 = vpack.c.bf16 %v1315_v52, %v1309_v3 }
 0xa50   : > { %10228 = vmatpush1.bf16.msra.mxu1 %v15208_v42  ;;  %18965 = vst [vmem:[#allocation351_spill] sm:$0xff] %v15244_v27  ;;  %v1319_v42 = vld [vmem:[%s15027_s25 + $0x428] sm:$0xff] }
 0xa51   : > { %10132 = vmatpush1.bf16.msra.mxu0 %v15204_v13  ;;  %10230 = vmatprep.subr.bf16.mxu1 %v15216_v55  ;;  %18963 = vst [vmem:[#allocation349_spill] sm:$0xff] %v15235_v32  ;;  %v1325_v13 = vld [vmem:[%s15027_s25 + $0x458] sm:$0xff] }
 0xa52   : > { %10134 = vmatprep.subr.bf16.mxu0 %v15210_v57  ;;  %v15300_v17 = vpack.c.bf16 %v1325_v13, %v1319_v42  ;;  %v1331_v13 = vld [vmem:[%s15027_s25 + $0x488] sm:$0xff]  ;;  %v1337_v42 = vld [vmem:[%s15027_s25 + $0x4b8] sm:$0xff] }
 0xa54   : > { %10232 = vmatpush1.bf16.msra.mxu1 %v15228_v6  ;;  %18966 = vst [vmem:[#allocation352_spill] sm:$0xff] %v15300_v17 }
 0xa55   : > { %10136 = vmatpush1.bf16.msra.mxu0 %v15224_v45  ;;  %10234 = vmatprep.subr.bf16.mxu1 %v15235_v32 }
 0xa56   : > { %10138 = vmatprep.subr.bf16.mxu0 %v15230_v48 }
 0xa58   : > { %10236 = vmatpush1.bf16.msra.mxu1 %v15244_v27 }
 0xa59   : > { %10140 = vmatpush1.bf16.msra.mxu0 %v15240_v49 }
 0xa5a   : > { %10142 = vmatprep.subr.bf16.mxu0 %v15300_v17  ;;  %v1374_v17 = vld [vmem:[%s15027_s25 + $0x5e0] sm:$0xff] }
 0xab6   : > { %v4028_v3 = vpop.xlane.xlu0 %4027 }
 0xab7   : > { %v4040_v39 = vmul.f32 0.0026041667, %v4028_v3 }
 0xab9   : > { %v15250_v52 = vsub.f32 %v14977_v31, %v4040_v39  ;;  %v15253_v37 = vsub.f32 %v14981_v8, %v4040_v39  ;;  %v15256_v29 = vsub.f32 %v14984_v36, %v4040_v39 }
 0xaba   : > { %v4032_v53 = vpop.xlane.xlu1 %4031 }
 0xabb   : > { %v4041_v54 = vmul.f32 0.0026041667, %v4032_v53  ;;  %v4052_v24 = vmul.f32 %v15250_v52, %v15250_v52  ;;  %v4053_v43 = vmul.f32 %v15253_v37, %v15253_v37  ;;  %v4054_v20 = vmul.f32 %v15256_v29, %v15256_v29 }
 0xabd   : > { %v15265_v3 = vsub.f32 %v14991_v16, %v4041_v54  ;;  %v15268_v27 = vsub.f32 %v14995_v40, %v4041_v54  ;;  %v15271_v39 = vsub.f32 %v14999_v62, %v4041_v54  ;;  %v4061_v49 = vadd.f32 %v4053_v43, %v4052_v24 }
 0xabf   : > { %v4039_v53 = vpop.xlane.xlu0 %4038  ;;  %v4062_v32 = vadd.f32 %v4061_v49, %v4054_v20  ;;  %v4055_v48 = vmul.f32 %v15265_v3, %v15265_v3  ;;  %v4056_v6 = vmul.f32 %v15268_v27, %v15268_v27  ;;  %v4057_v55 = vmul.f32 %v15271_v39, %v15271_v39 }
 0xac0   : > { %v4042_v45 = vmul.f32 0.0026041667, %v4039_v53 }
 0xac1   : > { %4063 = vadd.xlane.f32.xlu1 %v4062_v32  ;;  %v4065_v57 = vadd.f32 %v4056_v6, %v4055_v48 }
 0xac2   : > { %v15280_v54 = vsub.f32 %v15006_v9, %v4042_v45  ;;  %v15283_v49 = vsub.f32 %v15010_v22, %v4042_v45  ;;  %v15286_v24 = vsub.f32 %v15014_v28, %v4042_v45 }
 0xac3   : > { %v4066_v43 = vadd.f32 %v4065_v57, %v4057_v55 }
 0xac4   : > { %v4058_v32 = vmul.f32 %v15280_v54, %v15280_v54  ;;  %v4059_v6 = vmul.f32 %v15283_v49, %v15283_v49  ;;  %v4060_v48 = vmul.f32 %v15286_v24, %v15286_v24 }
 0xac5   : > { %4067 = vadd.xlane.f32.xlu0 %v4066_v43  ;;  %v1327_v43 = vld [vmem:[%s15027_s25 + $0x468] sm:$0xff] }
 0xac6   : > { %v4069_v20 = vsel %vm2069_vm6, %v4058_v32, 0.0  ;;  %v4070_v45 = vsel %vm2069_vm6, %v4059_v6, 0.0  ;;  %v4072_v55 = vsel %vm2069_vm6, %v4060_v48, 0.0  ;;  %v1324_v32 = vld [vmem:[%s15027_s25 + $0x450] sm:$0xff]  ;;  %v15305_v6 = vpack.c.bf16 %v1327_v43, %v1321_v7  ;;  %v1333_v7 = vld [vmem:[%s15027_s25 + $0x498] sm:$0xff] }
 0xac7   : > { %v4071_v53 = vadd.f32 %v4070_v45, %v4069_v20  ;;  %v15307_v20 = vpack.c.bf16 %v1324_v32, %v1318_v56  ;;  %v1320_v48 = vld [vmem:[%s15027_s25 + $0x430] sm:$0xff]  ;;  %v1326_v45 = vld [vmem:[%s15027_s25 + $0x460] sm:$0xff]  ;;  %v15320_v56 = vpack.c.bf16 %v1337_v42, %v1331_v13  ;;  %v1343_v13 = vld [vmem:[%s15027_s25 + $0x4e8] sm:$0xff] }
 0xac8   : > { %18967 = vst [vmem:[#allocation353_spill] sm:$0xff] %v15305_v6  ;;  %10238 = vmatprep.subr.bf16.mxu1 %v15305_v6  ;;  %v1336_v43 = vld [vmem:[%s15027_s25 + $0x4b0] sm:$0xff]  ;;  %v1349_v42 = vld [vmem:[%s15027_s25 + $0x518] sm:$0xff] }
 0xac9   : > { %v4073_v57 = vadd.f32 %v4072_v55, %v4071_v53  ;;  %18968 = vst [vmem:[#allocation354_spill] sm:$0xff] %v15307_v20  ;;  %v15312_v53 = vpack.c.bf16 %v1326_v45, %v1320_v48  ;;  %10144 = vmatpush1.bf16.msra.mxu0 %v15307_v20  ;;  %18970 = vst [vmem:[#allocation356_spill] sm:$0xff] %v15320_v56  ;;  %v1339_v55 = vld [vmem:[%s15027_s25 + $0x4c8] sm:$0xff]  ;;  %v1332_v45 = vld [vmem:[%s15027_s25 + $0x490] sm:$0xff] }
 0xaca   : > { %v15325_v32 = vpack.c.bf16 %v1339_v55, %v1333_v7  ;;  %v1338_v20 = vld [vmem:[%s15027_s25 + $0x4c0] sm:$0xff]  ;;  %10146 = vmatprep.subr.bf16.mxu0 %v15320_v56  ;;  %v1345_v7 = vld [vmem:[%s15027_s25 + $0x4f8] sm:$0xff]  ;;  %v15340_v55 = vpack.c.bf16 %v1349_v42, %v1343_v13  ;;  %v1355_v13 = vld [vmem:[%s15027_s25 + $0x548] sm:$0xff] }
 0xacb   : > { %4074 = vadd.xlane.f32.xlu1 %v4073_v57  ;;  %18969 = vst [vmem:[#allocation355_spill] sm:$0xff] %v15312_v53  ;;  %10240 = vmatpush1.bf16.msra.mxu1 %v15312_v53  ;;  %v1330_v57 = vld [vmem:[%s15027_s25 + $0x480] sm:$0xff]  ;;  %v15332_v6 = vpack.c.bf16 %v1338_v20, %v1332_v45  ;;  %v1348_v20 = vld [vmem:[%s15027_s25 + $0x510] sm:$0xff]  ;;  %v1361_v42 = vld [vmem:[%s15027_s25 + $0x578] sm:$0xff] }
 0xacc   : > { %18971 = vst [vmem:[#allocation357_spill] sm:$0xff] %v15325_v32  ;;  %v15327_v48 = vpack.c.bf16 %v1336_v43, %v1330_v57  ;;  %10242 = vmatprep.subr.bf16.mxu1 %v15325_v32  ;;  %18974 = vst [vmem:[#allocation360_spill] sm:$0xff] %v15340_v55  ;;  %v1351_v57 = vld [vmem:[%s15027_s25 + $0x528] sm:$0xff]  ;;  %v1342_v43 = vld [vmem:[%s15027_s25 + $0x4e0] sm:$0xff] }
 0xacd   : > { %18973 = vst [vmem:[#allocation359_spill] sm:$0xff] %v15332_v6  ;;  %v15345_v45 = vpack.c.bf16 %v1351_v57, %v1345_v7  ;;  %v15347_v32 = vpack.c.bf16 %v1348_v20, %v1342_v43  ;;  %v1350_v56 = vld [vmem:[%s15027_s25 + $0x520] sm:$0xff]  ;;  %v1357_v7 = vld [vmem:[%s15027_s25 + $0x558] sm:$0xff]  ;;  %v15360_v57 = vpack.c.bf16 %v1361_v42, %v1355_v13  ;;  %v1363_v43 = vld [vmem:[%s15027_s25 + $0x588] sm:$0xff] }
 0xace   : > { %18972 = vst [vmem:[#allocation358_spill] sm:$0xff] %v15327_v48  ;;  %10148 = vmatpush1.bf16.msra.mxu0 %v15327_v48  ;;  %v1344_v48 = vld [vmem:[%s15027_s25 + $0x4f0] sm:$0xff]  ;;  %v1354_v20 = vld [vmem:[%s15027_s25 + $0x540] sm:$0xff]  ;;  %v1367_v13 = vld [vmem:[%s15027_s25 + $0x5a8] sm:$0xff] }
 0xacf   : > { %10244 = vmatpush1.bf16.msra.mxu1 %v15332_v6  ;;  %18975 = vst [vmem:[#allocation361_spill] sm:$0xff] %v15345_v45  ;;  %18976 = vst [vmem:[#allocation362_spill] sm:$0xff] %v15347_v32  ;;  %10150 = vmatprep.subr.bf16.mxu0 %v15340_v55  ;;  %v15352_v53 = vpack.c.bf16 %v1350_v56, %v1344_v48  ;;  %v1360_v56 = vld [vmem:[%s15027_s25 + $0x570] sm:$0xff]  ;;  %v15365_v48 = vpack.c.bf16 %v1363_v43, %v1357_v7  ;;  %v1362_v55 = vld [vmem:[%s15027_s25 + $0x580] sm:$0xff] }
 0xad0   : > { %10246 = vmatprep.subr.bf16.mxu1 %v15345_v45  ;;  %18978 = vst [vmem:[#allocation364_spill] sm:$0xff] %v15360_v57  ;;  %v15367_v45 = vpack.c.bf16 %v1360_v56, %v1354_v20  ;;  %v1373_v42 = vld [vmem:[%s15027_s25 + $0x5d8] sm:$0xff]  ;;  %v1375_v43 = vld [vmem:[%s15027_s25 + $0x5e8] sm:$0xff]  ;;  %v1366_v20 = vld [vmem:[%s15027_s25 + $0x5a0] sm:$0xff] }
 0xad1   : > { %18977 = vst [vmem:[#allocation363_spill] sm:$0xff] %v15352_v53  ;;  %18979 = vst [vmem:[#allocation365_spill] sm:$0xff] %v15365_v48  ;;  %v15379_v7 = vpack.c.bf16 %v1373_v42, %v1367_v13  ;;  %v1372_v56 = vld [vmem:[%s15027_s25 + $0x5d0] sm:$0xff]  ;;  %v1379_v13 = vld [vmem:[%s15027_s25 + $0x608] sm:$0xff] }
 0xad2   : > { %10152 = vmatpush1.bf16.msra.mxu0 %v15347_v32  ;;  %18980 = vst [vmem:[#allocation366_spill] sm:$0xff] %v15367_v45  ;;  %v1356_v32 = vld [vmem:[%s15027_s25 + $0x550] sm:$0xff]  ;;  %v1385_v42 = vld [vmem:[%s15027_s25 + $0x638] sm:$0xff] }
 0xad3   : > { %10248 = vmatpush1.bf16.msra.mxu1 %v15352_v53  ;;  %10154 = vmatprep.subr.bf16.mxu0 %v15360_v57  ;;  %v15372_v6 = vpack.c.bf16 %v1362_v55, %v1356_v32  ;;  %v1369_v53 = vld [vmem:[%s15027_s25 + $0x5b8] sm:$0xff]  ;;  %18982 = vst [vmem:[#allocation368_spill] sm:$0xff] %v15379_v7  ;;  %v15387_v55 = vpack.c.bf16 %v1372_v56, %v1366_v20  ;;  %v1368_v57 = vld [vmem:[%s15027_s25 + $0x5b0] sm:$0xff] }
 0xad4   : > { %10250 = vmatprep.subr.bf16.mxu1 %v15365_v48  ;;  %v15385_v32 = vpack.c.bf16 %v1375_v43, %v1369_v53  ;;  %v15392_v48 = vpack.c.bf16 %v1374_v17, %v1368_v57  ;;  %v1387_v53 = vld [vmem:[%s15027_s25 + $0x648] sm:$0xff] }
 0xad5   : > { %18981 = vst [vmem:[#allocation367_spill] sm:$0xff] %v15372_v6  ;;  %18984 = vst [vmem:[#allocation370_spill] sm:$0xff] %v15387_v55 }
 0xad6   : > { %10156 = vmatpush1.bf16.msra.mxu0 %v15367_v45  ;;  %18983 = vst [vmem:[#allocation369_spill] sm:$0xff] %v15385_v32  ;;  %18985 = vst [vmem:[#allocation371_spill] sm:$0xff] %v15392_v48  ;;  %v1381_v45 = vld [vmem:[%s15027_s25 + $0x618] sm:$0xff] }
 0xad7   : > { %10252 = vmatpush1.bf16.msra.mxu1 %v15372_v6  ;;  %10158 = vmatprep.subr.bf16.mxu0 %v15379_v7  ;;  %v15400_v6 = vpack.c.bf16 %v1385_v42, %v1379_v13  ;;  %v15403_v43 = vpack.c.bf16 %v1387_v53, %v1381_v45  ;;  %v15408_v45 = vsub.s32 3, %v12931_v21  ;;  %v15411_v53 = vsub.s32 4, %v12931_v21  ;;  %v1380_v7 = vld [vmem:[%s15027_s25 + $0x610] sm:$0xff] }
 0xad8   : > { %10254 = vmatprep.subr.bf16.mxu1 %v15385_v32  ;;  %v15448_v5 = vpack.c.bf16 %v1386_v35, %v1380_v7  ;;  %v1392_v7 = vld [vmem:[%s15027_s25 + $0x670] sm:$0xff] }
 0xad9   : > { %18986 = vst [vmem:[#allocation372_spill] sm:$0xff] %v15400_v6  ;;  %18987 = vst [vmem:[#allocation373_spill] sm:$0xff] %v15403_v43 }
 0xada   : > { %10160 = vmatpush1.bf16.msra.mxu0 %v15387_v55  ;;  %18993 = vst [vmem:[#allocation379_spill] sm:$0xff] %v15448_v5 }
 0xadb   : > { %10256 = vmatpush1.bf16.msra.mxu1 %v15392_v48  ;;  %10162 = vmatprep.subr.bf16.mxu0 %v15400_v6  ;;  %v15433_v6 = vrot.slane %v14963_v14, %v15411_v53  ;;  %v1384_v48 = vld [vmem:[%s15027_s25 + $0x630] sm:$0xff] }
 0xadc   : > { %10258 = vmatprep.subr.bf16.mxu1 %v15403_v43 }
 0xadd   : > { %18991 = vst [vmem:[#allocation377_spill] sm:$0xff] %v15433_v6 }
 0xb4e   : > { %v4064_v17 = vpop.xlane.xlu1 %4063 }
 0xb4f   : > { %v4076_v57 = vmul.f32 0.0026041667, %v4064_v17 }
 0xb51   : > { %v4079_v20 = vadd.f32 1e-06, %v4076_v57  ;;  %v12302_v57 = vld [vmem:[%s12936_s24 + $0x50] sm:$0xff] }
 0xb52   : > { %v4068_v56 = vpop.xlane.xlu0 %4067 }
 0xb53   : > { %12193 = vrsqrt.f32 %v4079_v20  ;;  %v4077_v55 = vmul.f32 0.0026041667, %v4068_v56  ;;  %v15415_v20 = vrot.slane %v12302_v57, %v15408_v45  ;;  %v1378_v56 = vld [vmem:[%s15027_s25 + $0x600] sm:$0xff] }
 0xb55   : > { %v4080_v32 = vadd.f32 1e-06, %v4077_v55  ;;  %18988 = vst [vmem:[#allocation374_spill] sm:$0xff] %v15415_v20 }
 0xb57   : > { %12195 = vrsqrt.f32 %v4080_v32  ;;  %v15419_v32 = vrot.slane %v14963_v14, %v15408_v45  ;;  %v15446_v14 = vpack.c.bf16 %v1384_v48, %v1378_v56  ;;  %v1396_v48 = vld [vmem:[%s15027_s25 + $0x690] sm:$0xff] }
 0xb58   : > { %v4075_v13 = vpop.xlane.xlu1 %4074 }
 0xb59   : > { %v4078_v42 = vmul.f32 0.0026041667, %v4075_v13  ;;  %18989 = vst [vmem:[#allocation375_spill] sm:$0xff] %v15419_v32  ;;  %18992 = vst [vmem:[#allocation378_spill] sm:$0xff] %v15446_v14 }
 0xb5b   : > { %v4081_v17 = vadd.f32 1e-06, %v4078_v42  ;;  %v15427_v42 = vrot.slane %v12302_v57, %v15411_v53  ;;  %v1397_v57 = vld [vmem:[%s15027_s25 + $0x698] sm:$0xff] }
 0xb5d   : > { %v15421_v55 = vpop.eup %12193  ;;  %12197 = vrsqrt.f32 %v4081_v17  ;;  %18990 = vst [vmem:[#allocation376_spill] sm:$0xff] %v15427_v42  ;;  %v1391_v17 = vld [vmem:[%s15027_s25 + $0x668] sm:$0xff] }
 0xb5e   : > { %v4086_v13 = vmul.f32 %v15421_v55, %v15253_v37  ;;  %v4085_v43 = vmul.f32 %v15421_v55, %v15250_v52  ;;  %v1399_v52 = vld [vmem:[%s15027_s25 + $0x6a8] sm:$0xff]  ;;  %v15462_v56 = vpack.c.bf16 %v1397_v57, %v1391_v17 }
 0xb5f   : > { %v15464_v35 = vpack.c.bf16 %v1399_v52, %v1393_v23  ;;  %v15478_v23 = vpack.c.bf16 %v1396_v48, %v1390_v0  ;;  %v1402_v52 = vld [vmem:[%s15027_s25 + $0x6c0] sm:$0xff]  ;;  %v15498_v48 = vpack.c.bf16 %v1411_v51, %v1405_v47  ;;  %v1415_v47 = vld [vmem:[%s15027_s25 + $0x728] sm:$0xff] }
 0xb60   : > { %v4107_v30 = vmul.f32 %v15415_v20, %v4086_v13  ;;  %v4106_v37 = vmul.f32 %v15419_v32, %v4085_v43  ;;  %18994 = vst [vmem:[#allocation380_spill] sm:$0xff] %v15462_v56 }
 0xb61   : > { %v15444_v25 = vpop.eup %12195  ;;  %18995 = vst [vmem:[#allocation381_spill] sm:$0xff] %v15464_v35  ;;  %18996 = vst [vmem:[#allocation382_spill] sm:$0xff] %v15478_v23 }
 0xb62   : > { %v15451_v19 = vadd.f32 %v15427_v42, %v4107_v30  ;;  %v15454_v13 = vadd.f32 %v15433_v6, %v4106_v37  ;;  %v4089_v43 = vmul.f32 %v15444_v25, %v15268_v27  ;;  %v4088_v60 = vmul.f32 %v15444_v25, %v15265_v3  ;;  %v1398_v30 = vld [vmem:[%s15027_s25 + $0x6a0] sm:$0xff]  ;;  %v1409_v3 = vld [vmem:[%s15027_s25 + $0x6f8] sm:$0xff]  ;;  %18999 = vst [vmem:[#allocation385_spill] sm:$0xff] %v15498_v48 }
 0xb63   : > { %v15488_v57 = vpack.c.bf16 %v1398_v30, %v1392_v7  ;;  %v15496_v0 = vpack.c.bf16 %v1409_v3, %v1403_v2  ;;  %v1421_v2 = vld [vmem:[%s15027_s25 + $0x758] sm:$0xff] }
 0xb64   : > { %4224 = vmatprep.mubr.f32.mxu0 %v15451_v19  ;;  %4390 = vmatprep.mubr.f32.mxu1 %v15451_v19  ;;  %v4110_v27 = vmul.f32 %v15415_v20, %v4089_v43  ;;  %v4109_v37 = vmul.f32 %v15419_v32, %v4088_v60  ;;  %v1408_v43 = vld [vmem:[%s15027_s25 + $0x6f0] sm:$0xff]  ;;  %v1417_v3 = vld [vmem:[%s15027_s25 + $0x738] sm:$0xff] }
 0xb65   : > { %4225 = vmatmul.mubr.f32.vlgmr.msra.gmra.mrb[52].mxu0 %v15454_v13  ;;  %4391 = vmatmul.mubr.f32.vlgmr.msra.gmra.mrb[46].mxu1 %v15454_v13  ;;  %18997 = vst [vmem:[#allocation383_spill] sm:$0xff] %v15488_v57  ;;  %18998 = vst [vmem:[#allocation384_spill] sm:$0xff] %v15496_v0  ;;  %v15510_v51 = vpack.c.bf16 %v1408_v43, %v1402_v52  ;;  %v1414_v52 = vld [vmem:[%s15027_s25 + $0x720] sm:$0xff]  ;;  %v1420_v43 = vld [vmem:[%s15027_s25 + $0x750] sm:$0xff] }
 0xb66   : > { %10164 = vmatpush1.bf16.msra.mxu0 %v15446_v14  ;;  %10260 = vmatpush1.bf16.msra.mxu1 %v15448_v5  ;;  %v15483_v17 = vadd.f32 %v15427_v42, %v4110_v27  ;;  %v15486_v60 = vadd.f32 %v15433_v6, %v4109_v37  ;;  %v1404_v27 = vld [vmem:[%s15027_s25 + $0x6d0] sm:$0xff]  ;;  %v1410_v37 = vld [vmem:[%s15027_s25 + $0x700] sm:$0xff]  ;;  %v1427_v14 = vld [vmem:[%s15027_s25 + $0x788] sm:$0xff] }
 0xb67   : > { %v15492_v1 = vpop.eup %12197  ;;  %10166 = vmatprep.subr.bf16.mxu0 %v15462_v56  ;;  %10262 = vmatprep.subr.bf16.mxu1 %v15464_v35  ;;  %19000 = vst [vmem:[#allocation386_spill] sm:$0xff] %v15510_v51  ;;  %v1423_v56 = vld [vmem:[%s15027_s25 + $0x768] sm:$0xff]  ;;  %v1422_v5 = vld [vmem:[%s15027_s25 + $0x760] sm:$0xff] }
 0xb68   : > { %4230 = vmatprep.mubr.f32.mxu0 %v15483_v17  ;;  %4396 = vmatprep.mubr.f32.mxu1 %v15483_v17  ;;  %v4092_v7 = vmul.f32 %v15492_v1, %v15283_v49  ;;  %v4091_v30 = vmul.f32 %v15492_v1, %v15280_v54  ;;  %v15517_v54 = vpack.c.bf16 %v1410_v37, %v1404_v27  ;;  %v1433_v37 = vld [vmem:[%s15027_s25 + $0x7b8] sm:$0xff] }
 0xb69   : > { %4231 = vmatmul.mubr.f32.gmra.mrb[54].mxu0 %v15486_v60  ;;  %4397 = vmatmul.mubr.f32.gmra.mrb[48].mxu1 %v15486_v60 }
 0xb6a   : > { %10168 = vmatpush1.bf16.msra.mxu0 %v15478_v23  ;;  %10264 = vmatpush1.bf16.msra.mxu1 %v15488_v57  ;;  %19001 = vst [vmem:[#allocation387_spill] sm:$0xff] %v15517_v54  ;;  %v4113_v49 = vmul.f32 %v15415_v20, %v4092_v7  ;;  %v4112_v35 = vmul.f32 %v15419_v32, %v4091_v30  ;;  %v1416_v23 = vld [vmem:[%s15027_s25 + $0x730] sm:$0xff]  ;;  %v1429_v7 = vld [vmem:[%s15027_s25 + $0x798] sm:$0xff]  ;;  %v1435_v30 = vld [vmem:[%s15027_s25 + $0x7c8] sm:$0xff] }
 0xb6b   : > { %10170 = vmatprep.subr.bf16.mxu0 %v15496_v0  ;;  %10266 = vmatprep.subr.bf16.mxu1 %v15498_v48  ;;  %v15538_v0 = vpack.c.bf16 %v1421_v2, %v1415_v47  ;;  %v15540_v32 = vpack.c.bf16 %v1423_v56, %v1417_v3  ;;  %v1426_v48 = vld [vmem:[%s15027_s25 + $0x780] sm:$0xff]  ;;  %v15552_v47 = vpack.c.bf16 %v1433_v37, %v1427_v14  ;;  %v1428_v2 = vld [vmem:[%s15027_s25 + $0x790] sm:$0xff] }
 0xb6c   : > { %v15530_v57 = vadd.f32 %v15427_v42, %v4113_v49  ;;  %v15533_v27 = vadd.f32 %v15433_v6, %v4112_v35  ;;  %v15544_v49 = vpack.c.bf16 %v1420_v43, %v1414_v52  ;;  %v15546_v35 = vpack.c.bf16 %v1422_v5, %v1416_v23  ;;  %v1432_v6 = vld [vmem:[%s15027_s25 + $0x7b0] sm:$0xff]  ;;  %v1434_v3 = vld [vmem:[%s15027_s25 + $0x7c0] sm:$0xff]  ;;  %v1445_v5 = vld [vmem:[%s15027_s25 + $0x818] sm:$0xff] }
 0xb6d   : > { %19002 = vst [vmem:[#allocation388_spill] sm:$0xff] %v15538_v0  ;;  %19003 = vst [vmem:[#allocation389_spill] sm:$0xff] %v15540_v32  ;;  %v15554_v56 = vpack.c.bf16 %v1435_v30, %v1429_v7  ;;  %v1441_v23 = vld [vmem:[%s15027_s25 + $0x7f8] sm:$0xff]  ;;  %v1447_v52 = vld [vmem:[%s15027_s25 + $0x828] sm:$0xff]  ;;  %v15568_v14 = vpack.c.bf16 %v1432_v6, %v1426_v48  ;;  %v15570_v43 = vpack.c.bf16 %v1434_v3, %v1428_v2 }
 0xb6e   : > { %10172 = vmatpush1.bf16.msra.mxu0 %v15510_v51  ;;  %10268 = vmatpush1.bf16.msra.mxu1 %v15517_v54  ;;  %19004 = vst [vmem:[#allocation390_spill] sm:$0xff] %v15544_v49  ;;  %19005 = vst [vmem:[#allocation391_spill] sm:$0xff] %v15546_v35  ;;  %v1439_v54 = vld [vmem:[%s15027_s25 + $0x7e8] sm:$0xff]  ;;  %v1438_v37 = vld [vmem:[%s15027_s25 + $0x7e0] sm:$0xff] }
 0xb6f   : > { %4236 = vmatprep.mubr.f32.mxu0 %v15530_v57  ;;  %4402 = vmatprep.mubr.f32.mxu1 %v15530_v57  ;;  %19006 = vst [vmem:[#allocation392_spill] sm:$0xff] %v15552_v47  ;;  %19007 = vst [vmem:[#allocation393_spill] sm:$0xff] %v15554_v56  ;;  %v1444_v7 = vld [vmem:[%s15027_s25 + $0x810] sm:$0xff]  ;;  %v15576_v30 = vpack.c.bf16 %v1445_v5, %v1439_v54  ;;  %v1451_v51 = vld [vmem:[%s15027_s25 + $0x848] sm:$0xff] }
 0xb70   : > { %4237 = vmatmul.mubr.f32.gmra.mrb[56].mxu0 %v15533_v27  ;;  %4403 = vmatmul.mubr.f32.gmra.mrb[50].mxu1 %v15533_v27  ;;  %19008 = vst [vmem:[#allocation394_spill] sm:$0xff] %v15568_v14  ;;  %19009 = vst [vmem:[#allocation395_spill] sm:$0xff] %v15570_v43  ;;  %v1457_v6 = vld [vmem:[%s15027_s25 + $0x878] sm:$0xff]  ;;  %v1459_v2 = vld [vmem:[%s15027_s25 + $0x888] sm:$0xff]  ;;  %v15590_v54 = vpack.c.bf16 %v1444_v7, %v1438_v37 }
 0xb71   : > { %10174 = vmatprep.subr.bf16.mxu0 %v15538_v0  ;;  %10270 = vmatprep.subr.bf16.mxu1 %v15540_v32  ;;  %19010 = vst [vmem:[#allocation396_spill] sm:$0xff] %v15576_v30  ;;  %v15578_v32 = vpack.c.bf16 %v1447_v52, %v1441_v23  ;;  %v1440_v0 = vld [vmem:[%s15027_s25 + $0x7f0] sm:$0xff]  ;;  %v1453_v48 = vld [vmem:[%s15027_s25 + $0x858] sm:$0xff]  ;;  %v1450_v5 = vld [vmem:[%s15027_s25 + $0x840] sm:$0xff]  ;;  %v15598_v52 = vpack.c.bf16 %v1457_v6, %v1451_v51 }
 0xb72   : > { %10176 = vmatpush1.bf16.msra.mxu0 %v15544_v49  ;;  %10272 = vmatpush1.bf16.msra.mxu1 %v15546_v35  ;;  %v1446_v49 = vld [vmem:[%s15027_s25 + $0x820] sm:$0xff]  ;;  %19012 = vst [vmem:[#allocation398_spill] sm:$0xff] %v15590_v54  ;;  %v1456_v23 = vld [vmem:[%s15027_s25 + $0x870] sm:$0xff]  ;;  %v1463_v37 = vld [vmem:[%s15027_s25 + $0x8a8] sm:$0xff] }
 0xb73   : > { %10178 = vmatprep.subr.bf16.mxu0 %v15552_v47  ;;  %10274 = vmatprep.subr.bf16.mxu1 %v15554_v56  ;;  %19011 = vst [vmem:[#allocation397_spill] sm:$0xff] %v15578_v32  ;;  %v15592_v3 = vpack.c.bf16 %v1446_v49, %v1440_v0  ;;  %19014 = vst [vmem:[#allocation400_spill] sm:$0xff] %v15598_v52  ;;  %v15600_v56 = vpack.c.bf16 %v1459_v2, %v1453_v48  ;;  %v1469_v7 = vld [vmem:[%s15027_s25 + $0x8d8] sm:$0xff]  ;;  %v1471_v49 = vld [vmem:[%s15027_s25 + $0x8e8] sm:$0xff] }
 0xb74   : > { %4307 = vmatprep.mubr.f32.mxu0 %v18720_v50  ;;  %4473 = vmatprep.mubr.f32.mxu1 %v18720_v50  ;;  %v1465_v0 = vld [vmem:[%s15027_s25 + $0x8b8] sm:$0xff]  ;;  %v1462_v6 = vld [vmem:[%s15027_s25 + $0x8a0] sm:$0xff]  ;;  %v1468_v48 = vld [vmem:[%s15027_s25 + $0x8d0] sm:$0xff] }
 0xb75   : > { %19013 = vst [vmem:[#allocation399_spill] sm:$0xff] %v15592_v3  ;;  %19015 = vst [vmem:[#allocation401_spill] sm:$0xff] %v15600_v56  ;;  %v1464_v2 = vld [vmem:[%s15027_s25 + $0x8b0] sm:$0xff]  ;;  %v1579_v35 = vld [vmem:[%s15636_s28 + $0x348] sm:$0xff] }
 0xb76   : > { %10180 = vmatpush1.bf16.msra.mxu0 %v15568_v14  ;;  %10276 = vmatpush1.bf16.msra.mxu1 %v15570_v43  ;;  %v1452_v14 = vld [vmem:[%s15027_s25 + $0x850] sm:$0xff]  ;;  %v1458_v43 = vld [vmem:[%s15027_s25 + $0x880] sm:$0xff] }
 0xb77   : > { %10182 = vmatprep.subr.bf16.mxu0 %v15576_v30  ;;  %10278 = vmatprep.subr.bf16.mxu1 %v15578_v32  ;;  %v15610_v32 = vpack.c.bf16 %v1456_v23, %v1450_v5  ;;  %v15612_v51 = vpack.c.bf16 %v1458_v43, %v1452_v14  ;;  %v15618_v30 = vld [vmem:[%s12936_s24 + $0x58] sm:$0xff]  ;;  %v15628_v5 = vpack.c.bf16 %v1471_v49, %v1465_v0  ;;  %v1470_v14 = vld [vmem:[%s15027_s25 + $0x8e0] sm:$0xff]  ;;  %v1191_v23 = vld [vmem:[%s15027_s25 + $0x28] sm:$0xff] }
 0xb78   : > { %v15622_v47 = vrot.slane %v15618_v30, %v15408_v45  ;;  %v4087_v43 = vmul.f32 %v15421_v55, %v15256_v29  ;;  %v1475_v45 = vld [vmem:[%s15636_s28 + $0x8] sm:$0xff]  ;;  %v15646_v29 = vpack.c.bf16 %v1468_v48, %v1462_v6  ;;  %v15648_v55 = vpack.c.bf16 %v1470_v14, %v1464_v2  ;;  %v1190_v0 = vld [vmem:[%s15027_s25 + $0x20] sm:$0xff]  ;;  %v1196_v49 = vld [vmem:[%s15027_s25 + $0x50] sm:$0xff] }
 0xb79   : > { %19016 = vst [vmem:[#allocation402_spill] sm:$0xff] %v15610_v32  ;;  %19017 = vst [vmem:[#allocation403_spill] sm:$0xff] %v15612_v51  ;;  %v1209_v6 = vld [vmem:[%s15027_s25 + $0xb8] sm:$0xff]  ;;  %v15667_v14 = vpack.c.bf16 %v1196_v49, %v1190_v0  ;;  %v1578_v42 = vld [vmem:[%s15636_s28 + $0x340] sm:$0xff] }
 0xb7a   : > { %10184 = vmatpush1.bf16.msra.mxu0 %v15590_v54  ;;  %10280 = vmatpush1.bf16.msra.mxu1 %v15592_v3  ;;  %19018 = vst [vmem:[#allocation404_spill] sm:$0xff] %v15622_v47  ;;  %v15626_v3 = vpack.c.bf16 %v1469_v7, %v1463_v37  ;;  %19020 = vst [vmem:[#allocation406_spill] sm:$0xff] %v15628_v5  ;;  %v1197_v54 = vld [vmem:[%s15027_s25 + $0x58] sm:$0xff]  ;;  %v15642_v37 = vrot.slane %v15618_v30, %v15411_v53 }
 0xb7b   : > { %10186 = vmatprep.subr.bf16.mxu0 %v15598_v52  ;;  %10282 = vmatprep.subr.bf16.mxu1 %v15600_v56  ;;  %v1478_v56 = vld [vmem:[%s15636_s28 + $0x20] sm:$0xff]  ;;  %19022 = vst [vmem:[#allocation408_spill] sm:$0xff] %v15646_v29  ;;  %19023 = vst [vmem:[#allocation409_spill] sm:$0xff] %v15648_v55  ;;  %v15650_v7 = vpack.c.bf16 %v1197_v54, %v1191_v23  ;;  %v4108_v53 = vmul.f32 %v15622_v47, %v4087_v43  ;;  %v1477_v2 = vld [vmem:[%s15636_s28 + $0x18] sm:$0xff] }
 0xb7c   : > { %19019 = vst [vmem:[#allocation405_spill] sm:$0xff] %v15626_v3  ;;  %19021 = vst [vmem:[#allocation407_spill] sm:$0xff] %v15642_v37  ;;  %v15661_v48 = vpack.c.bf16 %v1478_v56, %v1475_v45  ;;  %v1474_v54 = vld [vmem:[%s15636_s28] sm:$0xff]  ;;  %v1208_v23 = vld [vmem:[%s15027_s25 + $0xb0] sm:$0xff]  ;;  %v4093_v45 = vmul.f32 %v15492_v1, %v15286_v24 }
 0xb7d   : > { %19024 = vst [vmem:[#allocation410_spill] sm:$0xff] %v15650_v7  ;;  %19026 = vst [vmem:[#allocation412_spill] sm:$0xff] %v15667_v14  ;;  %v1202_v56 = vld [vmem:[%s15027_s25 + $0x80] sm:$0xff]  ;;  %v1221_v0 = vld [vmem:[%s15027_s25 + $0x118] sm:$0xff] }
 0xb7e   : > { %10188 = vmatpush1.bf16.msra.mxu0 %v15610_v32  ;;  %10284 = vmatpush1.bf16.msra.mxu1 %v15612_v51  ;;  %v4090_v32 = vmul.f32 %v15444_v25, %v15271_v39  ;;  %v1203_v51 = vld [vmem:[%s15027_s25 + $0x88] sm:$0xff]  ;;  %19025 = vst [vmem:[#allocation411_spill] sm:$0xff] %v15661_v48  ;;  %v15672_v25 = vadd.f32 %v15642_v37, %v4108_v53  ;;  %v1484_v53 = vld [vmem:[%s15636_s28 + $0x50] sm:$0xff] }
 0xb7f   : > { %10190 = vmatprep.subr.bf16.mxu0 %v15626_v3  ;;  %10286 = vmatprep.subr.bf16.mxu1 %v15628_v5  ;;  %v15669_v43 = vpack.c.bf16 %v1209_v6, %v1203_v51  ;;  %v15683_v51 = vpack.c.bf16 %v1477_v2, %v1474_v54  ;;  %v15691_v1 = vpack.c.bf16 %v1208_v23, %v1202_v56  ;;  %v1214_v54 = vld [vmem:[%s15027_s25 + $0xe0] sm:$0xff]  ;;  %v1220_v2 = vld [vmem:[%s15027_s25 + $0x110] sm:$0xff] }
 0xb80   : > { %v4111_v39 = vmul.f32 %v15622_v47, %v4090_v32  ;;  %v1481_v32 = vld [vmem:[%s15636_s28 + $0x38] sm:$0xff]  ;;  %v4114_v49 = vmul.f32 %v15622_v47, %v4093_v45  ;;  %v1480_v23 = vld [vmem:[%s15636_s28 + $0x30] sm:$0xff]  ;;  %v1490_v45 = vld [vmem:[%s15636_s28 + $0x80] sm:$0xff] }
 0xb81   : > { %19027 = vst [vmem:[#allocation413_spill] sm:$0xff] %v15669_v43  ;;  %19028 = vst [vmem:[#allocation414_spill] sm:$0xff] %v15683_v51  ;;  %v15706_v56 = vpack.c.bf16 %v1484_v53, %v1481_v32 }
 0xb82   : > { %10192 = vmatpush1.bf16.msra.mxu0 %v15646_v29  ;;  %10288 = vmatpush1.bf16.msra.mxu1 %v15648_v55  ;;  %v1215_v55 = vld [vmem:[%s15027_s25 + $0xe8] sm:$0xff]  ;;  %19029 = vst [vmem:[#allocation415_spill] sm:$0xff] %v15691_v1  ;;  %v15695_v24 = vadd.f32 %v15642_v37, %v4111_v39  ;;  %v15720_v32 = vadd.f32 %v15642_v37, %v4114_v49  ;;  %v1486_v29 = vld [vmem:[%s15636_s28 + $0x60] sm:$0xff]  ;;  %v1489_v49 = vld [vmem:[%s15636_s28 + $0x78] sm:$0xff] }
 0xb83   : > { %10290 = vmatprep.subr.bf16.mxu0 %v15650_v7  ;;  %10386 = vmatprep.subr.bf16.mxu1 %v15661_v48  ;;  %v15699_v6 = vpack.c.bf16 %v1221_v0, %v1215_v55  ;;  %v1233_v48 = vld [vmem:[%s15027_s25 + $0x178] sm:$0xff]  ;;  %19031 = vst [vmem:[#allocation417_spill] sm:$0xff] %v15706_v56  ;;  %v1483_v39 = vld [vmem:[%s15636_s28 + $0x48] sm:$0xff]  ;;  %v15716_v0 = vpack.c.bf16 %v1220_v2, %v1214_v54 }
 0xb84   : > { %v1487_v55 = vld [vmem:[%s15636_s28 + $0x68] sm:$0xff]  ;;  %v1245_v54 = vld [vmem:[%s15027_s25 + $0x1d8] sm:$0xff] }
 0xb85   : > { %4308 = vmatmul.mubr.f32.vlgmr.msra.gmra.mrb[52].mxu0 %v15672_v25  ;;  %4474 = vmatmul.mubr.f32.vlgmr.msra.gmra.mrb[46].mxu1 %v15672_v25  ;;  %19030 = vst [vmem:[#allocation416_spill] sm:$0xff] %v15699_v6  ;;  %19032 = vst [vmem:[#allocation418_spill] sm:$0xff] %v15716_v0  ;;  %v1239_v7 = vld [vmem:[%s15027_s25 + $0x1a8] sm:$0xff]  ;;  %v15732_v2 = vpack.c.bf16 %v1490_v45, %v1487_v55  ;;  %v1238_v55 = vld [vmem:[%s15027_s25 + $0x1a0] sm:$0xff] }
 0xb86   : > { %10292 = vmatpush1.bf16.msra.mxu0 %v15667_v14  ;;  %4313 = vmatprep.mubr.f32.mxu0 %v18720_v50  ;;  %v1227_v14 = vld [vmem:[%s15027_s25 + $0x148] sm:$0xff]  ;;  %v1244_v45 = vld [vmem:[%s15027_s25 + $0x1d0] sm:$0xff] }
 0xb87   : > { %4479 = vmatprep.mubr.f32.mxu1 %v18720_v50  ;;  %10294 = vmatprep.subr.bf16.mxu0 %v15669_v43  ;;  %v15723_v53 = vpack.c.bf16 %v1233_v48, %v1227_v14  ;;  %v1232_v43 = vld [vmem:[%s15027_s25 + $0x170] sm:$0xff]  ;;  %19035 = vst [vmem:[#allocation421_spill] sm:$0xff] %v15732_v2  ;;  %v1493_v48 = vld [vmem:[%s15636_s28 + $0x98] sm:$0xff] }
 0xb88   : > { %10388 = vmatpush1.bf16.msra.mxu1 %v15683_v51  ;;  %v1226_v51 = vld [vmem:[%s15027_s25 + $0x140] sm:$0xff]  ;;  %v1496_v14 = vld [vmem:[%s15636_s28 + $0xb0] sm:$0xff] }
 0xb89   : > { %4314 = vmatmul.mubr.f32.gmra.mrb[54].mxu0 %v15695_v24  ;;  %4480 = vmatmul.mubr.f32.gmra.mrb[48].mxu1 %v15695_v24  ;;  %19033 = vst [vmem:[#allocation419_spill] sm:$0xff] %v15723_v53 }
 0xb8a   : > { %10296 = vmatpush1.bf16.msra.mxu0 %v15691_v1  ;;  %4319 = vmatprep.mubr.f32.mxu0 %v18720_v50  ;;  %v15728_v1 = vpack.c.bf16 %v1483_v39, %v1480_v23  ;;  %v15742_v23 = vpack.c.bf16 %v1232_v43, %v1226_v51  ;;  %v15745_v39 = vpack.c.bf16 %v1245_v54, %v1239_v7  ;;  %v1492_v43 = vld [vmem:[%s15636_s28 + $0x90] sm:$0xff]  ;;  %v1495_v7 = vld [vmem:[%s15636_s28 + $0xa8] sm:$0xff]  ;;  %v1502_v54 = vld [vmem:[%s15636_s28 + $0xe0] sm:$0xff] }
 0xb8b   : > { %4485 = vmatprep.mubr.f32.mxu1 %v18720_v50  ;;  %10298 = vmatprep.subr.bf16.mxu0 %v15699_v6  ;;  %v15751_v6 = vpack.c.bf16 %v1489_v49, %v1486_v29  ;;  %v1499_v51 = vld [vmem:[%s15636_s28 + $0xc8] sm:$0xff]  ;;  %v1250_v49 = vld [vmem:[%s15027_s25 + $0x200] sm:$0xff] }
 0xb8c   : > { %19034 = vst [vmem:[#allocation420_spill] sm:$0xff] %v15728_v1  ;;  %10390 = vmatprep.subr.bf16.mxu1 %v15706_v56  ;;  %19036 = vst [vmem:[#allocation422_spill] sm:$0xff] %v15742_v23  ;;  %v1251_v56 = vld [vmem:[%s15027_s25 + $0x208] sm:$0xff] }
 0xb8d   : > { %4320 = vmatmul.mubr.f32.gmra.mrb[56].mxu0 %v15720_v32  ;;  %4486 = vmatmul.mubr.f32.gmra.mrb[50].mxu1 %v15720_v32  ;;  %19037 = vst [vmem:[#allocation423_spill] sm:$0xff] %v15745_v39  ;;  %19038 = vst [vmem:[#allocation424_spill] sm:$0xff] %v15751_v6 }
 0xb8e   : > { %10300 = vmatpush1.bf16.msra.mxu0 %v15716_v0  ;;  %4556 = vmatprep.mubr.f32.mxu0 %v15451_v19  ;;  %v1257_v0 = vld [vmem:[%s15027_s25 + $0x238] sm:$0xff]  ;;  %v15755_v19 = vpack.c.bf16 %v1496_v14, %v1493_v48  ;;  %v1256_v48 = vld [vmem:[%s15027_s25 + $0x230] sm:$0xff]  ;;  %v1263_v14 = vld [vmem:[%s15027_s25 + $0x268] sm:$0xff] }
 0xb8f   : > { %10302 = vmatprep.subr.bf16.mxu0 %v15723_v53  ;;  %10392 = vmatpush1.bf16.msra.mxu1 %v15728_v1  ;;  %v15762_v53 = vpack.c.bf16 %v1244_v45, %v1238_v55  ;;  %v15765_v29 = vpack.c.bf16 %v1257_v0, %v1251_v56  ;;  %v1269_v1 = vld [vmem:[%s15027_s25 + $0x298] sm:$0xff]  ;;  %v15775_v55 = vpack.c.bf16 %v1502_v54, %v1499_v51  ;;  %v1498_v45 = vld [vmem:[%s15636_s28 + $0xc0] sm:$0xff]  ;;  %v1268_v51 = vld [vmem:[%s15027_s25 + $0x290] sm:$0xff] }
 0xb90   : > { %10394 = vmatprep.subr.bf16.mxu1 %v15732_v2  ;;  %19039 = vst [vmem:[#allocation425_spill] sm:$0xff] %v15755_v19  ;;  %v15771_v2 = vpack.c.bf16 %v1495_v7, %v1492_v43  ;;  %v1501_v56 = vld [vmem:[%s15636_s28 + $0xd8] sm:$0xff]  ;;  %v15785_v43 = vpack.c.bf16 %v1269_v1, %v1263_v14  ;;  %v1262_v7 = vld [vmem:[%s15027_s25 + $0x260] sm:$0xff]  ;;  %v1275_v54 = vld [vmem:[%s15027_s25 + $0x2c8] sm:$0xff] }
 0xb91   : > { %19040 = vst [vmem:[#allocation426_spill] sm:$0xff] %v15762_v53  ;;  %19041 = vst [vmem:[#allocation427_spill] sm:$0xff] %v15765_v29  ;;  %v1505_v0 = vld [vmem:[%s15636_s28 + $0xf8] sm:$0xff]  ;;  %v1507_v1 = vld [vmem:[%s15636_s28 + $0x108] sm:$0xff] }
 0xb92   : > { %10304 = vmatpush1.bf16.msra.mxu0 %v15742_v23  ;;  %19042 = vst [vmem:[#allocation428_spill] sm:$0xff] %v15771_v2  ;;  %19043 = vst [vmem:[#allocation429_spill] sm:$0xff] %v15775_v55  ;;  %v15782_v23 = vpack.c.bf16 %v1256_v48, %v1250_v49  ;;  %v1504_v48 = vld [vmem:[%s15636_s28 + $0xf0] sm:$0xff]  ;;  %v1511_v14 = vld [vmem:[%s15636_s28 + $0x128] sm:$0xff] }
 0xb93   : > { %10306 = vmatprep.subr.bf16.mxu0 %v15745_v39  ;;  %10396 = vmatpush1.bf16.msra.mxu1 %v15751_v6  ;;  %v1508_v39 = vld [vmem:[%s15636_s28 + $0x110] sm:$0xff]  ;;  %19045 = vst [vmem:[#allocation431_spill] sm:$0xff] %v15785_v43  ;;  %v1281_v6 = vld [vmem:[%s15027_s25 + $0x2f8] sm:$0xff] }
 0xb94   : > { %10398 = vmatprep.subr.bf16.mxu1 %v15755_v19  ;;  %19044 = vst [vmem:[#allocation430_spill] sm:$0xff] %v15782_v23  ;;  %v15791_v19 = vpack.c.bf16 %v1501_v56, %v1498_v45  ;;  %v15795_v49 = vpack.c.bf16 %v1508_v39, %v1505_v0  ;;  %v15805_v45 = vpack.c.bf16 %v1281_v6, %v1275_v54  ;;  %v1274_v56 = vld [vmem:[%s15027_s25 + $0x2c0] sm:$0xff]  ;;  %v1280_v39 = vld [vmem:[%s15027_s25 + $0x2f0] sm:$0xff]  ;;  %v1287_v0 = vld [vmem:[%s15027_s25 + $0x328] sm:$0xff] }
 0xb95   : > { %v1513_v6 = vld [vmem:[%s15636_s28 + $0x138] sm:$0xff] }
 0xb96   : > { %10308 = vmatpush1.bf16.msra.mxu0 %v15762_v53  ;;  %19046 = vst [vmem:[#allocation432_spill] sm:$0xff] %v15791_v19  ;;  %19047 = vst [vmem:[#allocation433_spill] sm:$0xff] %v15795_v49  ;;  %v15802_v53 = vpack.c.bf16 %v1268_v51, %v1262_v7  ;;  %v1510_v51 = vld [vmem:[%s15636_s28 + $0x120] sm:$0xff]  ;;  %v1517_v54 = vld [vmem:[%s15636_s28 + $0x158] sm:$0xff] }
 0xb97   : > { %10310 = vmatprep.subr.bf16.mxu0 %v15765_v29  ;;  %10400 = vmatpush1.bf16.msra.mxu1 %v15771_v2  ;;  %v1514_v29 = vld [vmem:[%s15636_s28 + $0x140] sm:$0xff]  ;;  %19049 = vst [vmem:[#allocation435_spill] sm:$0xff] %v15805_v45  ;;  %v1293_v2 = vld [vmem:[%s15027_s25 + $0x358] sm:$0xff] }
 0xb98   : > { %10402 = vmatprep.subr.bf16.mxu1 %v15775_v55  ;;  %19048 = vst [vmem:[#allocation434_spill] sm:$0xff] %v15802_v53  ;;  %v15811_v55 = vpack.c.bf16 %v1507_v1, %v1504_v48  ;;  %v15815_v7 = vpack.c.bf16 %v1514_v29, %v1511_v14  ;;  %v15825_v48 = vpack.c.bf16 %v1293_v2, %v1287_v0  ;;  %v1286_v1 = vld [vmem:[%s15027_s25 + $0x320] sm:$0xff]  ;;  %v1292_v29 = vld [vmem:[%s15027_s25 + $0x350] sm:$0xff]  ;;  %v1299_v14 = vld [vmem:[%s15027_s25 + $0x388] sm:$0xff] }
 0xb99   : > { %v1519_v2 = vld [vmem:[%s15636_s28 + $0x168] sm:$0xff] }
 0xb9a   : > { %10312 = vmatpush1.bf16.msra.mxu0 %v15782_v23  ;;  %19050 = vst [vmem:[#allocation436_spill] sm:$0xff] %v15811_v55  ;;  %19051 = vst [vmem:[#allocation437_spill] sm:$0xff] %v15815_v7  ;;  %v15822_v23 = vpack.c.bf16 %v1280_v39, %v1274_v56  ;;  %v1516_v39 = vld [vmem:[%s15636_s28 + $0x150] sm:$0xff]  ;;  %v1523_v0 = vld [vmem:[%s15636_s28 + $0x188] sm:$0xff] }
 0xb9b   : > { %10314 = vmatprep.subr.bf16.mxu0 %v15785_v43  ;;  %10404 = vmatpush1.bf16.msra.mxu1 %v15791_v19  ;;  %v1520_v43 = vld [vmem:[%s15636_s28 + $0x170] sm:$0xff]  ;;  %19053 = vst [vmem:[#allocation439_spill] sm:$0xff] %v15825_v48  ;;  %v1305_v19 = vld [vmem:[%s15027_s25 + $0x3b8] sm:$0xff] }
 0xb9c   : > { %10406 = vmatprep.subr.bf16.mxu1 %v15795_v49  ;;  %19052 = vst [vmem:[#allocation438_spill] sm:$0xff] %v15822_v23  ;;  %v15831_v49 = vpack.c.bf16 %v1513_v6, %v1510_v51  ;;  %v15835_v56 = vpack.c.bf16 %v1520_v43, %v1517_v54  ;;  %v15845_v51 = vpack.c.bf16 %v1305_v19, %v1299_v14  ;;  %v1298_v6 = vld [vmem:[%s15027_s25 + $0x380] sm:$0xff]  ;;  %v1311_v43 = vld [vmem:[%s15027_s25 + $0x3e8] sm:$0xff] }
 0xb9d   : > { %v15851_v54 = vpack.c.bf16 %v1519_v2, %v1516_v39  ;;  %v1310_v39 = vld [vmem:[%s15027_s25 + $0x3e0] sm:$0xff]  ;;  %v1316_v2 = vld [vmem:[%s15027_s25 + $0x410] sm:$0xff] }
 0xb9e   : > { %10316 = vmatpush1.bf16.msra.mxu0 %v15802_v53  ;;  %19054 = vst [vmem:[#allocation440_spill] sm:$0xff] %v15831_v49  ;;  %19055 = vst [vmem:[#allocation441_spill] sm:$0xff] %v15835_v56  ;;  %v15842_v53 = vpack.c.bf16 %v1292_v29, %v1286_v1  ;;  %v1522_v29 = vld [vmem:[%s15636_s28 + $0x180] sm:$0xff] }
 0xb9f   : > { %10318 = vmatprep.subr.bf16.mxu0 %v15805_v45  ;;  %10408 = vmatpush1.bf16.msra.mxu1 %v15811_v55  ;;  %v1526_v45 = vld [vmem:[%s15636_s28 + $0x1a0] sm:$0xff]  ;;  %19057 = vst [vmem:[#allocation443_spill] sm:$0xff] %v15845_v51  ;;  %19058 = vst [vmem:[#allocation444_spill] sm:$0xff] %v15851_v54  ;;  %v1317_v55 = vld [vmem:[%s15027_s25 + $0x418] sm:$0xff] }
 0xba0   : > { %10410 = vmatprep.subr.bf16.mxu1 %v15815_v7  ;;  %19056 = vst [vmem:[#allocation442_spill] sm:$0xff] %v15842_v53  ;;  %v1304_v7 = vld [vmem:[%s15027_s25 + $0x3b0] sm:$0xff]  ;;  %v15855_v1 = vpack.c.bf16 %v1526_v45, %v1523_v0  ;;  %v15863_v14 = vpack.c.bf16 %v1317_v55, %v1311_v43  ;;  %v1323_v0 = vld [vmem:[%s15027_s25 + $0x448] sm:$0xff] }
 0xba1   : > { %v15860_v19 = vpack.c.bf16 %v1304_v7, %v1298_v6  ;;  %v15874_v7 = vpack.c.bf16 %v1316_v2, %v1310_v39  ;;  %v1322_v6 = vld [vmem:[%s15027_s25 + $0x440] sm:$0xff]  ;;  %v1328_v43 = vld [vmem:[%s15027_s25 + $0x470] sm:$0xff] }
 0xba2   : > { %10320 = vmatpush1.bf16.msra.mxu0 %v15822_v23  ;;  %19059 = vst [vmem:[#allocation445_spill] sm:$0xff] %v15855_v1  ;;  %19061 = vst [vmem:[#allocation447_spill] sm:$0xff] %v15863_v14  ;;  %v1329_v23 = vld [vmem:[%s15027_s25 + $0x478] sm:$0xff]  ;;  %v1340_v2 = vld [vmem:[%s15027_s25 + $0x4d0] sm:$0xff] }
 0xba3   : > { %10322 = vmatprep.subr.bf16.mxu0 %v15825_v48  ;;  %10412 = vmatpush1.bf16.msra.mxu1 %v15831_v49  ;;  %v1525_v48 = vld [vmem:[%s15636_s28 + $0x198] sm:$0xff]  ;;  %19060 = vst [vmem:[#allocation446_spill] sm:$0xff] %v15860_v19  ;;  %19063 = vst [vmem:[#allocation449_spill] sm:$0xff] %v15874_v7  ;;  %v15877_v55 = vpack.c.bf16 %v1329_v23, %v1323_v0  ;;  %v1334_v23 = vld [vmem:[%s15027_s25 + $0x4a0] sm:$0xff] }
 0xba4   : > { %10414 = vmatprep.subr.bf16.mxu1 %v15835_v56  ;;  %v15868_v45 = vpack.c.bf16 %v1525_v48, %v1522_v29  ;;  %v1335_v48 = vld [vmem:[%s15027_s25 + $0x4a8] sm:$0xff]  ;;  %v1341_v29 = vld [vmem:[%s15027_s25 + $0x4d8] sm:$0xff] }
 0xba5   : > { %19064 = vst [vmem:[#allocation450_spill] sm:$0xff] %v15877_v55  ;;  %v15888_v39 = vpack.c.bf16 %v1341_v29, %v1335_v48  ;;  %v1347_v0 = vld [vmem:[%s15027_s25 + $0x508] sm:$0xff]  ;;  %v1352_v48 = vld [vmem:[%s15027_s25 + $0x530] sm:$0xff] }
 0xba6   : > { %10324 = vmatpush1.bf16.msra.mxu0 %v15842_v53  ;;  %19062 = vst [vmem:[#allocation448_spill] sm:$0xff] %v15868_v45  ;;  %v1359_v29 = vld [vmem:[%s15027_s25 + $0x568] sm:$0xff] }
 0xba7   : > { %10326 = vmatprep.subr.bf16.mxu0 %v15845_v51  ;;  %10416 = vmatpush1.bf16.msra.mxu1 %v15851_v54  ;;  %19066 = vst [vmem:[#allocation452_spill] sm:$0xff] %v15888_v39 }
 0xba8   : > { %10418 = vmatprep.subr.bf16.mxu1 %v15855_v1 }
 0xbaa   : > { %10328 = vmatpush1.bf16.msra.mxu0 %v15860_v19  ;;  %v15885_v19 = vpack.c.bf16 %v1328_v43, %v1322_v6  ;;  %v1346_v43 = vld [vmem:[%s15027_s25 + $0x500] sm:$0xff] }
 0xbab   : > { %10330 = vmatprep.subr.bf16.mxu0 %v15863_v14  ;;  %10420 = vmatpush1.bf16.msra.mxu1 %v15868_v45  ;;  %v1353_v14 = vld [vmem:[%s15027_s25 + $0x538] sm:$0xff]  ;;  %v15895_v45 = vpack.c.bf16 %v1340_v2, %v1334_v23  ;;  %v1358_v2 = vld [vmem:[%s15027_s25 + $0x560] sm:$0xff] }
 0xbac   : > { %19065 = vst [vmem:[#allocation451_spill] sm:$0xff] %v15885_v19  ;;  %v15898_v6 = vpack.c.bf16 %v1353_v14, %v1347_v0  ;;  %v1364_v14 = vld [vmem:[%s15027_s25 + $0x590] sm:$0xff]  ;;  %v1371_v0 = vld [vmem:[%s15027_s25 + $0x5c8] sm:$0xff] }
 0xbad   : > { %19067 = vst [vmem:[#allocation453_spill] sm:$0xff] %v15895_v45 }
 0xbae   : > { %10332 = vmatpush1.bf16.msra.mxu0 %v15874_v7  ;;  %19068 = vst [vmem:[#allocation454_spill] sm:$0xff] %v15898_v6  ;;  %v15905_v7 = vpack.c.bf16 %v1352_v48, %v1346_v43  ;;  %v1370_v48 = vld [vmem:[%s15027_s25 + $0x5c0] sm:$0xff] }
 0xbaf   : > { %10334 = vmatprep.subr.bf16.mxu0 %v15877_v55  ;;  %v1365_v55 = vld [vmem:[%s15027_s25 + $0x598] sm:$0xff] }
 0xbb0   : > { %19069 = vst [vmem:[#allocation455_spill] sm:$0xff] %v15905_v7  ;;  %v15908_v23 = vpack.c.bf16 %v1365_v55, %v1359_v29  ;;  %v1376_v55 = vld [vmem:[%s15027_s25 + $0x5f0] sm:$0xff]  ;;  %v1383_v29 = vld [vmem:[%s15027_s25 + $0x628] sm:$0xff] }
 0xbb2   : > { %10336 = vmatpush1.bf16.msra.mxu0 %v15885_v19  ;;  %19070 = vst [vmem:[#allocation456_spill] sm:$0xff] %v15908_v23  ;;  %v15915_v19 = vpack.c.bf16 %v1364_v14, %v1358_v2  ;;  %v1382_v14 = vld [vmem:[%s15027_s25 + $0x620] sm:$0xff] }
 0xbb3   : > { %10338 = vmatprep.subr.bf16.mxu0 %v15888_v39  ;;  %v1377_v39 = vld [vmem:[%s15027_s25 + $0x5f8] sm:$0xff] }
 0xbb4   : > { %19071 = vst [vmem:[#allocation457_spill] sm:$0xff] %v15915_v19  ;;  %v15918_v43 = vpack.c.bf16 %v1377_v39, %v1371_v0  ;;  %v1395_v39 = vld [vmem:[%s15027_s25 + $0x688] sm:$0xff]  ;;  %v1401_v0 = vld [vmem:[%s15027_s25 + $0x6b8] sm:$0xff] }
 0xbb6   : > { %10340 = vmatpush1.bf16.msra.mxu0 %v15895_v45  ;;  %19072 = vst [vmem:[#allocation458_spill] sm:$0xff] %v15918_v43  ;;  %v15925_v45 = vpack.c.bf16 %v1376_v55, %v1370_v48  ;;  %v15938_v48 = vpack.c.bf16 %v1401_v0, %v1395_v39  ;;  %v1394_v55 = vld [vmem:[%s15027_s25 + $0x680] sm:$0xff]  ;;  %v1412_v0 = vld [vmem:[%s15027_s25 + $0x710] sm:$0xff] }
 0xbb7   : > { %10342 = vmatprep.subr.bf16.mxu0 %v15898_v6  ;;  %v1389_v6 = vld [vmem:[%s15027_s25 + $0x658] sm:$0xff]  ;;  %v1406_v39 = vld [vmem:[%s15027_s25 + $0x6e0] sm:$0xff] }
 0xbb8   : > { %19073 = vst [vmem:[#allocation459_spill] sm:$0xff] %v15925_v45  ;;  %v15928_v2 = vpack.c.bf16 %v1389_v6, %v1383_v29  ;;  %19076 = vst [vmem:[#allocation462_spill] sm:$0xff] %v15938_v48  ;;  %v1407_v6 = vld [vmem:[%s15027_s25 + $0x6e8] sm:$0xff]  ;;  %v1413_v29 = vld [vmem:[%s15027_s25 + $0x718] sm:$0xff] }
 0xbba   : > { %10344 = vmatpush1.bf16.msra.mxu0 %v15905_v7  ;;  %19074 = vst [vmem:[#allocation460_spill] sm:$0xff] %v15928_v2 }
 0xbbb   : > { %10346 = vmatprep.subr.bf16.mxu0 %v15908_v23  ;;  %v1388_v23 = vld [vmem:[%s15027_s25 + $0x650] sm:$0xff] }
 0xbbc   : > { %v15935_v7 = vpack.c.bf16 %v1388_v23, %v1382_v14  ;;  %v15950_v14 = vpack.c.bf16 %v1413_v29, %v1407_v6  ;;  %v1431_v6 = vld [vmem:[%s15027_s25 + $0x7a8] sm:$0xff]  ;;  %v1437_v29 = vld [vmem:[%s15027_s25 + $0x7d8] sm:$0xff] }
 0xbbe   : > { %10348 = vmatpush1.bf16.msra.mxu0 %v15915_v19  ;;  %19075 = vst [vmem:[#allocation461_spill] sm:$0xff] %v15935_v7  ;;  %19078 = vst [vmem:[#allocation464_spill] sm:$0xff] %v15950_v14  ;;  %v1543_v19 = vld [vmem:[%s15636_s28 + $0x228] sm:$0xff] }
 0xbbf   : > { %10350 = vmatprep.subr.bf16.mxu0 %v15918_v43  ;;  %v1400_v43 = vld [vmem:[%s15027_s25 + $0x6b0] sm:$0xff] }
 0xbc0   : > { %v15947_v23 = vpack.c.bf16 %v1400_v43, %v1394_v55  ;;  %v1418_v43 = vld [vmem:[%s15027_s25 + $0x740] sm:$0xff]  ;;  %v1424_v55 = vld [vmem:[%s15027_s25 + $0x770] sm:$0xff] }
 0xbc2   : > { %10352 = vmatpush1.bf16.msra.mxu0 %v15925_v45  ;;  %19077 = vst [vmem:[#allocation463_spill] sm:$0xff] %v15947_v23  ;;  %v1425_v45 = vld [vmem:[%s15027_s25 + $0x778] sm:$0xff] }
 0xbc3   : > { %10354 = vmatprep.subr.bf16.mxu0 %v15928_v2  ;;  %v1419_v2 = vld [vmem:[%s15027_s25 + $0x748] sm:$0xff] }
 0xbc5   : > { %4557 = vmatmul.mubr.f32.vlgmr.msra.gmra.mrb[58].mxu0 %v15454_v13  ;;  %v15959_v13 = vpack.c.bf16 %v1412_v0, %v1406_v39  ;;  %v1443_v39 = vld [vmem:[%s15027_s25 + $0x808] sm:$0xff]  ;;  %v1449_v0 = vld [vmem:[%s15027_s25 + $0x838] sm:$0xff] }
 0xbc6   : > { %4562 = vmatprep.mubr.f32.mxu0 %v15483_v17  ;;  %10356 = vmatpush1.bf16.msra.mxu0 %v15935_v7  ;;  %v15962_v17 = vpack.c.bf16 %v1425_v45, %v1419_v2  ;;  %v1430_v45 = vld [vmem:[%s15027_s25 + $0x7a0] sm:$0xff]  ;;  %v1436_v2 = vld [vmem:[%s15027_s25 + $0x7d0] sm:$0xff] }
 0xbc7   : > { %10358 = vmatprep.subr.bf16.mxu0 %v15938_v48  ;;  %19079 = vst [vmem:[#allocation465_spill] sm:$0xff] %v15959_v13  ;;  %v1537_v48 = vld [vmem:[%s15636_s28 + $0x1f8] sm:$0xff] }
 0xbc8   : > { %19080 = vst [vmem:[#allocation466_spill] sm:$0xff] %v15962_v17 }
 0xbc9   : > { %4563 = vmatmul.mubr.f32.gmra.mrb[60].mxu0 %v15486_v60  ;;  %v15970_v60 = vpack.c.bf16 %v1424_v55, %v1418_v43  ;;  %v15984_v43 = vpack.c.bf16 %v1449_v0, %v1443_v39  ;;  %v1442_v55 = vld [vmem:[%s15027_s25 + $0x800] sm:$0xff]  ;;  %v1467_v39 = vld [vmem:[%s15027_s25 + $0x8c8] sm:$0xff]  ;;  %v1529_v0 = vld [vmem:[%s15636_s28 + $0x1b8] sm:$0xff] }
 0xbca   : > { %4568 = vmatprep.mubr.f32.mxu0 %v15530_v57  ;;  %10360 = vmatpush1.bf16.msra.mxu0 %v15947_v23  ;;  %v15974_v57 = vpack.c.bf16 %v1437_v29, %v1431_v6  ;;  %v1448_v6 = vld [vmem:[%s15027_s25 + $0x830] sm:$0xff]  ;;  %v1455_v29 = vld [vmem:[%s15027_s25 + $0x868] sm:$0xff] }
 0xbcb   : > { %10362 = vmatprep.subr.bf16.mxu0 %v15950_v14  ;;  %19081 = vst [vmem:[#allocation467_spill] sm:$0xff] %v15970_v60  ;;  %19084 = vst [vmem:[#allocation470_spill] sm:$0xff] %v15984_v43  ;;  %v1473_v14 = vld [vmem:[%s15027_s25 + $0x8f8] sm:$0xff] }
 0xbcc   : > { %19082 = vst [vmem:[#allocation468_spill] sm:$0xff] %v15974_v57 }
 0xbcd   : > { %4569 = vmatmul.mubr.f32.gmra.mrb[62].mxu0 %v15533_v27  ;;  %v15981_v27 = vpack.c.bf16 %v1436_v2, %v1430_v45  ;;  %v1460_v45 = vld [vmem:[%s15027_s25 + $0x890] sm:$0xff] }
 0xbce   : > { %10364 = vmatpush1.bf16.msra.mxu0 %v15959_v13  ;;  %4639 = vmatprep.mubr.f32.mxu0 %v18720_v50  ;;  %v15991_v13 = vpack.c.bf16 %v1448_v6, %v1442_v55  ;;  %v1531_v55 = vld [vmem:[%s15636_s28 + $0x1c8] sm:$0xff] }
 0xbcf   : > { %10366 = vmatprep.subr.bf16.mxu0 %v15962_v17  ;;  %19083 = vst [vmem:[#allocation469_spill] sm:$0xff] %v15981_v27  ;;  %v1461_v17 = vld [vmem:[%s15027_s25 + $0x898] sm:$0xff] }
 0xbd0   : > { %19085 = vst [vmem:[#allocation471_spill] sm:$0xff] %v15991_v13  ;;  %v15996_v2 = vpack.c.bf16 %v1461_v17, %v1455_v29  ;;  %v1466_v29 = vld [vmem:[%s15027_s25 + $0x8c0] sm:$0xff] }
 0xbd2   : > { %10368 = vmatpush1.bf16.msra.mxu0 %v15970_v60  ;;  %v1454_v60 = vld [vmem:[%s15027_s25 + $0x860] sm:$0xff]  ;;  %19086 = vst [vmem:[#allocation472_spill] sm:$0xff] %v15996_v2 }
 0xbd3   : > { %10370 = vmatprep.subr.bf16.mxu0 %v15974_v57  ;;  %v1532_v57 = vld [vmem:[%s15636_s28 + $0x1d0] sm:$0xff]  ;;  %v16009_v17 = vpack.c.bf16 %v1460_v45, %v1454_v60  ;;  %v1527_v60 = vld [vmem:[%s15636_s28 + $0x1a8] sm:$0xff] }
 0xbd4   : > { %v16002_v23 = vpack.c.bf16 %v1532_v57, %v1529_v0  ;;  %v16015_v57 = vpack.c.bf16 %v1473_v14, %v1467_v39  ;;  %v1524_v0 = vld [vmem:[%s15636_s28 + $0x190] sm:$0xff] }
 0xbd5   : > { %19089 = vst [vmem:[#allocation475_spill] sm:$0xff] %v16009_v17  ;;  %v1476_v39 = vld [vmem:[%s15636_s28 + $0x10] sm:$0xff] }
 0xbd6   : > { %10372 = vmatpush1.bf16.msra.mxu0 %v15981_v27  ;;  %19087 = vst [vmem:[#allocation473_spill] sm:$0xff] %v16002_v23  ;;  %v1528_v27 = vld [vmem:[%s15636_s28 + $0x1b0] sm:$0xff]  ;;  %10422 = vmatprep.subr.bf16.mxu1 %v16002_v23  ;;  %19090 = vst [vmem:[#allocation476_spill] sm:$0xff] %v16015_v57 }
 0xbd7   : > { %10374 = vmatprep.subr.bf16.mxu0 %v15984_v43  ;;  %v16006_v6 = vpack.c.bf16 %v1531_v55, %v1528_v27  ;;  %v1472_v43 = vld [vmem:[%s15027_s25 + $0x8f0] sm:$0xff]  ;;  %v1535_v27 = vld [vmem:[%s15636_s28 + $0x1e8] sm:$0xff]  ;;  %v1538_v55 = vld [vmem:[%s15636_s28 + $0x200] sm:$0xff] }
 0xbd8   : > { %v16022_v45 = vpack.c.bf16 %v1538_v55, %v1535_v27  ;;  %v16029_v14 = vpack.c.bf16 %v1472_v43, %v1466_v29  ;;  %v16035_v27 = vpack.c.bf16 %v1527_v60, %v1524_v0  ;;  %v1530_v55 = vld [vmem:[%s15636_s28 + $0x1c0] sm:$0xff]  ;;  %v1533_v43 = vld [vmem:[%s15636_s28 + $0x1d8] sm:$0xff] }
 0xbd9   : > { %19088 = vst [vmem:[#allocation474_spill] sm:$0xff] %v16006_v6  ;;  %10424 = vmatpush1.bf16.msra.mxu1 %v16006_v6  ;;  %v1482_v60 = vld [vmem:[%s15636_s28 + $0x40] sm:$0xff] }
 0xbda   : > { %10376 = vmatpush1.bf16.msra.mxu0 %v15991_v13  ;;  %19091 = vst [vmem:[#allocation477_spill] sm:$0xff] %v16022_v45  ;;  %v1534_v13 = vld [vmem:[%s15636_s28 + $0x1e0] sm:$0xff]  ;;  %19093 = vst [vmem:[#allocation479_spill] sm:$0xff] %v16029_v14  ;;  %10426 = vmatprep.subr.bf16.mxu1 %v16022_v45 }
 0xbdb   : > { %10378 = vmatprep.subr.bf16.mxu0 %v15996_v2  ;;  %v16026_v7 = vpack.c.bf16 %v1537_v48, %v1534_v13  ;;  %v1479_v2 = vld [vmem:[%s15636_s28 + $0x28] sm:$0xff]  ;;  %19094 = vst [vmem:[#allocation480_spill] sm:$0xff] %v16035_v27  ;;  %v1541_v48 = vld [vmem:[%s15636_s28 + $0x218] sm:$0xff]  ;;  %v1544_v13 = vld [vmem:[%s15636_s28 + $0x230] sm:$0xff] }
 0xbdc   : > { %v16042_v29 = vpack.c.bf16 %v1544_v13, %v1541_v48  ;;  %v16049_v0 = vpack.c.bf16 %v1479_v2, %v1476_v39  ;;  %v16055_v48 = vpack.c.bf16 %v1533_v43, %v1530_v55  ;;  %v1536_v13 = vld [vmem:[%s15636_s28 + $0x1f0] sm:$0xff]  ;;  %v1546_v39 = vld [vmem:[%s15636_s28 + $0x240] sm:$0xff] }
 0xbdd   : > { %19092 = vst [vmem:[#allocation478_spill] sm:$0xff] %v16026_v7  ;;  %10428 = vmatpush1.bf16.msra.mxu1 %v16026_v7  ;;  %v1488_v43 = vld [vmem:[%s15636_s28 + $0x70] sm:$0xff] }
 0xbde   : > { %10380 = vmatpush1.bf16.msra.mxu0 %v16009_v17  ;;  %19095 = vst [vmem:[#allocation481_spill] sm:$0xff] %v16042_v29  ;;  %v1540_v17 = vld [vmem:[%s15636_s28 + $0x210] sm:$0xff]  ;;  %19097 = vst [vmem:[#allocation483_spill] sm:$0xff] %v16049_v0  ;;  %10430 = vmatprep.subr.bf16.mxu1 %v16042_v29  ;;  %v1549_v29 = vld [vmem:[%s15636_s28 + $0x258] sm:$0xff] }
 0xbdf   : > { %10382 = vmatprep.subr.bf16.mxu0 %v16015_v57  ;;  %v16046_v45 = vpack.c.bf16 %v1543_v19, %v1540_v17  ;;  %v1485_v57 = vld [vmem:[%s15636_s28 + $0x58] sm:$0xff]  ;;  %19098 = vst [vmem:[#allocation484_spill] sm:$0xff] %v16055_v48  ;;  %v1547_v19 = vld [vmem:[%s15636_s28 + $0x248] sm:$0xff]  ;;  %v1550_v17 = vld [vmem:[%s15636_s28 + $0x260] sm:$0xff] }
 0xbe0   : > { %v16062_v2 = vpack.c.bf16 %v1550_v17, %v1547_v19  ;;  %v16071_v55 = vpack.c.bf16 %v1485_v57, %v1482_v60  ;;  %v1542_v17 = vld [vmem:[%s15636_s28 + $0x220] sm:$0xff]  ;;  %v1552_v60 = vld [vmem:[%s15636_s28 + $0x270] sm:$0xff] }
 0xbe1   : > { %19096 = vst [vmem:[#allocation482_spill] sm:$0xff] %v16046_v45  ;;  %10432 = vmatpush1.bf16.msra.mxu1 %v16046_v45  ;;  %v1491_v45 = vld [vmem:[%s15636_s28 + $0x88] sm:$0xff] }
 0xbe2   : > { %10384 = vmatpush1.bf16.msra.mxu0 %v16029_v14  ;;  %v1539_v14 = vld [vmem:[%s15636_s28 + $0x208] sm:$0xff]  ;;  %19099 = vst [vmem:[#allocation485_spill] sm:$0xff] %v16062_v2  ;;  %19101 = vst [vmem:[#allocation487_spill] sm:$0xff] %v16071_v55  ;;  %10434 = vmatprep.subr.bf16.mxu1 %v16062_v2 }
 0xbe3   : > { %10578 = vmatprep.subr.bf16.mxu0 %v16035_v27  ;;  %v16067_v27 = vpack.c.bf16 %v1549_v29, %v1546_v39  ;;  %v16076_v19 = vpack.c.bf16 %v1539_v14, %v1536_v13  ;;  %v1556_v29 = vld [vmem:[%s15636_s28 + $0x290] sm:$0xff]  ;;  %v1545_v39 = vld [vmem:[%s15636_s28 + $0x238] sm:$0xff]  ;;  %v1559_v13 = vld [vmem:[%s15636_s28 + $0x2a8] sm:$0xff] }
 0xbe4   : > { %v16100_v2 = vpack.c.bf16 %v1545_v39, %v1542_v17  ;;  %v1568_v17 = vld [vmem:[%s15636_s28 + $0x2f0] sm:$0xff] }
 0xbe5   : > { %4640 = vmatmul.mubr.f32.vlgmr.msra.gmra.mrb[58].mxu0 %v15672_v25  ;;  %19100 = vst [vmem:[#allocation486_spill] sm:$0xff] %v16067_v27  ;;  %19102 = vst [vmem:[#allocation488_spill] sm:$0xff] %v16076_v19  ;;  %v1553_v25 = vld [vmem:[%s15636_s28 + $0x278] sm:$0xff]  ;;  %10436 = vmatpush1.bf16.msra.mxu1 %v16067_v27  ;;  %v1562_v27 = vld [vmem:[%s15636_s28 + $0x2c0] sm:$0xff] }
 0xbe6   : > { %4645 = vmatprep.mubr.f32.mxu0 %v18720_v50  ;;  %10580 = vmatpush3.bf16.msra.mxu0 %v16049_v0  ;;  %v16084_v57 = vpack.c.bf16 %v1556_v29, %v1553_v25  ;;  %v1555_v0 = vld [vmem:[%s15636_s28 + $0x288] sm:$0xff]  ;;  %v1494_v25 = vld [vmem:[%s15636_s28 + $0xa0] sm:$0xff]  ;;  %v1497_v29 = vld [vmem:[%s15636_s28 + $0xb8] sm:$0xff]  ;;  %19106 = vst [vmem:[#allocation492_spill] sm:$0xff] %v16100_v2 }
 0xbe7   : > { %10582 = vmatprep.subr.bf16.mxu0 %v16055_v48  ;;  %v16089_v14 = vpack.c.bf16 %v1555_v0, %v1552_v60  ;;  %v16094_v48 = vpack.c.bf16 %v1491_v45, %v1488_v43  ;;  %v16104_v0 = vpack.c.bf16 %v1562_v27, %v1559_v13  ;;  %v1558_v60 = vld [vmem:[%s15636_s28 + $0x2a0] sm:$0xff]  ;;  %v1551_v45 = vld [vmem:[%s15636_s28 + $0x268] sm:$0xff]  ;;  %v1564_v27 = vld [vmem:[%s15636_s28 + $0x2d0] sm:$0xff]  ;;  %v16120_v13 = vpack.c.bf16 %v1497_v29, %v1494_v25 }
 0xbe8   : > { %19103 = vst [vmem:[#allocation489_spill] sm:$0xff] %v16084_v57  ;;  %10438 = vmatprep.subr.bf16.mxu1 %v16084_v57  ;;  %v1567_v57 = vld [vmem:[%s15636_s28 + $0x2e8] sm:$0xff] }
 0xbe9   : > { %4646 = vmatmul.mubr.f32.gmra.mrb[60].mxu0 %v15695_v24  ;;  %19104 = vst [vmem:[#allocation490_spill] sm:$0xff] %v16089_v14  ;;  %19105 = vst [vmem:[#allocation491_spill] sm:$0xff] %v16094_v48  ;;  %v1548_v24 = vld [vmem:[%s15636_s28 + $0x250] sm:$0xff]  ;;  %10440 = vmatpush1.bf16.msra.mxu1 %v16089_v14  ;;  %v1554_v14 = vld [vmem:[%s15636_s28 + $0x280] sm:$0xff] }
 0xbea   : > { %4651 = vmatprep.mubr.f32.mxu0 %v18720_v50  ;;  %10584 = vmatpush3.bf16.msra.mxu0 %v16071_v55  ;;  %19107 = vst [vmem:[#allocation493_spill] sm:$0xff] %v16104_v0  ;;  %v1561_v55 = vld [vmem:[%s15636_s28 + $0x2b8] sm:$0xff]  ;;  %19110 = vst [vmem:[#allocation496_spill] sm:$0xff] %v16120_v13 }
 0xbeb   : > { %10586 = vmatprep.subr.bf16.mxu0 %v16076_v19  ;;  %v16110_v43 = vpack.c.bf16 %v1561_v55, %v1558_v60  ;;  %v1565_v19 = vld [vmem:[%s15636_s28 + $0x2d8] sm:$0xff]  ;;  %10442 = vmatprep.subr.bf16.mxu1 %v16104_v0  ;;  %v16124_v55 = vpack.c.bf16 %v1551_v45, %v1548_v24  ;;  %v1500_v60 = vld [vmem:[%s15636_s28 + $0xd0] sm:$0xff]  ;;  %v1506_v24 = vld [vmem:[%s15636_s28 + $0x100] sm:$0xff] }
 0xbec   : > { %v16116_v39 = vpack.c.bf16 %v1568_v17, %v1565_v19  ;;  %v1557_v19 = vld [vmem:[%s15636_s28 + $0x298] sm:$0xff]  ;;  %v16131_v17 = vpack.c.bf16 %v1567_v57, %v1564_v27  ;;  %v1563_v57 = vld [vmem:[%s15636_s28 + $0x2c8] sm:$0xff] }
 0xbed   : > { %19108 = vst [vmem:[#allocation494_spill] sm:$0xff] %v16110_v43  ;;  %4652 = vmatmul.mubr.f32.gmra.mrb[62].mxu0 %v15720_v32  ;;  %19111 = vst [vmem:[#allocation497_spill] sm:$0xff] %v16124_v55  ;;  %v1503_v32 = vld [vmem:[%s15636_s28 + $0xe8] sm:$0xff]  ;;  %10444 = vmatpush1.bf16.msra.mxu1 %v16110_v43  ;;  %v16138_v29 = vpack.c.bf16 %v1557_v19, %v1554_v14  ;;  %v1509_v45 = vld [vmem:[%s15636_s28 + $0x118] sm:$0xff] }
 0xbee   : > { %19109 = vst [vmem:[#allocation495_spill] sm:$0xff] %v16116_v39  ;;  %10588 = vmatpush3.bf16.msra.mxu0 %v16094_v48  ;;  %19112 = vst [vmem:[#allocation498_spill] sm:$0xff] %v16131_v17  ;;  %10446 = vmatprep.subr.bf16.mxu1 %v16116_v39  ;;  %v16135_v25 = vpack.c.bf16 %v1503_v32, %v1500_v60  ;;  %v16146_v27 = vpack.c.bf16 %v1509_v45, %v1506_v24  ;;  %v1512_v60 = vld [vmem:[%s15636_s28 + $0x130] sm:$0xff]  ;;  %v1515_v14 = vld [vmem:[%s15636_s28 + $0x148] sm:$0xff] }
 0xbef   : > { %10590 = vmatprep.subr.bf16.mxu0 %v16100_v2  ;;  %19114 = vst [vmem:[#allocation500_spill] sm:$0xff] %v16138_v29  ;;  %v1560_v2 = vld [vmem:[%s15636_s28 + $0x2b0] sm:$0xff]  ;;  %v1571_v19 = vld [vmem:[%s15636_s28 + $0x308] sm:$0xff]  ;;  %v1569_v48 = vld [vmem:[%s15636_s28 + $0x2f8] sm:$0xff]  ;;  %v16160_v24 = vpack.c.bf16 %v1515_v14, %v1512_v60 }
 0xbf0   : > { %19113 = vst [vmem:[#allocation499_spill] sm:$0xff] %v16135_v25  ;;  %19115 = vst [vmem:[#allocation501_spill] sm:$0xff] %v16146_v27  ;;  %v16150_v32 = vpack.c.bf16 %v1563_v57, %v1560_v2  ;;  %v1518_v2 = vld [vmem:[%s15636_s28 + $0x160] sm:$0xff]  ;;  %v1521_v57 = vld [vmem:[%s15636_s28 + $0x178] sm:$0xff] }
 0xbf1   : > { %10448 = vmatpush1.bf16.msra.mxu1 %v16131_v17  ;;  %19118 = vst [vmem:[#allocation504_spill] sm:$0xff] %v16160_v24 }
 0xbf2   : > { %10592 = vmatpush3.bf16.msra.mxu0 %v16120_v13  ;;  %19116 = vst [vmem:[#allocation502_spill] sm:$0xff] %v16150_v32  ;;  %v1566_v13 = vld [vmem:[%s15636_s28 + $0x2e0] sm:$0xff] }
 0xbf3   : > { %10594 = vmatprep.subr.bf16.mxu0 %v16124_v55  ;;  %v1574_v55 = vld [vmem:[%s15636_s28 + $0x320] sm:$0xff]  ;;  %v16164_v45 = vpack.c.bf16 %v1569_v48, %v1566_v13  ;;  %v16179_v48 = vsub.s32 5, %v12931_v21 }
 0xbf4   : > { %v16157_v39 = vpack.c.bf16 %v1574_v55, %v1571_v19  ;;  %v16171_v55 = vpack.c.bf16 %v1521_v57, %v1518_v2  ;;  %v12304_v13 = vld [vmem:[%s12936_s24 + $0x48] sm:$0xff]  ;;  %v12305_v19 = vld [vmem:[%s12936_s24 + $0x50] sm:$0xff]  ;;  %v12306_v2 = vld [vmem:[%s12936_s24 + $0x60] sm:$0xff] }
 0xbf5   : > { %19119 = vst [vmem:[#allocation505_spill] sm:$0xff] %v16164_v45  ;;  %v16183_v14 = vrot.slane %v12304_v13, %v16179_v48  ;;  %v16191_v57 = vrot.slane %v12306_v2, %v16179_v48 }
 0xbf6   : > { %10596 = vmatpush3.bf16.msra.mxu0 %v16135_v25  ;;  %19117 = vst [vmem:[#allocation503_spill] sm:$0xff] %v16157_v39  ;;  %10450 = vmatprep.subr.bf16.mxu1 %v16157_v39  ;;  %v1623_v25 = vld [vmem:[%s15636_s28 + $0x4a8] sm:$0xff]  ;;  %19120 = vst [vmem:[#allocation506_spill] sm:$0xff] %v16171_v55 }
 0xbf7   : > { %10598 = vmatprep.subr.bf16.mxu0 %v16138_v29  ;;  %v1620_v29 = vld [vmem:[%s15636_s28 + $0x490] sm:$0xff]  ;;  %19122 = vst [vmem:[#allocation508_spill] sm:$0xff] %v16183_v14  ;;  %19124 = vst [vmem:[#allocation510_spill] sm:$0xff] %v16191_v57 }
 0xbf8   : > { %v16174_v60 = vpack.c.bf16 %v1623_v25, %v1620_v29 }
 0xbfa   : > { %10600 = vmatpush3.bf16.msra.mxu0 %v16146_v27  ;;  %19121 = vst [vmem:[#allocation507_spill] sm:$0xff] %v16174_v60 }
 0xbfb   : > { %10602 = vmatprep.subr.bf16.mxu0 %v16150_v32 }
 0xbfe   : > { %10604 = vmatpush3.bf16.msra.mxu0 %v16160_v24  ;;  %v16187_v24 = vrot.slane %v12305_v19, %v16179_v48 }
 0xbff   : > { %10606 = vmatprep.subr.bf16.mxu0 %v16164_v45 }
 0xc00   : > { %19123 = vst [vmem:[#allocation509_spill] sm:$0xff] %v16187_v24 }
 0xc02   : > { %10608 = vmatpush3.bf16.msra.mxu0 %v16171_v55 }
 0xc03   : > { %10610 = vmatprep.subr.bf16.mxu0 %v16174_v60 }
 0xc58   : > { %v4309_v25 = vpop.f32.mrb[52].mxu0  ;;  %v4475_v29 = vpop.f32.mrb[46].mxu1 }
 0xc59   : > { %v16194_v55 = vadd.f32 %v4309_v25, %v16183_v14  ;;  %v4311_v60 = vpop.f32.mrb[53].mxu0  ;;  %v4477_v45 = vpop.f32.mrb[47].mxu1 }
 0xc5a   : > { %v16197_v32 = vadd.f32 %v4311_v60, %v16187_v24  ;;  %v16200_v13 = vadd.f32 %v4477_v45, %v16191_v57 }
 0xc5b   : > { %v4676_v19 = vmul.f32 0.044715, %v16194_v55 }
 0xc5c   : > { %v4677_v27 = vmul.f32 0.044715, %v16197_v32  ;;  %v4315_v39 = vpop.f32.mrb[54].mxu0  ;;  %v4481_v2 = vpop.f32.mrb[48].mxu1  ;;  %v4679_v60 = vmul.f32 0.044715, %v16200_v13 }
 0xc5d   : > { %v4694_v17 = vmul.f32 %v16194_v55, %v4676_v19  ;;  %v16206_v43 = vadd.f32 %v4315_v39, %v16183_v14  ;;  %v4317_v25 = vpop.f32.mrb[55].mxu0  ;;  %v4483_v0 = vpop.f32.mrb[49].mxu1 }
 0xc5e   : > { %v4695_v7 = vmul.f32 %v16197_v32, %v4677_v27  ;;  %v16211_v45 = vadd.f32 %v4317_v25, %v16187_v24  ;;  %v4697_v56 = vmul.f32 %v16200_v13, %v4679_v60 }
 0xc5f   : > { %v4712_v6 = vmul.f32 %v16194_v55, %v4694_v17  ;;  %v4682_v23 = vmul.f32 0.044715, %v16206_v43 }
 0xc60   : > { %v4683_v51 = vmul.f32 0.044715, %v16211_v45  ;;  %v4321_v53 = vpop.f32.mrb[56].mxu0  ;;  %v16216_v19 = vpop.f32.mrb[50].mxu1  ;;  %v4713_v39 = vmul.f32 %v16197_v32, %v4695_v7 }
 0xc61   : > { %v4730_v1 = vadd.f32 %v16194_v55, %v4712_v6  ;;  %v4323_v54 = vpop.f32.mrb[57].mxu0  ;;  %v4489_v27 = vpop.f32.mrb[51].mxu1  ;;  %v16222_v25 = vadd.f32 %v4321_v53, %v16183_v14  ;;  %v4700_v47 = vmul.f32 %v16206_v43, %v4682_v23  ;;  %v4715_v53 = vmul.f32 %v16200_v13, %v4697_v56  ;;  %v1629_v14 = vld [vmem:[%s15636_s28 + $0x4d8] sm:$0xff] }
 0xc62   : > { %v4701_v17 = vmul.f32 %v16211_v45, %v4683_v51  ;;  %v16226_v37 = vadd.f32 %v4323_v54, %v16187_v24  ;;  %v4731_v7 = vadd.f32 %v16197_v32, %v4713_v39  ;;  %v16238_v54 = vrot.slane %v15618_v30, %v16179_v48  ;;  %v1626_v24 = vld [vmem:[%s15636_s28 + $0x4c0] sm:$0xff] }
 0xc63   : > { %v4748_v49 = vmul.f32 0.7978846, %v4730_v1  ;;  %v4688_v5 = vmul.f32 0.044715, %v16222_v25  ;;  %v4718_v23 = vmul.f32 %v16206_v43, %v4700_v47  ;;  %v4733_v56 = vadd.f32 %v16200_v13, %v4715_v53 }
 0xc64   : > { %v4689_v6 = vmul.f32 0.044715, %v16226_v37  ;;  %v4749_v3 = vmul.f32 0.7978846, %v4731_v7  ;;  %v4719_v51 = vmul.f32 %v16211_v45, %v4701_v17  ;;  %v16249_v47 = vadd.f32 %v4475_v29, %v16238_v54 }
 0xc65   : > { %12199 = vtanh.f32 %v4748_v49  ;;  %v4706_v60 = vmul.f32 %v16222_v25, %v4688_v5  ;;  %v4736_v7 = vadd.f32 %v16206_v43, %v4718_v23  ;;  %v16252_v23 = vadd.f32 %v4483_v0, %v16191_v57  ;;  %v1575_v0 = vld [vmem:[%s15636_s28 + $0x328] sm:$0xff] }
 0xc66   : > { %v4707_v1 = vmul.f32 %v16226_v37, %v4689_v6  ;;  %12201 = vtanh.f32 %v4749_v3  ;;  %v4737_v49 = vadd.f32 %v16211_v45, %v4719_v51  ;;  %v4751_v51 = vmul.f32 0.7978846, %v4733_v56 }
 0xc67   : > { %v4724_v5 = vmul.f32 %v16222_v25, %v4706_v60  ;;  %v4754_v3 = vmul.f32 0.7978846, %v4736_v7  ;;  %v16256_v29 = vadd.f32 %v4481_v2, %v16238_v54  ;;  %v1572_v7 = vld [vmem:[%s15636_s28 + $0x310] sm:$0xff]  ;;  %v4659_v2 = vmul.f32 0.5, %v16197_v32  ;;  %v1586_v32 = vld [vmem:[%s15636_s28 + $0x380] sm:$0xff] }
 0xc68   : > { %v4725_v39 = vmul.f32 %v16226_v37, %v4707_v1  ;;  %v4755_v6 = vmul.f32 0.7978846, %v4737_v49  ;;  %v4678_v49 = vmul.f32 0.044715, %v16249_v47 }
 0xc69   : > { %v4742_v30 = vadd.f32 %v16222_v25, %v4724_v5  ;;  %v1573_v5 = vld [vmem:[%s15636_s28 + $0x318] sm:$0xff]  ;;  %v4684_v41 = vmul.f32 0.044715, %v16256_v29 }
 0xc6a   : > { %v4743_v17 = vadd.f32 %v16226_v37, %v4725_v39  ;;  %12203 = vtanh.f32 %v4755_v6  ;;  %v1570_v39 = vld [vmem:[%s15636_s28 + $0x300] sm:$0xff]  ;;  %v4696_v20 = vmul.f32 %v16249_v47, %v4678_v49 }
 0xc6b   : > { %v4760_v60 = vmul.f32 0.7978846, %v4742_v30  ;;  %12205 = vtanh.f32 %v4754_v3  ;;  %v1580_v30 = vld [vmem:[%s15636_s28 + $0x350] sm:$0xff]  ;;  %v4685_v3 = vmul.f32 0.044715, %v16252_v23  ;;  %v16272_v52 = vpack.c.bf16 %v1573_v5, %v1570_v39 }
 0xc6c   : > { %v4761_v1 = vmul.f32 0.7978846, %v4743_v17  ;;  %v1577_v17 = vld [vmem:[%s15636_s28 + $0x338] sm:$0xff]  ;;  %v16290_v5 = vpack.c.bf16 %v1629_v14, %v1626_v24  ;;  %v16299_v14 = vpack.c.bf16 %v1586_v32, %v1583_v10  ;;  %v1587_v32 = vld [vmem:[%s15636_s28 + $0x388] sm:$0xff] }
 0xc6d   : > { %v16288_v39 = vpack.c.bf16 %v1580_v30, %v1577_v17  ;;  %v4703_v49 = vmul.f32 %v16252_v23, %v4685_v3  ;;  %v1632_v17 = vld [vmem:[%s15636_s28 + $0x4f0] sm:$0xff]  ;;  %v4714_v3 = vmul.f32 %v16249_v47, %v4696_v20 }
 0xc6e   : > { %12207 = vtanh.f32 %v4761_v1  ;;  %v16266_v1 = vadd.f32 %v4489_v27, %v16191_v57  ;;  %v16279_v27 = vpack.c.bf16 %v1575_v0, %v1572_v7  ;;  %v1581_v57 = vld [vmem:[%s15636_s28 + $0x358] sm:$0xff]  ;;  %19127 = vst [vmem:[#allocation513_spill] sm:$0xff] %v16290_v5 }
 0xc6f   : > { %v12200_v53 = vpop.eup %12199  ;;  %12209 = vtanh.f32 %v4760_v60  ;;  %19126 = vst [vmem:[#allocation512_spill] sm:$0xff] %v16288_v39  ;;  %v16297_v24 = vpack.c.bf16 %v1581_v57, %v1578_v42  ;;  %v1582_v42 = vld [vmem:[%s15636_s28 + $0x360] sm:$0xff]  ;;  %v1585_v57 = vld [vmem:[%s15636_s28 + $0x378] sm:$0xff] }
 0xc70   : > { %12211 = vtanh.f32 %v4751_v51  ;;  %v12202_v56 = vpop.eup %12201  ;;  %v4784_v6 = vadd.f32 1.0, %v12200_v53  ;;  %v4658_v51 = vmul.f32 0.5, %v16194_v55  ;;  %v1576_v53 = vld [vmem:[%s15636_s28 + $0x330] sm:$0xff]  ;;  %19125 = vst [vmem:[#allocation511_spill] sm:$0xff] %v16279_v27 }
 0xc71   : > { %v4785_v60 = vadd.f32 1.0, %v12202_v56  ;;  %v16286_v56 = vadd.f32 %v16216_v19, %v16238_v54  ;;  %v16294_v7 = vpack.c.bf16 %v1579_v35, %v1576_v53  ;;  %v4665_v19 = vmul.f32 0.5, %v16211_v45  ;;  %v1584_v53 = vld [vmem:[%s15636_s28 + $0x370] sm:$0xff] }
 0xc72   : > { %v4802_v55 = vmul.f32 %v4784_v6, %v4658_v51  ;;  %v4664_v35 = vmul.f32 0.5, %v16206_v43 }
 0xc73   : > { %v4803_v44 = vmul.f32 %v4785_v60, %v4659_v2  ;;  %v4691_v2 = vmul.f32 0.044715, %v16266_v1  ;;  %v4690_v60 = vmul.f32 0.044715, %v16286_v56 }
 0xc74   : > { %v12204_v50 = vpop.eup %12203 }
 0xc75   : > { %4884 = vmatprep.mubr.f32.mxu1 %v4803_v44  ;;  %5133 = vmatprep.mubr.f32.mxu0 %v4803_v44  ;;  %v12206_v0 = vpop.eup %12205  ;;  %v4791_v6 = vadd.f32 1.0, %v12204_v50  ;;  %v4702_v44 = vmul.f32 %v16256_v29, %v4684_v41  ;;  %v1635_v50 = vld [vmem:[%s15636_s28 + $0x508] sm:$0xff]  ;;  %v4671_v41 = vmul.f32 0.5, %v16226_v37  ;;  %v4709_v43 = vmul.f32 %v16266_v1, %v4691_v2  ;;  %v1589_v37 = vld [vmem:[%s15636_s28 + $0x398] sm:$0xff] }
 0xc76   : > { %4885 = vmatmul.mubr.f32.vlgmr.msra.gmra.mrb[52].mxu1 %v4802_v55  ;;  %5134 = vmatmul.mubr.f32.vlgmr.msra.gmra.mrb[64].mxu0 %v4802_v55  ;;  %v4790_v45 = vadd.f32 1.0, %v12206_v0  ;;  %v16324_v2 = vpack.c.bf16 %v1587_v32, %v1584_v53 }
 0xc77   : > { %10452 = vmatpush1.bf16.msra.mxu1 %v16272_v52  ;;  %10612 = vmatpush3.bf16.msra.mxu0 %v16279_v27  ;;  %v4809_v51 = vmul.f32 %v4791_v6, %v4665_v19  ;;  %v4721_v19 = vmul.f32 %v16252_v23, %v4703_v49  ;;  %v1592_v49 = vld [vmem:[%s15636_s28 + $0x3b0] sm:$0xff]  ;;  %v4727_v32 = vmul.f32 %v16266_v1, %v4709_v43 }
 0xc78   : > { %v12208_v30 = vpop.eup %12207  ;;  %10454 = vmatprep.subr.bf16.mxu1 %v16288_v39  ;;  %10614 = vmatprep.subr.bf16.mxu0 %v16290_v5  ;;  %v4808_v0 = vmul.f32 %v4790_v45, %v4664_v35  ;;  %v16318_v5 = vpack.c.bf16 %v1635_v50, %v1632_v17  ;;  %v16322_v39 = vpack.c.bf16 %v1585_v57, %v1582_v42  ;;  %v1638_v45 = vld [vmem:[%s15636_s28 + $0x520] sm:$0xff]  ;;  %v1591_v42 = vld [vmem:[%s15636_s28 + $0x3a8] sm:$0xff] }
 0xc79   : > { %v12210_v10 = vpop.eup %12209  ;;  %v4797_v20 = vadd.f32 1.0, %v12208_v30  ;;  %4890 = vmatprep.mubr.f32.mxu1 %v4809_v51  ;;  %5138 = vmatprep.mubr.f32.mxu0 %v4809_v51  ;;  %v4670_v30 = vmul.f32 0.5, %v16222_v25  ;;  %v4732_v17 = vadd.f32 %v16249_v47, %v4714_v3  ;;  %v4708_v50 = vmul.f32 %v16286_v56, %v4690_v60  ;;  %v1588_v25 = vld [vmem:[%s15636_s28 + $0x390] sm:$0xff]  ;;  %v1590_v3 = vld [vmem:[%s15636_s28 + $0x3a0] sm:$0xff]  ;;  %v1595_v60 = vld [vmem:[%s15636_s28 + $0x3c8] sm:$0xff] }
 0xc7a   : > { %v12212_v55 = vpop.eup %12211  ;;  %v4796_v27 = vadd.f32 1.0, %v12210_v10  ;;  %4891 = vmatmul.mubr.f32.gmra.mrb[54].mxu1 %v4808_v0  ;;  %5139 = vmatmul.mubr.f32.gmra.mrb[66].mxu0 %v4808_v0  ;;  %v1641_v10 = vld [vmem:[%s15636_s28 + $0x538] sm:$0xff]  ;;  %v4720_v57 = vmul.f32 %v16256_v29, %v4702_v44  ;;  %v4739_v53 = vadd.f32 %v16252_v23, %v4721_v19  ;;  %v16344_v44 = vpack.c.bf16 %v1592_v49, %v1589_v37  ;;  %v1598_v0 = vld [vmem:[%s15636_s28 + $0x3e0] sm:$0xff] }
 0xc7b   : > { %v4815_v6 = vmul.f32 %v4797_v20, %v4671_v41  ;;  %v4787_v35 = vadd.f32 1.0, %v12212_v55  ;;  %10456 = vmatpush1.bf16.msra.mxu1 %v16294_v7  ;;  %10616 = vmatpush3.bf16.msra.mxu0 %v16297_v24  ;;  %v4661_v41 = vmul.f32 0.5, %v16200_v13  ;;  %v1593_v20 = vld [vmem:[%s15636_s28 + $0x3b8] sm:$0xff]  ;;  %v16346_v55 = vpack.c.bf16 %v1641_v10, %v1638_v45  ;;  %v1594_v37 = vld [vmem:[%s15636_s28 + $0x3c0] sm:$0xff] }
 0xc7c   : > { %10458 = vmatprep.subr.bf16.mxu1 %v16299_v14  ;;  %v4814_v51 = vmul.f32 %v4796_v27, %v4670_v30  ;;  %10618 = vmatprep.subr.bf16.mxu0 %v16318_v5  ;;  %v1644_v27 = vld [vmem:[%s15636_s28 + $0x550] sm:$0xff]  ;;  %v1647_v30 = vld [vmem:[%s15636_s28 + $0x568] sm:$0xff]  ;;  %v16351_v19 = vpack.c.bf16 %v1591_v42, %v1588_v25  ;;  %v4750_v43 = vmul.f32 0.7978846, %v4732_v17  ;;  %v1597_v49 = vld [vmem:[%s15636_s28 + $0x3d8] sm:$0xff]  ;;  %v4738_v45 = vadd.f32 %v16256_v29, %v4720_v57 }
 0xc7d   : > { %4896 = vmatprep.mubr.f32.mxu1 %v4815_v6  ;;  %5143 = vmatprep.mubr.f32.mxu0 %v4815_v6  ;;  %v4805_v13 = vmul.f32 %v4787_v35, %v4661_v41  ;;  %v16355_v6 = vpack.c.bf16 %v1593_v20, %v1590_v3  ;;  %v4726_v10 = vmul.f32 %v16286_v56, %v4708_v50  ;;  %v1596_v25 = vld [vmem:[%s15636_s28 + $0x3d0] sm:$0xff]  ;;  %v1599_v42 = vld [vmem:[%s15636_s28 + $0x3e8] sm:$0xff]  ;;  %v4757_v41 = vmul.f32 0.7978846, %v4739_v53  ;;  %v1650_v50 = vld [vmem:[%s15636_s28 + $0x580] sm:$0xff] }
 0xc7e   : > { %4897 = vmatmul.mubr.f32.gmra.mrb[56].mxu1 %v4814_v51  ;;  %5144 = vmatmul.mubr.f32.gmra.mrb[68].mxu0 %v4814_v51  ;;  %19128 = vst [vmem:[#allocation514_spill] sm:$0xff] %v16351_v19  ;;  %v16361_v35 = vpack.c.bf16 %v1598_v0, %v1595_v60  ;;  %v16363_v17 = vpack.c.bf16 %v1647_v30, %v1644_v27  ;;  %v1601_v51 = vld [vmem:[%s15636_s28 + $0x3f8] sm:$0xff]  ;;  %v1604_v57 = vld [vmem:[%s15636_s28 + $0x410] sm:$0xff]  ;;  %12213 = vtanh.f32 %v4750_v43  ;;  %v1603_v0 = vld [vmem:[%s15636_s28 + $0x408] sm:$0xff]  ;;  %v4756_v27 = vmul.f32 0.7978846, %v4738_v45 }
 0xc7f   : > { %10460 = vmatpush1.bf16.msra.mxu1 %v16322_v39  ;;  %10620 = vmatpush3.bf16.msra.mxu0 %v16324_v2  ;;  %19129 = vst [vmem:[#allocation515_spill] sm:$0xff] %v16355_v6  ;;  %v4745_v3 = vadd.f32 %v16266_v1, %v4727_v32  ;;  %v1653_v20 = vld [vmem:[%s15636_s28 + $0x598] sm:$0xff]  ;;  %v16374_v60 = vpack.c.bf16 %v1597_v49, %v1594_v37  ;;  %v1600_v32 = vld [vmem:[%s15636_s28 + $0x3f0] sm:$0xff]  ;;  %v1602_v37 = vld [vmem:[%s15636_s28 + $0x400] sm:$0xff]  ;;  %12215 = vtanh.f32 %v4757_v41 }
 0xc80   : > { %4967 = vmatprep.mubr.f32.mxu1 %v4805_v13  ;;  %5213 = vmatprep.mubr.f32.mxu0 %v4805_v13  ;;  %19130 = vst [vmem:[#allocation516_spill] sm:$0xff] %v16361_v35  ;;  %19131 = vst [vmem:[#allocation517_spill] sm:$0xff] %v16363_v17  ;;  %v16378_v53 = vpack.c.bf16 %v1599_v42, %v1596_v25  ;;  %v4744_v30 = vadd.f32 %v16286_v56, %v4726_v10  ;;  %v1605_v49 = vld [vmem:[%s15636_s28 + $0x418] sm:$0xff]  ;;  %v1607_v25 = vld [vmem:[%s15636_s28 + $0x428] sm:$0xff]  ;;  %12217 = vtanh.f32 %v4756_v27 }
 0xc81   : > { %10462 = vmatprep.subr.bf16.mxu1 %v16344_v44  ;;  %10622 = vmatprep.subr.bf16.mxu0 %v16346_v55  ;;  %19132 = vst [vmem:[#allocation518_spill] sm:$0xff] %v16374_v60  ;;  %v16385_v13 = vpack.c.bf16 %v1604_v57, %v1601_v51  ;;  %v16387_v43 = vpack.c.bf16 %v1653_v20, %v1650_v50  ;;  %v4763_v42 = vmul.f32 0.7978846, %v4745_v3  ;;  %v1656_v45 = vld [vmem:[%s15636_s28 + $0x5b0] sm:$0xff]  ;;  %v1659_v10 = vld [vmem:[%s15636_s28 + $0x5c8] sm:$0xff]  ;;  %v1606_v50 = vld [vmem:[%s15636_s28 + $0x420] sm:$0xff] }
 0xc82   : > { %19133 = vst [vmem:[#allocation519_spill] sm:$0xff] %v16378_v53  ;;  %v16397_v51 = vpack.c.bf16 %v1603_v0, %v1600_v32  ;;  %v16399_v57 = vpack.c.bf16 %v1605_v49, %v1602_v37  ;;  %v1609_v41 = vld [vmem:[%s15636_s28 + $0x438] sm:$0xff]  ;;  %v4762_v3 = vmul.f32 0.7978846, %v4744_v30  ;;  %v1611_v32 = vld [vmem:[%s15636_s28 + $0x448] sm:$0xff]  ;;  %v1616_v37 = vld [vmem:[%s15636_s28 + $0x470] sm:$0xff] }
 0xc83   : > { %10464 = vmatpush1.bf16.msra.mxu1 %v16351_v19  ;;  %10624 = vmatpush3.bf16.msra.mxu0 %v16355_v6  ;;  %19134 = vst [vmem:[#allocation520_spill] sm:$0xff] %v16385_v13  ;;  %19135 = vst [vmem:[#allocation521_spill] sm:$0xff] %v16387_v43  ;;  %v1610_v6 = vld [vmem:[%s15636_s28 + $0x440] sm:$0xff]  ;;  %v1613_v0 = vld [vmem:[%s15636_s28 + $0x458] sm:$0xff]  ;;  %12219 = vtanh.f32 %v4763_v42 }
 0xc84   : > { %10466 = vmatprep.subr.bf16.mxu1 %v16361_v35  ;;  %10626 = vmatprep.subr.bf16.mxu0 %v16363_v17  ;;  %19136 = vst [vmem:[#allocation522_spill] sm:$0xff] %v16397_v51  ;;  %19137 = vst [vmem:[#allocation523_spill] sm:$0xff] %v16399_v57  ;;  %v16405_v20 = vpack.c.bf16 %v1610_v6, %v1607_v25  ;;  %v1662_v27 = vld [vmem:[%s15636_s28 + $0x5e0] sm:$0xff]  ;;  %v1665_v30 = vld [vmem:[%s15636_s28 + $0x5f8] sm:$0xff]  ;;  %v16417_v6 = vpack.c.bf16 %v1609_v41, %v1606_v50  ;;  %12221 = vtanh.f32 %v4762_v3 }
 0xc85   : > { %v1612_v25 = vld [vmem:[%s15636_s28 + $0x450] sm:$0xff]  ;;  %v16425_v42 = vpack.c.bf16 %v1616_v37, %v1613_v0  ;;  %v1631_v35 = vld [vmem:[%s15636_s28 + $0x4e8] sm:$0xff]  ;;  %v1634_v19 = vld [vmem:[%s15636_s28 + $0x500] sm:$0xff] }
 0xc86   : > { %19138 = vst [vmem:[#allocation524_spill] sm:$0xff] %v16405_v20  ;;  %19140 = vst [vmem:[#allocation526_spill] sm:$0xff] %v16417_v6  ;;  %v1716_v41 = vld [vmem:[%s15636_s28 + $0x790] sm:$0xff] }
 0xc87   : > { %10468 = vmatpush1.bf16.msra.mxu1 %v16374_v60  ;;  %10628 = vmatpush3.bf16.msra.mxu0 %v16378_v53  ;;  %v16407_v60 = vpack.c.bf16 %v1659_v10, %v1656_v45  ;;  %v1608_v53 = vld [vmem:[%s15636_s28 + $0x430] sm:$0xff]  ;;  %v1615_v45 = vld [vmem:[%s15636_s28 + $0x468] sm:$0xff]  ;;  %19142 = vst [vmem:[#allocation528_spill] sm:$0xff] %v16425_v42  ;;  %v16427_v10 = vpack.c.bf16 %v1665_v30, %v1662_v27 }
 0xc88   : > { %10470 = vmatprep.subr.bf16.mxu1 %v16385_v13  ;;  %10630 = vmatprep.subr.bf16.mxu0 %v16387_v43  ;;  %v16419_v49 = vpack.c.bf16 %v1611_v32, %v1608_v53  ;;  %v1617_v43 = vld [vmem:[%s15636_s28 + $0x478] sm:$0xff]  ;;  %v12214_v50 = vpop.eup %12213  ;;  %v1622_v53 = vld [vmem:[%s15636_s28 + $0x4a0] sm:$0xff]  ;;  %v1719_v32 = vld [vmem:[%s15636_s28 + $0x7a8] sm:$0xff]  ;;  %v16437_v0 = vpack.c.bf16 %v1615_v45, %v1612_v25 }
 0xc89   : > { %19139 = vst [vmem:[#allocation525_spill] sm:$0xff] %v16407_v60  ;;  %19143 = vst [vmem:[#allocation529_spill] sm:$0xff] %v16427_v10  ;;  %v12216_v3 = vpop.eup %12215  ;;  %v4786_v30 = vadd.f32 1.0, %v12214_v50  ;;  %v1625_v13 = vld [vmem:[%s15636_s28 + $0x4b8] sm:$0xff]  ;;  %v1628_v25 = vld [vmem:[%s15636_s28 + $0x4d0] sm:$0xff] }
 0xc8a   : > { %19141 = vst [vmem:[#allocation527_spill] sm:$0xff] %v16419_v49  ;;  %19144 = vst [vmem:[#allocation530_spill] sm:$0xff] %v16437_v0  ;;  %v12218_v17 = vpop.eup %12217 }
 0xc8b   : > { %10472 = vmatpush1.bf16.msra.mxu1 %v16397_v51  ;;  %10632 = vmatpush3.bf16.msra.mxu0 %v16399_v57  ;;  %v1614_v51 = vld [vmem:[%s15636_s28 + $0x460] sm:$0xff]  ;;  %v1619_v57 = vld [vmem:[%s15636_s28 + $0x488] sm:$0xff] }
 0xc8c   : > { %10474 = vmatprep.subr.bf16.mxu1 %v16405_v20  ;;  %10634 = vmatprep.subr.bf16.mxu0 %v16407_v60  ;;  %v16439_v37 = vpack.c.bf16 %v1617_v43, %v1614_v51  ;;  %v16443_v27 = vpack.c.bf16 %v1622_v53, %v1619_v57  ;;  %v1618_v60 = vld [vmem:[%s15636_s28 + $0x480] sm:$0xff]  ;;  %v1621_v20 = vld [vmem:[%s15636_s28 + $0x498] sm:$0xff]  ;;  %v1668_v43 = vld [vmem:[%s15636_s28 + $0x610] sm:$0xff]  ;;  %v4667_v53 = vmul.f32 0.5, %v16252_v23 }
 0xc8d   : > { %v1671_v51 = vld [vmem:[%s15636_s28 + $0x628] sm:$0xff]  ;;  %v12220_v45 = vpop.eup %12219  ;;  %v1725_v57 = vld [vmem:[%s15636_s28 + $0x7d8] sm:$0xff]  ;;  %v16458_v50 = vpack.c.bf16 %v1621_v20, %v1618_v60 }
 0xc8e   : > { %19145 = vst [vmem:[#allocation531_spill] sm:$0xff] %v16439_v37  ;;  %v16470_v60 = vpack.c.bf16 %v1671_v51, %v1668_v43  ;;  %v12222_v20 = vpop.eup %12221  ;;  %v4799_v23 = vadd.f32 1.0, %v12220_v45  ;;  %v1731_v43 = vld [vmem:[%s15636_s28 + $0x808] sm:$0xff]  ;;  %v16491_v45 = vpack.c.bf16 %v1634_v19, %v1631_v35  ;;  %v1680_v19 = vld [vmem:[%s15636_s28 + $0x670] sm:$0xff] }
 0xc8f   : > { %10476 = vmatpush1.bf16.msra.mxu1 %v16417_v6  ;;  %10636 = vmatpush3.bf16.msra.mxu0 %v16419_v49  ;;  %v16448_v6 = vpack.c.bf16 %v1719_v32, %v1716_v41  ;;  %v4793_v49 = vadd.f32 1.0, %v12216_v3  ;;  %19147 = vst [vmem:[#allocation533_spill] sm:$0xff] %v16458_v50  ;;  %v16464_v32 = vpack.c.bf16 %v1628_v25, %v1625_v13  ;;  %v1624_v3 = vld [vmem:[%s15636_s28 + $0x4b0] sm:$0xff]  ;;  %v1674_v13 = vld [vmem:[%s15636_s28 + $0x640] sm:$0xff]  ;;  %v1683_v35 = vld [vmem:[%s15636_s28 + $0x688] sm:$0xff] }
 0xc90   : > { %10478 = vmatprep.subr.bf16.mxu1 %v16425_v42  ;;  %10638 = vmatprep.subr.bf16.mxu0 %v16427_v10  ;;  %v4660_v42 = vmul.f32 0.5, %v16249_v47  ;;  %v1722_v10 = vld [vmem:[%s15636_s28 + $0x7c0] sm:$0xff]  ;;  %v4792_v47 = vadd.f32 1.0, %v12218_v17  ;;  %v1677_v17 = vld [vmem:[%s15636_s28 + $0x658] sm:$0xff]  ;;  %v1728_v25 = vld [vmem:[%s15636_s28 + $0x7f0] sm:$0xff] }
 0xc91   : > { %19146 = vst [vmem:[#allocation532_spill] sm:$0xff] %v16448_v6 }
 0xc92   : > { %v16462_v41 = vmul.f32 %v4786_v30, %v4660_v42  ;;  %v16475_v42 = vpack.c.bf16 %v1725_v57, %v1722_v10  ;;  %v4666_v30 = vmul.f32 0.5, %v16256_v29  ;;  %v4673_v10 = vmul.f32 0.5, %v16266_v1  ;;  %v1630_v57 = vld [vmem:[%s15636_s28 + $0x4e0] sm:$0xff]  ;;  %v1640_v1 = vld [vmem:[%s15636_s28 + $0x530] sm:$0xff] }
 0xc93   : > { %10480 = vmatpush1.bf16.msra.mxu1 %v16437_v0  ;;  %10640 = vmatpush3.bf16.msra.mxu0 %v16439_v37  ;;  %v1627_v0 = vld [vmem:[%s15636_s28 + $0x4c8] sm:$0xff]  ;;  %v16472_v37 = vmul.f32 %v4793_v49, %v4667_v53  ;;  %v4798_v29 = vadd.f32 1.0, %v12222_v20  ;;  %v1633_v53 = vld [vmem:[%s15636_s28 + $0x4f8] sm:$0xff]  ;;  %v1734_v20 = vld [vmem:[%s15636_s28 + $0x820] sm:$0xff] }
 0xc94   : > { %10482 = vmatprep.subr.bf16.mxu1 %v16443_v27  ;;  %10642 = vmatprep.subr.bf16.mxu0 %v16448_v6  ;;  %v16485_v49 = vpack.c.bf16 %v1627_v0, %v1624_v3  ;;  %v16489_v51 = vmul.f32 %v4792_v47, %v4666_v30  ;;  %v16497_v6 = vpack.c.bf16 %v1677_v17, %v1674_v13  ;;  %v4672_v3 = vmul.f32 0.5, %v16286_v56  ;;  %v1737_v13 = vld [vmem:[%s15636_s28 + $0x838] sm:$0xff]  ;;  %v1639_v56 = vld [vmem:[%s15636_s28 + $0x528] sm:$0xff] }
 0xc95   : > { %v16499_v0 = vmul.f32 %v4799_v23, %v4673_v10  ;;  %v16503_v47 = vpack.c.bf16 %v1731_v43, %v1728_v25  ;;  %v16513_v23 = vpack.c.bf16 %v1633_v53, %v1630_v57  ;;  %v1636_v25 = vld [vmem:[%s15636_s28 + $0x510] sm:$0xff]  ;;  %v1643_v43 = vld [vmem:[%s15636_s28 + $0x548] sm:$0xff]  ;;  %v16524_v10 = vpack.c.bf16 %v1683_v35, %v1680_v19  ;;  %v1689_v53 = vld [vmem:[%s15636_s28 + $0x6b8] sm:$0xff] }
 0xc96   : > { %5214 = vmatmul.mubr.f32.vlgmr.msra.gmra.mrb[70].mxu0 %v16462_v41  ;;  %19148 = vst [vmem:[#allocation534_spill] sm:$0xff] %v16485_v49  ;;  %19149 = vst [vmem:[#allocation535_spill] sm:$0xff] %v16497_v6  ;;  %v16516_v17 = vmul.f32 %v4798_v29, %v4672_v3  ;;  %v16528_v57 = vpack.c.bf16 %v1737_v13, %v1734_v20  ;;  %v1686_v29 = vld [vmem:[%s15636_s28 + $0x6a0] sm:$0xff]  ;;  %v16536_v19 = vpack.c.bf16 %v1639_v56, %v1636_v25  ;;  %v1645_v20 = vld [vmem:[%s15636_s28 + $0x558] sm:$0xff] }
 0xc97   : > { %10484 = vmatpush1.bf16.msra.mxu1 %v16458_v50  ;;  %5218 = vmatprep.mubr.f32.mxu0 %v16472_v37  ;;  %v1637_v50 = vld [vmem:[%s15636_s28 + $0x518] sm:$0xff]  ;;  %19150 = vst [vmem:[#allocation536_spill] sm:$0xff] %v16503_v47  ;;  %19151 = vst [vmem:[#allocation537_spill] sm:$0xff] %v16513_v23  ;;  %v1642_v3 = vld [vmem:[%s15636_s28 + $0x540] sm:$0xff] }
 0xc98   : > { %10486 = vmatprep.subr.bf16.mxu1 %v16464_v32  ;;  %10644 = vmatpush3.bf16.msra.mxu0 %v16470_v60  ;;  %v16518_v30 = vpack.c.bf16 %v1640_v1, %v1637_v50  ;;  %19153 = vst [vmem:[#allocation539_spill] sm:$0xff] %v16524_v10  ;;  %19154 = vst [vmem:[#allocation540_spill] sm:$0xff] %v16528_v57  ;;  %v1740_v50 = vld [vmem:[%s15636_s28 + $0x850] sm:$0xff]  ;;  %v1743_v1 = vld [vmem:[%s15636_s28 + $0x868] sm:$0xff] }
 0xc99   : > { %10646 = vmatprep.subr.bf16.mxu0 %v16475_v42  ;;  %19155 = vst [vmem:[#allocation541_spill] sm:$0xff] %v16536_v19  ;;  %v1649_v13 = vld [vmem:[%s15636_s28 + $0x578] sm:$0xff]  ;;  %v16549_v25 = vpack.c.bf16 %v1743_v1, %v1740_v50  ;;  %v1692_v56 = vld [vmem:[%s15636_s28 + $0x6d0] sm:$0xff]  ;;  %v1651_v50 = vld [vmem:[%s15636_s28 + $0x588] sm:$0xff] }
 0xc9a   : > { %5219 = vmatmul.mubr.f32.gmra.mrb[72].mxu0 %v16489_v51  ;;  %19152 = vst [vmem:[#allocation538_spill] sm:$0xff] %v16518_v30  ;;  %v1655_v1 = vld [vmem:[%s15636_s28 + $0x5a8] sm:$0xff] }
 0xc9b   : > { %10488 = vmatpush1.bf16.msra.mxu1 %v16485_v49  ;;  %5223 = vmatprep.mubr.f32.mxu0 %v16499_v0  ;;  %v1646_v49 = vld [vmem:[%s15636_s28 + $0x560] sm:$0xff]  ;;  %19158 = vst [vmem:[#allocation544_spill] sm:$0xff] %v16549_v25 }
 0xc9c   : > { %10490 = vmatprep.subr.bf16.mxu1 %v16491_v45  ;;  %10648 = vmatpush3.bf16.msra.mxu0 %v16497_v6  ;;  %v16539_v35 = vpack.c.bf16 %v1646_v49, %v1643_v43  ;;  %v1652_v6 = vld [vmem:[%s15636_s28 + $0x590] sm:$0xff]  ;;  %v1695_v49 = vld [vmem:[%s15636_s28 + $0x6e8] sm:$0xff]  ;;  %v1746_v43 = vld [vmem:[%s15636_s28 + $0x880] sm:$0xff] }
 0xc9d   : > { %10650 = vmatprep.subr.bf16.mxu0 %v16503_v47  ;;  %v16545_v47 = vpack.c.bf16 %v1689_v53, %v1686_v29  ;;  %v16559_v29 = vpack.c.bf16 %v1652_v6, %v1649_v13  ;;  %v1648_v53 = vld [vmem:[%s15636_s28 + $0x570] sm:$0xff]  ;;  %v1701_v6 = vld [vmem:[%s15636_s28 + $0x718] sm:$0xff] }
 0xc9e   : > { %5224 = vmatmul.mubr.f32.gmra.mrb[74].mxu0 %v16516_v17  ;;  %19156 = vst [vmem:[#allocation542_spill] sm:$0xff] %v16539_v35  ;;  %v1752_v13 = vld [vmem:[%s15636_s28 + $0x8b0] sm:$0xff] }
 0xc9f   : > { %10492 = vmatpush1.bf16.msra.mxu1 %v16513_v23  ;;  %19157 = vst [vmem:[#allocation543_spill] sm:$0xff] %v16545_v47  ;;  %v16556_v23 = vpack.c.bf16 %v1645_v20, %v1642_v3  ;;  %19160 = vst [vmem:[#allocation546_spill] sm:$0xff] %v16559_v29  ;;  %v1698_v20 = vld [vmem:[%s15636_s28 + $0x700] sm:$0xff] }
 0xca0   : > { %10494 = vmatprep.subr.bf16.mxu1 %v16518_v30  ;;  %10652 = vmatpush3.bf16.msra.mxu0 %v16524_v10  ;;  %v1749_v30 = vld [vmem:[%s15636_s28 + $0x898] sm:$0xff]  ;;  %v1658_v10 = vld [vmem:[%s15636_s28 + $0x5c0] sm:$0xff] }
 0xca1   : > { %10654 = vmatprep.subr.bf16.mxu0 %v16528_v57  ;;  %19159 = vst [vmem:[#allocation545_spill] sm:$0xff] %v16556_v23  ;;  %v16565_v57 = vpack.c.bf16 %v1695_v49, %v1692_v56  ;;  %v16569_v3 = vpack.c.bf16 %v1749_v30, %v1746_v43  ;;  %v16579_v56 = vpack.c.bf16 %v1658_v10, %v1655_v1  ;;  %v1654_v49 = vld [vmem:[%s15636_s28 + $0x5a0] sm:$0xff]  ;;  %v1657_v30 = vld [vmem:[%s15636_s28 + $0x5b8] sm:$0xff]  ;;  %v1707_v10 = vld [vmem:[%s15636_s28 + $0x748] sm:$0xff] }
 0xca2   : > { %v1661_v43 = vld [vmem:[%s15636_s28 + $0x5d8] sm:$0xff]  ;;  %v1758_v1 = vld [vmem:[%s15636_s28 + $0x8e0] sm:$0xff] }
 0xca3   : > { %10496 = vmatpush1.bf16.msra.mxu1 %v16536_v19  ;;  %19161 = vst [vmem:[#allocation547_spill] sm:$0xff] %v16565_v57  ;;  %19162 = vst [vmem:[#allocation548_spill] sm:$0xff] %v16569_v3  ;;  %v16576_v19 = vpack.c.bf16 %v1651_v50, %v1648_v53  ;;  %v1704_v50 = vld [vmem:[%s15636_s28 + $0x730] sm:$0xff] }
 0xca4   : > { %10498 = vmatprep.subr.bf16.mxu1 %v16539_v35  ;;  %10656 = vmatpush3.bf16.msra.mxu0 %v16545_v47  ;;  %v1755_v35 = vld [vmem:[%s15636_s28 + $0x8c8] sm:$0xff]  ;;  %19164 = vst [vmem:[#allocation550_spill] sm:$0xff] %v16579_v56  ;;  %v1664_v47 = vld [vmem:[%s15636_s28 + $0x5f0] sm:$0xff] }
 0xca5   : > { %10658 = vmatprep.subr.bf16.mxu0 %v16549_v25  ;;  %19163 = vst [vmem:[#allocation549_spill] sm:$0xff] %v16576_v19  ;;  %v16585_v25 = vpack.c.bf16 %v1701_v6, %v1698_v20  ;;  %v16589_v53 = vpack.c.bf16 %v1755_v35, %v1752_v13  ;;  %v16599_v20 = vpack.c.bf16 %v1664_v47, %v1661_v43  ;;  %v1660_v6 = vld [vmem:[%s15636_s28 + $0x5d0] sm:$0xff]  ;;  %v1667_v35 = vld [vmem:[%s15636_s28 + $0x608] sm:$0xff] }
 0xca6   : > { %v16605_v13 = vpack.c.bf16 %v1707_v10, %v1704_v50  ;;  %v1666_v50 = vld [vmem:[%s15636_s28 + $0x600] sm:$0xff]  ;;  %v1669_v10 = vld [vmem:[%s15636_s28 + $0x618] sm:$0xff] }
 0xca7   : > { %10500 = vmatpush1.bf16.msra.mxu1 %v16556_v23  ;;  %19165 = vst [vmem:[#allocation551_spill] sm:$0xff] %v16585_v25  ;;  %19166 = vst [vmem:[#allocation552_spill] sm:$0xff] %v16589_v53  ;;  %v16596_v23 = vpack.c.bf16 %v1657_v30, %v1654_v49  ;;  %v1710_v30 = vld [vmem:[%s15636_s28 + $0x760] sm:$0xff] }
 0xca8   : > { %10502 = vmatprep.subr.bf16.mxu1 %v16559_v29  ;;  %10660 = vmatpush3.bf16.msra.mxu0 %v16565_v57  ;;  %v1761_v29 = vld [vmem:[%s15636_s28 + $0x8f8] sm:$0xff]  ;;  %19168 = vst [vmem:[#allocation554_spill] sm:$0xff] %v16599_v20  ;;  %19169 = vst [vmem:[#allocation555_spill] sm:$0xff] %v16605_v13  ;;  %v1670_v57 = vld [vmem:[%s15636_s28 + $0x620] sm:$0xff] }
 0xca9   : > { %10662 = vmatprep.subr.bf16.mxu0 %v16569_v3  ;;  %19167 = vst [vmem:[#allocation553_spill] sm:$0xff] %v16596_v23  ;;  %v1663_v3 = vld [vmem:[%s15636_s28 + $0x5e8] sm:$0xff]  ;;  %v16609_v49 = vpack.c.bf16 %v1761_v29, %v1758_v1  ;;  %v16617_v43 = vpack.c.bf16 %v1670_v57, %v1667_v35  ;;  %v1673_v29 = vld [vmem:[%s15636_s28 + $0x638] sm:$0xff]  ;;  %v1676_v1 = vld [vmem:[%s15636_s28 + $0x650] sm:$0xff]  ;;  %v16632_v57 = vpack.c.bf16 %v1669_v10, %v1666_v50 }
 0xcaa   : > { %v16614_v47 = vpack.c.bf16 %v1663_v3, %v1660_v6  ;;  %v12307_v3 = vld [vmem:[%s12936_s24 + $0x68] sm:$0xff]  ;;  %v12308_v35 = vld [vmem:[%s12936_s24 + $0x70] sm:$0xff] }
 0xcab   : > { %10504 = vmatpush1.bf16.msra.mxu1 %v16576_v19  ;;  %19170 = vst [vmem:[#allocation556_spill] sm:$0xff] %v16609_v49  ;;  %19172 = vst [vmem:[#allocation558_spill] sm:$0xff] %v16617_v43  ;;  %v16629_v6 = vrot.slane %v12307_v3, %v16179_v48  ;;  %v1693_v19 = vld [vmem:[%s15636_s28 + $0x6d8] sm:$0xff] }
 0xcac   : > { %10506 = vmatprep.subr.bf16.mxu1 %v16579_v56  ;;  %10664 = vmatpush3.bf16.msra.mxu0 %v16585_v25  ;;  %v1713_v56 = vld [vmem:[%s15636_s28 + $0x778] sm:$0xff]  ;;  %19171 = vst [vmem:[#allocation557_spill] sm:$0xff] %v16614_v47  ;;  %19175 = vst [vmem:[#allocation561_spill] sm:$0xff] %v16632_v57  ;;  %v1691_v25 = vld [vmem:[%s15636_s28 + $0x6c8] sm:$0xff] }
 0xcad   : > { %10666 = vmatprep.subr.bf16.mxu0 %v16589_v53  ;;  %v16622_v53 = vpack.c.bf16 %v1713_v56, %v1710_v30  ;;  %19174 = vst [vmem:[#allocation560_spill] sm:$0xff] %v16629_v6  ;;  %v16639_v56 = vpack.c.bf16 %v1676_v1, %v1673_v29  ;;  %v1672_v30 = vld [vmem:[%s15636_s28 + $0x630] sm:$0xff] }
 0xcaf   : > { %10508 = vmatpush1.bf16.msra.mxu1 %v16596_v23  ;;  %19173 = vst [vmem:[#allocation559_spill] sm:$0xff] %v16622_v53  ;;  %19177 = vst [vmem:[#allocation563_spill] sm:$0xff] %v16639_v56  ;;  %v1682_v23 = vld [vmem:[%s15636_s28 + $0x680] sm:$0xff] }
 0xcb0   : > { %10510 = vmatprep.subr.bf16.mxu1 %v16599_v20  ;;  %10668 = vmatpush3.bf16.msra.mxu0 %v16605_v13  ;;  %v16636_v20 = vrot.slane %v12308_v35, %v16179_v48  ;;  %v1675_v13 = vld [vmem:[%s15636_s28 + $0x648] sm:$0xff]  ;;  %v1681_v35 = vld [vmem:[%s15636_s28 + $0x678] sm:$0xff] }
 0xcb1   : > { %10670 = vmatprep.subr.bf16.mxu0 %v16609_v49  ;;  %v1679_v49 = vld [vmem:[%s15636_s28 + $0x668] sm:$0xff]  ;;  %v16656_v29 = vpack.c.bf16 %v1675_v13, %v1672_v30 }
 0xcb2   : > { %19176 = vst [vmem:[#allocation562_spill] sm:$0xff] %v16636_v20 }
 0xcb3   : > { %10512 = vmatpush1.bf16.msra.mxu1 %v16614_v47  ;;  %19178 = vst [vmem:[#allocation564_spill] sm:$0xff] %v16656_v29  ;;  %v1687_v47 = vld [vmem:[%s15636_s28 + $0x6a8] sm:$0xff] }
 0xcb4   : > { %10514 = vmatprep.subr.bf16.mxu1 %v16617_v43  ;;  %10672 = vmatpush3.bf16.msra.mxu0 %v16622_v53  ;;  %v1684_v43 = vld [vmem:[%s15636_s28 + $0x690] sm:$0xff] }
 0xcb5   : > { %10674 = vmatprep.subr.bf16.mxu0 %v13040_v63  ;;  %v16660_v63 = vpack.c.bf16 %v1682_v23, %v1679_v49 }
 0xcb6   : > { %4968 = vmatmul.mubr.f32.vlgmr.msra.gmra.mrb[52].mxu1 %v16462_v41  ;;  %v1678_v41 = vld [vmem:[%s15636_s28 + $0x660] sm:$0xff] }
 0xcb7   : > { %4973 = vmatprep.mubr.f32.mxu1 %v16472_v37  ;;  %10516 = vmatpush1.bf16.msra.mxu1 %v16632_v57  ;;  %19179 = vst [vmem:[#allocation565_spill] sm:$0xff] %v16660_v63  ;;  %v1685_v37 = vld [vmem:[%s15636_s28 + $0x698] sm:$0xff]  ;;  %v1688_v57 = vld [vmem:[%s15636_s28 + $0x6b0] sm:$0xff] }
 0xcb8   : > { %v4641_v3 = vpop.f32.mrb[58].mxu0  ;;  %10518 = vmatprep.subr.bf16.mxu1 %v16639_v56  ;;  %v16678_v56 = vpack.c.bf16 %v1681_v35, %v1678_v41 }
 0xcb9   : > { %v16649_v48 = vadd.f32 %v4641_v3, %v16629_v6  ;;  %v4643_v50 = vpop.f32.mrb[59].mxu0 }
 0xcba   : > { %v16654_v10 = vadd.f32 %v4643_v50, %v16636_v20  ;;  %4974 = vmatmul.mubr.f32.gmra.mrb[54].mxu1 %v16489_v51  ;;  %19180 = vst [vmem:[#allocation566_spill] sm:$0xff] %v16678_v56 }
 0xcbb   : > { %v4680_v1 = vmul.f32 0.044715, %v16649_v48  ;;  %4979 = vmatprep.mubr.f32.mxu1 %v16499_v0  ;;  %10520 = vmatpush1.bf16.msra.mxu1 %v16656_v29  ;;  %v1694_v29 = vld [vmem:[%s15636_s28 + $0x6e0] sm:$0xff] }
 0xcbc   : > { %v4681_v3 = vmul.f32 0.044715, %v16654_v10  ;;  %v4647_v53 = vpop.f32.mrb[60].mxu0  ;;  %10522 = vmatprep.subr.bf16.mxu1 %v16660_v63 }
 0xcbd   : > { %v4698_v50 = vmul.f32 %v16649_v48, %v4680_v1  ;;  %v16670_v13 = vadd.f32 %v4647_v53, %v16629_v6  ;;  %v4649_v23 = vpop.f32.mrb[61].mxu0  ;;  %v16683_v53 = vpack.c.bf16 %v1688_v57, %v1685_v37 }
 0xcbe   : > { %v4699_v49 = vmul.f32 %v16654_v10, %v4681_v3  ;;  %v16676_v30 = vadd.f32 %v4649_v23, %v16636_v20  ;;  %4980 = vmatmul.mubr.f32.gmra.mrb[56].mxu1 %v16516_v17 }
 0xcbf   : > { %v4716_v1 = vmul.f32 %v16649_v48, %v4698_v50  ;;  %v4686_v51 = vmul.f32 0.044715, %v16670_v13  ;;  %19181 = vst [vmem:[#allocation567_spill] sm:$0xff] %v16683_v53  ;;  %10524 = vmatpush1.bf16.msra.mxu1 %v16678_v56 }
 0xcc0   : > { %v4687_v3 = vmul.f32 0.044715, %v16676_v30  ;;  %v4653_v0 = vpop.f32.mrb[62].mxu0  ;;  %v4717_v23 = vmul.f32 %v16654_v10, %v4699_v49  ;;  %v16702_v49 = vpack.c.bf16 %v1687_v47, %v1684_v43  ;;  %10526 = vmatprep.subr.bf16.mxu1 %v16683_v53  ;;  %v1700_v47 = vld [vmem:[%s15636_s28 + $0x710] sm:$0xff] }
 0xcc1   : > { %v4734_v41 = vadd.f32 %v16649_v48, %v4716_v1  ;;  %v4704_v35 = vmul.f32 %v16670_v13, %v4686_v51  ;;  %v16695_v57 = vadd.f32 %v4653_v0, %v16629_v6  ;;  %v4655_v37 = vpop.f32.mrb[63].mxu0  ;;  %v16707_v0 = vpack.c.bf16 %v1694_v29, %v1691_v25  ;;  %v1690_v6 = vld [vmem:[%s15636_s28 + $0x6c0] sm:$0xff] }
 0xcc2   : > { %v4705_v50 = vmul.f32 %v16676_v30, %v4687_v3  ;;  %v16700_v63 = vadd.f32 %v4655_v37, %v16636_v20  ;;  %19182 = vst [vmem:[#allocation568_spill] sm:$0xff] %v16702_v49  ;;  %v4735_v1 = vadd.f32 %v16654_v10, %v4717_v23  ;;  %v1697_v37 = vld [vmem:[%s15636_s28 + $0x6f8] sm:$0xff] }
 0xcc3   : > { %v4752_v51 = vmul.f32 0.7978846, %v4734_v41  ;;  %v4692_v17 = vmul.f32 0.044715, %v16695_v57  ;;  %19183 = vst [vmem:[#allocation569_spill] sm:$0xff] %v16707_v0  ;;  %v4722_v3 = vmul.f32 %v16670_v13, %v4704_v35  ;;  %10528 = vmatpush1.bf16.msra.mxu1 %v16702_v49  ;;  %v16720_v35 = vpack.c.bf16 %v1693_v19, %v1690_v6  ;;  %v1706_v49 = vld [vmem:[%s15636_s28 + $0x740] sm:$0xff] }
 0xcc4   : > { %v4693_v56 = vmul.f32 0.044715, %v16700_v63  ;;  %v4753_v43 = vmul.f32 0.7978846, %v4735_v1  ;;  %v4723_v23 = vmul.f32 %v16676_v30, %v4705_v50  ;;  %10530 = vmatprep.subr.bf16.mxu1 %v16707_v0  ;;  %v16724_v1 = vpack.c.bf16 %v1700_v47, %v1697_v37  ;;  %v1696_v50 = vld [vmem:[%s15636_s28 + $0x6f0] sm:$0xff] }
 0xcc5   : > { %12223 = vtanh.f32 %v4752_v51  ;;  %v4710_v41 = vmul.f32 %v16695_v57, %v4692_v17  ;;  %v4740_v25 = vadd.f32 %v16670_v13, %v4722_v3  ;;  %19184 = vst [vmem:[#allocation570_spill] sm:$0xff] %v16720_v35  ;;  %v1699_v51 = vld [vmem:[%s15636_s28 + $0x708] sm:$0xff] }
 0xcc6   : > { %v4711_v29 = vmul.f32 %v16700_v63, %v4693_v56  ;;  %12225 = vtanh.f32 %v4753_v43  ;;  %v4741_v53 = vadd.f32 %v16676_v30, %v4723_v23  ;;  %19185 = vst [vmem:[#allocation571_spill] sm:$0xff] %v16724_v1  ;;  %v1703_v56 = vld [vmem:[%s15636_s28 + $0x728] sm:$0xff]  ;;  %v16734_v37 = vpack.c.bf16 %v1699_v51, %v1696_v50 }
 0xcc7   : > { %v4758_v17 = vmul.f32 0.7978846, %v4740_v25  ;;  %v4728_v3 = vmul.f32 %v16695_v57, %v4710_v41  ;;  %10532 = vmatpush1.bf16.msra.mxu1 %v16720_v35  ;;  %v16738_v23 = vpack.c.bf16 %v1706_v49, %v1703_v56  ;;  %v1702_v41 = vld [vmem:[%s15636_s28 + $0x720] sm:$0xff]  ;;  %v1708_v49 = vld [vmem:[%s15636_s28 + $0x750] sm:$0xff]  ;;  %v1711_v56 = vld [vmem:[%s15636_s28 + $0x768] sm:$0xff] }
 0xcc8   : > { %v4759_v19 = vmul.f32 0.7978846, %v4741_v53  ;;  %v4729_v6 = vmul.f32 %v16700_v63, %v4711_v29  ;;  %19186 = vst [vmem:[#allocation572_spill] sm:$0xff] %v16734_v37  ;;  %10534 = vmatprep.subr.bf16.mxu1 %v16724_v1  ;;  %v1705_v53 = vld [vmem:[%s15636_s28 + $0x738] sm:$0xff]  ;;  %v1718_v1 = vld [vmem:[%s15636_s28 + $0x7a0] sm:$0xff] }
 0xcc9   : > { %12227 = vtanh.f32 %v4758_v17  ;;  %v4746_v43 = vadd.f32 %v16695_v57, %v4728_v3  ;;  %19187 = vst [vmem:[#allocation573_spill] sm:$0xff] %v16738_v23  ;;  %v1709_v29 = vld [vmem:[%s15636_s28 + $0x758] sm:$0xff]  ;;  %v1712_v17 = vld [vmem:[%s15636_s28 + $0x770] sm:$0xff]  ;;  %v16745_v50 = vpack.c.bf16 %v1705_v53, %v1702_v41  ;;  %v4662_v53 = vmul.f32 0.5, %v16649_v48 }
 0xcca   : > { %12229 = vtanh.f32 %v4759_v19  ;;  %v4747_v47 = vadd.f32 %v16700_v63, %v4729_v6  ;;  %v16748_v19 = vpack.c.bf16 %v1712_v17, %v1709_v29  ;;  %v1717_v35 = vld [vmem:[%s15636_s28 + $0x798] sm:$0xff] }
 0xccb   : > { %v4764_v25 = vmul.f32 0.7978846, %v4746_v43  ;;  %10536 = vmatpush1.bf16.msra.mxu1 %v16734_v37  ;;  %v1715_v43 = vld [vmem:[%s15636_s28 + $0x788] sm:$0xff]  ;;  %v1714_v37 = vld [vmem:[%s15636_s28 + $0x780] sm:$0xff] }
 0xccc   : > { %v4765_v3 = vmul.f32 0.7978846, %v4747_v47  ;;  %10538 = vmatprep.subr.bf16.mxu1 %v16738_v23  ;;  %v16760_v17 = vpack.c.bf16 %v1718_v1, %v1715_v43  ;;  %v16770_v1 = vpack.c.bf16 %v1717_v35, %v1714_v37  ;;  %v1727_v35 = vld [vmem:[%s15636_s28 + $0x7e8] sm:$0xff]  ;;  %v1730_v37 = vld [vmem:[%s15636_s28 + $0x800] sm:$0xff] }
 0xccd   : > { %12231 = vtanh.f32 %v4764_v25  ;;  %v4663_v25 = vmul.f32 0.5, %v16654_v10  ;;  %v1721_v10 = vld [vmem:[%s15636_s28 + $0x7b8] sm:$0xff] }
 0xcce   : > { %12233 = vtanh.f32 %v4765_v3  ;;  %v16757_v3 = vpack.c.bf16 %v1711_v56, %v1708_v49  ;;  %v4669_v49 = vmul.f32 0.5, %v16676_v30 }
 0xccf   : > { %v12224_v51 = vpop.eup %12223  ;;  %10540 = vmatpush1.bf16.msra.mxu1 %v16745_v50 }
 0xcd0   : > { %v12226_v6 = vpop.eup %12225  ;;  %v4788_v47 = vadd.f32 1.0, %v12224_v51  ;;  %10542 = vmatprep.subr.bf16.mxu1 %v16748_v19  ;;  %v1724_v51 = vld [vmem:[%s15636_s28 + $0x7d0] sm:$0xff] }
 0xcd1   : > { %v4789_v41 = vadd.f32 1.0, %v12226_v6  ;;  %v4668_v6 = vmul.f32 0.5, %v16670_v13  ;;  %v4675_v13 = vmul.f32 0.5, %v16700_v63  ;;  %v1729_v63 = vld [vmem:[%s15636_s28 + $0x7f8] sm:$0xff] }
 0xcd2   : > { %v16764_v20 = vmul.f32 %v4788_v47, %v4662_v53  ;;  %v16775_v47 = vpack.c.bf16 %v1724_v51, %v1721_v10  ;;  %v4674_v10 = vmul.f32 0.5, %v16695_v57  ;;  %v16795_v51 = vpack.c.bf16 %v1730_v37, %v1727_v35  ;;  %v1738_v37 = vld [vmem:[%s15636_s28 + $0x840] sm:$0xff] }
 0xcd3   : > { %v12228_v29 = vpop.eup %12227  ;;  %v4807_v23 = vmul.f32 %v4789_v41, %v4663_v25  ;;  %10544 = vmatpush1.bf16.msra.mxu1 %v16757_v3  ;;  %v1723_v41 = vld [vmem:[%s15636_s28 + $0x7c8] sm:$0xff] }
 0xcd4   : > { %v12230_v0 = vpop.eup %12229  ;;  %v4794_v48 = vadd.f32 1.0, %v12228_v29  ;;  %10546 = vmatprep.subr.bf16.mxu1 %v16760_v17 }
 0xcd5   : > { %5050 = vmatprep.mubr.f32.mxu1 %v4807_v23  ;;  %5293 = vmatprep.mubr.f32.mxu0 %v4807_v23  ;;  %v4795_v56 = vadd.f32 1.0, %v12230_v0  ;;  %v1720_v23 = vld [vmem:[%s15636_s28 + $0x7b0] sm:$0xff] }
 0xcd6   : > { %5294 = vmatmul.mubr.f32.vlgmr.msra.gmra.mrb[76].mxu0 %v16764_v20  ;;  %v16782_v0 = vmul.f32 %v4794_v48, %v4668_v6  ;;  %v1726_v48 = vld [vmem:[%s15636_s28 + $0x7e0] sm:$0xff]  ;;  %v1736_v6 = vld [vmem:[%s15636_s28 + $0x830] sm:$0xff] }
 0xcd7   : > { %v12232_v43 = vpop.eup %12231  ;;  %v16777_v25 = vmul.f32 %v4795_v56, %v4669_v49  ;;  %10676 = vmatpush1.bf16.msra.mxu0 %v13047_v4  ;;  %10548 = vmatpush1.bf16.msra.mxu1 %v16770_v1  ;;  %v16790_v4 = vpack.c.bf16 %v1723_v41, %v1720_v23  ;;  %v1733_v56 = vld [vmem:[%s15636_s28 + $0x818] sm:$0xff]  ;;  %v16809_v57 = vpack.c.bf16 %v1729_v63, %v1726_v48  ;;  %v1735_v23 = vld [vmem:[%s15636_s28 + $0x828] sm:$0xff]  ;;  %v1742_v41 = vld [vmem:[%s15636_s28 + $0x860] sm:$0xff] }
 0xcd8   : > { %v12234_v30 = vpop.eup %12233  ;;  %v4800_v53 = vadd.f32 1.0, %v12232_v43  ;;  %10678 = vmatprep.subr.bf16.mxu0 %v13060_v12  ;;  %10550 = vmatprep.subr.bf16.mxu1 %v16775_v47  ;;  %v1732_v43 = vld [vmem:[%s15636_s28 + $0x810] sm:$0xff]  ;;  %v1747_v48 = vld [vmem:[%s15636_s28 + $0x888] sm:$0xff]  ;;  %v1754_v63 = vld [vmem:[%s15636_s28 + $0x8c0] sm:$0xff] }
 0xcd9   : > { %5298 = vmatprep.mubr.f32.mxu0 %v16777_v25  ;;  %v4801_v29 = vadd.f32 1.0, %v12234_v30  ;;  %v16822_v30 = vpack.c.bf16 %v1735_v23, %v1732_v43  ;;  %v1753_v43 = vld [vmem:[%s15636_s28 + $0x8b8] sm:$0xff] }
 0xcda   : > { %5299 = vmatmul.mubr.f32.gmra.mrb[78].mxu0 %v16782_v0  ;;  %v16802_v49 = vmul.f32 %v4800_v53, %v4674_v10  ;;  %v1741_v53 = vld [vmem:[%s15636_s28 + $0x858] sm:$0xff]  ;;  %v1744_v10 = vld [vmem:[%s15636_s28 + $0x870] sm:$0xff] }
 0xcdb   : > { %v16797_v12 = vmul.f32 %v4801_v29, %v4675_v13  ;;  %10680 = vmatpush1.bf16.msra.mxu0 %v13068_v18  ;;  %10552 = vmatpush1.bf16.msra.mxu1 %v16790_v4  ;;  %v16813_v18 = vpack.c.bf16 %v1736_v6, %v1733_v56  ;;  %v1748_v13 = vld [vmem:[%s15636_s28 + $0x890] sm:$0xff]  ;;  %v1750_v6 = vld [vmem:[%s15636_s28 + $0x8a0] sm:$0xff]  ;;  %v1757_v23 = vld [vmem:[%s15636_s28 + $0x8d8] sm:$0xff] }
 0xcdc   : > { %10682 = vmatprep.subr.bf16.mxu0 %v13077_v26  ;;  %10554 = vmatprep.subr.bf16.mxu1 %v16795_v51  ;;  %v1739_v26 = vld [vmem:[%s15636_s28 + $0x848] sm:$0xff] }
 0xcdd   : > { %5303 = vmatprep.mubr.f32.mxu0 %v16797_v12  ;;  %v16825_v35 = vpack.c.bf16 %v1742_v41, %v1739_v26  ;;  %v1756_v41 = vld [vmem:[%s15636_s28 + $0x8d0] sm:$0xff] }
 0xcde   : > { %5304 = vmatmul.mubr.f32.gmra.mrb[80].mxu0 %v16802_v49 }
 0xcdf   : > { %10684 = vmatpush1.bf16.msra.mxu0 %v13088_v34  ;;  %10556 = vmatpush1.bf16.msra.mxu1 %v16809_v57  ;;  %v1745_v34 = vld [vmem:[%s15636_s28 + $0x878] sm:$0xff] }
 0xce0   : > { %10686 = vmatprep.subr.bf16.mxu0 %v13097_v46  ;;  %10558 = vmatprep.subr.bf16.mxu1 %v16813_v18  ;;  %v16834_v46 = vpack.c.bf16 %v1741_v53, %v1738_v37  ;;  %v16837_v29 = vpack.c.bf16 %v1748_v13, %v1745_v34  ;;  %v1759_v37 = vld [vmem:[%s15636_s28 + $0x8e8] sm:$0xff]  ;;  %v19191_v53 = vld [vmem:[#allocation29_spill] sm:$0xff]  ;;  %v19195_v13 = vld [vmem:[#allocation15_spill] sm:$0xff] }
 0xce1   : > { %v19194_v34 = vld [vmem:[#allocation33_spill] sm:$0xff] }
 0xce3   : > { %10688 = vmatpush1.bf16.msra.mxu0 %v13112_v59  ;;  %10560 = vmatpush1.bf16.msra.mxu1 %v16822_v30  ;;  %v1751_v59 = vld [vmem:[%s15636_s28 + $0x8a8] sm:$0xff] }
 0xce4   : > { %10690 = vmatprep.subr.bf16.mxu0 %v13118_v61  ;;  %10562 = vmatprep.subr.bf16.mxu1 %v16825_v35  ;;  %v16846_v61 = vpack.c.bf16 %v1747_v48, %v1744_v10  ;;  %v16849_v56 = vpack.c.bf16 %v1754_v63, %v1751_v59  ;;  %v19196_v10 = vld [vmem:[#allocation35_spill] sm:$0xff]  ;;  %v19197_v48 = vld [vmem:[#allocation37_spill] sm:$0xff] }
 0xce5   : > { %v19199_v59 = vld [vmem:[#allocation17_spill] sm:$0xff]  ;;  %v19200_v63 = vld [vmem:[#allocation39_spill] sm:$0xff] }
 0xce6   : > { %19188 = vst [vmem:[#allocation574_spill] sm:$0xff] %v16849_v56 }
 0xce7   : > { %10692 = vmatpush1.bf16.msra.mxu0 %v13132_v11  ;;  %10564 = vmatpush1.bf16.msra.mxu1 %v16834_v46  ;;  %v1760_v11 = vld [vmem:[%s15636_s28 + $0x8f0] sm:$0xff] }
 0xce8   : > { %10694 = vmatprep.subr.bf16.mxu0 %v13138_v15  ;;  %10566 = vmatprep.subr.bf16.mxu1 %v16837_v29  ;;  %v16858_v15 = vpack.c.bf16 %v1753_v43, %v1750_v6  ;;  %v16861_v26 = vpack.c.bf16 %v1760_v11, %v1757_v23  ;;  %v19201_v6 = vld [vmem:[#allocation41_spill] sm:$0xff]  ;;  %v19202_v43 = vld [vmem:[#allocation18_spill] sm:$0xff]  ;;  %v19203_v23 = vld [vmem:[#allocation19_spill] sm:$0xff] }
 0xce9   : > { %v19204_v11 = vld [vmem:[#allocation43_spill] sm:$0xff] }
 0xcea   : > { %19189 = vst [vmem:[#allocation575_spill] sm:$0xff] %v16858_v15  ;;  %19190 = vst [vmem:[#allocation576_spill] sm:$0xff] %v16861_v26 }
 0xceb   : > { %10696 = vmatpush1.bf16.msra.mxu0 %v13152_v33  ;;  %10568 = vmatpush1.bf16.msra.mxu1 %v16846_v61  ;;  %v16868_v33 = vpack.c.bf16 %v1759_v37, %v1756_v41  ;;  %v19207_v41 = vld [vmem:[#allocation21_spill] sm:$0xff]  ;;  %v19208_v37 = vld [vmem:[#allocation47_spill] sm:$0xff] }
 0xcec   : > { %10698 = vmatprep.subr.bf16.mxu0 %v13158_v38  ;;  %10570 = vmatprep.subr.bf16.mxu1 %v16849_v56  ;;  %v19193_v38 = vld [vmem:[#allocation31_spill] sm:$0xff] }
 0xced   : > { %19192 = vst [vmem:[#allocation29_spill] sm:$0xff] %v16868_v33 }
 0xcef   : > { %10700 = vmatpush1.bf16.msra.mxu0 %v13172_v58  ;;  %10572 = vmatpush1.bf16.msra.mxu1 %v16858_v15  ;;  %v19198_v58 = vld [vmem:[#allocation16_spill] sm:$0xff] }
 0xcf0   : > { %10702 = vmatprep.subr.bf16.mxu0 %v19191_v53  ;;  %10574 = vmatprep.subr.bf16.mxu1 %v16861_v26  ;;  %v19209_v53 = vld [vmem:[#allocation49_spill] sm:$0xff] }
 0xcf3   : > { %10704 = vmatpush1.bf16.msra.mxu0 %v19193_v38  ;;  %10576 = vmatpush1.bf16.msra.mxu1 %v16868_v33  ;;  %v19212_v38 = vld [vmem:[#allocation51_spill] sm:$0xff] }
 0xcf4   : > { %10706 = vmatprep.subr.bf16.mxu0 %v19194_v34  ;;  %10770 = vmatprep.subr.bf16.mxu1 %v19195_v13  ;;  %v19213_v34 = vld [vmem:[#allocation53_spill] sm:$0xff]  ;;  %v19214_v13 = vld [vmem:[#allocation24_spill] sm:$0xff] }
 0xcf6   : > { %5051 = vmatmul.mubr.f32.vlgmr.msra.gmra.mrb[52].mxu1 %v16764_v20  ;;  %v19205_v20 = vld [vmem:[#allocation45_spill] sm:$0xff] }
 0xcf7   : > { %10708 = vmatpush1.bf16.msra.mxu0 %v19196_v10  ;;  %5056 = vmatprep.mubr.f32.mxu1 %v16777_v25  ;;  %v19206_v25 = vld [vmem:[#allocation20_spill] sm:$0xff]  ;;  %v19215_v10 = vld [vmem:[#allocation25_spill] sm:$0xff] }
 0xcf8   : > { %10710 = vmatprep.subr.bf16.mxu0 %v19197_v48  ;;  %10772 = vmatpush1.bf16.msra.mxu1 %v19198_v58  ;;  %v19217_v48 = vld [vmem:[#allocation57_spill] sm:$0xff]  ;;  %v19218_v58 = vld [vmem:[#allocation26_spill] sm:$0xff] }
 0xcf9   : > { %10774 = vmatprep.subr.bf16.mxu1 %v19199_v59  ;;  %v19219_v59 = vld [vmem:[#allocation27_spill] sm:$0xff] }
 0xcfa   : > { %5057 = vmatmul.mubr.f32.gmra.mrb[54].mxu1 %v16782_v0  ;;  %v19210_v0 = vld [vmem:[#allocation22_spill] sm:$0xff] }
 0xcfb   : > { %10712 = vmatpush1.bf16.msra.mxu0 %v19200_v63  ;;  %5062 = vmatprep.mubr.f32.mxu1 %v16797_v12  ;;  %v19211_v12 = vld [vmem:[#allocation23_spill] sm:$0xff] }
 0xcfc   : > { %10714 = vmatprep.subr.bf16.mxu0 %v19201_v6  ;;  %10776 = vmatpush1.bf16.msra.mxu1 %v19202_v43  ;;  %v19220_v63 = vld [vmem:[#allocation59_spill] sm:$0xff]  ;;  %v19221_v6 = vld [vmem:[#allocation61_spill] sm:$0xff]  ;;  %v19222_v43 = vld [vmem:[#allocation28_spill] sm:$0xff] }
 0xcfd   : > { %10778 = vmatprep.subr.bf16.mxu1 %v19203_v23  ;;  %v19223_v23 = vld [vmem:[#allocation30_spill] sm:$0xff] }
 0xcfe   : > { %5063 = vmatmul.mubr.f32.gmra.mrb[56].mxu1 %v16802_v49  ;;  %v19216_v49 = vld [vmem:[#allocation55_spill] sm:$0xff] }
 0xcff   : > { %10716 = vmatpush1.bf16.msra.mxu0 %v19204_v11  ;;  %v19224_v11 = vld [vmem:[#allocation63_spill] sm:$0xff] }
 0xd00   : > { %10718 = vmatprep.subr.bf16.mxu0 %v19205_v20  ;;  %10780 = vmatpush1.bf16.msra.mxu1 %v19206_v25  ;;  %v19225_v20 = vld [vmem:[#allocation65_spill] sm:$0xff]  ;;  %v19226_v25 = vld [vmem:[#allocation32_spill] sm:$0xff] }
 0xd01   : > { %10782 = vmatprep.subr.bf16.mxu1 %v19207_v41  ;;  %v19227_v41 = vld [vmem:[#allocation34_spill] sm:$0xff] }
 0xd03   : > { %10720 = vmatpush1.bf16.msra.mxu0 %v19208_v37  ;;  %v19228_v37 = vld [vmem:[#allocation36_spill] sm:$0xff] }
 0xd04   : > { %10722 = vmatprep.subr.bf16.mxu0 %v19209_v53  ;;  %10784 = vmatpush1.bf16.msra.mxu1 %v19210_v0  ;;  %v19229_v53 = vld [vmem:[#allocation38_spill] sm:$0xff]  ;;  %v19230_v0 = vld [vmem:[#allocation40_spill] sm:$0xff] }
 0xd05   : > { %10786 = vmatprep.subr.bf16.mxu1 %v19211_v12  ;;  %v19231_v12 = vld [vmem:[#allocation42_spill] sm:$0xff] }
 0xd07   : > { %10724 = vmatpush1.bf16.msra.mxu0 %v19212_v38  ;;  %v19232_v38 = vld [vmem:[#allocation44_spill] sm:$0xff] }
 0xd08   : > { %10726 = vmatprep.subr.bf16.mxu0 %v19213_v34  ;;  %10788 = vmatpush1.bf16.msra.mxu1 %v19214_v13  ;;  %v19233_v34 = vld [vmem:[#allocation46_spill] sm:$0xff]  ;;  %v19234_v13 = vld [vmem:[#allocation48_spill] sm:$0xff] }
 0xd09   : > { %10790 = vmatprep.subr.bf16.mxu1 %v19215_v10  ;;  %v19235_v10 = vld [vmem:[#allocation50_spill] sm:$0xff] }
 0xd0b   : > { %10728 = vmatpush1.bf16.msra.mxu0 %v19216_v49  ;;  %v19236_v49 = vld [vmem:[#allocation52_spill] sm:$0xff] }
 0xd0c   : > { %10730 = vmatprep.subr.bf16.mxu0 %v19217_v48  ;;  %10792 = vmatpush1.bf16.msra.mxu1 %v19218_v58  ;;  %v19237_v48 = vld [vmem:[#allocation54_spill] sm:$0xff]  ;;  %v19238_v58 = vld [vmem:[#allocation56_spill] sm:$0xff] }
 0xd0d   : > { %10794 = vmatprep.subr.bf16.mxu1 %v19219_v59  ;;  %v19239_v59 = vld [vmem:[#allocation58_spill] sm:$0xff] }
 0xd0f   : > { %10732 = vmatpush1.bf16.msra.mxu0 %v19220_v63  ;;  %v19240_v63 = vld [vmem:[#allocation60_spill] sm:$0xff] }
 0xd10   : > { %10734 = vmatprep.subr.bf16.mxu0 %v19221_v6  ;;  %10796 = vmatpush1.bf16.msra.mxu1 %v19222_v43  ;;  %v19241_v6 = vld [vmem:[#allocation62_spill] sm:$0xff]  ;;  %v19242_v43 = vld [vmem:[#allocation64_spill] sm:$0xff] }
 0xd11   : > { %10798 = vmatprep.subr.bf16.mxu1 %v19223_v23  ;;  %v19243_v23 = vld [vmem:[#allocation66_spill] sm:$0xff] }
 0xd13   : > { %10736 = vmatpush1.bf16.msra.mxu0 %v19224_v11 }
 0xd14   : > { %10738 = vmatprep.subr.bf16.mxu0 %v19225_v20  ;;  %10800 = vmatpush1.bf16.msra.mxu1 %v19226_v25 }
 0xd15   : > { %10802 = vmatprep.subr.bf16.mxu1 %v19227_v41 }
 0xd18   : > { %10804 = vmatpush1.bf16.msra.mxu1 %v19228_v37 }
 0xd19   : > { %10806 = vmatprep.subr.bf16.mxu1 %v19229_v53 }
 0xd1c   : > { %10808 = vmatpush1.bf16.msra.mxu1 %v19230_v0 }
 0xd1d   : > { %10810 = vmatprep.subr.bf16.mxu1 %v19231_v12 }
 0xd20   : > { %10812 = vmatpush1.bf16.msra.mxu1 %v19232_v38 }
 0xd21   : > { %10814 = vmatprep.subr.bf16.mxu1 %v19233_v34 }
 0xd24   : > { %10816 = vmatpush1.bf16.msra.mxu1 %v19234_v13 }
 0xd25   : > { %10818 = vmatprep.subr.bf16.mxu1 %v19235_v10 }
 0xd28   : > { %10820 = vmatpush1.bf16.msra.mxu1 %v19236_v49 }
 0xd29   : > { %10822 = vmatprep.subr.bf16.mxu1 %v19237_v48 }
 0xd2c   : > { %10824 = vmatpush1.bf16.msra.mxu1 %v19238_v58 }
 0xd2d   : > { %10826 = vmatprep.subr.bf16.mxu1 %v19239_v59 }
 0xd30   : > { %10828 = vmatpush1.bf16.msra.mxu1 %v19240_v63 }
 0xd31   : > { %10830 = vmatprep.subr.bf16.mxu1 %v19241_v6 }
 0xd34   : > { %10832 = vmatpush1.bf16.msra.mxu1 %v19242_v43 }
 0xd35   : > { %10834 = vmatprep.subr.bf16.mxu1 %v19243_v23 }
 0xd49   : > { %v8766_v11 = vpop.f32.mrb[64].mxu0 }
 0xd4a   : > { %v8767_v20 = vpop.f32.mrb[65].mxu0 }
 0xd4b   : > { %v8768_v25 = vadd.f32 %v8767_v20, %v8766_v11 }
 0xd4d   : > { %v8769_v41 = vpop.f32.mrb[66].mxu0 }
 0xd4e   : > { %v8770_v37 = vpop.f32.mrb[67].mxu0 }
 0xd4f   : > { %v8771_v53 = vadd.f32 %v8770_v37, %v8769_v41 }
 0xd51   : > { %v8772_v0 = vpop.f32.mrb[68].mxu0 }
 0xd52   : > { %v8773_v12 = vpop.f32.mrb[69].mxu0 }
 0xd53   : > { %v8774_v38 = vadd.f32 %v8773_v12, %v8772_v0 }
 0xd69   : > { %v8807_v34 = vpop.f32.mrb[70].mxu0 }
 0xd6a   : > { %v8808_v13 = vpop.f32.mrb[71].mxu0 }
 0xd6b   : > { %v8809_v10 = vadd.f32 %v8808_v13, %v8807_v34 }
 0xd6d   : > { %v5216_v49 = vadd.f32 %v8809_v10, %v8768_v25  ;;  %v8810_v48 = vpop.f32.mrb[72].mxu0 }
 0xd6e   : > { %v8811_v58 = vpop.f32.mrb[73].mxu0 }
 0xd6f   : > { %v8812_v59 = vadd.f32 %v8811_v58, %v8810_v48  ;;  %v5320_v58 = vsub.s32 6, %v12931_v21 }
 0xd71   : > { %v5221_v63 = vadd.f32 %v8812_v59, %v8771_v53  ;;  %v8813_v6 = vpop.f32.mrb[74].mxu0  ;;  %v16931_v59 = vld [vmem:[%s12936_s24 + $0x48] sm:$0xff] }
 0xd72   : > { %v8814_v43 = vpop.f32.mrb[75].mxu0 }
 0xd73   : > { %v8815_v23 = vadd.f32 %v8814_v43, %v8813_v6  ;;  %v16938_v6 = vld [vmem:[%s12936_s24 + $0x50] sm:$0xff] }
 0xd75   : > { %v5226_v33 = vadd.f32 %v8815_v23, %v8774_v38 }
 0xda9   : > { %v8848_v26 = vpop.f32.mrb[76].mxu0 }
 0xdaa   : > { %v8849_v11 = vpop.f32.mrb[77].mxu0 }
 0xdab   : > { %v8850_v20 = vadd.f32 %v8849_v11, %v8848_v26  ;;  %v16934_v26 = vrot.slane %v16931_v59, %v5320_v58 }
 0xdad   : > { %v5296_v41 = vadd.f32 %v8850_v20, %v5216_v49  ;;  %v8851_v37 = vpop.f32.mrb[78].mxu0  ;;  %19244 = vst [vmem:[#allocation31_spill] sm:$0xff] %v16934_v26  ;;  %v16948_v20 = vld [vmem:[%s12936_s24 + $0x58] sm:$0xff] }
 0xdae   : > { %v8852_v0 = vpop.f32.mrb[79].mxu0 }
 0xdaf   : > { %v8853_v12 = vadd.f32 %v8852_v0, %v8851_v37  ;;  %v16951_v37 = vrot.slane %v16948_v20, %v5320_v58 }
 0xdb1   : > { %v5301_v15 = vadd.f32 %v8853_v12, %v5221_v63  ;;  %v8854_v34 = vpop.f32.mrb[80].mxu0  ;;  %v16941_v63 = vrot.slane %v16938_v6, %v5320_v58  ;;  %19246 = vst [vmem:[#allocation15_spill] sm:$0xff] %v16951_v37 }
 0xdb2   : > { %v8855_v25 = vpop.f32.mrb[81].mxu0 }
 0xdb3   : > { %v8856_v13 = vadd.f32 %v8855_v25, %v8854_v34  ;;  %19245 = vst [vmem:[#allocation33_spill] sm:$0xff] %v16941_v63  ;;  %v5314_v21 = vadd.f32 %v5301_v15, %v14999_v62 }
 0xdb5   : > { %v5306_v10 = vadd.f32 %v8856_v13, %v5226_v33  ;;  %v5335_v13 = vadd.f32 %v16951_v37, %v5314_v21 }
 0xdc9   : > { %v5052_v53 = vpop.f32.mrb[52].mxu1 }
 0xdca   : > { %v5054_v48 = vpop.f32.mrb[53].mxu1  ;;  %v5309_v38 = vadd.f32 %v5052_v53, %v14977_v31 }
 0xdcb   : > { %v5310_v49 = vadd.f32 %v5054_v48, %v14981_v8  ;;  %v5317_v8 = vadd.f32 %v5306_v10, %v15014_v28 }
 0xdcc   : > { %v5330_v0 = vadd.f32 %v16934_v26, %v5309_v38 }
 0xdcd   : > { %v5058_v33 = vpop.f32.mrb[54].mxu1  ;;  %v5331_v12 = vadd.f32 %v16941_v63, %v5310_v49  ;;  %v5338_v38 = vadd.f32 %v16951_v37, %v5317_v8 }
 0xdce   : > { %v5312_v43 = vadd.f32 %v5058_v33, %v14991_v16  ;;  %v5060_v23 = vpop.f32.mrb[55].mxu1 }
 0xdcf   : > { %v5313_v31 = vadd.f32 %v5060_v23, %v14995_v40  ;;  %v5311_v40 = vadd.f32 %v5296_v41, %v14984_v36  ;;  %v5339_v58 = vadd.f32 %v5331_v12, %v5330_v0  ;;  %v5350_v33 = vsel %vm2069_vm6, %v5338_v38, 0.0 }
 0xdd0   : > { %v5333_v11 = vadd.f32 %v16934_v26, %v5312_v43 }
 0xdd1   : > { %v5334_v16 = vadd.f32 %v16941_v63, %v5313_v31  ;;  %v5064_v34 = vpop.f32.mrb[56].mxu1 }
 0xdd2   : > { %v5315_v62 = vadd.f32 %v5064_v34, %v15006_v9  ;;  %v5066_v15 = vpop.f32.mrb[57].mxu1  ;;  %v5332_v9 = vadd.f32 %v16951_v37, %v5311_v40 }
 0xdd3   : > { %v5316_v25 = vadd.f32 %v5066_v15, %v15010_v22  ;;  %v5343_v53 = vadd.f32 %v5334_v16, %v5333_v11 }
 0xdd4   : > { %v5336_v48 = vadd.f32 %v16934_v26, %v5315_v62  ;;  %v5340_v22 = vadd.f32 %v5339_v58, %v5332_v9 }
 0xdd5   : > { %v5337_v28 = vadd.f32 %v16941_v63, %v5316_v25  ;;  %v5344_v10 = vadd.f32 %v5343_v53, %v5335_v13 }
 0xdd6   : > { %v5347_v49 = vsel %vm2069_vm6, %v5336_v48, 0.0 }
 0xdd7   : > { %5345 = vadd.xlane.f32.xlu0 %v5344_v10  ;;  %v5348_v36 = vsel %vm2069_vm6, %v5337_v28, 0.0 }
 0xdd8   : > { %v5349_v41 = vadd.f32 %v5348_v36, %v5347_v49 }
 0xdda   : > { %v5351_v43 = vadd.f32 %v5350_v33, %v5349_v41 }
 0xddb   : > { %5341 = vadd.xlane.f32.xlu0 %v5340_v22 }
 0xddc   : > { %5352 = vadd.xlane.f32.xlu1 %v5351_v43 }
 0xe64   : > { %v5346_v23 = vpop.xlane.xlu0 %5345 }
 0xe65   : > { %v5355_v21 = vmul.f32 0.0026041667, %v5346_v23 }
 0xe67   : > { %v5360_v31 = vsub.f32 %v5333_v11, %v5355_v21  ;;  %v5361_v34 = vsub.f32 %v5334_v16, %v5355_v21  ;;  %v5362_v62 = vsub.f32 %v5335_v13, %v5355_v21 }
 0xe68   : > { %v5342_v8 = vpop.xlane.xlu0 %5341 }
 0xe69   : > { %v5354_v15 = vmul.f32 0.0026041667, %v5342_v8  ;;  %v5353_v25 = vpop.xlane.xlu1 %5352  ;;  %v5369_v53 = vmul.f32 %v5360_v31, %v5360_v31  ;;  %v5370_v10 = vmul.f32 %v5361_v34, %v5361_v34  ;;  %v5371_v63 = vmul.f32 %v5362_v62, %v5362_v62 }
 0xe6a   : > { %v5356_v40 = vmul.f32 0.0026041667, %v5353_v25 }
 0xe6b   : > { %v5357_v26 = vsub.f32 %v5330_v0, %v5354_v15  ;;  %v5358_v49 = vsub.f32 %v5331_v12, %v5354_v15  ;;  %v5359_v58 = vsub.f32 %v5332_v9, %v5354_v15  ;;  %v5379_v36 = vadd.f32 %v5370_v10, %v5369_v53 }
 0xe6c   : > { %v5363_v37 = vsub.f32 %v5336_v48, %v5356_v40  ;;  %v5364_v41 = vsub.f32 %v5337_v28, %v5356_v40  ;;  %v5365_v22 = vsub.f32 %v5338_v38, %v5356_v40 }
 0xe6d   : > { %v5380_v33 = vadd.f32 %v5379_v36, %v5371_v63  ;;  %v5366_v43 = vmul.f32 %v5357_v26, %v5357_v26  ;;  %v5367_v23 = vmul.f32 %v5358_v49, %v5358_v49  ;;  %v5368_v21 = vmul.f32 %v5359_v58, %v5359_v58 }
 0xe6e   : > { %v5372_v11 = vmul.f32 %v5363_v37, %v5363_v37  ;;  %v5373_v16 = vmul.f32 %v5364_v41, %v5364_v41  ;;  %v5374_v13 = vmul.f32 %v5365_v22, %v5365_v22 }
 0xe6f   : > { %5381 = vadd.xlane.f32.xlu1 %v5380_v33  ;;  %v5375_v8 = vadd.f32 %v5367_v23, %v5366_v43 }
 0xe70   : > { %v5383_v56 = vsel %vm2069_vm6, %v5372_v11, 0.0  ;;  %v5384_v25 = vsel %vm2069_vm6, %v5373_v16, 0.0  ;;  %v5386_v9 = vsel %vm2069_vm6, %v5374_v13, 0.0 }
 0xe71   : > { %v5376_v0 = vadd.f32 %v5375_v8, %v5368_v21  ;;  %v5385_v12 = vadd.f32 %v5384_v25, %v5383_v56  ;;  %v19247_v56 = vld [vmem:[#allocation67_spill] sm:$0xff]  ;;  %v8526_v25 = vld [vmem:[%s12936_s24 + $0x90] ss:$0 sm:$0xff] }
 0xe72   : > { %v5411_v43 = vrot.slane %v16931_v59, %v19247_v56  ;;  %v5415_v23 = vrot.slane %v16938_v6, %v19247_v56  ;;  %v5419_v11 = vrot.slane %v16948_v20, %v19247_v56 }
 0xe73   : > { %5377 = vadd.xlane.f32.xlu0 %v5376_v0  ;;  %v5387_v48 = vadd.f32 %v5386_v9, %v5385_v12  ;;  %v8527_v0 = vld [vmem:[%s12936_s24 + $0x98] ss:$0 sm:$0xff]  ;;  %v8528_v12 = vld [vmem:[%s12936_s24 + $0xa0] ss:$0 sm:$0xff] }
 0xe75   : > { %5388 = vadd.xlane.f32.xlu1 %v5387_v48 }
 0xefc   : > { %v5382_v63 = vpop.xlane.xlu1 %5381 }
 0xefd   : > { %v5391_v28 = vmul.f32 0.0026041667, %v5382_v63 }
 0xeff   : > { %v5394_v38 = vadd.f32 1e-06, %v5391_v28 }
 0xf00   : > { %v5378_v15 = vpop.xlane.xlu0 %5377 }
 0xf01   : > { %12235 = vrsqrt.f32 %v5394_v38  ;;  %v5390_v53 = vmul.f32 0.0026041667, %v5378_v15 }
 0xf02   : > { %v5389_v10 = vpop.xlane.xlu1 %5388 }
 0xf03   : > { %v5393_v40 = vadd.f32 1e-06, %v5390_v53  ;;  %v5392_v36 = vmul.f32 0.0026041667, %v5389_v10 }
 0xf05   : > { %12237 = vrsqrt.f32 %v5393_v40  ;;  %v5395_v33 = vadd.f32 1e-06, %v5392_v36 }
 0xf07   : > { %12239 = vrsqrt.f32 %v5395_v33 }
 0xf0b   : > { %v12236_v16 = vpop.eup %12235 }
 0xf0c   : > { %v5402_v13 = vmul.f32 %v12236_v16, %v5360_v31  ;;  %v5403_v21 = vmul.f32 %v12236_v16, %v5361_v34  ;;  %v5404_v8 = vmul.f32 %v12236_v16, %v5362_v62 }
 0xf0e   : > { %v5423_v9 = vmul.f32 %v5411_v43, %v5402_v13  ;;  %v5424_v48 = vmul.f32 %v5415_v23, %v5403_v21  ;;  %v5425_v63 = vmul.f32 %v5419_v11, %v5404_v8 }
 0xf0f   : > { %v12238_v28 = vpop.eup %12237 }
 0xf10   : > { %v5399_v38 = vmul.f32 %v12238_v28, %v5357_v26  ;;  %v5400_v15 = vmul.f32 %v12238_v28, %v5358_v49  ;;  %v5401_v59 = vmul.f32 %v12238_v28, %v5359_v58  ;;  %v16980_v53 = vadd.f32 %v8526_v25, %v5423_v9 }
 0xf11   : > { %v12240_v6 = vpop.eup %12239  ;;  %v16982_v10 = vadd.f32 %v8527_v0, %v5424_v48  ;;  %v5446_v20 = vadd.f32 %v8528_v12, %v5425_v63 }
 0xf12   : > { %v5405_v40 = vmul.f32 %v12240_v6, %v5363_v37  ;;  %v5406_v31 = vmul.f32 %v12240_v6, %v5364_v41  ;;  %v5407_v34 = vmul.f32 %v12240_v6, %v5365_v22  ;;  %v5420_v62 = vmul.f32 %v5411_v43, %v5399_v38 }
 0xf13   : > { %v5421_v36 = vmul.f32 %v5415_v23, %v5400_v15  ;;  %v5422_v33 = vmul.f32 %v5419_v11, %v5401_v59  ;;  %v5453_v56 = vrot.slane %v16980_v53, 2  ;;  %v5454_v16 = vrot.slane %v16982_v10, 2 }
 0xf14   : > { %v5426_v13 = vmul.f32 %v5411_v43, %v5405_v40  ;;  %v5427_v26 = vmul.f32 %v5415_v23, %v5406_v31  ;;  %v5428_v49 = vmul.f32 %v5419_v11, %v5407_v34  ;;  %v5441_v58 = vadd.f32 %v8526_v25, %v5420_v62 }
 0xf15   : > { %v5442_v21 = vadd.f32 %v8527_v0, %v5421_v36  ;;  %v5443_v8 = vadd.f32 %v8528_v12, %v5422_v33  ;;  %v5455_v9 = vrot.slane %v5446_v20, 2  ;;  %v5468_v48 = vrot.slane %v16980_v53, 4 }
 0xf16   : > { %v5447_v63 = vadd.f32 %v8526_v25, %v5426_v13  ;;  %v5448_v37 = vadd.f32 %v8527_v0, %v5427_v26  ;;  %v5449_v41 = vadd.f32 %v8528_v12, %v5428_v49  ;;  %v5474_v22 = vsel %vm2007_vm2, %v5441_v58, %v5453_v56 }
 0xf17   : > { %v5475_v28 = vsel %vm2007_vm2, %v5442_v21, %v5454_v16  ;;  %v5476_v38 = vsel %vm2007_vm2, %v5443_v8, %v5455_v9  ;;  %v5477_v15 = vsel %vm2011_vm3, %v5474_v22, %v5441_v58  ;;  %v8291_v43 = vrot.slane %v5443_v8, 4 }
 0xf18   : > { %v5462_v23 = vrot.slane %v5447_v63, 2  ;;  %v5463_v11 = vrot.slane %v5448_v37, 2  ;;  %v5464_v59 = vrot.slane %v5449_v41, 2  ;;  %v5478_v6 = vsel %vm2011_vm3, %v5475_v28, %v5442_v21 }
 0xf19   : > { %v5479_v40 = vsel %vm2011_vm3, %v5476_v38, %v5443_v8  ;;  %v5469_v25 = vrot.slane %v16982_v10, 4  ;;  %v5470_v0 = vrot.slane %v5446_v20, 4  ;;  %v8315_v12 = vsel %vm2007_vm2, %v5443_v8, %v8291_v43 }
 0xf1a   : > { %v16996_v31 = vsel %vm2015_vm4, %v5477_v15, %v5462_v23  ;;  %v16999_v34 = vsel %vm2015_vm4, %v5478_v6, %v5463_v11  ;;  %v17002_v62 = vsel %vm2015_vm4, %v5479_v40, %v5464_v59  ;;  %v5483_v36 = vsel %vm2019_vm0, %v5462_v23, %v16980_v53 }
 0xf1b   : > { %v5489_v33 = vadd.f32 %v16999_v34, %v16996_v31  ;;  %v5484_v56 = vsel %vm2019_vm0, %v5463_v11, %v16982_v10  ;;  %v5485_v16 = vsel %vm2019_vm0, %v5464_v59, %v5446_v20  ;;  %v17012_v13 = vsel %vm2023_vm1, %v5483_v36, %v5468_v48 }
 0xf1c   : > { %v17015_v26 = vsel %vm2023_vm1, %v5484_v56, %v5469_v25  ;;  %v17018_v49 = vsel %vm2023_vm1, %v5485_v16, %v5470_v0  ;;  %v5493_v8 = vsel %vm2069_vm6, %v17012_v13, 0.0  ;;  %v8318_v9 = vsel %vm2019_vm0, %v8315_v12, %v5446_v20 }
 0xf1d   : > { %v5490_v63 = vadd.f32 %v5489_v33, %v17002_v62  ;;  %v5494_v37 = vsel %vm2069_vm6, %v17015_v26, 0.0  ;;  %v17027_v41 = vsel %vm2023_vm1, %v8318_v9, %v5470_v0  ;;  %v8289_v28 = vrot.slane %v5441_v58, 4 }
 0xf1e   : > { %v5495_v22 = vadd.f32 %v5494_v37, %v5493_v8  ;;  %v8290_v38 = vrot.slane %v5442_v21, 4  ;;  %v5496_v15 = vsel %vm2069_vm6, %v17018_v49, 0.0 }
 0xf1f   : > { %5491 = vadd.xlane.f32.xlu0 %v5490_v63  ;;  %v8313_v23 = vsel %vm2007_vm2, %v5441_v58, %v8289_v28 }
 0xf20   : > { %v5497_v43 = vadd.f32 %v5496_v15, %v5495_v22  ;;  %v8314_v20 = vsel %vm2007_vm2, %v5442_v21, %v8290_v38  ;;  %v8316_v11 = vsel %vm2019_vm0, %v8313_v23, %v16980_v53 }
 0xf21   : > { %v8317_v59 = vsel %vm2019_vm0, %v8314_v20, %v16982_v10  ;;  %v17038_v6 = vsel %vm2023_vm1, %v8316_v11, %v5468_v48 }
 0xf22   : > { %5498 = vadd.xlane.f32.xlu1 %v5497_v43  ;;  %19248 = vst [vmem:[#allocation35_spill] sm:$0xff] %v17038_v6  ;;  %v17041_v40 = vsel %vm2023_vm1, %v8317_v59, %v5469_v25 }
 0xf23   : > { %19249 = vst [vmem:[#allocation37_spill] sm:$0xff] %v17041_v40 }
 0xfac   : > { %v5492_v0 = vpop.xlane.xlu0 %5491 }
 0xfad   : > { %v5500_v12 = vmul.f32 0.0026041667, %v5492_v0 }
 0xfaf   : > { %v5502_v36 = vsub.f32 %v16996_v31, %v5500_v12  ;;  %v5503_v58 = vsub.f32 %v16999_v34, %v5500_v12  ;;  %v17046_v21 = vsub.f32 %v17002_v62, %v5500_v12  ;;  %v5499_v53 = vpop.xlane.xlu1 %5498 }
 0xfb0   : > { %v5501_v33 = vmul.f32 0.0026041667, %v5499_v53 }
 0xfb1   : > { %v5508_v56 = vmul.f32 %v5502_v36, %v5502_v36  ;;  %v5509_v10 = vmul.f32 %v5503_v58, %v5503_v58  ;;  %v5510_v8 = vmul.f32 %v17046_v21, %v17046_v21 }
 0xfb2   : > { %v5505_v16 = vsub.f32 %v17012_v13, %v5501_v33  ;;  %v5506_v48 = vsub.f32 %v17015_v26, %v5501_v33  ;;  %v17051_v25 = vsub.f32 %v17018_v49, %v5501_v33 }
 0xfb3   : > { %v5514_v9 = vadd.f32 %v5509_v10, %v5508_v56 }
 0xfb4   : > { %v5511_v63 = vmul.f32 %v5505_v16, %v5505_v16  ;;  %v5512_v37 = vmul.f32 %v5506_v48, %v5506_v48  ;;  %v5513_v22 = vmul.f32 %v17051_v25, %v17051_v25 }
 0xfb5   : > { %v5515_v28 = vadd.f32 %v5514_v9, %v5510_v8  ;;  %v19250_v9 = vld [vmem:[#allocation68_spill] sm:$0xff] }
 0xfb6   : > { %v5518_v38 = vsel %vm2069_vm6, %v5511_v63, 0.0  ;;  %v5519_v15 = vsel %vm2069_vm6, %v5512_v37, 0.0  ;;  %v5521_v23 = vsel %vm2069_vm6, %v5513_v22, 0.0  ;;  %v19251_v37 = vld [vmem:[#allocation69_spill] sm:$0xff] }
 0xfb7   : > { %5516 = vadd.xlane.f32.xlu0 %v5515_v28  ;;  %v5520_v43 = vadd.f32 %v5519_v15, %v5518_v38  ;;  %v19252_v15 = vld [vmem:[#allocation70_spill] sm:$0xff] }
 0xfb9   : > { %v5522_v20 = vadd.f32 %v5521_v23, %v5520_v43  ;;  %v19253_v43 = vld [vmem:[#allocation71_spill] sm:$0xff] }
 0xfbb   : > { %5523 = vadd.xlane.f32.xlu1 %v5522_v20 }
0x1044   : > { %v5517_v11 = vpop.xlane.xlu0 %5516 }
0x1045   : > { %v5525_v59 = vmul.f32 0.0026041667, %v5517_v11 }
0x1047   : > { %v5527_v0 = vadd.f32 1e-06, %v5525_v59  ;;  %v19254_v59 = vld [vmem:[#allocation72_spill] sm:$0xff] }
0x1048   : > { %v5524_v12 = vpop.xlane.xlu1 %5523 }
0x1049   : > { %12241 = vrsqrt.f32 %v5527_v0  ;;  %v5526_v53 = vmul.f32 0.0026041667, %v5524_v12  ;;  %v19255_v0 = vld [vmem:[#allocation73_spill] sm:$0xff] }
0x104b   : > { %v5528_v33 = vadd.f32 1e-06, %v5526_v53 }
0x104d   : > { %12243 = vrsqrt.f32 %v5528_v33  ;;  %v19258_v33 = vld [vmem:[#allocation76_spill] sm:$0xff] }
0x1053   : > { %v12242_v56 = vpop.eup %12241 }
0x1054   : > { %v5532_v10 = vmul.f32 %v12242_v56, %v5503_v58  ;;  %v5531_v8 = vmul.f32 %v12242_v56, %v5502_v36 }
0x1056   : > { %v5538_v63 = vmul.f32 %v5532_v10, %v19250_v9  ;;  %v5537_v28 = vmul.f32 %v5531_v8, %v19251_v37  ;;  %v19259_v10 = vld [vmem:[#allocation77_spill] sm:$0xff]  ;;  %v19260_v8 = vld [vmem:[#allocation78_spill] sm:$0xff] }
0x1057   : > { %v12244_v38 = vpop.eup %12243 }
0x1058   : > { %v17063_v22 = vadd.f32 %v5538_v63, %v19252_v15  ;;  %v17066_v23 = vadd.f32 %v5537_v28, %v19253_v43  ;;  %v5535_v20 = vmul.f32 %v12244_v38, %v5506_v48  ;;  %v5534_v11 = vmul.f32 %v12244_v38, %v5505_v16  ;;  %v19256_v16 = vld [vmem:[#allocation74_spill] sm:$0xff]  ;;  %v19257_v48 = vld [vmem:[#allocation75_spill] sm:$0xff]  ;;  %v19264_v28 = vld [vmem:[#allocation81_spill] sm:$0xff] }
0x1059   : > { %v19262_v63 = vmov 0.0  }
0x105a   : > { %5613 = vmatprep.mubr.f32.mxu0 %v17063_v22  ;;  %5767 = vmatprep.mubr.f32.mxu1 %v17063_v22  ;;  %v5541_v58 = vmul.f32 %v5535_v20, %v19250_v9  ;;  %v5540_v36 = vmul.f32 %v5534_v11, %v19251_v37  ;;  %v19261_v9 = vld [vmem:[#allocation79_spill] sm:$0xff]  ;;  %v19263_v37 = vld [vmem:[#allocation80_spill] sm:$0xff]  ;;  %v19268_v11 = vld [vmem:[#allocation85_spill] sm:$0xff] }
0x105b   : > { %5614 = vmatmul.mubr.f32.vlgmr.msra.gmra.mrb[82].mxu0 %v17066_v23  ;;  %5768 = vmatmul.mubr.f32.vlgmr.msra.gmra.mrb[58].mxu1 %v17066_v23  ;;  %v19267_v20 = vld [vmem:[#allocation84_spill] sm:$0xff] }
0x105c   : > { %10740 = vmatpush1.bf16.msra.mxu0 %v19254_v59  ;;  %10836 = vmatpush1.bf16.msra.mxu1 %v19255_v0  ;;  %v17077_v12 = vadd.f32 %v5541_v58, %v19252_v15  ;;  %v17082_v53 = vadd.f32 %v5540_v36, %v19253_v43  ;;  %v19265_v15 = vld [vmem:[#allocation82_spill] sm:$0xff]  ;;  %v19266_v43 = vld [vmem:[#allocation83_spill] sm:$0xff]  ;;  %v19271_v59 = vld [vmem:[#allocation88_spill] sm:$0xff] }
0x105d   : > { %10742 = vmatprep.subr.bf16.mxu0 %v19256_v16  ;;  %10838 = vmatprep.subr.bf16.mxu1 %v19257_v48  ;;  %v19269_v58 = vld [vmem:[#allocation86_spill] sm:$0xff]  ;;  %v19270_v36 = vld [vmem:[#allocation87_spill] sm:$0xff]  ;;  %v19272_v0 = vld [vmem:[#allocation89_spill] sm:$0xff] }
0x105e   : > { %5619 = vmatprep.mubr.f32.mxu0 %v17077_v12  ;;  %5773 = vmatprep.mubr.f32.mxu1 %v17077_v12  ;;  %v19273_v16 = vld [vmem:[#allocation90_spill] sm:$0xff]  ;;  %v19274_v48 = vld [vmem:[#allocation91_spill] sm:$0xff] }
0x105f   : > { %5620 = vmatmul.mubr.f32.gmra.mrb[84].mxu0 %v17082_v53  ;;  %5774 = vmatmul.mubr.f32.gmra.mrb[60].mxu1 %v17082_v53 }
0x1060   : > { %10744 = vmatpush1.bf16.msra.mxu0 %v19258_v33  ;;  %10840 = vmatpush1.bf16.msra.mxu1 %v19259_v10  ;;  %v19275_v33 = vld [vmem:[#allocation92_spill] sm:$0xff]  ;;  %v19276_v10 = vld [vmem:[#allocation93_spill] sm:$0xff] }
0x1061   : > { %10746 = vmatprep.subr.bf16.mxu0 %v19260_v8  ;;  %10842 = vmatprep.subr.bf16.mxu1 %v19261_v9  ;;  %v19277_v8 = vld [vmem:[#allocation94_spill] sm:$0xff]  ;;  %v19278_v9 = vld [vmem:[#allocation95_spill] sm:$0xff] }
0x1062   : > { %5690 = vmatprep.mubr.f32.mxu0 %v19262_v63  ;;  %5844 = vmatprep.mubr.f32.mxu1 %v19262_v63 }
0x1064   : > { %10748 = vmatpush1.bf16.msra.mxu0 %v19263_v37  ;;  %10844 = vmatpush1.bf16.msra.mxu1 %v19264_v28  ;;  %v5533_v37 = vmul.f32 %v12242_v56, %v17046_v21  ;;  %v19279_v28 = vld [vmem:[#allocation96_spill] sm:$0xff]  ;;  %v19288_v56 = vld [vmem:[#allocation105_spill] sm:$0xff] }
0x1065   : > { %10750 = vmatprep.subr.bf16.mxu0 %v19265_v15  ;;  %10846 = vmatprep.subr.bf16.mxu1 %v19266_v43  ;;  %v19280_v15 = vld [vmem:[#allocation97_spill] sm:$0xff]  ;;  %v19281_v43 = vld [vmem:[#allocation99_spill] sm:$0xff]  ;;  %v19287_v21 = vld [vmem:[#allocation104_spill] sm:$0xff] }
0x1068   : > { %10752 = vmatpush1.bf16.msra.mxu0 %v19267_v20  ;;  %10848 = vmatpush1.bf16.msra.mxu1 %v19268_v11  ;;  %v19282_v20 = vld [vmem:[#allocation100_spill] sm:$0xff]  ;;  %v19283_v11 = vld [vmem:[#allocation98_spill] sm:$0xff] }
0x1069   : > { %10754 = vmatprep.subr.bf16.mxu0 %v19269_v58  ;;  %10850 = vmatprep.subr.bf16.mxu1 %v19270_v36  ;;  %v5539_v58 = vmul.f32 %v5533_v37, %v19283_v11  ;;  %v5536_v36 = vmul.f32 %v12244_v38, %v17051_v25  ;;  %v19290_v25 = vld [vmem:[#allocation107_spill] sm:$0xff]  ;;  %v19293_v37 = vld [vmem:[#allocation110_spill] sm:$0xff] }
0x106c   : > { %10756 = vmatpush1.bf16.msra.mxu0 %v19271_v59  ;;  %10852 = vmatpush1.bf16.msra.mxu1 %v19272_v0  ;;  %v19284_v59 = vld [vmem:[#allocation102_spill] sm:$0xff]  ;;  %v19285_v0 = vld [vmem:[#allocation103_spill] sm:$0xff] }
0x106d   : > { %10758 = vmatprep.subr.bf16.mxu0 %v19273_v16  ;;  %10854 = vmatprep.subr.bf16.mxu1 %v19274_v48  ;;  %v19286_v16 = vld [vmem:[#allocation101_spill] sm:$0xff] }
0x106e   : > { %v17120_v48 = vadd.f32 %v5539_v58, %v19286_v16  ;;  %v19299_v58 = vld [vmem:[#allocation116_spill] sm:$0xff] }
0x1070   : > { %10760 = vmatpush1.bf16.msra.mxu0 %v19275_v33  ;;  %10856 = vmatpush1.bf16.msra.mxu1 %v19276_v10  ;;  %v5542_v33 = vmul.f32 %v5536_v36, %v19283_v11  ;;  %v19289_v10 = vld [vmem:[#allocation106_spill] sm:$0xff]  ;;  %v19298_v11 = vld [vmem:[#allocation115_spill] sm:$0xff]  ;;  %v19300_v36 = vld [vmem:[#allocation117_spill] sm:$0xff] }
0x1071   : > { %10762 = vmatprep.subr.bf16.mxu0 %v19277_v8  ;;  %10858 = vmatprep.subr.bf16.mxu1 %v19278_v9  ;;  %v19291_v8 = vld [vmem:[#allocation108_spill] sm:$0xff]  ;;  %v19292_v9 = vld [vmem:[#allocation109_spill] sm:$0xff] }
0x1072   : > { %v17132_v38 = vadd.f32 %v5542_v33, %v19286_v16  ;;  %v19303_v16 = vld [vmem:[#allocation120_spill] sm:$0xff]  ;;  %v19306_v33 = vld [vmem:[#allocation123_spill] sm:$0xff] }
0x1074   : > { %10764 = vmatpush1.bf16.msra.mxu0 %v19279_v28  ;;  %10860 = vmatpush1.bf16.msra.mxu1 %v19280_v15  ;;  %v19294_v28 = vld [vmem:[#allocation111_spill] sm:$0xff]  ;;  %v19295_v15 = vld [vmem:[#allocation112_spill] sm:$0xff] }
0x1075   : > { %10766 = vmatprep.subr.bf16.mxu0 %v19281_v43  ;;  %10862 = vmatprep.subr.bf16.mxu1 %v19282_v20  ;;  %v19296_v43 = vld [vmem:[#allocation113_spill] sm:$0xff]  ;;  %v19297_v20 = vld [vmem:[#allocation114_spill] sm:$0xff] }
0x1078   : > { %10768 = vmatpush1.bf16.msra.mxu0 %v19284_v59  ;;  %10864 = vmatpush1.bf16.msra.mxu1 %v19285_v0  ;;  %v19301_v59 = vld [vmem:[#allocation118_spill] sm:$0xff]  ;;  %v19302_v0 = vld [vmem:[#allocation119_spill] sm:$0xff] }
0x1079   : > { %10866 = vmatprep.subr.bf16.mxu0 %v19287_v21  ;;  %10962 = vmatprep.subr.bf16.mxu1 %v19288_v56  ;;  %v19304_v21 = vld [vmem:[#allocation121_spill] sm:$0xff]  ;;  %v19305_v56 = vld [vmem:[#allocation122_spill] sm:$0xff] }
0x107b   : > { %5691 = vmatmul.mubr.f32.vlgmr.msra.gmra.mrb[82].mxu0 %v17120_v48  ;;  %5845 = vmatmul.mubr.f32.vlgmr.msra.gmra.mrb[58].mxu1 %v17120_v48 }
0x107c   : > { %10868 = vmatpush1.bf16.msra.mxu0 %v19289_v10  ;;  %10964 = vmatpush1.bf16.msra.mxu1 %v19290_v25  ;;  %v19307_v10 = vld [vmem:[#allocation124_spill] sm:$0xff]  ;;  %v19308_v25 = vld [vmem:[#allocation125_spill] sm:$0xff] }
0x107d   : > { %5696 = vmatprep.mubr.f32.mxu0 %v19262_v63  ;;  %5850 = vmatprep.mubr.f32.mxu1 %v19262_v63 }
0x107e   : > { %10870 = vmatprep.subr.bf16.mxu0 %v19291_v8  ;;  %10966 = vmatprep.subr.bf16.mxu1 %v19292_v9  ;;  %v19309_v8 = vld [vmem:[#allocation126_spill] sm:$0xff]  ;;  %v19310_v9 = vld [vmem:[#allocation127_spill] sm:$0xff] }
0x107f   : > { %5697 = vmatmul.mubr.f32.gmra.mrb[84].mxu0 %v17132_v38  ;;  %5851 = vmatmul.mubr.f32.gmra.mrb[60].mxu1 %v17132_v38 }
0x1080   : > { %10872 = vmatpush1.bf16.msra.mxu0 %v19293_v37  ;;  %5921 = vmatprep.mubr.f32.mxu0 %v17063_v22  ;;  %v19311_v37 = vld [vmem:[#allocation128_spill] sm:$0xff] }
0x1081   : > { %10968 = vmatpush1.bf16.msra.mxu1 %v19294_v28  ;;  %6075 = vmatprep.mubr.f32.mxu1 %v17063_v22  ;;  %v19312_v28 = vld [vmem:[#allocation129_spill] sm:$0xff] }
0x1082   : > { %10874 = vmatprep.subr.bf16.mxu0 %v19295_v15  ;;  %10970 = vmatprep.subr.bf16.mxu1 %v19296_v43  ;;  %v19313_v15 = vld [vmem:[#allocation130_spill] sm:$0xff]  ;;  %v19314_v43 = vld [vmem:[#allocation131_spill] sm:$0xff] }
0x1084   : > { %10876 = vmatpush1.bf16.msra.mxu0 %v19297_v20  ;;  %v19315_v20 = vld [vmem:[#allocation132_spill] sm:$0xff] }
0x1085   : > { %10972 = vmatpush1.bf16.msra.mxu1 %v19298_v11  ;;  %10878 = vmatprep.subr.bf16.mxu0 %v19299_v58  ;;  %v19316_v11 = vld [vmem:[#allocation133_spill] sm:$0xff]  ;;  %v19317_v58 = vld [vmem:[#allocation134_spill] sm:$0xff] }
0x1086   : > { %10974 = vmatprep.subr.bf16.mxu1 %v19300_v36  ;;  %v19318_v36 = vld [vmem:[#allocation135_spill] sm:$0xff] }
0x1088   : > { %10880 = vmatpush1.bf16.msra.mxu0 %v19301_v59  ;;  %v19319_v59 = vld [vmem:[#allocation136_spill] sm:$0xff] }
0x1089   : > { %10976 = vmatpush1.bf16.msra.mxu1 %v19302_v0  ;;  %10882 = vmatprep.subr.bf16.mxu0 %v19303_v16  ;;  %v19320_v0 = vld [vmem:[#allocation137_spill] sm:$0xff]  ;;  %v19321_v16 = vld [vmem:[#allocation138_spill] sm:$0xff] }
0x108a   : > { %10978 = vmatprep.subr.bf16.mxu1 %v19304_v21  ;;  %v19322_v21 = vld [vmem:[#allocation139_spill] sm:$0xff] }
0x108c   : > { %10884 = vmatpush1.bf16.msra.mxu0 %v19305_v56  ;;  %v19323_v56 = vld [vmem:[#allocation140_spill] sm:$0xff] }
0x108d   : > { %10980 = vmatpush1.bf16.msra.mxu1 %v19306_v33  ;;  %10886 = vmatprep.subr.bf16.mxu0 %v19307_v10  ;;  %v19324_v33 = vld [vmem:[#allocation141_spill] sm:$0xff]  ;;  %v19325_v10 = vld [vmem:[#allocation142_spill] sm:$0xff] }
0x108e   : > { %10982 = vmatprep.subr.bf16.mxu1 %v19308_v25  ;;  %v19326_v25 = vld [vmem:[#allocation143_spill] sm:$0xff] }
0x1090   : > { %10888 = vmatpush1.bf16.msra.mxu0 %v19309_v8  ;;  %v19327_v8 = vld [vmem:[#allocation144_spill] sm:$0xff] }
0x1091   : > { %10984 = vmatpush1.bf16.msra.mxu1 %v19310_v9  ;;  %10890 = vmatprep.subr.bf16.mxu0 %v19311_v37  ;;  %v19328_v9 = vld [vmem:[#allocation145_spill] sm:$0xff]  ;;  %v19329_v37 = vld [vmem:[#allocation146_spill] sm:$0xff] }
0x1092   : > { %10986 = vmatprep.subr.bf16.mxu1 %v19312_v28  ;;  %v19330_v28 = vld [vmem:[#allocation147_spill] sm:$0xff] }
0x1094   : > { %10892 = vmatpush1.bf16.msra.mxu0 %v19313_v15  ;;  %v19331_v15 = vld [vmem:[#allocation148_spill] sm:$0xff] }
0x1095   : > { %10988 = vmatpush1.bf16.msra.mxu1 %v19314_v43  ;;  %10894 = vmatprep.subr.bf16.mxu0 %v19315_v20  ;;  %v19332_v43 = vld [vmem:[#allocation149_spill] sm:$0xff]  ;;  %v19333_v20 = vld [vmem:[#allocation150_spill] sm:$0xff] }
0x1096   : > { %10990 = vmatprep.subr.bf16.mxu1 %v19316_v11  ;;  %v19334_v11 = vld [vmem:[#allocation151_spill] sm:$0xff] }
0x1098   : > { %10896 = vmatpush1.bf16.msra.mxu0 %v19317_v58  ;;  %v19335_v58 = vld [vmem:[#allocation152_spill] sm:$0xff] }
0x1099   : > { %10992 = vmatpush1.bf16.msra.mxu1 %v19318_v36  ;;  %10898 = vmatprep.subr.bf16.mxu0 %v19319_v59  ;;  %v19336_v36 = vld [vmem:[#allocation153_spill] sm:$0xff]  ;;  %v19337_v59 = vld [vmem:[#allocation154_spill] sm:$0xff] }
0x109a   : > { %10994 = vmatprep.subr.bf16.mxu1 %v19320_v0  ;;  %v19338_v0 = vld [vmem:[#allocation155_spill] sm:$0xff] }
0x109c   : > { %10900 = vmatpush1.bf16.msra.mxu0 %v19321_v16  ;;  %v19339_v16 = vld [vmem:[#allocation156_spill] sm:$0xff] }
0x109d   : > { %10996 = vmatpush1.bf16.msra.mxu1 %v19322_v21  ;;  %10902 = vmatprep.subr.bf16.mxu0 %v19323_v56  ;;  %v19340_v21 = vld [vmem:[#allocation157_spill] sm:$0xff]  ;;  %v19341_v56 = vld [vmem:[#allocation158_spill] sm:$0xff] }
0x109e   : > { %10998 = vmatprep.subr.bf16.mxu1 %v19324_v33  ;;  %v19342_v33 = vld [vmem:[#allocation159_spill] sm:$0xff] }
0x10a0   : > { %10904 = vmatpush1.bf16.msra.mxu0 %v19325_v10  ;;  %v19343_v10 = vld [vmem:[#allocation160_spill] sm:$0xff] }
0x10a1   : > { %11000 = vmatpush1.bf16.msra.mxu1 %v19326_v25  ;;  %10906 = vmatprep.subr.bf16.mxu0 %v19327_v8  ;;  %v19344_v25 = vld [vmem:[#allocation161_spill] sm:$0xff]  ;;  %v19345_v8 = vld [vmem:[#allocation162_spill] sm:$0xff] }
0x10a2   : > { %11002 = vmatprep.subr.bf16.mxu1 %v19328_v9  ;;  %v19346_v9 = vld [vmem:[#allocation163_spill] sm:$0xff] }
0x10a4   : > { %10908 = vmatpush1.bf16.msra.mxu0 %v19329_v37  ;;  %v19347_v37 = vld [vmem:[#allocation164_spill] sm:$0xff] }
0x10a5   : > { %11004 = vmatpush1.bf16.msra.mxu1 %v19330_v28  ;;  %10910 = vmatprep.subr.bf16.mxu0 %v19331_v15  ;;  %v19348_v28 = vld [vmem:[#allocation165_spill] sm:$0xff]  ;;  %v19349_v15 = vld [vmem:[#allocation166_spill] sm:$0xff] }
0x10a6   : > { %11006 = vmatprep.subr.bf16.mxu1 %v19332_v43  ;;  %v19350_v43 = vld [vmem:[#allocation167_spill] sm:$0xff] }
0x10a8   : > { %10912 = vmatpush1.bf16.msra.mxu0 %v19333_v20  ;;  %v19351_v20 = vld [vmem:[#allocation168_spill] sm:$0xff] }
0x10a9   : > { %11008 = vmatpush1.bf16.msra.mxu1 %v19334_v11  ;;  %10914 = vmatprep.subr.bf16.mxu0 %v19335_v58  ;;  %v19352_v11 = vld [vmem:[#allocation169_spill] sm:$0xff]  ;;  %v19353_v58 = vld [vmem:[#allocation170_spill] sm:$0xff] }
0x10aa   : > { %11010 = vmatprep.subr.bf16.mxu1 %v19336_v36  ;;  %v19354_v36 = vld [vmem:[#allocation171_spill] sm:$0xff] }
0x10ac   : > { %10916 = vmatpush1.bf16.msra.mxu0 %v19337_v59  ;;  %v19355_v59 = vld [vmem:[#allocation172_spill] sm:$0xff] }
0x10ad   : > { %11012 = vmatpush1.bf16.msra.mxu1 %v19338_v0  ;;  %10918 = vmatprep.subr.bf16.mxu0 %v19339_v16  ;;  %v19356_v0 = vld [vmem:[#allocation173_spill] sm:$0xff]  ;;  %v19357_v16 = vld [vmem:[#allocation174_spill] sm:$0xff] }
0x10ae   : > { %11014 = vmatprep.subr.bf16.mxu1 %v19340_v21  ;;  %v19358_v21 = vld [vmem:[#allocation175_spill] sm:$0xff] }
0x10b0   : > { %10920 = vmatpush1.bf16.msra.mxu0 %v19341_v56  ;;  %v19359_v56 = vld [vmem:[#allocation176_spill] sm:$0xff] }
0x10b1   : > { %11016 = vmatpush1.bf16.msra.mxu1 %v19342_v33  ;;  %10922 = vmatprep.subr.bf16.mxu0 %v19343_v10  ;;  %v19360_v33 = vld [vmem:[#allocation177_spill] sm:$0xff]  ;;  %v19361_v10 = vld [vmem:[#allocation178_spill] sm:$0xff] }
0x10b2   : > { %11018 = vmatprep.subr.bf16.mxu1 %v19344_v25  ;;  %v19362_v25 = vld [vmem:[#allocation179_spill] sm:$0xff] }
0x10b4   : > { %10924 = vmatpush1.bf16.msra.mxu0 %v19345_v8  ;;  %v19363_v8 = vld [vmem:[#allocation180_spill] sm:$0xff] }
0x10b5   : > { %11020 = vmatpush1.bf16.msra.mxu1 %v19346_v9  ;;  %10926 = vmatprep.subr.bf16.mxu0 %v19347_v37  ;;  %v19364_v9 = vld [vmem:[#allocation181_spill] sm:$0xff]  ;;  %v19365_v37 = vld [vmem:[#allocation182_spill] sm:$0xff] }
0x10b6   : > { %11022 = vmatprep.subr.bf16.mxu1 %v19348_v28  ;;  %v19366_v28 = vld [vmem:[#allocation183_spill] sm:$0xff] }
0x10b8   : > { %10928 = vmatpush1.bf16.msra.mxu0 %v19349_v15  ;;  %v19367_v15 = vld [vmem:[#allocation184_spill] sm:$0xff] }
0x10b9   : > { %11024 = vmatpush1.bf16.msra.mxu1 %v19350_v43  ;;  %10930 = vmatprep.subr.bf16.mxu0 %v19351_v20  ;;  %v19368_v43 = vld [vmem:[#allocation185_spill] sm:$0xff]  ;;  %v19369_v20 = vld [vmem:[#allocation186_spill] sm:$0xff] }
0x10ba   : > { %11026 = vmatprep.subr.bf16.mxu1 %v19352_v11  ;;  %v19370_v11 = vld [vmem:[#allocation187_spill] sm:$0xff] }
0x10bb   : > { %5922 = vmatmul.mubr.f32.vlgmr.msra.gmra.mrb[86].mxu0 %v17066_v23 }
0x10bc   : > { %6076 = vmatmul.mubr.f32.vlgmr.msra.gmra.mrb[62].mxu1 %v17066_v23  ;;  %5927 = vmatprep.mubr.f32.mxu0 %v17077_v12 }
0x10bd   : > { %10932 = vmatpush1.bf16.msra.mxu0 %v19353_v58  ;;  %6081 = vmatprep.mubr.f32.mxu1 %v17077_v12  ;;  %v19371_v58 = vld [vmem:[#allocation188_spill] sm:$0xff] }
0x10be   : > { %11028 = vmatpush1.bf16.msra.mxu1 %v19354_v36  ;;  %10934 = vmatprep.subr.bf16.mxu0 %v19355_v59  ;;  %v19372_v36 = vld [vmem:[#allocation189_spill] sm:$0xff]  ;;  %v19373_v59 = vld [vmem:[#allocation190_spill] sm:$0xff] }
0x10bf   : > { %5928 = vmatmul.mubr.f32.gmra.mrb[88].mxu0 %v17082_v53  ;;  %11030 = vmatprep.subr.bf16.mxu1 %v19356_v0  ;;  %v19374_v0 = vld [vmem:[#allocation191_spill] sm:$0xff] }
0x10c0   : > { %6082 = vmatmul.mubr.f32.gmra.mrb[64].mxu1 %v17082_v53  ;;  %5998 = vmatprep.mubr.f32.mxu0 %v19262_v63 }
0x10c1   : > { %10936 = vmatpush1.bf16.msra.mxu0 %v19357_v16  ;;  %6152 = vmatprep.mubr.f32.mxu1 %v19262_v63  ;;  %v19375_v16 = vld [vmem:[#allocation192_spill] sm:$0xff] }
0x10c2   : > { %11032 = vmatpush1.bf16.msra.mxu1 %v19358_v21  ;;  %10938 = vmatprep.subr.bf16.mxu0 %v19359_v56  ;;  %v19376_v21 = vld [vmem:[#allocation193_spill] sm:$0xff]  ;;  %v19377_v56 = vld [vmem:[#allocation194_spill] sm:$0xff] }
0x10c3   : > { %11034 = vmatprep.subr.bf16.mxu1 %v19360_v33  ;;  %v19378_v33 = vld [vmem:[#allocation195_spill] sm:$0xff] }
0x10c5   : > { %10940 = vmatpush1.bf16.msra.mxu0 %v19361_v10  ;;  %v19379_v10 = vld [vmem:[#allocation196_spill] sm:$0xff] }
0x10c6   : > { %11036 = vmatpush1.bf16.msra.mxu1 %v19362_v25  ;;  %10942 = vmatprep.subr.bf16.mxu0 %v19363_v8  ;;  %v19380_v25 = vld [vmem:[#allocation197_spill] sm:$0xff]  ;;  %v19381_v8 = vld [vmem:[#allocation198_spill] sm:$0xff] }
0x10c7   : > { %11038 = vmatprep.subr.bf16.mxu1 %v19364_v9  ;;  %v19382_v9 = vld [vmem:[#allocation199_spill] sm:$0xff] }
0x10c9   : > { %10944 = vmatpush1.bf16.msra.mxu0 %v19365_v37  ;;  %v19383_v37 = vld [vmem:[#allocation200_spill] sm:$0xff] }
0x10ca   : > { %11040 = vmatpush1.bf16.msra.mxu1 %v19366_v28  ;;  %10946 = vmatprep.subr.bf16.mxu0 %v19367_v15  ;;  %v19384_v28 = vld [vmem:[#allocation202_spill] sm:$0xff]  ;;  %v19385_v15 = vld [vmem:[#allocation201_spill] sm:$0xff] }
0x10cb   : > { %11042 = vmatprep.subr.bf16.mxu1 %v19368_v43  ;;  %v19386_v43 = vld [vmem:[#allocation203_spill] sm:$0xff] }
0x10cd   : > { %10948 = vmatpush1.bf16.msra.mxu0 %v19369_v20  ;;  %v19387_v20 = vld [vmem:[#allocation205_spill] sm:$0xff] }
0x10ce   : > { %11044 = vmatpush1.bf16.msra.mxu1 %v19370_v11  ;;  %10950 = vmatprep.subr.bf16.mxu0 %v19371_v58  ;;  %v19388_v11 = vld [vmem:[#allocation204_spill] sm:$0xff]  ;;  %v19389_v58 = vld [vmem:[#allocation206_spill] sm:$0xff] }
0x10cf   : > { %11046 = vmatprep.subr.bf16.mxu1 %v19372_v36  ;;  %v19390_v36 = vld [vmem:[#allocation208_spill] sm:$0xff] }
0x10d1   : > { %10952 = vmatpush1.bf16.msra.mxu0 %v19373_v59  ;;  %v19391_v59 = vld [vmem:[#allocation207_spill] sm:$0xff] }
0x10d2   : > { %11048 = vmatpush1.bf16.msra.mxu1 %v19374_v0  ;;  %10954 = vmatprep.subr.bf16.mxu0 %v19375_v16  ;;  %v19392_v0 = vld [vmem:[#allocation209_spill] sm:$0xff]  ;;  %v19393_v16 = vld [vmem:[#allocation211_spill] sm:$0xff] }
0x10d3   : > { %11050 = vmatprep.subr.bf16.mxu1 %v19376_v21  ;;  %v19394_v21 = vld [vmem:[#allocation210_spill] sm:$0xff] }
0x10d5   : > { %10956 = vmatpush1.bf16.msra.mxu0 %v19377_v56  ;;  %v19396_v56 = vld [vmem:[#allocation214_spill] sm:$0xff] }
0x10d6   : > { %11052 = vmatpush1.bf16.msra.mxu1 %v19378_v33  ;;  %10958 = vmatprep.subr.bf16.mxu0 %v19379_v10  ;;  %v19398_v33 = vld [vmem:[#allocation215_spill] sm:$0xff]  ;;  %v19399_v10 = vld [vmem:[#allocation217_spill] sm:$0xff] }
0x10d7   : > { %11054 = vmatprep.subr.bf16.mxu1 %v19380_v25  ;;  %v19400_v25 = vld [vmem:[#allocation216_spill] sm:$0xff] }
0x10d9   : > { %10960 = vmatpush1.bf16.msra.mxu0 %v19381_v8  ;;  %v19401_v8 = vld [vmem:[#allocation218_spill] sm:$0xff] }
0x10da   : > { %11056 = vmatpush1.bf16.msra.mxu1 %v19382_v9  ;;  %11058 = vmatprep.subr.bf16.mxu0 %v19383_v37  ;;  %v19402_v9 = vld [vmem:[#allocation220_spill] sm:$0xff]  ;;  %v19403_v37 = vld [vmem:[#allocation219_spill] sm:$0xff] }
0x10db   : > { %11090 = vmatprep.subr.bf16.mxu1 %v19384_v28 }
0x10dc   : > { %5999 = vmatmul.mubr.f32.vlgmr.msra.gmra.mrb[86].mxu0 %v17120_v48 }
0x10dd   : > { %6153 = vmatmul.mubr.f32.vlgmr.msra.gmra.mrb[62].mxu1 %v17120_v48  ;;  %11060 = vmatpush3.bf16.msra.mxu0 %v19385_v15  ;;  %v19405_v15 = vld [vmem:[#allocation223_spill] sm:$0xff] }
0x10de   : > { %11092 = vmatpush3.bf16.msra.mxu1 %v19384_v28  ;;  %6004 = vmatprep.mubr.f32.mxu0 %v19262_v63  ;;  %v19404_v28 = vld [vmem:[#allocation221_spill] sm:$0xff] }
0x10df   : > { %6158 = vmatprep.mubr.f32.mxu1 %v19262_v63  ;;  %11062 = vmatprep.subr.bf16.mxu0 %v19386_v43  ;;  %v19406_v43 = vld [vmem:[#allocation222_spill] sm:$0xff] }
0x10e0   : > { %6005 = vmatmul.mubr.f32.gmra.mrb[88].mxu0 %v17132_v38  ;;  %11094 = vmatprep.subr.bf16.mxu1 %v19387_v20 }
0x10e1   : > { %6159 = vmatmul.mubr.f32.gmra.mrb[64].mxu1 %v17132_v38  ;;  %11064 = vmatpush3.bf16.msra.mxu0 %v19388_v11 }
0x10e2   : > { %6229 = vmatprep.mubr.f32.mxu0 %v17063_v22  ;;  %11096 = vmatpush3.bf16.msra.mxu1 %v19387_v20  ;;  %v19395_v22 = vld [vmem:[#allocation212_spill] sm:$0xff] }
0x10e3   : > { %9311 = vmatprep.mubr.f32.mxu1 %v17120_v48  ;;  %11066 = vmatprep.subr.bf16.mxu0 %v19389_v58  ;;  %v19397_v48 = vld [vmem:[#allocation213_spill] sm:$0xff] }
0x10e4   : > { %11098 = vmatprep.subr.bf16.mxu1 %v19390_v36  ;;  %v19407_v58 = vld [vmem:[#allocation225_spill] sm:$0xff] }
0x10e5   : > { %11068 = vmatpush3.bf16.msra.mxu0 %v19391_v59 }
0x10e6   : > { %11100 = vmatpush3.bf16.msra.mxu1 %v19390_v36  ;;  %11070 = vmatprep.subr.bf16.mxu0 %v19392_v0 }
0x10e7   : > { %11102 = vmatprep.subr.bf16.mxu1 %v19393_v16 }
0x10e9   : > { %11072 = vmatpush3.bf16.msra.mxu0 %v19394_v21 }
0x10ea   : > { %11104 = vmatpush3.bf16.msra.mxu1 %v19393_v16  ;;  %11074 = vmatprep.subr.bf16.mxu0 %v19395_v22 }
0x10eb   : > { %11106 = vmatprep.subr.bf16.mxu1 %v19396_v56 }
0x10ed   : > { %11076 = vmatpush3.bf16.msra.mxu0 %v19397_v48 }
0x10ee   : > { %11108 = vmatpush3.bf16.msra.mxu1 %v19396_v56  ;;  %11078 = vmatprep.subr.bf16.mxu0 %v19398_v33 }
0x10ef   : > { %11110 = vmatprep.subr.bf16.mxu1 %v19399_v10 }
0x10f1   : > { %11080 = vmatpush3.bf16.msra.mxu0 %v19400_v25 }
0x10f2   : > { %11112 = vmatpush3.bf16.msra.mxu1 %v19399_v10  ;;  %11082 = vmatprep.subr.bf16.mxu0 %v19401_v8 }
0x10f3   : > { %11114 = vmatprep.subr.bf16.mxu1 %v19402_v9 }
0x10f5   : > { %11084 = vmatpush3.bf16.msra.mxu0 %v19403_v37  ;;  %v19409_v37 = vld [vmem:[#allocation226_spill] sm:$0xff] }
0x10f6   : > { %11116 = vmatpush3.bf16.msra.mxu1 %v19402_v9  ;;  %11086 = vmatprep.subr.bf16.mxu0 %v19404_v28 }
0x10f7   : > { %11118 = vmatprep.subr.bf16.mxu1 %v19405_v15 }
0x10f9   : > { %11088 = vmatpush3.bf16.msra.mxu0 %v19406_v43 }
0x10fa   : > { %11120 = vmatpush3.bf16.msra.mxu1 %v19405_v15 }
0x10fc   : > { %6230 = vmatmul.mubr.f32.vlgmr.msra.gmra.mrb[90].mxu0 %v17066_v23 }
0x10fd   : > { %9312 = vmatmul.mubr.f32.vlgmr.msra.gmra.mrb[66].mxu1 %v17132_v38  ;;  %6234 = vmatprep.mubr.f32.mxu0 %v17077_v12  ;;  %v19408_v38 = vld [vmem:[#allocation224_spill] sm:$0xff] }
0x1100   : > { %6235 = vmatmul.mubr.f32.gmra.mrb[92].mxu0 %v17082_v53 }
0x114e   : > { %v5692_v20 = vpop.f32.mrb[82].mxu0  ;;  %v17282_v11 = vpop.f32.mrb[58].mxu1 }
0x114f   : > { %v11929_v36 = vadd.f32 %v5692_v20, %v19407_v58  ;;  %v17285_v59 = vpop.f32.mrb[83].mxu0  ;;  %v5848_v0 = vpop.f32.mrb[59].mxu1 }
0x1150   : > { %v11934_v56 = vadd.f32 %v5848_v0, %v19408_v38 }
0x1151   : > { %9318 = vmatprep.mubr.f32.mxu0 %v11929_v36  ;;  %v19410_v36 = vld [vmem:[#allocation227_spill] sm:$0xff] }
0x1152   : > { %v5698_v16 = vpop.f32.mrb[84].mxu0  ;;  %v17287_v21 = vpop.f32.mrb[60].mxu1 }
0x1153   : > { %v17289_v22 = vpop.f32.mrb[85].mxu0  ;;  %v5854_v23 = vpop.f32.mrb[61].mxu1  ;;  %v11931_v48 = vadd.f32 %v5698_v16, %v19407_v58 }
0x1154   : > { %v11936_v12 = vadd.f32 %v5854_v23, %v19408_v38  ;;  %v19411_v23 = vld [vmem:[#allocation228_spill] sm:$0xff] }
0x1156   : > { %v11121_v53 = vpack.c.bf16 %v11936_v12, %v11934_v56  ;;  %v19412_v12 = vld [vmem:[#allocation229_spill] sm:$0xff] }
0x1158   : > { %11122 = vmatprep.subr.bf16.mxu0 %v11121_v53 }
0x1159   : > { %11124 = vmatpush3.bf16.xpose.msra.mxu0 %v11121_v53 }
0x1160   : > { %9319 = vmatmul.mubr.f32.vlgmr.msra.gmra.mrb[94].mxu0 %v11931_v48 }
0x11af   : > { %v6000_v33 = vpop.f32.mrb[86].mxu0 }
0x11b0   : > { %v6154_v10 = vpop.f32.mrb[62].mxu1  ;;  %v6002_v25 = vpop.f32.mrb[87].mxu0  ;;  %v11937_v28 = vadd.f32 %v6000_v33, %v19409_v37 }
0x11b1   : > { %v6156_v8 = vpop.f32.mrb[63].mxu1  ;;  %v11941_v0 = vadd.f32 %v6154_v10, %v19410_v36  ;;  %v11938_v38 = vadd.f32 %v6002_v25, %v19411_v23 }
0x11b2   : > { %v11942_v53 = vadd.f32 %v6156_v8, %v19412_v12 }
0x11b3   : > { %v6006_v9 = vpop.f32.mrb[88].mxu0 }
0x11b4   : > { %v11939_v15 = vadd.f32 %v6006_v9, %v19409_v37  ;;  %v6160_v43 = vpop.f32.mrb[64].mxu1  ;;  %v6008_v20 = vpop.f32.mrb[89].mxu0 }
0x11b5   : > { %v11943_v56 = vadd.f32 %v6160_v43, %v19410_v36  ;;  %v11940_v58 = vadd.f32 %v6008_v20, %v19411_v23  ;;  %v6162_v16 = vpop.f32.mrb[65].mxu1  ;;  %v19415_v20 = vld [vmem:[#allocation230_spill] sm:$0xff] }
0x11b6   : > { %v17301_v48 = vpack.c.bf16 %v11939_v15, %v11937_v28  ;;  %v11944_v40 = vadd.f32 %v6162_v16, %v19412_v12  ;;  %v19416_v12 = vld [vmem:[#allocation233_spill] sm:$0xff] }
0x11b7   : > { %v11125_v10 = vpack.c.bf16 %v11943_v56, %v11941_v0  ;;  %v17309_v9 = vpack.c.bf16 %v11940_v58, %v11938_v38 }
0x11b8   : > { %v17311_v25 = vpack.c.bf16 %v11944_v40, %v11942_v53 }
0x11b9   : > { %11127 = vmatprep.subr.msk.bf16.mxu0 %vm17305_vm11, %v11125_v10 }
0x11ba   : > { %11130 = vmatpush3.bf16.msk.msra.mxu0 %vm17305_vm11, %v11125_v10  ;;  %v17325_v10 = vld [vmem:[#allocation4 + $0x8] sm:$0xf] }
0x11bb   : > { %11132 = vmatprep.subr.bf16.mxu0 %v17301_v48 }
0x11cf   : > { %v8889_v8 = vpop.f32.mrb[90].mxu0 }
0x11d0   : > { %v9313_v37 = vpop.f32.mrb[66].mxu1  ;;  %v8890_v28 = vpop.f32.mrb[91].mxu0 }
0x11d1   : > { %v8891_v15 = vadd.f32 %v8890_v28, %v8889_v8  ;;  %v6306_v43 = vpop.f32.mrb[67].mxu1 }
0x11d3   : > { %v6232_v36 = vadd.f32 %v8891_v15, %v19415_v20  ;;  %v8892_v0 = vpop.f32.mrb[92].mxu0  ;;  %v17327_v15 = vld [vmem:[#allocation4] sm:$0xff] }
0x11d4   : > { %v8893_v23 = vpop.f32.mrb[93].mxu0 }
0x11d5   : > { %v6307_v38 = vadd.f32 %v6306_v43, %v6232_v36  ;;  %v8894_v40 = vadd.f32 %v8893_v23, %v8892_v0 }
0x11d7   : > { %v6237_v56 = vadd.f32 %v8894_v40, %v19415_v20 }
0x11d9   : > { %v6312_v58 = vadd.f32 %v9313_v37, %v6237_v56 }
0x11db   : > { %v11145_v16 = vpack.c.bf16 %v6312_v58, %v6307_v38 }
0x11dd   : > { %11147 = vmatprep.subr.msk.bf16.mxu1 %vm17305_vm11, %v11145_v16 }
0x11de   : > { %11150 = vmatpush3.bf16.msk.msra.mxu1 %vm17305_vm11, %v11145_v16 }
0x11df   : > { %11152 = vmatprep.subr.bf16.mxu1 %v19416_v12 }
0x1233   : > { %v9320_v53 = vpop.f32.mrb[94].mxu0 }
0x1234   : > { %v6391_v8 = vmul.f32 0.088388346, %v9320_v53  ;;  %v6381_v28 = vpop.f32.mrb[95].mxu0 }
0x1235   : > { %v6390_v43 = vmul.f32 0.088388346, %v6381_v28 }
0x1236   : > { %v6393_v37 = vadd.f32 %v6391_v8, %v17325_v10 }
0x1237   : > { %v6392_v20 = vadd.f32 %v6390_v43, %v17327_v15 }
0x1238   : > { %v6399_v36 = vsel %vm6398_vm12, %v6393_v37, -inf }
0x1239   : > { %6400 = vmax.xlane.f32.xlu1 %v6399_v36  ;;  %v6395_v0 = vsel %vm6394_vm13, %v6392_v20, -inf }
0x123a   : > { %6396 = vmax.xlane.f32.xlu0 %v6395_v0 }
0x12c6   : > { %v6401_v23 = vpop.xlane.xlu1 %6400 }
0x12c7   : > { %v6403_v38 = vsub.f32 %v6393_v37, %v6401_v23  ;;  %v6397_v40 = vpop.xlane.xlu0 %6396 }
0x12c8   : > { %v6402_v56 = vsub.f32 %v6392_v20, %v6397_v40 }
0x12c9   : > { %v6406_v58 = vmul.f32 1.442695, %v6403_v38  ;;  %v19417_v38 = vld [vmem:[#allocation231_spill] sm:$0xff] }
0x12ca   : > { %v6404_v16 = vmul.f32 1.442695, %v6402_v56  ;;  %v11930_v40 = vadd.f32 %v17285_v59, %v19417_v38  ;;  %v11932_v56 = vadd.f32 %v17289_v22, %v19417_v38 }
0x12cb   : > { %12245 = vpow2.f32 %v6406_v58 }
0x12cc   : > { %12247 = vpow2.f32 %v6404_v16 }
0x12d5   : > { %v12246_v12 = vpop.eup %12245 }
0x12d6   : > { %v12248_v53 = vpop.eup %12247  ;;  %v6411_v8 = vsel %vm6398_vm12, %v12246_v12, 0.0 }
0x12d7   : > { %6412 = vadd.xlane.f32.xlu1 %v6411_v8  ;;  %v6408_v28 = vsel %vm6394_vm13, %v12248_v53, 0.0 }
0x12d8   : > { %6409 = vadd.xlane.f32.xlu0 %v6408_v28 }
0x1364   : > { %v6413_v43 = vpop.xlane.xlu1 %6412 }
0x1365   : > { %12249 = vrcp.f32 %v6413_v43  ;;  %v6410_v36 = vpop.xlane.xlu0 %6409 }
0x1366   : > { %12251 = vrcp.f32 %v6410_v36 }
0x136f   : > { %v12250_v0 = vpop.eup %12249 }
0x1370   : > { %v12252_v37 = vpop.eup %12251  ;;  %v6417_v20 = vmul.f32 %v12250_v0, %v12246_v12 }
0x1371   : > { %v6415_v23 = vmul.f32 %v12252_v37, %v12248_v53 }
0x1373   : > { %9325 = vmatprep.mubr.msk.f32.mxu0 %vm6394_vm13, %v6415_v23 }
0x1374   : > { %9326 = vmatmul.mubr.msk.f32.vlgmr.msra.gmra.mrb[96].mxu0 %vm6394_vm13, %v6417_v20 }
0x1375   : > { %11134 = vmatpush3.bf16.xpose.msra.mxu0 %v17301_v48  ;;  %9332 = vmatprep.mubr.f32.mxu0 %v11930_v40 }
0x1376   : > { %11137 = vmatprep.subr.msk.bf16.mxu0 %vm17305_vm11, %v17311_v25 }
0x137c   : > { %9333 = vmatmul.mubr.f32.vlgmr.msra.gmra.mrb[98].mxu0 %v11932_v56 }
0x137d   : > { %11140 = vmatpush3.bf16.msk.msra.mxu0 %vm17305_vm11, %v17311_v25 }
0x137e   : > { %11142 = vmatprep.subr.bf16.mxu0 %v17309_v9 }
0x1447   : > { %v17349_v59 = vpop.f32.mrb[96].mxu0 }
0x1448   : > { %v17351_v58 = vpop.f32.mrb[97].mxu0 }
0x144f   : > { %v9334_v48 = vpop.f32.mrb[98].mxu0 }
0x1450   : > { %v6578_v16 = vmul.f32 0.088388346, %v9334_v48  ;;  %v6568_v12 = vpop.f32.mrb[99].mxu0 }
0x1451   : > { %v6577_v53 = vmul.f32 0.088388346, %v6568_v12 }
0x1452   : > { %v6580_v8 = vadd.f32 %v6578_v16, %v17325_v10 }
0x1453   : > { %v6579_v28 = vadd.f32 %v6577_v53, %v17327_v15 }
0x1454   : > { %v6584_v22 = vsel %vm6398_vm12, %v6580_v8, -inf }
0x1455   : > { %6585 = vmax.xlane.f32.xlu1 %v6584_v22  ;;  %v6581_v33 = vsel %vm6394_vm13, %v6579_v28, -inf  ;;  %v19418_v22 = vld [vmem:[#allocation232_spill] sm:$0xff] }
0x1456   : > { %6582 = vmax.xlane.f32.xlu0 %v6581_v33  ;;  %v11933_v33 = vadd.f32 %v17282_v11, %v19418_v22  ;;  %v19423_v11 = vld [vmem:[#allocation269_spill] sm:$0xff] }
0x14e2   : > { %v6586_v25 = vpop.xlane.xlu1 %6585 }
0x14e3   : > { %v6588_v43 = vsub.f32 %v6580_v8, %v6586_v25  ;;  %v6583_v36 = vpop.xlane.xlu0 %6582  ;;  %v19419_v25 = vld [vmem:[#allocation265_spill] sm:$0xff] }
0x14e4   : > { %v6587_v0 = vsub.f32 %v6579_v28, %v6583_v36  ;;  %v19420_v36 = vld [vmem:[#allocation266_spill] sm:$0xff] }
0x14e5   : > { %v6591_v37 = vmul.f32 1.442695, %v6588_v43  ;;  %v11935_v43 = vadd.f32 %v17287_v21, %v19418_v22  ;;  %v19429_v21 = vld [vmem:[#allocation275_spill] sm:$0xff] }
0x14e6   : > { %v6589_v23 = vmul.f32 1.442695, %v6587_v0  ;;  %v19421_v0 = vld [vmem:[#allocation267_spill] sm:$0xff] }
0x14e7   : > { %12253 = vpow2.f32 %v6591_v37  ;;  %v19422_v37 = vld [vmem:[#allocation268_spill] sm:$0xff] }
0x14e8   : > { %12255 = vpow2.f32 %v6589_v23  ;;  %v19424_v23 = vld [vmem:[#allocation270_spill] sm:$0xff] }
0x14f1   : > { %v12254_v20 = vpop.eup %12253 }
0x14f2   : > { %v12256_v38 = vpop.eup %12255  ;;  %v6596_v40 = vsel %vm6398_vm12, %v12254_v20, 0.0 }
0x14f3   : > { %6597 = vadd.xlane.f32.xlu1 %v6596_v40  ;;  %v6593_v56 = vsel %vm6394_vm13, %v12256_v38, 0.0  ;;  %v19428_v40 = vld [vmem:[#allocation274_spill] sm:$0xff] }
0x14f4   : > { %6594 = vadd.xlane.f32.xlu0 %v6593_v56  ;;  %v19430_v56 = vld [vmem:[#allocation276_spill] sm:$0xff] }
0x1580   : > { %v6598_v48 = vpop.xlane.xlu1 %6597 }
0x1581   : > { %12257 = vrcp.f32 %v6598_v48  ;;  %v6595_v16 = vpop.xlane.xlu0 %6594  ;;  %v19431_v48 = vld [vmem:[#allocation277_spill] sm:$0xff] }
0x1582   : > { %12259 = vrcp.f32 %v6595_v16  ;;  %v19432_v16 = vld [vmem:[#allocation278_spill] sm:$0xff] }
0x158b   : > { %v12258_v12 = vpop.eup %12257 }
0x158c   : > { %v12260_v53 = vpop.eup %12259  ;;  %v6602_v28 = vmul.f32 %v12258_v12, %v12254_v20  ;;  %v19425_v20 = vld [vmem:[#allocation271_spill] sm:$0xff] }
0x158d   : > { %v6600_v8 = vmul.f32 %v12260_v53, %v12256_v38  ;;  %v19427_v38 = vld [vmem:[#allocation273_spill] sm:$0xff]  ;;  %v19433_v12 = vld [vmem:[#allocation279_spill] sm:$0xff]  ;;  %v19434_v53 = vld [vmem:[#allocation280_spill] sm:$0xff] }
0x158f   : > { %9339 = vmatprep.mubr.msk.f32.mxu0 %vm6394_vm13, %v6600_v8  ;;  %v19435_v8 = vld [vmem:[#allocation283_spill] sm:$0xff] }
0x1590   : > { %9340 = vmatmul.mubr.msk.f32.vlgmr.msra.gmra.mrb[100].mxu0 %vm6394_vm13, %v6602_v28 }
0x1591   : > { %11144 = vmatpush3.bf16.xpose.msra.mxu0 %v17309_v9  ;;  %9346 = vmatprep.mubr.f32.mxu0 %v11933_v33  ;;  %v19426_v9 = vld [vmem:[#allocation272_spill] sm:$0xff]  ;;  %v19436_v33 = vld [vmem:[#allocation286_spill] sm:$0xff] }
0x1592   : > { %11248 = vmatprep.subr.bf16.mxu0 %v19419_v25 }
0x1598   : > { %9347 = vmatmul.mubr.f32.vlgmr.msra.gmra.mrb[102].mxu0 %v11935_v43 }
0x1599   : > { %11250 = vmatpush3.bf16.msra.mxu0 %v19420_v36 }
0x159a   : > { %11252 = vmatprep.subr.bf16.mxu0 %v19421_v0  ;;  %v19437_v0 = vld [vmem:[#allocation289_spill] sm:$0xff] }
0x159d   : > { %11254 = vmatpush3.bf16.msra.mxu0 %v19422_v37 }
0x159e   : > { %11256 = vmatprep.subr.bf16.mxu0 %v19423_v11 }
0x15a1   : > { %11258 = vmatpush3.bf16.msra.mxu0 %v19424_v23 }
0x15a2   : > { %11260 = vmatprep.subr.bf16.mxu0 %v19425_v20 }
0x15a5   : > { %11262 = vmatpush3.bf16.msra.mxu0 %v19426_v9  ;;  %v19438_v9 = vld [vmem:[#allocation292_spill] sm:$0xff] }
0x15a6   : > { %11264 = vmatprep.subr.bf16.mxu0 %v19427_v38 }
0x15a9   : > { %11266 = vmatpush3.bf16.msra.mxu0 %v19428_v40  ;;  %v19439_v40 = vld [vmem:[#allocation295_spill] sm:$0xff] }
0x15aa   : > { %11268 = vmatprep.subr.bf16.mxu0 %v19429_v21  ;;  %v19440_v21 = vld [vmem:[#allocation298_spill] sm:$0xff] }
0x15ad   : > { %11270 = vmatpush3.bf16.msra.mxu0 %v19430_v56  ;;  %v19443_v56 = vld [vmem:[#allocation308_spill] sm:$0xff] }
0x15ae   : > { %11272 = vmatprep.subr.bf16.mxu0 %v19431_v48 }
0x15b1   : > { %11274 = vmatpush3.bf16.msra.mxu0 %v19432_v16 }
0x15b2   : > { %11276 = vmatprep.subr.bf16.mxu0 %v19433_v12 }
0x15b5   : > { %11278 = vmatpush3.bf16.msra.mxu0 %v19434_v53 }
0x15b6   : > { %11280 = vmatprep.subr.bf16.mxu0 %v19435_v8 }
0x1663   : > { %v17383_v28 = vpop.f32.mrb[100].mxu0 }
0x1664   : > { %v6678_v22 = vpop.f32.mrb[101].mxu0 }
0x1665   : > { %7090 = vmatprep.mubr.f32.mxu0 %v6678_v22 }
0x1666   : > { %7091 = vmatmul.mubr.f32.vlgmr.msra.gmra.mrb[104].mxu0 %v17351_v58 }
0x1667   : > { %7095 = vmatprep.mubr.f32.mxu0 %v17383_v28  ;;  %11282 = vmatpush3.bf16.msra.mxu0 %v19435_v8 }
0x1668   : > { %11284 = vmatprep.subr.bf16.mxu0 %v19436_v33 }
0x166a   : > { %7096 = vmatmul.mubr.f32.gmra.mrb[106].mxu0 %v17349_v59 }
0x166b   : > { %v9348_v25 = vpop.f32.mrb[102].mxu0  ;;  %11286 = vmatpush3.bf16.msra.mxu0 %v19436_v33 }
0x166c   : > { %v6763_v43 = vmul.f32 0.088388346, %v9348_v25  ;;  %v6753_v36 = vpop.f32.mrb[103].mxu0  ;;  %11288 = vmatprep.subr.bf16.mxu0 %v19437_v0 }
0x166d   : > { %v6762_v37 = vmul.f32 0.088388346, %v6753_v36 }
0x166e   : > { %v6765_v11 = vadd.f32 %v6763_v43, %v17325_v10  ;;  %v19441_v10 = vld [vmem:[#allocation301_spill] sm:$0xff] }
0x166f   : > { %v6764_v23 = vadd.f32 %v6762_v37, %v17327_v15  ;;  %11290 = vmatpush3.bf16.msra.mxu0 %v19437_v0  ;;  %v19442_v15 = vld [vmem:[#allocation304_spill] sm:$0xff] }
0x1670   : > { %v6769_v20 = vsel %vm6398_vm12, %v6765_v11, -inf  ;;  %11292 = vmatprep.subr.bf16.mxu0 %v19438_v9 }
0x1671   : > { %6770 = vmax.xlane.f32.xlu1 %v6769_v20  ;;  %v6766_v38 = vsel %vm6394_vm13, %v6764_v23, -inf }
0x1672   : > { %6767 = vmax.xlane.f32.xlu0 %v6766_v38 }
0x1673   : > { %11294 = vmatpush3.bf16.msra.mxu0 %v19438_v9 }
0x1674   : > { %11296 = vmatprep.subr.bf16.mxu0 %v19439_v40 }
0x1677   : > { %11298 = vmatpush3.bf16.msra.mxu0 %v19439_v40 }
0x1678   : > { %11300 = vmatprep.subr.bf16.mxu0 %v19440_v21 }
0x167b   : > { %11302 = vmatpush3.bf16.msra.mxu0 %v19440_v21 }
0x167c   : > { %11304 = vmatprep.subr.bf16.mxu0 %v19441_v10 }
0x167f   : > { %11306 = vmatpush3.bf16.msra.mxu0 %v19441_v10 }
0x1680   : > { %11308 = vmatprep.subr.bf16.mxu0 %v19442_v15 }
0x1683   : > { %11310 = vmatpush3.bf16.msra.mxu0 %v19442_v15 }
0x1684   : > { %11312 = vmatprep.subr.bf16.mxu0 %v19443_v56 }
0x16fe   : > { %v6771_v48 = vpop.xlane.xlu1 %6770 }
0x16ff   : > { %v6773_v16 = vsub.f32 %v6765_v11, %v6771_v48  ;;  %v6768_v12 = vpop.xlane.xlu0 %6767 }
0x1700   : > { %v6772_v53 = vsub.f32 %v6764_v23, %v6768_v12  ;;  %v19445_v12 = vld [vmem:[#allocation235_spill] sm:$0xff] }
0x1701   : > { %v6776_v8 = vmul.f32 1.442695, %v6773_v16  ;;  %v19444_v16 = vld [vmem:[#allocation234_spill] sm:$0xff] }
0x1702   : > { %v6774_v33 = vmul.f32 1.442695, %v6772_v53  ;;  %v19446_v53 = vld [vmem:[#allocation236_spill] sm:$0xff] }
0x1703   : > { %12261 = vpow2.f32 %v6776_v8  ;;  %v19447_v8 = vld [vmem:[#allocation237_spill] sm:$0xff] }
0x1704   : > { %12263 = vpow2.f32 %v6774_v33  ;;  %v19448_v33 = vld [vmem:[#allocation238_spill] sm:$0xff] }
0x170d   : > { %v12262_v25 = vpop.eup %12261 }
0x170e   : > { %v12264_v43 = vpop.eup %12263  ;;  %v6781_v36 = vsel %vm6398_vm12, %v12262_v25, 0.0 }
0x170f   : > { %6782 = vadd.xlane.f32.xlu1 %v6781_v36  ;;  %v6778_v0 = vsel %vm6394_vm13, %v12264_v43, 0.0  ;;  %v19449_v36 = vld [vmem:[#allocation239_spill] sm:$0xff] }
0x1710   : > { %6779 = vadd.xlane.f32.xlu0 %v6778_v0  ;;  %v19450_v0 = vld [vmem:[#allocation240_spill] sm:$0xff] }
0x1739   : > { %v8969_v37 = vpop.f32.mrb[104].mxu0 }
0x173a   : > { %v8970_v20 = vpop.f32.mrb[105].mxu0 }
0x173b   : > { %v17410_v9 = vadd.f32 %v8970_v20, %v8969_v37  ;;  %v19453_v37 = vld [vmem:[#allocation243_spill] sm:$0xff]  ;;  %v19454_v20 = vld [vmem:[#allocation244_spill] sm:$0xff] }
0x173d   : > { %v8972_v38 = vpop.f32.mrb[106].mxu0 }
0x173e   : > { %v8973_v11 = vpop.f32.mrb[107].mxu0 }
0x173f   : > { %v17412_v40 = vadd.f32 %v8973_v11, %v8972_v38  ;;  %v19456_v38 = vld [vmem:[#allocation246_spill] sm:$0xff]  ;;  %v19457_v11 = vld [vmem:[#allocation247_spill] sm:$0xff] }
0x179c   : > { %v6783_v23 = vpop.xlane.xlu1 %6782 }
0x179d   : > { %12265 = vrcp.f32 %v6783_v23  ;;  %v6780_v21 = vpop.xlane.xlu0 %6779  ;;  %v19458_v23 = vld [vmem:[#allocation248_spill] sm:$0xff] }
0x179e   : > { %12267 = vrcp.f32 %v6780_v21  ;;  %v19459_v21 = vld [vmem:[#allocation249_spill] sm:$0xff] }
0x17a7   : > { %v12266_v10 = vpop.eup %12265 }
0x17a8   : > { %v12268_v15 = vpop.eup %12267  ;;  %v6787_v48 = vmul.f32 %v12266_v10, %v12262_v25  ;;  %v19451_v25 = vld [vmem:[#allocation241_spill] sm:$0xff]  ;;  %v19460_v10 = vld [vmem:[#allocation250_spill] sm:$0xff] }
0x17a9   : > { %v6785_v56 = vmul.f32 %v12268_v15, %v12264_v43  ;;  %v19452_v43 = vld [vmem:[#allocation242_spill] sm:$0xff]  ;;  %v19461_v15 = vld [vmem:[#allocation251_spill] sm:$0xff] }
0x17ab   : > { %9353 = vmatprep.mubr.msk.f32.mxu1 %vm6394_vm13, %v6785_v56  ;;  %v19462_v56 = vld [vmem:[#allocation252_spill] sm:$0xff] }
0x17ac   : > { %9354 = vmatmul.mubr.msk.f32.vlgmr.msra.gmra.mrb[68].mxu1 %vm6394_vm13, %v6787_v48  ;;  %v19463_v48 = vld [vmem:[#allocation253_spill] sm:$0xff] }
0x17ad   : > { %11154 = vmatpush1.bf16.msra.mxu1 %v19444_v16  ;;  %6936 = vmatprep.mubr.f32.mxu1 %v6678_v22  ;;  %v19455_v22 = vld [vmem:[#allocation245_spill] sm:$0xff]  ;;  %v19464_v16 = vld [vmem:[#allocation254_spill] sm:$0xff] }
0x17ae   : > { %11156 = vmatprep.subr.bf16.mxu1 %v19445_v12  ;;  %v19465_v12 = vld [vmem:[#allocation255_spill] sm:$0xff] }
0x17b1   : > { %11158 = vmatpush1.bf16.msra.mxu1 %v19446_v53  ;;  %v19466_v53 = vld [vmem:[#allocation256_spill] sm:$0xff] }
0x17b2   : > { %11160 = vmatprep.subr.bf16.mxu1 %v19447_v8  ;;  %v19467_v8 = vld [vmem:[#allocation257_spill] sm:$0xff] }
0x17b5   : > { %11162 = vmatpush1.bf16.msra.mxu1 %v19448_v33  ;;  %v19468_v33 = vld [vmem:[#allocation258_spill] sm:$0xff] }
0x17b6   : > { %11164 = vmatprep.subr.bf16.mxu1 %v19449_v36  ;;  %v19469_v36 = vld [vmem:[#allocation259_spill] sm:$0xff] }
0x17b9   : > { %11166 = vmatpush1.bf16.msra.mxu1 %v19450_v0  ;;  %v19470_v0 = vld [vmem:[#allocation260_spill] sm:$0xff] }
0x17ba   : > { %11168 = vmatprep.subr.bf16.mxu1 %v19451_v25  ;;  %v19471_v25 = vld [vmem:[#allocation261_spill] sm:$0xff] }
0x17bd   : > { %11170 = vmatpush1.bf16.msra.mxu1 %v19452_v43  ;;  %v19472_v43 = vld [vmem:[#allocation262_spill] sm:$0xff] }
0x17be   : > { %11172 = vmatprep.subr.bf16.mxu1 %v19453_v37  ;;  %v19473_v37 = vld [vmem:[#allocation263_spill] sm:$0xff] }
0x17c1   : > { %11174 = vmatpush1.bf16.msra.mxu1 %v19454_v20  ;;  %v19474_v20 = vld [vmem:[#allocation264_spill] sm:$0xff] }
0x17c2   : > { %11176 = vmatprep.subr.bf16.mxu1 %v19455_v22  ;;  %v19475_v22 = vld [vmem:[#allocation281_spill] sm:$0xff] }
0x17c5   : > { %11178 = vmatpush1.bf16.msra.mxu1 %v19456_v38  ;;  %v19476_v38 = vld [vmem:[#allocation282_spill] sm:$0xff] }
0x17c6   : > { %11180 = vmatprep.subr.bf16.mxu1 %v19457_v11  ;;  %v19477_v11 = vld [vmem:[#allocation284_spill] sm:$0xff] }
0x17c9   : > { %11182 = vmatpush1.bf16.msra.mxu1 %v19458_v23  ;;  %v19478_v23 = vld [vmem:[#allocation285_spill] sm:$0xff] }
0x17ca   : > { %11184 = vmatprep.subr.bf16.mxu1 %v19459_v21  ;;  %v19479_v21 = vld [vmem:[#allocation287_spill] sm:$0xff] }
0x17cd   : > { %11186 = vmatpush1.bf16.msra.mxu1 %v19460_v10  ;;  %v19480_v10 = vld [vmem:[#allocation288_spill] sm:$0xff] }
0x17ce   : > { %11188 = vmatprep.subr.bf16.mxu1 %v19461_v15  ;;  %v19481_v15 = vld [vmem:[#allocation290_spill] sm:$0xff] }
0x17d1   : > { %11190 = vmatpush1.bf16.msra.mxu1 %v19462_v56  ;;  %v19482_v56 = vld [vmem:[#allocation291_spill] sm:$0xff] }
0x17d2   : > { %11192 = vmatprep.subr.bf16.mxu1 %v19463_v48  ;;  %v19485_v48 = vld [vmem:[#allocation296_spill] sm:$0xff] }
0x17d5   : > { %11194 = vmatpush1.bf16.msra.mxu1 %v19464_v16  ;;  %v19486_v16 = vld [vmem:[#allocation297_spill] sm:$0xff] }
0x17d6   : > { %11196 = vmatprep.subr.bf16.mxu1 %v19465_v12  ;;  %v19488_v12 = vld [vmem:[#allocation300_spill] sm:$0xff] }
0x17d9   : > { %11198 = vmatpush1.bf16.msra.mxu1 %v19466_v53  ;;  %v19489_v53 = vld [vmem:[#allocation302_spill] sm:$0xff] }
0x17da   : > { %11200 = vmatprep.subr.bf16.mxu1 %v19467_v8  ;;  %v19490_v8 = vld [vmem:[#allocation303_spill] sm:$0xff] }
0x17dd   : > { %11202 = vmatpush1.bf16.msra.mxu1 %v19468_v33  ;;  %v19491_v33 = vld [vmem:[#allocation309_spill] sm:$0xff] }
0x17de   : > { %11204 = vmatprep.subr.bf16.mxu1 %v19469_v36 }
0x17e1   : > { %11206 = vmatpush1.bf16.msra.mxu1 %v19470_v0 }
0x17e2   : > { %11208 = vmatprep.subr.bf16.mxu1 %v19471_v25  ;;  %v19492_v25 = vld [vmem:[#allocation310_spill] sm:$0xff] }
0x17e5   : > { %11210 = vmatpush1.bf16.msra.mxu1 %v19472_v43  ;;  %v19493_v43 = vld [vmem:[#allocation311_spill] sm:$0xff] }
0x17e6   : > { %11212 = vmatprep.subr.bf16.mxu1 %v19473_v37  ;;  %v19494_v37 = vld [vmem:[#allocation312_spill] sm:$0xff] }
0x17e9   : > { %11214 = vmatpush1.bf16.msra.mxu1 %v19474_v20  ;;  %v19495_v20 = vld [vmem:[#allocation313_spill] sm:$0xff] }
0x17ea   : > { %11216 = vmatprep.subr.bf16.mxu1 %v19475_v22  ;;  %v19496_v22 = vld [vmem:[#allocation314_spill] sm:$0xff] }
0x17ec   : > { %6937 = vmatmul.mubr.f32.vlgmr.msra.gmra.mrb[70].mxu1 %v17351_v58  ;;  %v19483_v58 = vld [vmem:[#allocation293_spill] sm:$0xff] }
0x17ed   : > { %6942 = vmatprep.mubr.f32.mxu1 %v17383_v28  ;;  %11218 = vmatpush1.bf16.msra.mxu1 %v19476_v38  ;;  %v19484_v28 = vld [vmem:[#allocation294_spill] sm:$0xff]  ;;  %v19497_v38 = vld [vmem:[#allocation315_spill] sm:$0xff] }
0x17ee   : > { %11220 = vmatprep.subr.bf16.mxu1 %v19477_v11  ;;  %v19498_v11 = vld [vmem:[#allocation316_spill] sm:$0xff] }
0x17f0   : > { %6943 = vmatmul.mubr.f32.gmra.mrb[72].mxu1 %v17349_v59  ;;  %v19487_v59 = vld [vmem:[#allocation299_spill] sm:$0xff] }
0x17f1   : > { %11222 = vmatpush1.bf16.msra.mxu1 %v19478_v23  ;;  %7013 = vmatprep.mubr.f32.mxu1 %v19262_v63  ;;  %v19499_v23 = vld [vmem:[#allocation317_spill] sm:$0xff] }
0x17f2   : > { %11224 = vmatprep.subr.bf16.mxu1 %v19479_v21  ;;  %v19500_v21 = vld [vmem:[#allocation318_spill] sm:$0xff] }
0x17f5   : > { %11226 = vmatpush1.bf16.msra.mxu1 %v19480_v10  ;;  %v19501_v10 = vld [vmem:[#allocation319_spill] sm:$0xff] }
0x17f6   : > { %11228 = vmatprep.subr.bf16.mxu1 %v19481_v15  ;;  %v19502_v15 = vld [vmem:[#allocation320_spill] sm:$0xff] }
0x17f9   : > { %11230 = vmatpush1.bf16.msra.mxu1 %v19482_v56  ;;  %v19503_v56 = vld [vmem:[#allocation321_spill] sm:$0xff] }
0x17fa   : > { %11232 = vmatprep.subr.bf16.mxu1 %v19483_v58  ;;  %v19504_v58 = vld [vmem:[#allocation322_spill] sm:$0xff] }
0x17fd   : > { %11234 = vmatpush1.bf16.msra.mxu1 %v19484_v28  ;;  %v19505_v28 = vld [vmem:[#allocation323_spill] sm:$0xff] }
0x17fe   : > { %11236 = vmatprep.subr.bf16.mxu1 %v19485_v48  ;;  %v19506_v48 = vld [vmem:[#allocation324_spill] sm:$0xff] }
0x1801   : > { %11238 = vmatpush1.bf16.msra.mxu1 %v19486_v16  ;;  %v19507_v16 = vld [vmem:[#allocation325_spill] sm:$0xff] }
0x1802   : > { %11240 = vmatprep.subr.bf16.mxu1 %v19487_v59  ;;  %v19508_v59 = vld [vmem:[#allocation326_spill] sm:$0xff] }
0x1805   : > { %11242 = vmatpush1.bf16.msra.mxu1 %v19488_v12  ;;  %v19509_v12 = vld [vmem:[#allocation327_spill] sm:$0xff] }
0x1806   : > { %11244 = vmatprep.subr.bf16.mxu1 %v19489_v53  ;;  %v19510_v53 = vld [vmem:[#allocation328_spill] sm:$0xff] }
0x1809   : > { %11246 = vmatpush1.bf16.msra.mxu1 %v19490_v8  ;;  %v19511_v8 = vld [vmem:[#allocation329_spill] sm:$0xff] }
0x180a   : > { %11408 = vmatprep.subr.bf16.mxu1 %v19491_v33  ;;  %v19512_v33 = vld [vmem:[#allocation330_spill] sm:$0xff] }
0x187f   : > { %v9355_v36 = vpop.f32.mrb[68].mxu1 }
0x1880   : > { %v6863_v0 = vpop.f32.mrb[69].mxu1 }
0x1881   : > { %7014 = vmatmul.mubr.f32.vlgmr.msra.gmra.mrb[70].mxu1 %v6863_v0  ;;  %9388 = vmatprep.mubr.f32.mxu0 %v6863_v0  ;;  %v19514_v0 = vld [vmem:[#allocation332_spill] sm:$0xff] }
0x1882   : > { %9389 = vmatmul.mubr.f32.vlgmr.msra.gmra.mrb[108].mxu0 %v9355_v36  ;;  %7019 = vmatprep.mubr.f32.mxu1 %v19262_v63 }
0x1883   : > { %11314 = vmatpush1.bf16.msra.mxu0 %v19492_v25  ;;  %11410 = vmatpush1.bf16.msra.mxu1 %v19493_v43  ;;  %v19515_v25 = vld [vmem:[#allocation333_spill] sm:$0xff]  ;;  %v19516_v43 = vld [vmem:[#allocation334_spill] sm:$0xff] }
0x1884   : > { %11316 = vmatprep.subr.bf16.mxu0 %v19494_v37  ;;  %11412 = vmatprep.subr.bf16.mxu1 %v19495_v20  ;;  %v19517_v37 = vld [vmem:[#allocation335_spill] sm:$0xff]  ;;  %v19518_v20 = vld [vmem:[#allocation336_spill] sm:$0xff] }
0x1885   : > { %7020 = vmatmul.mubr.f32.gmra.mrb[72].mxu1 %v9355_v36  ;;  %v19513_v36 = vld [vmem:[#allocation331_spill] sm:$0xff] }
0x1887   : > { %11318 = vmatpush1.bf16.msra.mxu0 %v19496_v22  ;;  %11414 = vmatpush1.bf16.msra.mxu1 %v19497_v38  ;;  %v19519_v22 = vld [vmem:[#allocation337_spill] sm:$0xff]  ;;  %v19520_v38 = vld [vmem:[#allocation338_spill] sm:$0xff] }
0x1888   : > { %11320 = vmatprep.subr.bf16.mxu0 %v19498_v11  ;;  %11416 = vmatprep.subr.bf16.mxu1 %v19499_v23  ;;  %v19521_v11 = vld [vmem:[#allocation339_spill] sm:$0xff]  ;;  %v19522_v23 = vld [vmem:[#allocation340_spill] sm:$0xff] }
0x188b   : > { %11322 = vmatpush1.bf16.msra.mxu0 %v19500_v21  ;;  %11418 = vmatpush1.bf16.msra.mxu1 %v19501_v10  ;;  %v19523_v21 = vld [vmem:[#allocation341_spill] sm:$0xff]  ;;  %v19524_v10 = vld [vmem:[#allocation342_spill] sm:$0xff] }
0x188c   : > { %11324 = vmatprep.subr.bf16.mxu0 %v19502_v15  ;;  %11420 = vmatprep.subr.bf16.mxu1 %v19503_v56  ;;  %v19525_v15 = vld [vmem:[#allocation343_spill] sm:$0xff]  ;;  %v19526_v56 = vld [vmem:[#allocation344_spill] sm:$0xff] }
0x188f   : > { %11326 = vmatpush1.bf16.msra.mxu0 %v19504_v58  ;;  %11422 = vmatpush1.bf16.msra.mxu1 %v19505_v28  ;;  %v19527_v58 = vld [vmem:[#allocation345_spill] sm:$0xff]  ;;  %v19528_v28 = vld [vmem:[#allocation346_spill] sm:$0xff] }
0x1890   : > { %11328 = vmatprep.subr.bf16.mxu0 %v19506_v48  ;;  %11424 = vmatprep.subr.bf16.mxu1 %v19507_v16  ;;  %v19529_v48 = vld [vmem:[#allocation347_spill] sm:$0xff]  ;;  %v19530_v16 = vld [vmem:[#allocation348_spill] sm:$0xff] }
0x1893   : > { %11330 = vmatpush1.bf16.msra.mxu0 %v19508_v59  ;;  %11426 = vmatpush1.bf16.msra.mxu1 %v19509_v12  ;;  %v19531_v59 = vld [vmem:[#allocation349_spill] sm:$0xff]  ;;  %v19532_v12 = vld [vmem:[#allocation350_spill] sm:$0xff] }
0x1894   : > { %11332 = vmatprep.subr.bf16.mxu0 %v19510_v53  ;;  %11428 = vmatprep.subr.bf16.mxu1 %v19511_v8  ;;  %v19533_v53 = vld [vmem:[#allocation351_spill] sm:$0xff]  ;;  %v19534_v8 = vld [vmem:[#allocation352_spill] sm:$0xff] }
0x1897   : > { %11334 = vmatpush1.bf16.msra.mxu0 %v19512_v33  ;;  %11430 = vmatpush1.bf16.msra.mxu1 %v19513_v36  ;;  %v19535_v33 = vld [vmem:[#allocation353_spill] sm:$0xff]  ;;  %v19536_v36 = vld [vmem:[#allocation354_spill] sm:$0xff] }
0x1898   : > { %11336 = vmatprep.subr.bf16.mxu0 %v19514_v0  ;;  %11432 = vmatprep.subr.bf16.mxu1 %v19515_v25  ;;  %v19537_v0 = vld [vmem:[#allocation355_spill] sm:$0xff]  ;;  %v19538_v25 = vld [vmem:[#allocation356_spill] sm:$0xff] }
0x189b   : > { %11338 = vmatpush1.bf16.msra.mxu0 %v19516_v43  ;;  %11434 = vmatpush1.bf16.msra.mxu1 %v19517_v37  ;;  %v19539_v43 = vld [vmem:[#allocation357_spill] sm:$0xff]  ;;  %v19540_v37 = vld [vmem:[#allocation358_spill] sm:$0xff] }
0x189c   : > { %11340 = vmatprep.subr.bf16.mxu0 %v19518_v20  ;;  %11436 = vmatprep.subr.bf16.mxu1 %v19519_v22  ;;  %v19541_v20 = vld [vmem:[#allocation359_spill] sm:$0xff]  ;;  %v19542_v22 = vld [vmem:[#allocation360_spill] sm:$0xff] }
0x189f   : > { %11342 = vmatpush1.bf16.msra.mxu0 %v19520_v38  ;;  %11438 = vmatpush1.bf16.msra.mxu1 %v19521_v11  ;;  %v19543_v38 = vld [vmem:[#allocation361_spill] sm:$0xff]  ;;  %v19544_v11 = vld [vmem:[#allocation362_spill] sm:$0xff] }
0x18a0   : > { %11344 = vmatprep.subr.bf16.mxu0 %v19522_v23  ;;  %11440 = vmatprep.subr.bf16.mxu1 %v19523_v21  ;;  %v19545_v23 = vld [vmem:[#allocation363_spill] sm:$0xff]  ;;  %v19546_v21 = vld [vmem:[#allocation364_spill] sm:$0xff] }
0x18a3   : > { %11346 = vmatpush1.bf16.msra.mxu0 %v19524_v10  ;;  %11442 = vmatpush1.bf16.msra.mxu1 %v19525_v15  ;;  %v19547_v10 = vld [vmem:[#allocation365_spill] sm:$0xff]  ;;  %v19548_v15 = vld [vmem:[#allocation366_spill] sm:$0xff] }
0x18a4   : > { %11348 = vmatprep.subr.bf16.mxu0 %v19526_v56  ;;  %11444 = vmatprep.subr.bf16.mxu1 %v19527_v58  ;;  %v19549_v56 = vld [vmem:[#allocation367_spill] sm:$0xff]  ;;  %v19550_v58 = vld [vmem:[#allocation368_spill] sm:$0xff] }
0x18a7   : > { %11350 = vmatpush1.bf16.msra.mxu0 %v19528_v28  ;;  %11446 = vmatpush1.bf16.msra.mxu1 %v19529_v48  ;;  %v19551_v28 = vld [vmem:[#allocation369_spill] sm:$0xff]  ;;  %v19552_v48 = vld [vmem:[#allocation370_spill] sm:$0xff] }
0x18a8   : > { %11352 = vmatprep.subr.bf16.mxu0 %v19530_v16  ;;  %11448 = vmatprep.subr.bf16.mxu1 %v19531_v59  ;;  %v19553_v16 = vld [vmem:[#allocation371_spill] sm:$0xff]  ;;  %v19554_v59 = vld [vmem:[#allocation372_spill] sm:$0xff] }
0x18ab   : > { %11354 = vmatpush1.bf16.msra.mxu0 %v19532_v12  ;;  %11450 = vmatpush1.bf16.msra.mxu1 %v19533_v53  ;;  %v19555_v12 = vld [vmem:[#allocation373_spill] sm:$0xff] }
0x18ac   : > { %11356 = vmatprep.subr.bf16.mxu0 %v19534_v8  ;;  %11452 = vmatprep.subr.bf16.mxu1 %v19535_v33 }
0x18af   : > { %11358 = vmatpush1.bf16.msra.mxu0 %v19536_v36  ;;  %11454 = vmatpush1.bf16.msra.mxu1 %v19537_v0 }
0x18b0   : > { %11360 = vmatprep.subr.bf16.mxu0 %v19538_v25  ;;  %11456 = vmatprep.subr.bf16.mxu1 %v19539_v43 }
0x18b3   : > { %11362 = vmatpush1.bf16.msra.mxu0 %v19540_v37  ;;  %11458 = vmatpush1.bf16.msra.mxu1 %v19541_v20  ;;  %v19556_v37 = vld [vmem:[#allocation305_spill] sm:$0xff] }
0x18b4   : > { %11364 = vmatprep.subr.bf16.mxu0 %v19542_v22  ;;  %11460 = vmatprep.subr.bf16.mxu1 %v19543_v38  ;;  %v19557_v38 = vld [vmem:[#allocation306_spill] sm:$0xff] }
0x18b7   : > { %11366 = vmatpush1.bf16.msra.mxu0 %v19544_v11  ;;  %11462 = vmatpush1.bf16.msra.mxu1 %v19545_v23 }
0x18b8   : > { %11368 = vmatprep.subr.bf16.mxu0 %v19546_v21  ;;  %11464 = vmatprep.subr.bf16.mxu1 %v19547_v10 }
0x18bb   : > { %11370 = vmatpush1.bf16.msra.mxu0 %v19548_v15  ;;  %11466 = vmatpush1.bf16.msra.mxu1 %v19549_v56  ;;  %v19559_v56 = vld [vmem:[#allocation307_spill] sm:$0xff] }
0x18bc   : > { %11372 = vmatprep.subr.bf16.mxu0 %v19550_v58  ;;  %11468 = vmatprep.subr.bf16.mxu1 %v19551_v28 }
0x18bf   : > { %11374 = vmatpush1.bf16.msra.mxu0 %v19552_v48  ;;  %11470 = vmatpush1.bf16.msra.mxu1 %v19553_v16 }
0x18c0   : > { %11376 = vmatprep.subr.bf16.mxu0 %v19554_v59  ;;  %11472 = vmatprep.subr.bf16.mxu1 %v19555_v12 }
0x1954   : > { %v7015_v53 = vpop.f32.mrb[70].mxu1 }
0x1955   : > { %v7176_v8 = vadd.f32 %v7015_v53, %v16996_v31  ;;  %v7017_v33 = vpop.f32.mrb[71].mxu1  ;;  %v9390_v36 = vpop.f32.mrb[108].mxu0 }
0x1956   : > { %v7177_v0 = vadd.f32 %v7017_v33, %v16999_v34  ;;  %v7173_v25 = vadd.f32 %v9390_v36, %v17412_v40  ;;  %v7167_v43 = vpop.f32.mrb[109].mxu0 }
0x1957   : > { %v17537_v20 = vadd.f32 %v7176_v8, %v19556_v37  ;;  %v7168_v22 = vadd.f32 %v17410_v9, %v7167_v43 }
0x1958   : > { %v17541_v11 = vadd.f32 %v7177_v0, %v19557_v38  ;;  %v7181_v23 = vadd.f32 %v7173_v25, %v17018_v49  ;;  %v7021_v21 = vpop.f32.mrb[72].mxu1 }
0x1959   : > { %v7178_v31 = vadd.f32 %v7168_v22, %v17002_v62  ;;  %v7179_v10 = vadd.f32 %v7021_v21, %v17012_v13  ;;  %v7023_v15 = vpop.f32.mrb[73].mxu1 }
0x195a   : > { %19558 = vst [vmem:[#allocation16_spill] sm:$0xff] %v17541_v11  ;;  %v7180_v34 = vadd.f32 %v7023_v15, %v17015_v26  ;;  %v7188_v40 = vadd.f32 %v17541_v11, %v17537_v20  ;;  %v17556_v28 = vadd.f32 %v7181_v23, %v19559_v56 }
0x195b   : > { %v17550_v58 = vadd.f32 %v7178_v31, %v19559_v56  ;;  %v17553_v9 = vadd.f32 %v7179_v10, %v19556_v37 }
0x195c   : > { %v17559_v49 = vadd.f32 %v7180_v34, %v19557_v38  ;;  %v7195_v16 = vsel %vm2069_vm6, %v17556_v28, 0.0 }
0x195d   : > { %19560 = vst [vmem:[#allocation17_spill] sm:$0xff] %v17553_v9  ;;  %v7189_v62 = vadd.f32 %v7188_v40, %v17550_v58  ;;  %v7192_v13 = vsel %vm2069_vm6, %v17553_v9, 0.0 }
0x195e   : > { %19561 = vst [vmem:[#allocation39_spill] sm:$0xff] %v17559_v49  ;;  %v7193_v26 = vsel %vm2069_vm6, %v17559_v49, 0.0 }
0x195f   : > { %7190 = vadd.xlane.f32.xlu0 %v7189_v62  ;;  %v7194_v48 = vadd.f32 %v7193_v26, %v7192_v13 }
0x1961   : > { %v7196_v59 = vadd.f32 %v7195_v16, %v7194_v48 }
0x1963   : > { %7197 = vadd.xlane.f32.xlu1 %v7196_v59 }
0x19ec   : > { %v7191_v12 = vpop.xlane.xlu0 %7190 }
0x19ed   : > { %v7199_v53 = vmul.f32 0.0026041667, %v7191_v12 }
0x19ef   : > { %v7201_v8 = vsub.f32 %v17537_v20, %v7199_v53  ;;  %v7202_v33 = vsub.f32 %v17541_v11, %v7199_v53  ;;  %v17571_v36 = vsub.f32 %v17550_v58, %v7199_v53 }
0x19f0   : > { %v7198_v0 = vpop.xlane.xlu1 %7197 }
0x19f1   : > { %v7200_v25 = vmul.f32 0.0026041667, %v7198_v0  ;;  %v7207_v43 = vmul.f32 %v7201_v8, %v7201_v8  ;;  %v7208_v37 = vmul.f32 %v7202_v33, %v7202_v33  ;;  %v7209_v22 = vmul.f32 %v17571_v36, %v17571_v36 }
0x19f3   : > { %v7204_v38 = vsub.f32 %v17553_v9, %v7200_v25  ;;  %v7205_v23 = vsub.f32 %v17559_v49, %v7200_v25  ;;  %v17578_v21 = vsub.f32 %v17556_v28, %v7200_v25  ;;  %v7213_v31 = vadd.f32 %v7208_v37, %v7207_v43 }
0x19f5   : > { %v7214_v10 = vadd.f32 %v7213_v31, %v7209_v22  ;;  %v7210_v15 = vmul.f32 %v7204_v38, %v7204_v38  ;;  %v7211_v34 = vmul.f32 %v7205_v23, %v7205_v23  ;;  %v7212_v40 = vmul.f32 %v17578_v21, %v17578_v21  ;;  %v19562_v31 = vld [vmem:[#allocation374_spill] sm:$0xff] }
0x19f7   : > { %7215 = vadd.xlane.f32.xlu0 %v7214_v10  ;;  %v7217_v56 = vsel %vm2069_vm6, %v7210_v15, 0.0  ;;  %v7218_v62 = vsel %vm2069_vm6, %v7211_v34, 0.0  ;;  %v7220_v26 = vsel %vm2069_vm6, %v7212_v40, 0.0  ;;  %v19563_v15 = vld [vmem:[#allocation375_spill] sm:$0xff] }
0x19f8   : > { %v7219_v13 = vadd.f32 %v7218_v62, %v7217_v56  ;;  %v19564_v62 = vld [vmem:[#allocation376_spill] sm:$0xff] }
0x19fa   : > { %v7221_v48 = vadd.f32 %v7220_v26, %v7219_v13  ;;  %v19565_v13 = vld [vmem:[#allocation377_spill] sm:$0xff] }
0x19fc   : > { %7222 = vadd.xlane.f32.xlu1 %v7221_v48 }
0x1a84   : > { %v7216_v16 = vpop.xlane.xlu0 %7215 }
0x1a85   : > { %v7224_v59 = vmul.f32 0.0026041667, %v7216_v16 }
0x1a87   : > { %v7226_v12 = vadd.f32 1e-06, %v7224_v59  ;;  %v19566_v59 = vld [vmem:[#allocation378_spill] sm:$0xff] }
0x1a89   : > { %12269 = vrsqrt.f32 %v7226_v12  ;;  %v7223_v53 = vpop.xlane.xlu1 %7222  ;;  %v19567_v12 = vld [vmem:[#allocation379_spill] sm:$0xff] }
0x1a8a   : > { %v7225_v0 = vmul.f32 0.0026041667, %v7223_v53  ;;  %v19568_v53 = vld [vmem:[#allocation380_spill] sm:$0xff] }
0x1a8c   : > { %v7227_v25 = vadd.f32 1e-06, %v7225_v0 }
0x1a8e   : > { %12271 = vrsqrt.f32 %v7227_v25  ;;  %v19570_v25 = vld [vmem:[#allocation382_spill] sm:$0xff] }
0x1a93   : > { %v12270_v43 = vpop.eup %12269 }
0x1a94   : > { %v7231_v37 = vmul.f32 %v12270_v43, %v7202_v33  ;;  %v7230_v22 = vmul.f32 %v12270_v43, %v7201_v8 }
0x1a96   : > { %v7237_v10 = vmul.f32 %v7231_v37, %v19562_v31  ;;  %v7236_v34 = vmul.f32 %v7230_v22, %v19563_v15  ;;  %v19571_v37 = vld [vmem:[#allocation383_spill] sm:$0xff]  ;;  %v19572_v22 = vld [vmem:[#allocation384_spill] sm:$0xff] }
0x1a98   : > { %v12272_v56 = vpop.eup %12271  ;;  %v17588_v40 = vadd.f32 %v7237_v10, %v19564_v62  ;;  %v17591_v26 = vadd.f32 %v7236_v34, %v19565_v13  ;;  %v19574_v10 = vld [vmem:[#allocation386_spill] sm:$0xff]  ;;  %v19576_v34 = vld [vmem:[#allocation388_spill] sm:$0xff] }
0x1a99   : > { %v7234_v48 = vmul.f32 %v12272_v56, %v7205_v23  ;;  %v7233_v16 = vmul.f32 %v12272_v56, %v7204_v38  ;;  %v19569_v23 = vld [vmem:[#allocation381_spill] sm:$0xff] }
0x1a9a   : > { %7312 = vmatprep.mubr.f32.mxu0 %v17588_v40  ;;  %7466 = vmatprep.mubr.f32.mxu1 %v17588_v40 }
0x1a9b   : > { %7313 = vmatmul.mubr.f32.vlgmr.msra.gmra.mrb[110].mxu0 %v17591_v26  ;;  %7467 = vmatmul.mubr.f32.vlgmr.msra.gmra.mrb[74].mxu1 %v17591_v26  ;;  %v7240_v8 = vmul.f32 %v7234_v48, %v19562_v31  ;;  %v7239_v33 = vmul.f32 %v7233_v16, %v19563_v15  ;;  %v19573_v31 = vld [vmem:[#allocation385_spill] sm:$0xff]  ;;  %v19575_v15 = vld [vmem:[#allocation387_spill] sm:$0xff]  ;;  %v19580_v16 = vld [vmem:[#allocation392_spill] sm:$0xff] }
0x1a9c   : > { %11378 = vmatpush1.bf16.msra.mxu0 %v19566_v59  ;;  %11474 = vmatpush1.bf16.msra.mxu1 %v19567_v12  ;;  %v19579_v48 = vld [vmem:[#allocation391_spill] sm:$0xff]  ;;  %v19584_v12 = vld [vmem:[#allocation396_spill] sm:$0xff] }
0x1a9d   : > { %11380 = vmatprep.subr.bf16.mxu0 %v19568_v53  ;;  %11476 = vmatprep.subr.bf16.mxu1 %v19569_v23  ;;  %v17604_v38 = vadd.f32 %v7240_v8, %v19564_v62  ;;  %v17607_v0 = vadd.f32 %v7239_v33, %v19565_v13  ;;  %v19577_v62 = vld [vmem:[#allocation389_spill] sm:$0xff]  ;;  %v19578_v13 = vld [vmem:[#allocation390_spill] sm:$0xff]  ;;  %v19583_v59 = vld [vmem:[#allocation395_spill] sm:$0xff] }
0x1a9e   : > { %v19581_v8 = vld [vmem:[#allocation393_spill] sm:$0xff]  ;;  %v19582_v33 = vld [vmem:[#allocation394_spill] sm:$0xff] }
0x1a9f   : > { %7318 = vmatprep.mubr.f32.mxu0 %v17604_v38  ;;  %7472 = vmatprep.mubr.f32.mxu1 %v17604_v38  ;;  %v19585_v53 = vld [vmem:[#allocation397_spill] sm:$0xff]  ;;  %v19586_v23 = vld [vmem:[#allocation398_spill] sm:$0xff] }
0x1aa0   : > { %11382 = vmatpush1.bf16.msra.mxu0 %v19570_v25  ;;  %11478 = vmatpush1.bf16.msra.mxu1 %v19571_v37  ;;  %v19587_v25 = vld [vmem:[#allocation399_spill] sm:$0xff]  ;;  %v19588_v37 = vld [vmem:[#allocation400_spill] sm:$0xff] }
0x1aa1   : > { %7319 = vmatmul.mubr.f32.gmra.mrb[112].mxu0 %v17607_v0  ;;  %7473 = vmatmul.mubr.f32.gmra.mrb[76].mxu1 %v17607_v0 }
0x1aa2   : > { %11384 = vmatprep.subr.bf16.mxu0 %v19572_v22  ;;  %11480 = vmatprep.subr.bf16.mxu1 %v19573_v31  ;;  %v19589_v22 = vld [vmem:[#allocation401_spill] sm:$0xff]  ;;  %v7232_v31 = vmul.f32 %v12270_v43, %v17571_v36  ;;  %v19598_v36 = vld [vmem:[#allocation410_spill] sm:$0xff] }
0x1aa3   : > { %7389 = vmatprep.mubr.f32.mxu0 %v19262_v63  ;;  %7543 = vmatprep.mubr.f32.mxu1 %v19262_v63 }
0x1aa4   : > { %11386 = vmatpush1.bf16.msra.mxu0 %v19574_v10  ;;  %11482 = vmatpush1.bf16.msra.mxu1 %v19575_v15  ;;  %v19590_v10 = vld [vmem:[#allocation402_spill] sm:$0xff]  ;;  %v19591_v15 = vld [vmem:[#allocation403_spill] sm:$0xff] }
0x1aa5   : > { %11388 = vmatprep.subr.bf16.mxu0 %v19576_v34  ;;  %11484 = vmatprep.subr.bf16.mxu1 %v19577_v62  ;;  %v19592_v34 = vld [vmem:[#allocation405_spill] sm:$0xff]  ;;  %v19593_v62 = vld [vmem:[#allocation406_spill] sm:$0xff] }
0x1aa8   : > { %11390 = vmatpush1.bf16.msra.mxu0 %v19578_v13  ;;  %11486 = vmatpush1.bf16.msra.mxu1 %v19579_v48  ;;  %v19594_v13 = vld [vmem:[#allocation404_spill] sm:$0xff] }
0x1aa9   : > { %11392 = vmatprep.subr.bf16.mxu0 %v19580_v16  ;;  %11488 = vmatprep.subr.bf16.mxu1 %v19581_v8  ;;  %v7238_v48 = vmul.f32 %v7232_v31, %v19594_v13  ;;  %v7235_v16 = vmul.f32 %v12272_v56, %v17578_v21  ;;  %v19595_v8 = vld [vmem:[#allocation408_spill] sm:$0xff]  ;;  %v19601_v56 = vld [vmem:[#allocation413_spill] sm:$0xff] }
0x1aaa   : > { %v19605_v31 = vld [vmem:[#allocation417_spill] sm:$0xff] }
0x1aab   : > { %v7241_v43 = vmul.f32 %v7235_v16, %v19594_v13  ;;  %v19610_v13 = vld [vmem:[#allocation424_spill] sm:$0xff]  ;;  %v19612_v16 = vld [vmem:[#allocation422_spill] sm:$0xff] }
0x1aac   : > { %11394 = vmatpush1.bf16.msra.mxu0 %v19582_v33  ;;  %11490 = vmatpush1.bf16.msra.mxu1 %v19583_v59  ;;  %v19596_v33 = vld [vmem:[#allocation409_spill] sm:$0xff]  ;;  %v19597_v59 = vld [vmem:[#allocation407_spill] sm:$0xff] }
0x1aad   : > { %11396 = vmatprep.subr.bf16.mxu0 %v19584_v12  ;;  %11492 = vmatprep.subr.bf16.mxu1 %v19585_v53  ;;  %v17645_v12 = vadd.f32 %v7238_v48, %v19597_v59  ;;  %v19599_v53 = vld [vmem:[#allocation411_spill] sm:$0xff]  ;;  %v17656_v21 = vadd.f32 %v7241_v43, %v19597_v59  ;;  %v19611_v48 = vld [vmem:[#allocation425_spill] sm:$0xff]  ;;  %v19616_v59 = vld [vmem:[#allocation426_spill] sm:$0xff] }
0x1aae   : > { %v19618_v43 = vld [vmem:[#allocation432_spill] sm:$0xff] }
0x1ab0   : > { %11398 = vmatpush1.bf16.msra.mxu0 %v19586_v23  ;;  %11494 = vmatpush1.bf16.msra.mxu1 %v19587_v25  ;;  %v19600_v23 = vld [vmem:[#allocation412_spill] sm:$0xff]  ;;  %v19602_v25 = vld [vmem:[#allocation414_spill] sm:$0xff] }
0x1ab1   : > { %11400 = vmatprep.subr.bf16.mxu0 %v19588_v37  ;;  %11496 = vmatprep.subr.bf16.mxu1 %v19589_v22  ;;  %v19603_v37 = vld [vmem:[#allocation415_spill] sm:$0xff]  ;;  %v19604_v22 = vld [vmem:[#allocation416_spill] sm:$0xff] }
0x1ab4   : > { %11402 = vmatpush1.bf16.msra.mxu0 %v19590_v10  ;;  %11498 = vmatpush1.bf16.msra.mxu1 %v19591_v15  ;;  %v19606_v10 = vld [vmem:[#allocation420_spill] sm:$0xff]  ;;  %v19607_v15 = vld [vmem:[#allocation421_spill] sm:$0xff] }
0x1ab5   : > { %11404 = vmatprep.subr.bf16.mxu0 %v19592_v34  ;;  %11500 = vmatprep.subr.bf16.mxu1 %v19593_v62  ;;  %v19608_v34 = vld [vmem:[#allocation418_spill] sm:$0xff]  ;;  %v19609_v62 = vld [vmem:[#allocation419_spill] sm:$0xff] }
0x1ab8   : > { %11406 = vmatpush1.bf16.msra.mxu0 %v19595_v8  ;;  %11502 = vmatpush1.bf16.msra.mxu1 %v19596_v33  ;;  %v19613_v8 = vld [vmem:[#allocation423_spill] sm:$0xff]  ;;  %v19615_v33 = vld [vmem:[#allocation429_spill] sm:$0xff] }
0x1ab9   : > { %11504 = vmatprep.subr.bf16.mxu0 %v19598_v36  ;;  %11600 = vmatprep.subr.bf16.mxu1 %v19599_v53  ;;  %v19617_v36 = vld [vmem:[#allocation427_spill] sm:$0xff]  ;;  %v19619_v53 = vld [vmem:[#allocation433_spill] sm:$0xff] }
0x1abb   : > { %7390 = vmatmul.mubr.f32.vlgmr.msra.gmra.mrb[110].mxu0 %v17645_v12  ;;  %7544 = vmatmul.mubr.f32.vlgmr.msra.gmra.mrb[74].mxu1 %v17645_v12 }
0x1abc   : > { %11506 = vmatpush1.bf16.msra.mxu0 %v19600_v23  ;;  %7395 = vmatprep.mubr.f32.mxu0 %v19262_v63  ;;  %v19620_v23 = vld [vmem:[#allocation430_spill] sm:$0xff] }
0x1abd   : > { %7549 = vmatprep.mubr.f32.mxu1 %v19262_v63  ;;  %11508 = vmatprep.subr.bf16.mxu0 %v19601_v56  ;;  %v19621_v56 = vld [vmem:[#allocation431_spill] sm:$0xff] }
0x1abe   : > { %11602 = vmatpush1.bf16.msra.mxu1 %v19602_v25  ;;  %v19622_v25 = vld [vmem:[#allocation436_spill] sm:$0xff] }
0x1abf   : > { %7396 = vmatmul.mubr.f32.gmra.mrb[112].mxu0 %v17656_v21  ;;  %7550 = vmatmul.mubr.f32.gmra.mrb[76].mxu1 %v17656_v21 }
0x1ac0   : > { %11510 = vmatpush1.bf16.msra.mxu0 %v19603_v37  ;;  %7620 = vmatprep.mubr.f32.mxu0 %v17588_v40  ;;  %v19614_v40 = vld [vmem:[#allocation428_spill] sm:$0xff]  ;;  %v19623_v37 = vld [vmem:[#allocation437_spill] sm:$0xff] }
0x1ac1   : > { %11512 = vmatprep.subr.bf16.mxu0 %v19604_v22  ;;  %11604 = vmatprep.subr.bf16.mxu1 %v19605_v31  ;;  %v19624_v22 = vld [vmem:[#allocation434_spill] sm:$0xff]  ;;  %v19625_v31 = vld [vmem:[#allocation435_spill] sm:$0xff] }
0x1ac2   : > { %11606 = vmatpush1.bf16.msra.mxu1 %v19606_v10  ;;  %v19626_v10 = vld [vmem:[#allocation440_spill] sm:$0xff] }
0x1ac3   : > { %11608 = vmatprep.subr.bf16.mxu1 %v19607_v15  ;;  %v19627_v15 = vld [vmem:[#allocation441_spill] sm:$0xff] }
0x1ac4   : > { %11514 = vmatpush1.bf16.msra.mxu0 %v19608_v34  ;;  %v19628_v34 = vld [vmem:[#allocation438_spill] sm:$0xff] }
0x1ac5   : > { %11516 = vmatprep.subr.bf16.mxu0 %v19609_v62  ;;  %v19629_v62 = vld [vmem:[#allocation439_spill] sm:$0xff] }
0x1ac6   : > { %11610 = vmatpush1.bf16.msra.mxu1 %v19610_v13  ;;  %v19630_v13 = vld [vmem:[#allocation444_spill] sm:$0xff] }
0x1ac7   : > { %11612 = vmatprep.subr.bf16.mxu1 %v19611_v48  ;;  %v19631_v48 = vld [vmem:[#allocation445_spill] sm:$0xff] }
0x1ac8   : > { %11518 = vmatpush1.bf16.msra.mxu0 %v19612_v16  ;;  %v19632_v16 = vld [vmem:[#allocation442_spill] sm:$0xff] }
0x1ac9   : > { %11520 = vmatprep.subr.bf16.mxu0 %v19613_v8  ;;  %v19633_v8 = vld [vmem:[#allocation443_spill] sm:$0xff] }
0x1aca   : > { %11614 = vmatpush1.bf16.msra.mxu1 %v19614_v40  ;;  %v19634_v40 = vld [vmem:[#allocation448_spill] sm:$0xff] }
0x1acb   : > { %11616 = vmatprep.subr.bf16.mxu1 %v19615_v33  ;;  %v19635_v33 = vld [vmem:[#allocation473_spill] sm:$0xff] }
0x1acc   : > { %11522 = vmatpush1.bf16.msra.mxu0 %v19616_v59  ;;  %v19636_v59 = vld [vmem:[#allocation446_spill] sm:$0xff] }
0x1acd   : > { %11524 = vmatprep.subr.bf16.mxu0 %v19617_v36  ;;  %v19637_v36 = vld [vmem:[#allocation447_spill] sm:$0xff] }
0x1ace   : > { %11618 = vmatpush1.bf16.msra.mxu1 %v19618_v43  ;;  %v19638_v43 = vld [vmem:[#allocation474_spill] sm:$0xff] }
0x1acf   : > { %11620 = vmatprep.subr.bf16.mxu1 %v19619_v53  ;;  %v19639_v53 = vld [vmem:[#allocation477_spill] sm:$0xff] }
0x1ad0   : > { %11526 = vmatpush1.bf16.msra.mxu0 %v19620_v23  ;;  %v19640_v23 = vld [vmem:[#allocation449_spill] sm:$0xff] }
0x1ad1   : > { %11528 = vmatprep.subr.bf16.mxu0 %v19621_v56  ;;  %v19641_v56 = vld [vmem:[#allocation450_spill] sm:$0xff] }
0x1ad2   : > { %11622 = vmatpush1.bf16.msra.mxu1 %v19622_v25  ;;  %v19642_v25 = vld [vmem:[#allocation478_spill] sm:$0xff] }
0x1ad3   : > { %11624 = vmatprep.subr.bf16.mxu1 %v19623_v37  ;;  %v19643_v37 = vld [vmem:[#allocation481_spill] sm:$0xff] }
0x1ad4   : > { %11530 = vmatpush1.bf16.msra.mxu0 %v19624_v22  ;;  %v19644_v22 = vld [vmem:[#allocation451_spill] sm:$0xff] }
0x1ad5   : > { %11532 = vmatprep.subr.bf16.mxu0 %v19625_v31  ;;  %v19645_v31 = vld [vmem:[#allocation452_spill] sm:$0xff] }
0x1ad6   : > { %11626 = vmatpush1.bf16.msra.mxu1 %v19626_v10  ;;  %v19646_v10 = vld [vmem:[#allocation482_spill] sm:$0xff] }
0x1ad7   : > { %11628 = vmatprep.subr.bf16.mxu1 %v19627_v15  ;;  %v19647_v15 = vld [vmem:[#allocation485_spill] sm:$0xff] }
0x1ad8   : > { %11534 = vmatpush1.bf16.msra.mxu0 %v19628_v34  ;;  %v19648_v34 = vld [vmem:[#allocation453_spill] sm:$0xff] }
0x1ad9   : > { %11536 = vmatprep.subr.bf16.mxu0 %v19629_v62  ;;  %v19649_v62 = vld [vmem:[#allocation454_spill] sm:$0xff] }
0x1ada   : > { %11630 = vmatpush1.bf16.msra.mxu1 %v19630_v13  ;;  %v19650_v13 = vld [vmem:[#allocation486_spill] sm:$0xff] }
0x1adb   : > { %11632 = vmatprep.subr.bf16.mxu1 %v19631_v48  ;;  %v19651_v48 = vld [vmem:[#allocation489_spill] sm:$0xff] }
0x1adc   : > { %11538 = vmatpush1.bf16.msra.mxu0 %v19632_v16  ;;  %v19652_v16 = vld [vmem:[#allocation455_spill] sm:$0xff] }
0x1add   : > { %11540 = vmatprep.subr.bf16.mxu0 %v19633_v8  ;;  %v19653_v8 = vld [vmem:[#allocation456_spill] sm:$0xff] }
0x1ade   : > { %11634 = vmatpush1.bf16.msra.mxu1 %v19634_v40  ;;  %v19654_v40 = vld [vmem:[#allocation490_spill] sm:$0xff] }
0x1adf   : > { %11636 = vmatprep.subr.bf16.mxu1 %v19635_v33  ;;  %v19655_v33 = vld [vmem:[#allocation493_spill] sm:$0xff] }
0x1ae0   : > { %11542 = vmatpush1.bf16.msra.mxu0 %v19636_v59  ;;  %v19656_v59 = vld [vmem:[#allocation457_spill] sm:$0xff] }
0x1ae1   : > { %11544 = vmatprep.subr.bf16.mxu0 %v19637_v36  ;;  %v19657_v36 = vld [vmem:[#allocation458_spill] sm:$0xff] }
0x1ae2   : > { %11638 = vmatpush1.bf16.msra.mxu1 %v19638_v43  ;;  %v19658_v43 = vld [vmem:[#allocation494_spill] sm:$0xff] }
0x1ae3   : > { %11640 = vmatprep.subr.bf16.mxu1 %v19639_v53  ;;  %v19659_v53 = vld [vmem:[#allocation495_spill] sm:$0xff] }
0x1ae4   : > { %11546 = vmatpush1.bf16.msra.mxu0 %v19640_v23  ;;  %v19660_v23 = vld [vmem:[#allocation459_spill] sm:$0xff] }
0x1ae5   : > { %11548 = vmatprep.subr.bf16.mxu0 %v19641_v56  ;;  %v19661_v56 = vld [vmem:[#allocation460_spill] sm:$0xff] }
0x1ae6   : > { %11642 = vmatpush1.bf16.msra.mxu1 %v19642_v25  ;;  %v19662_v25 = vld [vmem:[#allocation498_spill] sm:$0xff] }
0x1ae7   : > { %11644 = vmatprep.subr.bf16.mxu1 %v19643_v37  ;;  %v19663_v37 = vld [vmem:[#allocation503_spill] sm:$0xff] }
0x1ae8   : > { %11550 = vmatpush1.bf16.msra.mxu0 %v19644_v22  ;;  %v19664_v22 = vld [vmem:[#allocation461_spill] sm:$0xff] }
0x1ae9   : > { %11552 = vmatprep.subr.bf16.mxu0 %v19645_v31  ;;  %v19665_v31 = vld [vmem:[#allocation462_spill] sm:$0xff] }
0x1aea   : > { %11646 = vmatpush1.bf16.msra.mxu1 %v19646_v10  ;;  %v19666_v10 = vld [vmem:[#allocation463_spill] sm:$0xff] }
0x1aeb   : > { %11648 = vmatprep.subr.bf16.mxu1 %v19647_v15  ;;  %v19667_v15 = vld [vmem:[#allocation464_spill] sm:$0xff] }
0x1aec   : > { %11554 = vmatpush1.bf16.msra.mxu0 %v19648_v34  ;;  %v19668_v34 = vld [vmem:[#allocation465_spill] sm:$0xff] }
0x1aed   : > { %11556 = vmatprep.subr.bf16.mxu0 %v19649_v62  ;;  %v19669_v62 = vld [vmem:[#allocation466_spill] sm:$0xff] }
0x1aee   : > { %11650 = vmatpush1.bf16.msra.mxu1 %v19650_v13  ;;  %v19671_v13 = vld [vmem:[#allocation468_spill] sm:$0xff] }
0x1aef   : > { %11652 = vmatprep.subr.bf16.mxu1 %v19651_v48  ;;  %v19673_v48 = vld [vmem:[#allocation470_spill] sm:$0xff] }
0x1af0   : > { %11558 = vmatpush1.bf16.msra.mxu0 %v19652_v16  ;;  %v19674_v16 = vld [vmem:[#allocation471_spill] sm:$0xff] }
0x1af1   : > { %11560 = vmatprep.subr.bf16.mxu0 %v19653_v8  ;;  %v19676_v8 = vld [vmem:[#allocation475_spill] sm:$0xff] }
0x1af2   : > { %11654 = vmatpush1.bf16.msra.mxu1 %v19654_v40  ;;  %v19677_v40 = vld [vmem:[#allocation476_spill] sm:$0xff] }
0x1af3   : > { %11656 = vmatprep.subr.bf16.mxu1 %v19655_v33  ;;  %v19678_v33 = vld [vmem:[#allocation479_spill] sm:$0xff] }
0x1af4   : > { %11562 = vmatpush1.bf16.msra.mxu0 %v19656_v59  ;;  %v19679_v59 = vld [vmem:[#allocation480_spill] sm:$0xff] }
0x1af5   : > { %11564 = vmatprep.subr.bf16.mxu0 %v19657_v36  ;;  %v19680_v36 = vld [vmem:[#allocation483_spill] sm:$0xff] }
0x1af6   : > { %11658 = vmatpush1.bf16.msra.mxu1 %v19658_v43  ;;  %v19681_v43 = vld [vmem:[#allocation484_spill] sm:$0xff] }
0x1af7   : > { %11660 = vmatprep.subr.bf16.mxu1 %v19659_v53  ;;  %v19682_v53 = vld [vmem:[#allocation487_spill] sm:$0xff] }
0x1af8   : > { %11566 = vmatpush1.bf16.msra.mxu0 %v19660_v23  ;;  %v19683_v23 = vld [vmem:[#allocation488_spill] sm:$0xff] }
0x1af9   : > { %11568 = vmatprep.subr.bf16.mxu0 %v19661_v56  ;;  %v19684_v56 = vld [vmem:[#allocation491_spill] sm:$0xff] }
0x1afa   : > { %11662 = vmatpush1.bf16.msra.mxu1 %v19662_v25  ;;  %v19685_v25 = vld [vmem:[#allocation492_spill] sm:$0xff] }
0x1afb   : > { %7621 = vmatmul.mubr.f32.vlgmr.msra.gmra.mrb[114].mxu0 %v17591_v26  ;;  %11664 = vmatprep.subr.bf16.mxu1 %v19663_v37  ;;  %v19670_v26 = vld [vmem:[#allocation467_spill] sm:$0xff]  ;;  %v19686_v37 = vld [vmem:[#allocation496_spill] sm:$0xff] }
0x1afc   : > { %7626 = vmatprep.mubr.f32.mxu0 %v17604_v38  ;;  %11570 = vmatpush1.bf16.msra.mxu0 %v19664_v22  ;;  %v19672_v38 = vld [vmem:[#allocation469_spill] sm:$0xff] }
0x1afd   : > { %11572 = vmatprep.subr.bf16.mxu0 %v19665_v31  ;;  %v19687_v22 = vld [vmem:[#allocation497_spill] sm:$0xff] }
0x1afe   : > { %v19690_v31 = vld [vmem:[#allocation501_spill] sm:$0xff] }
0x1aff   : > { %7627 = vmatmul.mubr.f32.gmra.mrb[116].mxu0 %v17607_v0  ;;  %v19675_v0 = vld [vmem:[#allocation472_spill] sm:$0xff] }
0x1b00   : > { %11574 = vmatpush1.bf16.msra.mxu0 %v19666_v10  ;;  %7697 = vmatprep.mubr.f32.mxu0 %v19262_v63  ;;  %v19691_v10 = vld [vmem:[#allocation502_spill] sm:$0xff] }
0x1b01   : > { %11576 = vmatprep.subr.bf16.mxu0 %v19667_v15  ;;  %v19693_v15 = vld [vmem:[#allocation505_spill] sm:$0xff] }
0x1b04   : > { %11578 = vmatpush1.bf16.msra.mxu0 %v19668_v34  ;;  %v19694_v34 = vld [vmem:[#allocation506_spill] sm:$0xff] }
0x1b05   : > { %11580 = vmatprep.subr.bf16.mxu0 %v19669_v62  ;;  %v19695_v62 = vld [vmem:[#allocation507_spill] sm:$0xff] }
0x1b08   : > { %11582 = vmatpush1.bf16.msra.mxu0 %v19670_v26 }
0x1b09   : > { %11584 = vmatprep.subr.bf16.mxu0 %v19671_v13 }
0x1b0c   : > { %11586 = vmatpush1.bf16.msra.mxu0 %v19672_v38  ;;  %v19696_v38 = vld [vmem:[#allocation508_spill] sm:$0xff] }
0x1b0d   : > { %11588 = vmatprep.subr.bf16.mxu0 %v19673_v48 }
0x1b10   : > { %11590 = vmatpush1.bf16.msra.mxu0 %v19674_v16 }
0x1b11   : > { %11592 = vmatprep.subr.bf16.mxu0 %v19675_v0 }
0x1b14   : > { %11594 = vmatpush1.bf16.msra.mxu0 %v19676_v8  ;;  %v19697_v8 = vld [vmem:[#allocation509_spill] sm:$0xff] }
0x1b15   : > { %11596 = vmatprep.subr.bf16.mxu0 %v19677_v40 }
0x1b18   : > { %11598 = vmatpush1.bf16.msra.mxu0 %v19678_v33  ;;  %v19698_v33 = vld [vmem:[#allocation510_spill] sm:$0xff] }
0x1b19   : > { %11792 = vmatprep.subr.bf16.mxu0 %v19679_v59 }
0x1b1b   : > { %7698 = vmatmul.mubr.f32.vlgmr.msra.gmra.mrb[114].mxu0 %v17645_v12  ;;  %v19688_v12 = vld [vmem:[#allocation499_spill] sm:$0xff] }
0x1b1c   : > { %7703 = vmatprep.mubr.f32.mxu0 %v19262_v63  ;;  %11794 = vmatpush3.bf16.msra.mxu0 %v19680_v36  ;;  %v19689_v63 = vld [vmem:[#allocation500_spill] sm:$0xff] }
0x1b1d   : > { %11796 = vmatprep.subr.bf16.mxu0 %v19681_v43 }
0x1b1f   : > { %7704 = vmatmul.mubr.f32.gmra.mrb[116].mxu0 %v17656_v21  ;;  %v19692_v21 = vld [vmem:[#allocation504_spill] sm:$0xff] }
0x1b20   : > { %11798 = vmatpush3.bf16.msra.mxu0 %v19682_v53 }
0x1b21   : > { %11800 = vmatprep.subr.bf16.mxu0 %v19683_v23 }
0x1b24   : > { %11802 = vmatpush3.bf16.msra.mxu0 %v19684_v56 }
0x1b25   : > { %11804 = vmatprep.subr.bf16.mxu0 %v19685_v25 }
0x1b28   : > { %11806 = vmatpush3.bf16.msra.mxu0 %v19686_v37 }
0x1b29   : > { %11808 = vmatprep.subr.bf16.mxu0 %v19687_v22 }
0x1b2c   : > { %11810 = vmatpush3.bf16.msra.mxu0 %v19688_v12 }
0x1b2d   : > { %11812 = vmatprep.subr.bf16.mxu0 %v19689_v63 }
0x1b30   : > { %11814 = vmatpush3.bf16.msra.mxu0 %v19690_v31 }
0x1b31   : > { %11816 = vmatprep.subr.bf16.mxu0 %v19691_v10 }
0x1b34   : > { %11818 = vmatpush3.bf16.msra.mxu0 %v19692_v21 }
0x1b35   : > { %11820 = vmatprep.subr.bf16.mxu0 %v19693_v15 }
0x1b38   : > { %11822 = vmatpush3.bf16.msra.mxu0 %v19694_v34 }
0x1b39   : > { %11824 = vmatprep.subr.bf16.mxu0 %v19695_v62 }
0x1b8e   : > { %v7391_v26 = vpop.f32.mrb[110].mxu0  ;;  %v7545_v13 = vpop.f32.mrb[74].mxu1 }
0x1b8f   : > { %v11945_v48 = vadd.f32 %v7391_v26, %v19696_v38  ;;  %v7393_v16 = vpop.f32.mrb[111].mxu0  ;;  %v7547_v0 = vpop.f32.mrb[75].mxu1 }
0x1b90   : > { %v11946_v40 = vadd.f32 %v7393_v16, %v19697_v8  ;;  %v17766_v59 = vadd.f32 %v7547_v0, %v19698_v33 }
0x1b91   : > { %v7722_v36 = vmul.f32 0.044715, %v11945_v48 }
0x1b92   : > { %v7723_v43 = vmul.f32 0.044715, %v11946_v40  ;;  %v7725_v53 = vmul.f32 0.044715, %v17766_v59  ;;  %v7397_v23 = vpop.f32.mrb[112].mxu0  ;;  %v7551_v56 = vpop.f32.mrb[76].mxu1 }
0x1b93   : > { %v7734_v25 = vmul.f32 %v11945_v48, %v7722_v36  ;;  %v11947_v37 = vadd.f32 %v7397_v23, %v19696_v38  ;;  %v7399_v22 = vpop.f32.mrb[113].mxu0  ;;  %v7553_v12 = vpop.f32.mrb[77].mxu1 }
0x1b94   : > { %v7735_v63 = vmul.f32 %v11946_v40, %v7723_v43  ;;  %v11948_v31 = vadd.f32 %v7399_v22, %v19697_v8  ;;  %v7737_v15 = vmul.f32 %v17766_v59, %v7725_v53 }
0x1b95   : > { %v7746_v10 = vmul.f32 %v11945_v48, %v7734_v25  ;;  %v7728_v21 = vmul.f32 0.044715, %v11947_v37 }
0x1b96   : > { %v7729_v34 = vmul.f32 0.044715, %v11948_v31  ;;  %v7747_v62 = vmul.f32 %v11946_v40, %v7735_v63  ;;  %v7749_v38 = vmul.f32 %v17766_v59, %v7737_v15  ;;  %v17775_v63 = vadd.f32 %v7545_v13, %v16238_v54 }
0x1b97   : > { %v7758_v26 = vadd.f32 %v11945_v48, %v7746_v10  ;;  %v7740_v16 = vmul.f32 %v11947_v37, %v7728_v21 }
0x1b98   : > { %v7741_v0 = vmul.f32 %v11948_v31, %v7729_v34  ;;  %v7759_v6 = vadd.f32 %v11946_v40, %v7747_v62  ;;  %v7761_v8 = vadd.f32 %v17766_v59, %v7749_v38  ;;  %v7711_v34 = vmul.f32 0.5, %v11946_v40 }
0x1b99   : > { %v7770_v49 = vmul.f32 0.7978846, %v7758_v26  ;;  %v7752_v9 = vmul.f32 %v11947_v37, %v7740_v16  ;;  %v7710_v16 = vmul.f32 0.5, %v11945_v48 }
0x1b9a   : > { %v7771_v36 = vmul.f32 0.7978846, %v7759_v6  ;;  %v7753_v11 = vmul.f32 %v11948_v31, %v7741_v0  ;;  %v7773_v22 = vmul.f32 0.7978846, %v7761_v8  ;;  %v17778_v6 = vadd.f32 %v7553_v12, %v19698_v33 }
0x1b9b   : > { %12273 = vtanh.f32 %v7770_v49  ;;  %v7764_v43 = vadd.f32 %v11947_v37, %v7752_v9  ;;  %v7724_v49 = vmul.f32 0.044715, %v17775_v63  ;;  %v7716_v8 = vmul.f32 0.5, %v11947_v37 }
0x1b9c   : > { %v7765_v23 = vadd.f32 %v11948_v31, %v7753_v11  ;;  %12275 = vtanh.f32 %v7771_v36  ;;  %v17782_v11 = vadd.f32 %v7551_v56, %v16238_v54  ;;  %v7731_v9 = vmul.f32 0.044715, %v17778_v6 }
0x1b9d   : > { %v7776_v25 = vmul.f32 0.7978846, %v7764_v43  ;;  %v7736_v13 = vmul.f32 %v17775_v63, %v7724_v49  ;;  %v7717_v54 = vmul.f32 0.5, %v11948_v31  ;;  %v7713_v49 = vmul.f32 0.5, %v17766_v59 }
0x1b9e   : > { %v7777_v53 = vmul.f32 0.7978846, %v7765_v23  ;;  %v7730_v33 = vmul.f32 0.044715, %v17782_v11  ;;  %v7743_v12 = vmul.f32 %v17778_v6, %v7731_v9 }
0x1b9f   : > { %12277 = vtanh.f32 %v7776_v25  ;;  %v7748_v25 = vmul.f32 %v17775_v63, %v7736_v13  ;;  %v19711_v13 = vld [vmem:[#allocation523_spill] sm:$0xff] }
0x1ba0   : > { %12279 = vtanh.f32 %v7777_v53  ;;  %v7742_v53 = vmul.f32 %v17782_v11, %v7730_v33  ;;  %v7755_v9 = vmul.f32 %v17778_v6, %v7743_v12  ;;  %v19712_v33 = vld [vmem:[#allocation524_spill] sm:$0xff]  ;;  %v19713_v12 = vld [vmem:[#allocation525_spill] sm:$0xff] }
0x1ba1   : > { %12281 = vtanh.f32 %v7773_v22  ;;  %v19699_v22 = vld [vmem:[#allocation511_spill] sm:$0xff] }
0x1ba2   : > { %v7767_v59 = vadd.f32 %v17778_v6, %v7755_v9  ;;  %v19720_v9 = vld [vmem:[#allocation532_spill] sm:$0xff] }
0x1ba5   : > { %v12274_v10 = vpop.eup %12273 }
0x1ba6   : > { %v12276_v21 = vpop.eup %12275  ;;  %v7794_v15 = vadd.f32 1.0, %v12274_v10  ;;  %v19700_v10 = vld [vmem:[#allocation512_spill] sm:$0xff] }
0x1ba7   : > { %v7795_v62 = vadd.f32 1.0, %v12276_v21  ;;  %v19701_v21 = vld [vmem:[#allocation513_spill] sm:$0xff] }
0x1ba8   : > { %v7806_v43 = vmul.f32 %v7794_v15, %v7710_v16  ;;  %v7760_v15 = vadd.f32 %v17775_v63, %v7748_v25  ;;  %v19704_v16 = vld [vmem:[#allocation516_spill] sm:$0xff]  ;;  %v7712_v25 = vmul.f32 0.5, %v17775_v63 }
0x1ba9   : > { %v12278_v26 = vpop.eup %12277  ;;  %v7807_v36 = vmul.f32 %v7795_v62, %v7711_v34 }
0x1baa   : > { %v12280_v0 = vpop.eup %12279  ;;  %v7800_v23 = vadd.f32 1.0, %v12278_v26  ;;  %v7772_v34 = vmul.f32 0.7978846, %v7760_v15  ;;  %v19703_v26 = vld [vmem:[#allocation515_spill] sm:$0xff]  ;;  %v19721_v15 = vld [vmem:[#allocation533_spill] sm:$0xff] }
0x1bab   : > { %v12282_v38 = vpop.eup %12281  ;;  %v7801_v56 = vadd.f32 1.0, %v12280_v0  ;;  %7882 = vmatprep.mubr.f32.mxu1 %v7807_v36  ;;  %8113 = vmatprep.mubr.f32.mxu0 %v7807_v36  ;;  %v19710_v0 = vld [vmem:[#allocation522_spill] sm:$0xff] }
0x1bac   : > { %7883 = vmatmul.mubr.f32.vlgmr.msra.gmra.mrb[78].mxu1 %v7806_v43  ;;  %8114 = vmatmul.mubr.f32.vlgmr.msra.gmra.mrb[118].mxu0 %v7806_v43  ;;  %v7797_v48 = vadd.f32 1.0, %v12282_v38  ;;  %v7812_v31 = vmul.f32 %v7800_v23, %v7716_v8  ;;  %12283 = vtanh.f32 %v7772_v34  ;;  %v19714_v43 = vld [vmem:[#allocation526_spill] sm:$0xff]  ;;  %v19717_v23 = vld [vmem:[#allocation529_spill] sm:$0xff]  ;;  %v19727_v34 = vld [vmem:[#allocation539_spill] sm:$0xff] }
0x1bad   : > { %v7813_v40 = vmul.f32 %v7801_v56, %v7717_v54  ;;  %11666 = vmatpush1.bf16.msra.mxu1 %v16272_v52  ;;  %11826 = vmatpush3.bf16.msra.mxu0 %v19699_v22  ;;  %v7754_v52 = vmul.f32 %v17782_v11, %v7742_v53  ;;  %v19715_v54 = vld [vmem:[#allocation527_spill] sm:$0xff]  ;;  %v19716_v56 = vld [vmem:[#allocation528_spill] sm:$0xff]  ;;  %v19718_v53 = vld [vmem:[#allocation530_spill] sm:$0xff] }
0x1bae   : > { %11668 = vmatprep.subr.bf16.mxu1 %v19700_v10  ;;  %11828 = vmatprep.subr.bf16.mxu0 %v19701_v21  ;;  %v7809_v37 = vmul.f32 %v7797_v48, %v7713_v49  ;;  %v19719_v22 = vld [vmem:[#allocation531_spill] sm:$0xff]  ;;  %v7719_v10 = vmul.f32 0.5, %v17778_v6 }
0x1baf   : > { %7888 = vmatprep.mubr.f32.mxu1 %v7813_v40  ;;  %8118 = vmatprep.mubr.f32.mxu0 %v7813_v40  ;;  %v7766_v62 = vadd.f32 %v17782_v11, %v7754_v52  ;;  %v19723_v6 = vld [vmem:[#allocation535_spill] sm:$0xff]  ;;  %v19724_v52 = vld [vmem:[#allocation536_spill] sm:$0xff] }
0x1bb0   : > { %7889 = vmatmul.mubr.f32.gmra.mrb[80].mxu1 %v7812_v31  ;;  %8119 = vmatmul.mubr.f32.gmra.mrb[120].mxu0 %v7812_v31 }
0x1bb1   : > { %11670 = vmatpush1.bf16.msra.mxu1 %v16294_v7  ;;  %11830 = vmatpush3.bf16.msra.mxu0 %v16297_v24  ;;  %v7779_v7 = vmul.f32 0.7978846, %v7767_v59  ;;  %v19702_v24 = vld [vmem:[#allocation514_spill] sm:$0xff] }
0x1bb2   : > { %7959 = vmatprep.mubr.f32.mxu1 %v7809_v37  ;;  %8188 = vmatprep.mubr.f32.mxu0 %v7809_v37  ;;  %v7718_v37 = vmul.f32 0.5, %v17782_v11  ;;  %v19725_v11 = vld [vmem:[#allocation537_spill] sm:$0xff]  ;;  %v19726_v59 = vld [vmem:[#allocation538_spill] sm:$0xff] }
0x1bb3   : > { %11672 = vmatprep.subr.bf16.mxu1 %v16299_v14  ;;  %11832 = vmatprep.subr.bf16.mxu0 %v16318_v5  ;;  %v7778_v14 = vmul.f32 0.7978846, %v7766_v62  ;;  %v19705_v5 = vld [vmem:[#allocation517_spill] sm:$0xff]  ;;  %12285 = vtanh.f32 %v7779_v7  ;;  %v19731_v62 = vld [vmem:[#allocation543_spill] sm:$0xff]  ;;  %v19732_v7 = vld [vmem:[#allocation544_spill] sm:$0xff] }
0x1bb5   : > { %11674 = vmatpush1.bf16.msra.mxu1 %v16322_v39  ;;  %11834 = vmatpush3.bf16.msra.mxu0 %v16324_v2  ;;  %v19706_v39 = vld [vmem:[#allocation518_spill] sm:$0xff]  ;;  %v19707_v2 = vld [vmem:[#allocation519_spill] sm:$0xff]  ;;  %12287 = vtanh.f32 %v7778_v14  ;;  %v19736_v14 = vld [vmem:[#allocation548_spill] sm:$0xff] }
0x1bb6   : > { %11676 = vmatprep.subr.bf16.mxu1 %v16344_v44  ;;  %11836 = vmatprep.subr.bf16.mxu0 %v16346_v55  ;;  %v19708_v44 = vld [vmem:[#allocation520_spill] sm:$0xff]  ;;  %v19709_v55 = vld [vmem:[#allocation521_spill] sm:$0xff]  ;;  %v12284_v36 = vpop.eup %12283 }
0x1bb7   : > { %v7796_v40 = vadd.f32 1.0, %v12284_v36  ;;  %v19747_v36 = vld [vmem:[#allocation559_spill] sm:$0xff] }
0x1bb9   : > { %11678 = vmatpush1.bf16.msra.mxu1 %v19702_v24  ;;  %11838 = vmatpush3.bf16.msra.mxu0 %v19703_v26  ;;  %v7808_v31 = vmul.f32 %v7796_v40, %v7712_v25  ;;  %v19734_v24 = vld [vmem:[#allocation546_spill] sm:$0xff]  ;;  %v19735_v26 = vld [vmem:[#allocation547_spill] sm:$0xff] }
0x1bba   : > { %11680 = vmatprep.subr.bf16.mxu1 %v19704_v16  ;;  %11840 = vmatprep.subr.bf16.mxu0 %v19705_v5  ;;  %v19737_v16 = vld [vmem:[#allocation549_spill] sm:$0xff]  ;;  %v19738_v5 = vld [vmem:[#allocation550_spill] sm:$0xff]  ;;  %v19750_v40 = vld [vmem:[#allocation563_spill] sm:$0xff] }
0x1bbd   : > { %11682 = vmatpush1.bf16.msra.mxu1 %v19706_v39  ;;  %11842 = vmatpush3.bf16.msra.mxu0 %v19707_v2  ;;  %v12286_v38 = vpop.eup %12285  ;;  %v19739_v39 = vld [vmem:[#allocation551_spill] sm:$0xff]  ;;  %v19740_v2 = vld [vmem:[#allocation552_spill] sm:$0xff] }
0x1bbe   : > { %11684 = vmatprep.subr.bf16.mxu1 %v19708_v44  ;;  %11844 = vmatprep.subr.bf16.mxu0 %v19709_v55  ;;  %v7803_v48 = vadd.f32 1.0, %v12286_v38  ;;  %v19741_v44 = vld [vmem:[#allocation553_spill] sm:$0xff]  ;;  %v19742_v55 = vld [vmem:[#allocation554_spill] sm:$0xff] }
0x1bbf   : > { %v12288_v8 = vpop.eup %12287  ;;  %v19748_v38 = vld [vmem:[#allocation561_spill] sm:$0xff] }
0x1bc0   : > { %v7802_v49 = vadd.f32 1.0, %v12288_v8  ;;  %v7815_v21 = vmul.f32 %v7803_v48, %v7719_v10  ;;  %v19751_v8 = vld [vmem:[#allocation562_spill] sm:$0xff] }
0x1bc1   : > { %11686 = vmatpush1.bf16.msra.mxu1 %v19710_v0  ;;  %11846 = vmatpush3.bf16.msra.mxu0 %v19711_v13  ;;  %v19743_v0 = vld [vmem:[#allocation555_spill] sm:$0xff]  ;;  %v19744_v13 = vld [vmem:[#allocation556_spill] sm:$0xff] }
0x1bc2   : > { %11688 = vmatprep.subr.bf16.mxu1 %v19712_v33  ;;  %11848 = vmatprep.subr.bf16.mxu0 %v19713_v12  ;;  %v7814_v63 = vmul.f32 %v7802_v49, %v7718_v37  ;;  %v19745_v33 = vld [vmem:[#allocation557_spill] sm:$0xff]  ;;  %v19746_v12 = vld [vmem:[#allocation558_spill] sm:$0xff] }
0x1bc5   : > { %11690 = vmatpush1.bf16.msra.mxu1 %v19714_v43  ;;  %11850 = vmatpush3.bf16.msra.mxu0 %v19715_v54  ;;  %v19749_v54 = vld [vmem:[#allocation560_spill] sm:$0xff] }
0x1bc6   : > { %11692 = vmatprep.subr.bf16.mxu1 %v19716_v56  ;;  %11852 = vmatprep.subr.bf16.mxu0 %v19717_v23 }
0x1bc9   : > { %11694 = vmatpush1.bf16.msra.mxu1 %v19718_v53  ;;  %11854 = vmatpush3.bf16.msra.mxu0 %v19719_v22  ;;  %v19752_v22 = vld [vmem:[#allocation564_spill] sm:$0xff] }
0x1bca   : > { %11696 = vmatprep.subr.bf16.mxu1 %v16443_v27  ;;  %11856 = vmatprep.subr.bf16.mxu0 %v19720_v9  ;;  %v19722_v27 = vld [vmem:[#allocation534_spill] sm:$0xff] }
0x1bcc   : > { %8189 = vmatmul.mubr.f32.vlgmr.msra.gmra.mrb[122].mxu0 %v7808_v31 }
0x1bcd   : > { %11698 = vmatpush1.bf16.msra.mxu1 %v19721_v15  ;;  %8193 = vmatprep.mubr.f32.mxu0 %v7815_v21 }
0x1bce   : > { %11700 = vmatprep.subr.bf16.mxu1 %v16464_v32  ;;  %11858 = vmatpush3.bf16.msra.mxu0 %v16470_v60  ;;  %v19728_v32 = vld [vmem:[#allocation540_spill] sm:$0xff]  ;;  %v19729_v60 = vld [vmem:[#allocation541_spill] sm:$0xff] }
0x1bcf   : > { %11860 = vmatprep.subr.bf16.mxu0 %v16475_v42  ;;  %v19730_v42 = vld [vmem:[#allocation542_spill] sm:$0xff] }
0x1bd0   : > { %8194 = vmatmul.mubr.f32.gmra.mrb[124].mxu0 %v7814_v63 }
0x1bd1   : > { %11702 = vmatpush1.bf16.msra.mxu1 %v19722_v27 }
0x1bd2   : > { %11704 = vmatprep.subr.bf16.mxu1 %v16491_v45  ;;  %11862 = vmatpush3.bf16.msra.mxu0 %v19723_v6  ;;  %v19733_v45 = vld [vmem:[#allocation545_spill] sm:$0xff] }
0x1bd3   : > { %11864 = vmatprep.subr.bf16.mxu0 %v19724_v52 }
0x1bd5   : > { %11706 = vmatpush1.bf16.msra.mxu1 %v19725_v11  ;;  %v19754_v11 = vld [vmem:[#allocation566_spill] sm:$0xff] }
0x1bd6   : > { %11708 = vmatprep.subr.bf16.mxu1 %v19726_v59  ;;  %11866 = vmatpush3.bf16.msra.mxu0 %v19727_v34 }
0x1bd7   : > { %11868 = vmatprep.subr.bf16.mxu0 %v19728_v32  ;;  %v19755_v32 = vld [vmem:[#allocation567_spill] sm:$0xff] }
0x1bd9   : > { %11710 = vmatpush1.bf16.msra.mxu1 %v19729_v60 }
0x1bda   : > { %11712 = vmatprep.subr.bf16.mxu1 %v19730_v42  ;;  %11870 = vmatpush3.bf16.msra.mxu0 %v19731_v62 }
0x1bdb   : > { %11872 = vmatprep.subr.bf16.mxu0 %v19732_v7 }
0x1bdd   : > { %11714 = vmatpush1.bf16.msra.mxu1 %v19733_v45  ;;  %v19756_v45 = vld [vmem:[#allocation568_spill] sm:$0xff] }
0x1bde   : > { %11716 = vmatprep.subr.bf16.mxu1 %v19734_v24  ;;  %11874 = vmatpush3.bf16.msra.mxu0 %v19735_v26 }
0x1bdf   : > { %11876 = vmatprep.subr.bf16.mxu0 %v19736_v14  ;;  %v19757_v14 = vld [vmem:[#allocation569_spill] sm:$0xff] }
0x1be1   : > { %11718 = vmatpush1.bf16.msra.mxu1 %v19737_v16 }
0x1be2   : > { %11720 = vmatprep.subr.bf16.mxu1 %v19738_v5  ;;  %11878 = vmatpush3.bf16.msra.mxu0 %v19739_v39 }
0x1be3   : > { %11880 = vmatprep.subr.bf16.mxu0 %v19740_v2  ;;  %v19758_v2 = vld [vmem:[#allocation570_spill] sm:$0xff] }
0x1be5   : > { %11722 = vmatpush1.bf16.msra.mxu1 %v19741_v44 }
0x1be6   : > { %11724 = vmatprep.subr.bf16.mxu1 %v19742_v55  ;;  %11882 = vmatpush3.bf16.msra.mxu0 %v19743_v0  ;;  %v19759_v55 = vld [vmem:[#allocation571_spill] sm:$0xff]  ;;  %v19760_v0 = vld [vmem:[#allocation572_spill] sm:$0xff] }
0x1be7   : > { %11884 = vmatprep.subr.bf16.mxu0 %v19744_v13  ;;  %v19761_v13 = vld [vmem:[#allocation573_spill] sm:$0xff] }
0x1be9   : > { %11726 = vmatpush1.bf16.msra.mxu1 %v19745_v33 }
0x1bea   : > { %11728 = vmatprep.subr.bf16.mxu1 %v19746_v12  ;;  %11886 = vmatpush3.bf16.msra.mxu0 %v19747_v36 }
0x1bec   : > { %7960 = vmatmul.mubr.f32.vlgmr.msra.gmra.mrb[78].mxu1 %v7808_v31 }
0x1bed   : > { %7965 = vmatprep.mubr.f32.mxu1 %v7815_v21  ;;  %11730 = vmatpush1.bf16.msra.mxu1 %v19748_v38  ;;  %v19753_v21 = vld [vmem:[#allocation565_spill] sm:$0xff] }
0x1bee   : > { %v7699_v43 = vpop.f32.mrb[114].mxu0  ;;  %11732 = vmatprep.subr.bf16.mxu1 %v19750_v40 }
0x1bef   : > { %v11953_v56 = vadd.f32 %v7699_v43, %v19749_v54  ;;  %v7701_v23 = vpop.f32.mrb[115].mxu0 }
0x1bf0   : > { %v11954_v48 = vadd.f32 %v7701_v23, %v19751_v8  ;;  %7966 = vmatmul.mubr.f32.gmra.mrb[80].mxu1 %v7814_v63 }
0x1bf1   : > { %v7726_v25 = vmul.f32 0.044715, %v11953_v56  ;;  %11734 = vmatpush1.bf16.msra.mxu1 %v19752_v22  ;;  %v7714_v23 = vmul.f32 0.5, %v11953_v56 }
0x1bf2   : > { %v7727_v53 = vmul.f32 0.044715, %v11954_v48  ;;  %v7705_v10 = vpop.f32.mrb[116].mxu0  ;;  %11736 = vmatprep.subr.bf16.mxu1 %v19753_v21  ;;  %v7715_v36 = vmul.f32 0.5, %v11954_v48 }
0x1bf3   : > { %v7738_v49 = vmul.f32 %v11953_v56, %v7726_v25  ;;  %v11955_v31 = vadd.f32 %v7705_v10, %v19749_v54  ;;  %v7707_v9 = vpop.f32.mrb[117].mxu0 }
0x1bf4   : > { %v7739_v37 = vmul.f32 %v11954_v48, %v7727_v53  ;;  %v11956_v15 = vadd.f32 %v7707_v9, %v19751_v8 }
0x1bf5   : > { %v7750_v27 = vmul.f32 %v11953_v56, %v7738_v49  ;;  %v7732_v6 = vmul.f32 0.044715, %v11955_v31  ;;  %11738 = vmatpush1.bf16.msra.mxu1 %v19754_v11 }
0x1bf6   : > { %v7733_v52 = vmul.f32 0.044715, %v11956_v15  ;;  %v7751_v59 = vmul.f32 %v11954_v48, %v7739_v37  ;;  %11740 = vmatprep.subr.bf16.mxu1 %v19755_v32  ;;  %v7721_v53 = vmul.f32 0.5, %v11956_v15 }
0x1bf7   : > { %v7762_v63 = vadd.f32 %v11953_v56, %v7750_v27  ;;  %v7744_v34 = vmul.f32 %v11955_v31, %v7732_v6 }
0x1bf8   : > { %v7745_v60 = vmul.f32 %v11956_v15, %v7733_v52  ;;  %v7763_v42 = vadd.f32 %v11954_v48, %v7751_v59 }
0x1bf9   : > { %v7774_v62 = vmul.f32 0.7978846, %v7762_v63  ;;  %v7756_v7 = vmul.f32 %v11955_v31, %v7744_v34  ;;  %11742 = vmatpush1.bf16.msra.mxu1 %v19756_v45  ;;  %v19766_v34 = vld [vmem:[#allocation15_spill] sm:$0xff] }
0x1bfa   : > { %v7775_v24 = vmul.f32 0.7978846, %v7763_v42  ;;  %v7757_v26 = vmul.f32 %v11956_v15, %v7745_v60  ;;  %11744 = vmatprep.subr.bf16.mxu1 %v19757_v14 }
0x1bfb   : > { %12289 = vtanh.f32 %v7774_v62  ;;  %v7768_v16 = vadd.f32 %v11955_v31, %v7756_v7 }
0x1bfc   : > { %12291 = vtanh.f32 %v7775_v24  ;;  %v7769_v5 = vadd.f32 %v11956_v15, %v7757_v26 }
0x1bfd   : > { %v7780_v39 = vmul.f32 0.7978846, %v7768_v16  ;;  %11746 = vmatpush1.bf16.msra.mxu1 %v19758_v2  ;;  %v19769_v2 = vld [vmem:[#allocation31_spill] sm:$0xff] }
0x1bfe   : > { %v7781_v44 = vmul.f32 0.7978846, %v7769_v5  ;;  %11748 = vmatprep.subr.bf16.mxu1 %v19759_v55  ;;  %v19770_v55 = vld [vmem:[#allocation33_spill] sm:$0xff] }
0x1bff   : > { %12293 = vtanh.f32 %v7780_v39  ;;  %v19768_v39 = vld [vmem:[#allocation16_spill] sm:$0xff] }
0x1c00   : > { %12295 = vtanh.f32 %v7781_v44 }
0x1c01   : > { %11750 = vmatpush1.bf16.msra.mxu1 %v19760_v0 }
0x1c02   : > { %11752 = vmatprep.subr.bf16.mxu1 %v19761_v13 }
0x1c05   : > { %v12290_v33 = vpop.eup %12289  ;;  %11754 = vmatpush1.bf16.msra.mxu1 %v16745_v50 }
0x1c06   : > { %v12292_v12 = vpop.eup %12291  ;;  %11756 = vmatprep.subr.bf16.mxu1 %v16748_v19  ;;  %v7798_v43 = vadd.f32 1.0, %v12290_v33  ;;  %v7720_v19 = vmul.f32 0.5, %v11955_v31 }
0x1c07   : > { %v7799_v38 = vadd.f32 1.0, %v12292_v12  ;;  %v19771_v12 = vld [vmem:[#allocation17_spill] sm:$0xff] }
0x1c08   : > { %v7810_v25 = vmul.f32 %v7798_v43, %v7714_v23 }
0x1c09   : > { %v12294_v54 = vpop.eup %12293  ;;  %v7811_v40 = vmul.f32 %v7799_v38, %v7715_v36  ;;  %11758 = vmatpush1.bf16.msra.mxu1 %v16757_v3  ;;  %v19762_v3 = vld [vmem:[#allocation574_spill] sm:$0xff] }
0x1c0a   : > { %v12296_v8 = vpop.eup %12295  ;;  %11760 = vmatprep.subr.bf16.mxu1 %v16760_v17  ;;  %v7804_v10 = vadd.f32 1.0, %v12294_v54  ;;  %v19763_v17 = vld [vmem:[#allocation575_spill] sm:$0xff] }
0x1c0b   : > { %8036 = vmatprep.mubr.f32.mxu1 %v7811_v40  ;;  %v7805_v22 = vadd.f32 1.0, %v12296_v8  ;;  %8263 = vmatprep.mubr.f32.mxu0 %v7811_v40  ;;  %v19772_v54 = vld [vmem:[#allocation39_spill] sm:$0xff] }
0x1c0c   : > { %8264 = vmatmul.mubr.f32.vlgmr.msra.gmra.mrb[126].mxu0 %v7810_v25  ;;  %v7816_v56 = vmul.f32 %v7804_v10, %v7720_v19  ;;  %v19773_v40 = vld [vmem:[#allocation35_spill] sm:$0xff] }
0x1c0d   : > { %v7817_v50 = vmul.f32 %v7805_v22, %v7721_v53  ;;  %11762 = vmatpush1.bf16.msra.mxu1 %v16770_v1  ;;  %v19764_v1 = vld [vmem:[#allocation576_spill] sm:$0xff]  ;;  %v19774_v53 = vld [vmem:[#allocation37_spill] sm:$0xff] }
0x1c0e   : > { %11764 = vmatprep.subr.bf16.mxu1 %v16775_v47  ;;  %v19765_v47 = vld [vmem:[#allocation29_spill] sm:$0xff] }
0x1c0f   : > { %8268 = vmatprep.mubr.f32.mxu0 %v7817_v50 }
0x1c10   : > { %8269 = vmatmul.mubr.f32.gmra.mrb[128].mxu0 %v7816_v56 }
0x1c11   : > { %11766 = vmatpush1.bf16.msra.mxu1 %v16790_v4 }
0x1c12   : > { %11768 = vmatprep.subr.bf16.mxu1 %v16795_v51 }
0x1c15   : > { %11770 = vmatpush1.bf16.msra.mxu1 %v16809_v57 }
0x1c16   : > { %11772 = vmatprep.subr.bf16.mxu1 %v16813_v18 }
0x1c19   : > { %11774 = vmatpush1.bf16.msra.mxu1 %v16822_v30 }
0x1c1a   : > { %11776 = vmatprep.subr.bf16.mxu1 %v16825_v35 }
0x1c1d   : > { %11778 = vmatpush1.bf16.msra.mxu1 %v16834_v46 }
0x1c1e   : > { %11780 = vmatprep.subr.bf16.mxu1 %v16837_v29 }
0x1c21   : > { %11782 = vmatpush1.bf16.msra.mxu1 %v16846_v61 }
0x1c22   : > { %11784 = vmatprep.subr.bf16.mxu1 %v19762_v3 }
0x1c25   : > { %11786 = vmatpush1.bf16.msra.mxu1 %v19763_v17 }
0x1c26   : > { %11788 = vmatprep.subr.bf16.mxu1 %v19764_v1 }
0x1c29   : > { %11790 = vmatpush1.bf16.msra.mxu1 %v19765_v47 }
0x1c2c   : > { %8037 = vmatmul.mubr.f32.vlgmr.msra.gmra.mrb[78].mxu1 %v7810_v25 }
0x1c2d   : > { %8042 = vmatprep.mubr.f32.mxu1 %v7817_v50 }
0x1c30   : > { %8043 = vmatmul.mubr.f32.gmra.mrb[80].mxu1 %v7816_v56 }
0x1c7f   : > { %v9025_v4 = vpop.f32.mrb[118].mxu0 }
0x1c80   : > { %v9026_v51 = vpop.f32.mrb[119].mxu0 }
0x1c81   : > { %v9027_v57 = vadd.f32 %v9026_v51, %v9025_v4 }
0x1c83   : > { %v9028_v18 = vpop.f32.mrb[120].mxu0 }
0x1c84   : > { %v9029_v30 = vpop.f32.mrb[121].mxu0 }
0x1c85   : > { %v9030_v35 = vadd.f32 %v9029_v30, %v9028_v18 }
0x1c9f   : > { %v9063_v46 = vpop.f32.mrb[122].mxu0 }
0x1ca0   : > { %v9064_v29 = vpop.f32.mrb[123].mxu0 }
0x1ca1   : > { %v9065_v61 = vadd.f32 %v9064_v29, %v9063_v46 }
0x1ca3   : > { %v8191_v48 = vadd.f32 %v9065_v61, %v9027_v57  ;;  %v9066_v49 = vpop.f32.mrb[124].mxu0 }
0x1ca4   : > { %v9067_v31 = vpop.f32.mrb[125].mxu0 }
0x1ca5   : > { %v9068_v9 = vadd.f32 %v9067_v31, %v9066_v49 }
0x1ca7   : > { %v8196_v21 = vadd.f32 %v9068_v9, %v9030_v35 }
0x1cdf   : > { %v9101_v37 = vpop.f32.mrb[126].mxu0 }
0x1ce0   : > { %v9102_v15 = vpop.f32.mrb[127].mxu0 }
0x1ce1   : > { %v9103_v27 = vadd.f32 %v9102_v15, %v9101_v37 }
0x1ce3   : > { %v8266_v6 = vadd.f32 %v9103_v27, %v8191_v48  ;;  %v9104_v52 = vpop.f32.mrb[128].mxu0 }
0x1ce4   : > { %v9105_v11 = vpop.f32.mrb[129].mxu0 }
0x1ce5   : > { %v8276_v59 = vadd.f32 %v8266_v6, %v17550_v58  ;;  %v9106_v63 = vadd.f32 %v9105_v11, %v9104_v52 }
0x1ce7   : > { %v8282_v32 = vadd.f32 %v8276_v59, %v19766_v34  ;;  %v8271_v60 = vadd.f32 %v9106_v63, %v8196_v21 }
0x1ce9   : > { %v8300_v42 = vrot.slane %v8282_v32, 4  ;;  %v8279_v62 = vadd.f32 %v8271_v60, %v17556_v28 }
0x1ceb   : > { %v8324_v7 = vsel %vm2069_vm6, %v17027_v41, %v8300_v42  ;;  %v8285_v45 = vadd.f32 %v8279_v62, %v19766_v34 }
0x1cec   : > { %v8327_v24 = vsel %vm2011_vm3, %v8324_v7, %v8282_v32 }
0x1ced   : > { %v8309_v26 = vrot.slane %v8285_v45, 4 }
0x1cef   : > { %v8330_v58 = vsel %vm2015_vm4, %v8327_v24, %v8309_v26 }
0x1cf0   : > { %v8333_v14 = vsel %vm2027_vm5, %v8330_v58, %v8309_v26 }
0x1cf1   : > { %8336 = vst [vmem:[%s513_s19 + $0x10] sm:$0xff] %v8333_v14 }
0x1cff   : > { %v8038_v16 = vpop.f32.mrb[78].mxu1 }
0x1d00   : > { %v8274_v28 = vadd.f32 %v8038_v16, %v17537_v20  ;;  %v8040_v5 = vpop.f32.mrb[79].mxu1 }
0x1d01   : > { %v8275_v41 = vadd.f32 %v8040_v5, %v19768_v39 }
0x1d02   : > { %v8280_v44 = vadd.f32 %v8274_v28, %v19769_v2 }
0x1d03   : > { %v8281_v0 = vadd.f32 %v8275_v41, %v19770_v55  ;;  %v8044_v13 = vpop.f32.mrb[80].mxu1 }
0x1d04   : > { %v8298_v33 = vrot.slane %v8280_v44, 4  ;;  %v8277_v36 = vadd.f32 %v8044_v13, %v19771_v12  ;;  %v8046_v38 = vpop.f32.mrb[81].mxu1 }
0x1d05   : > { %v8299_v43 = vrot.slane %v8281_v0, 4  ;;  %v8278_v23 = vadd.f32 %v8046_v38, %v19772_v54 }
0x1d06   : > { %v8322_v8 = vsel %vm2069_vm6, %v19773_v40, %v8298_v33  ;;  %v8283_v20 = vadd.f32 %v8277_v36, %v19769_v2 }
0x1d07   : > { %v8325_v25 = vsel %vm2011_vm3, %v8322_v8, %v8280_v44  ;;  %v8323_v22 = vsel %vm2069_vm6, %v19774_v53, %v8299_v43  ;;  %v8284_v10 = vadd.f32 %v8278_v23, %v19770_v55 }
0x1d08   : > { %v8326_v50 = vsel %vm2011_vm3, %v8323_v22, %v8281_v0  ;;  %v8307_v19 = vrot.slane %v8283_v20, 4 }
0x1d09   : > { %v8308_v56 = vrot.slane %v8284_v10, 4 }
0x1d0a   : > { %v8328_v3 = vsel %vm2015_vm4, %v8325_v25, %v8307_v19 }
0x1d0b   : > { %v8331_v17 = vsel %vm2027_vm5, %v8328_v3, %v8307_v19  ;;  %v8329_v1 = vsel %vm2015_vm4, %v8326_v50, %v8308_v56 }
0x1d0c   : > { %8334 = vst [vmem:[%s513_s19] sm:$0xff] %v8331_v17  ;;  %v8332_v47 = vsel %vm2027_vm5, %v8329_v1, %v8308_v56 }
0x1d0d   : > { %8335 = vst [vmem:[%s513_s19 + $0x8] sm:$0xff] %v8332_v47 }
0x1d0e PF: > { %s19775_s12 = sld [smem:[#allocation13_spill]]  ;;  %s19776_s13 = sld [smem:[#allocation12_spill]] }
0x1d0f   : > { %s19777_s11 = sld [smem:[#allocation14_spill]]  ;;  %s19778_s30 = smov %s12492_s10 }
0x1d14   : > { %p18_p4 = scmp.ge.s32.totalorder %s19775_s12, 4   ;;  %s19779_s10 = smov %s19776_s13 }
0x1d16   :  { %20 = sbr.rel (!%p18_p4) target bundleno = 10 (0xa), region = 134 }
0x1d1d   :  { %8358 = vsyncpa [#allocation3], 1 }
0x1d1e   :  { %8360 = vsyncpa [#allocation3 + $0x1], 1 }
0x1d1f   :  { %8361 = vsyncpa [#allocation5], 1 }

</bundles_post_ra>
